<compile_context>
chip_gen: v7x
topology: tpu7x:2x2x1
jax: 0.10.0
libtpu: 0.0.40
codegen_flags: <defaults>
</compile_context>

<pallas_src>
import functools

import jax
import jax.numpy as jnp
import numpy as np
from jax.experimental import pallas as pl
from jax.experimental.pallas import tpu as pltpu


def _bottleneck_kernel(x_ref, w1_ref, b1_ref, w2_ref, b2_ref, w3_ref, b3_ref,
                       *rest, H, W, Ho, Wo, stride, has_sc_conv):
    """One batch element per grid step.

    x_ref  : (1, H, W, Cin)  bf16   input, NHWC (unpadded)
    w1_ref : (Cin, P)        bf16   conv1 weights, BN1 scale folded in
    b1_ref : (1, P)          f32    BN1 bias
    w2_ref : (3, 3P, P)      bf16   conv2 weights, row index = kw*P + cin, BN2 folded
    b2_ref : (1, P)          f32    BN2 bias
    w3_ref : (P, OC)         bf16   conv3 weights, BN3 scale folded
    b3_ref : (1, OC)         f32    BN3 bias
    [ws_ref: (Cin, OC) bf16, bs_ref: (1, OC) f32]   only when shortcut has a conv
    o_ref  : (1, Ho*Wo, OC)         output, lane-dense 2-D slab
    h1p_ref: (H+2, Wp, P)    bf16   VMEM scratch: zero-padded conv2 input (Wp 8-aligned)
    """
    if has_sc_conv:
        ws_ref, bs_ref, o_ref, h1p_ref = rest
    else:
        o_ref, h1p_ref = rest

    Cin = w1_ref.shape[0]
    P = w1_ref.shape[1]
    Wp = h1p_ref.shape[1]

    # --- conv1 (1x1) + bn1 + relu: (H*W, Cin) @ (Cin, P) on the MXU -------------
    x2d = x_ref[0].reshape(H * W, Cin)                                     # bf16
    h1 = jnp.dot(x2d, w1_ref[...], preferred_element_type=jnp.float32)
    h1 = jnp.maximum(h1 + b1_ref[...], 0.0)                                # (H*W, P) f32

    # --- padded conv2 input lives only in VMEM scratch (bf16) -------------------
    # Zero just the 1-pixel border; the interior is fully overwritten below.
    # Columns >= W+2 of the 8-aligned scratch are never read.
    zero_row = jnp.zeros((1, Wp, P), jnp.bfloat16)
    h1p_ref[pl.ds(0, 1), :, :] = zero_row
    h1p_ref[pl.ds(H + 1, 1), :, :] = zero_row
    zero_col = jnp.zeros((H, 1, P), jnp.bfloat16)
    h1p_ref[pl.ds(1, H), pl.ds(0, 1), :] = zero_col
    h1p_ref[pl.ds(1, H), pl.ds(W + 1, 1), :] = zero_col
    h1p_ref[pl.ds(1, H), pl.ds(1, W), :] = h1.reshape(H, W, P).astype(jnp.bfloat16)

    # --- conv2 (3x3, stride, pad=1) + bn2 + relu --------------------------------
    # im2col on the contraction dim: per kh, concat the 3 kw-shifted views on the
    # channel (lane) axis -> one (Ho*Wo, 3P) @ (3P, P) matmul (K grows 3x).
    acc = jnp.zeros((Ho * Wo, P), jnp.float32)
    for kh in range(3):
        if stride == 1:
            taps = [h1p_ref[pl.ds(kh, Ho), pl.ds(kw, Wo), :] for kw in range(3)]
        else:
            taps = [h1p_ref[pl.ds(kh, Ho, stride=stride),
                            pl.ds(kw, Wo, stride=stride), :] for kw in range(3)]
        patch = jnp.concatenate(taps, axis=-1).reshape(Ho * Wo, 3 * P)     # bf16
        acc = acc + jnp.dot(patch, w2_ref[kh], preferred_element_type=jnp.float32)
    h2 = jnp.maximum(acc + b2_ref[...], 0.0)                               # (Ho*Wo, P) f32

    # --- conv3 (1x1) + bn3 --------------------------------------------------------
    y = jnp.dot(h2.astype(jnp.bfloat16), w3_ref[...],
                preferred_element_type=jnp.float32) + b3_ref[...]

    # --- shortcut -----------------------------------------------------------------
    if has_sc_conv:
        if stride == 1:
            xs2d = x2d
        else:
            xs2d = x_ref[pl.ds(0, 1), pl.ds(0, Ho, stride=stride),
                         pl.ds(0, Wo, stride=stride), :].reshape(Ho * Wo, Cin)
        y = y + jnp.dot(xs2d, ws_ref[...],
                        preferred_element_type=jnp.float32) + bs_ref[...]
    else:
        # Identity shortcut: direct f32 residual add, no matmul, no extra DMA.
        y = y + x2d.astype(jnp.float32)

    # --- final relu, lane-dense 2-D store ------------------------------------------
    o_ref[0] = jnp.maximum(y, 0.0).astype(o_ref.dtype)


def _fold_bn(gamma, beta, mean, var, eps=1e-5):
    """Inference-mode BN as per-channel (scale, bias)."""
    scale = gamma / jnp.sqrt(var + eps)
    bias = beta - mean * scale
    return scale, bias


def _vmem_limit_bytes():
    """Generation-aware scoped-VMEM limit (~75% of per-core VMEM, capped at 96 MiB)."""
    cap = 64 * 1024 * 1024  # conservative default if the hardware query fails
    try:
        cap = int(pltpu.get_tpu_info().vmem_capacity_bytes)
    except Exception:
        pass
    return min(96 * 1024 * 1024, (cap * 3) // 4)


def bottleneck_forward(x_nchw, params, *, stride=1, bn_eps=1e-5):
    """Fused Bottleneck forward matching the torch module (inference-mode BN).

    params:
      conv1_w (P, Cin, 1, 1), bn1=(gamma, beta, mean, var)
      conv2_w (P, P, 3, 3),   bn2
      conv3_w (OC, P, 1, 1),  bn3
      optional: sc_w (OC, Cin, 1, 1), bn_sc   (conv shortcut branch)
    """
    N, Cin, H, W = x_nchw.shape
    conv1_w, conv2_w, conv3_w = params["conv1_w"], params["conv2_w"], params["conv3_w"]
    P = conv1_w.shape[0]
    OC = conv3_w.shape[0]
    Ho = (H + 2 - 3) // stride + 1
    Wo = (W + 2 - 3) // stride + 1
    Wp = ((W + 2 + 7) // 8) * 8  # 8-aligned sublane width for the padded scratch

    s1, b1 = _fold_bn(*params["bn1"], eps=bn_eps)
    s2, b2 = _fold_bn(*params["bn2"], eps=bn_eps)
    s3, b3 = _fold_bn(*params["bn3"], eps=bn_eps)

    # Fold BN scales into conv weights; weights & activations bf16, biases f32.
    w1 = (jnp.transpose(conv1_w[:, :, 0, 0], (1, 0)) * s1[None, :]).astype(jnp.bfloat16)
    w2 = (jnp.transpose(conv2_w, (2, 3, 1, 0)) * s2[None, None, None, :]
          ).reshape(3, 3 * P, P).astype(jnp.bfloat16)            # row index = kw*P + cin
    w3 = (jnp.transpose(conv3_w[:, :, 0, 0], (1, 0)) * s3[None, :]).astype(jnp.bfloat16)

    has_sc_conv = "sc_w" in params
    if has_sc_conv:
        ss, bs = _fold_bn(*params["bn_sc"], eps=bn_eps)
        ws = (jnp.transpose(params["sc_w"][:, :, 0, 0], (1, 0)) * ss[None, :]
              ).astype(jnp.bfloat16)
    else:
        assert stride == 1 and Cin == OC, "identity shortcut needs stride=1, Cin==OC"

    x_nhwc = jnp.transpose(x_nchw, (0, 2, 3, 1)).astype(jnp.bfloat16)

    kernel = functools.partial(_bottleneck_kernel, H=H, W=W, Ho=Ho, Wo=Wo,
                               stride=stride, has_sc_conv=has_sc_conv)

    operands = [x_nhwc,
                w1, b1.reshape(1, P).astype(jnp.float32),
                w2, b2.reshape(1, P).astype(jnp.float32),
                w3, b3.reshape(1, OC).astype(jnp.float32)]
    if has_sc_conv:
        operands += [ws, bs.reshape(1, OC).astype(jnp.float32)]

    def build(single_buffer_weights):
        # Grid-invariant weight/bias operands: single-buffer to halve their VMEM.
        wkw = {"pipeline_mode": pl.Buffered(1)} if single_buffer_weights else {}
        in_specs = [pl.BlockSpec((1, H, W, Cin), lambda n: (n, 0, 0, 0))]
        in_specs += [
            pl.BlockSpec((Cin, P), lambda n: (0, 0), **wkw),
            pl.BlockSpec((1, P), lambda n: (0, 0), **wkw),
            pl.BlockSpec((3, 3 * P, P), lambda n: (0, 0, 0), **wkw),
            pl.BlockSpec((1, P), lambda n: (0, 0), **wkw),
            pl.BlockSpec((P, OC), lambda n: (0, 0), **wkw),
            pl.BlockSpec((1, OC), lambda n: (0, 0), **wkw),
        ]
        if has_sc_conv:
            in_specs += [pl.BlockSpec((Cin, OC), lambda n: (0, 0), **wkw),
                         pl.BlockSpec((1, OC), lambda n: (0, 0), **wkw)]
        return pl.pallas_call(
            kernel,
            out_shape=jax.ShapeDtypeStruct((N, Ho * Wo, OC), x_nchw.dtype),
            grid=(N,),
            in_specs=in_specs,
            out_specs=pl.BlockSpec((1, Ho * Wo, OC), lambda n: (n, 0, 0)),
            scratch_shapes=[pltpu.VMEM((H + 2, Wp, P), jnp.bfloat16)],
            compiler_params=pltpu.CompilerParams(
                dimension_semantics=("parallel",),
                vmem_limit_bytes=_vmem_limit_bytes(),
            ),
        )

    try:
        out2d = build(True)(*operands)
    except Exception:
        # Fallback for jax versions without pl.Buffered single-buffering support.
        out2d = build(False)(*operands)

    out = out2d.reshape(N, Ho, Wo, OC)
    return jnp.transpose(out, (0, 3, 1, 2))  # back to NCHW


# ----------------------------- pure-JAX reference -----------------------------
def _bn_ref(x, gamma, beta, mean, var, eps=1e-5):
    inv = gamma / jnp.sqrt(var + eps)
    return (x - mean[None, :, None, None]) * inv[None, :, None, None] \
        + beta[None, :, None, None]


def _conv_ref(x, w, stride=1, padding=0):
    dn = jax.lax.conv_dimension_numbers(x.shape, w.shape, ("NCHW", "OIHW", "NCHW"))
    return jax.lax.conv_general_dilated(
        x, w, window_strides=(stride, stride),
        padding=[(padding, padding), (padding, padding)], dimension_numbers=dn)


def _bottleneck_ref(x, params, *, stride=1):
    h = jax.nn.relu(_bn_ref(_conv_ref(x, params["conv1_w"]), *params["bn1"]))
    h = jax.nn.relu(_bn_ref(_conv_ref(h, params["conv2_w"], stride=stride, padding=1),
                            *params["bn2"]))
    h = _bn_ref(_conv_ref(h, params["conv3_w"]), *params["bn3"])
    if "sc_w" in params:
        sc = _bn_ref(_conv_ref(x, params["sc_w"], stride=stride), *params["bn_sc"])
    else:
        sc = x
    return jax.nn.relu(h + sc)


def _make_params(key, in_planes, planes, *, stride=1, expansion=4):
    OC = expansion * planes
    ks = jax.random.split(key, 8)

    def bn_params(k, c):
        k1, k2, k3, k4 = jax.random.split(k, 4)
        gamma = 1.0 + 0.1 * jax.random.normal(k1, (c,), jnp.float32)
        beta = 0.1 * jax.random.normal(k2, (c,), jnp.float32)
        mean = 0.1 * jax.random.normal(k3, (c,), jnp.float32)
        var = jax.random.uniform(k4, (c,), jnp.float32, 0.5, 1.5)
        return (gamma, beta, mean, var)

    params = {
        "conv1_w": 0.2 * jax.random.normal(ks[0], (planes, in_planes, 1, 1), jnp.float32),
        "bn1": bn_params(ks[1], planes),
        "conv2_w": 0.2 * jax.random.normal(ks[2], (planes, planes, 3, 3), jnp.float32),
        "bn2": bn_params(ks[3], planes),
        "conv3_w": 0.2 * jax.random.normal(ks[4], (OC, planes, 1, 1), jnp.float32),
        "bn3": bn_params(ks[5], OC),
    }
    if stride != 1 or in_planes != OC:
        params["sc_w"] = 0.2 * jax.random.normal(ks[6], (OC, in_planes, 1, 1), jnp.float32)
        params["bn_sc"] = bn_params(ks[7], OC)
    return params


if __name__ == "__main__":
    key = jax.random.PRNGKey(0)
    kx1, kp1, kx2, kp2 = jax.random.split(key, 4)

    # bf16 matmul path vs. f32 reference -> loose tolerances (a real layout/offset bug
    # would produce O(1) errors and still be caught).
    RTOL, ATOL = 5e-2, 1e-1

    # Case 1: conv shortcut (in_planes != expansion*planes), stride=1.
    N, Cin, H, W, planes = 2, 16, 16, 16, 8
    x1 = jax.random.normal(kx1, (N, Cin, H, W), jnp.float32)
    p1 = _make_params(kp1, Cin, planes, stride=1)
    out1 = jax.block_until_ready(bottleneck_forward(x1, p1, stride=1))
    ref1 = _bottleneck_ref(x1, p1, stride=1)
    assert out1.shape == ref1.shape, (out1.shape, ref1.shape)
    np.testing.assert_allclose(np.asarray(out1), np.asarray(ref1), rtol=RTOL, atol=ATOL)

    # Case 2: identity shortcut (in_planes == expansion*planes), stride=1.
    Cin2 = 32
    x2 = jax.random.normal(kx2, (N, Cin2, H, W), jnp.float32)
    p2 = _make_params(kp2, Cin2, planes, stride=1)
    out2 = jax.block_until_ready(bottleneck_forward(x2, p2, stride=1))
    ref2 = _bottleneck_ref(x2, p2, stride=1)
    assert out2.shape == ref2.shape, (out2.shape, ref2.shape)
    np.testing.assert_allclose(np.asarray(out2), np.asarray(ref2), rtol=RTOL, atol=ATOL)

    print("KERNEL_OK")
</pallas_src>

<mosaic_0001>
module attributes {stable_mosaic.version = 11 : i64} {
  func.func @_bottleneck_kernel(%arg0: i32, %arg1: memref<1x16x16x16xbf16, #tpu.memory_space<vmem>>, %arg2: memref<16x8xbf16, #tpu.memory_space<vmem>>, %arg3: memref<1x8xf32, #tpu.memory_space<vmem>>, %arg4: memref<3x24x8xbf16, #tpu.memory_space<vmem>>, %arg5: memref<1x8xf32, #tpu.memory_space<vmem>>, %arg6: memref<8x32xbf16, #tpu.memory_space<vmem>>, %arg7: memref<1x32xf32, #tpu.memory_space<vmem>>, %arg8: memref<16x32xbf16, #tpu.memory_space<vmem>>, %arg9: memref<1x32xf32, #tpu.memory_space<vmem>>, %arg10: memref<1x256x32xf32, #tpu.memory_space<vmem>>, %arg11: memref<18x24x8xbf16, #tpu.memory_space<vmem>>) attributes {dimension_semantics = [#tpu.dimension_semantics<parallel>], iteration_bounds = array<i64: 2>, scalar_prefetch = 0 : i64, scratch_operands = 1 : i64, tpu.core_type = #tpu.core_type<tc>, window_params = [{transform_indices = @transform_0, window_bounds = array<i64: 1, 16, 16, 16>}, {pipeline_mode = #tpu.pipeline_mode<synchronous>, transform_indices = @transform_1, window_bounds = array<i64: 16, 8>}, {pipeline_mode = #tpu.pipeline_mode<synchronous>, transform_indices = @transform_2, window_bounds = array<i64: 1, 8>}, {pipeline_mode = #tpu.pipeline_mode<synchronous>, transform_indices = @transform_3, window_bounds = array<i64: 3, 24, 8>}, {pipeline_mode = #tpu.pipeline_mode<synchronous>, transform_indices = @transform_4, window_bounds = array<i64: 1, 8>}, {pipeline_mode = #tpu.pipeline_mode<synchronous>, transform_indices = @transform_5, window_bounds = array<i64: 8, 32>}, {pipeline_mode = #tpu.pipeline_mode<synchronous>, transform_indices = @transform_6, window_bounds = array<i64: 1, 32>}, {pipeline_mode = #tpu.pipeline_mode<synchronous>, transform_indices = @transform_7, window_bounds = array<i64: 16, 32>}, {pipeline_mode = #tpu.pipeline_mode<synchronous>, transform_indices = @transform_8, window_bounds = array<i64: 1, 32>}, {transform_indices = @transform_9, window_bounds = array<i64: 1, 256, 32>}]} {
    %c0 = arith.constant 0 : index
    %c0_0 = arith.constant 0 : index
    %c0_1 = arith.constant 0 : index
    %c0_2 = arith.constant 0 : index
    %0 = vector.load %arg1[%c0, %c0_0, %c0_1, %c0_2] : memref<1x16x16x16xbf16, #tpu.memory_space<vmem>>, vector<1x16x16x16xbf16>
    %1 = vector.shape_cast %0 : vector<1x16x16x16xbf16> to vector<16x16x16xbf16>
    %2 = vector.shape_cast %1 : vector<16x16x16xbf16> to vector<256x16xbf16>
    %c0_3 = arith.constant 0 : index
    %c0_4 = arith.constant 0 : index
    %3 = vector.load %arg2[%c0_3, %c0_4] : memref<16x8xbf16, #tpu.memory_space<vmem>>, vector<16x8xbf16>
    %cst = arith.constant dense<0.000000e+00> : vector<256x8xf32>
    %4 = tpu.matmul %2, %3, %cst {dimension_numbers = #tpu.dot_dimension_numbers<[1], [0], [0], [1], [0, 0, 1, 1], [], []>} : vector<256x16xbf16>, vector<16x8xbf16>, vector<256x8xf32> -> vector<256x8xf32>
    %c0_5 = arith.constant 0 : index
    %c0_6 = arith.constant 0 : index
    %5 = vector.load %arg3[%c0_5, %c0_6] : memref<1x8xf32, #tpu.memory_space<vmem>>, vector<1x8xf32>
    %6 = vector.broadcast %5 : vector<1x8xf32> to vector<256x8xf32>
    %7 = arith.addf %4, %6 : vector<256x8xf32>
    %cst_7 = arith.constant 0.000000e+00 : f32
    %8 = vector.broadcast %cst_7 : f32 to vector<256x8xf32>
    %9 = arith.maximumf %7, %8 : vector<256x8xf32>
    %cst_8 = arith.constant 0.000000e+00 : bf16
    %10 = vector.broadcast %cst_8 : bf16 to vector<1x24x8xbf16>
    %c0_9 = arith.constant 0 : index
    %c0_10 = arith.constant 0 : index
    %c0_11 = arith.constant 0 : index
    %11 = vector.load %arg11[%c0_9, %c0_10, %c0_11] : memref<18x24x8xbf16, #tpu.memory_space<vmem>>, vector<1x24x8xbf16>
    tpu.vector_store %arg11[%c0_9, %c0_10, %c0_11], %10 {strides = array<i32>} : memref<18x24x8xbf16, #tpu.memory_space<vmem>>, vector<1x24x8xbf16>,
    %c17 = arith.constant 17 : index
    %c0_12 = arith.constant 0 : index
    %c0_13 = arith.constant 0 : index
    %12 = vector.load %arg11[%c17, %c0_12, %c0_13] : memref<18x24x8xbf16, #tpu.memory_space<vmem>>, vector<1x24x8xbf16>
    tpu.vector_store %arg11[%c17, %c0_12, %c0_13], %10 {strides = array<i32>} : memref<18x24x8xbf16, #tpu.memory_space<vmem>>, vector<1x24x8xbf16>,
    %cst_14 = arith.constant 0.000000e+00 : bf16
    %13 = vector.broadcast %cst_14 : bf16 to vector<16x1x8xbf16>
    %c1 = arith.constant 1 : index
    %c0_15 = arith.constant 0 : index
    %c0_16 = arith.constant 0 : index
    %14 = vector.load %arg11[%c1, %c0_15, %c0_16] : memref<18x24x8xbf16, #tpu.memory_space<vmem>>, vector<16x1x8xbf16>
    tpu.vector_store %arg11[%c1, %c0_15, %c0_16], %13 {strides = array<i32>} : memref<18x24x8xbf16, #tpu.memory_space<vmem>>, vector<16x1x8xbf16>,
    %c1_17 = arith.constant 1 : index
    %c17_18 = arith.constant 17 : index
    %c0_19 = arith.constant 0 : index
    %15 = vector.load %arg11[%c1_17, %c17_18, %c0_19] : memref<18x24x8xbf16, #tpu.memory_space<vmem>>, vector<16x1x8xbf16>
    tpu.vector_store %arg11[%c1_17, %c17_18, %c0_19], %13 {strides = array<i32>} : memref<18x24x8xbf16, #tpu.memory_space<vmem>>, vector<16x1x8xbf16>,
    %16 = vector.shape_cast %9 : vector<256x8xf32> to vector<16x16x8xf32>
    %17 = arith.truncf %16 : vector<16x16x8xf32> to vector<16x16x8xbf16>
    %c1_20 = arith.constant 1 : index
    %c1_21 = arith.constant 1 : index
    %c0_22 = arith.constant 0 : index
    %18 = vector.load %arg11[%c1_20, %c1_21, %c0_22] : memref<18x24x8xbf16, #tpu.memory_space<vmem>>, vector<16x16x8xbf16>
    tpu.vector_store %arg11[%c1_20, %c1_21, %c0_22], %17 {strides = array<i32>} : memref<18x24x8xbf16, #tpu.memory_space<vmem>>, vector<16x16x8xbf16>,
    %cst_23 = arith.constant 0.000000e+00 : f32
    %19 = vector.broadcast %cst_23 : f32 to vector<256x8xf32>
    %c0_24 = arith.constant 0 : index
    %c0_25 = arith.constant 0 : index
    %c0_26 = arith.constant 0 : index
    %20 = vector.load %arg11[%c0_24, %c0_25, %c0_26] : memref<18x24x8xbf16, #tpu.memory_space<vmem>>, vector<16x16x8xbf16>
    %c0_27 = arith.constant 0 : index
    %c1_28 = arith.constant 1 : index
    %c0_29 = arith.constant 0 : index
    %21 = vector.load %arg11[%c0_27, %c1_28, %c0_29] : memref<18x24x8xbf16, #tpu.memory_space<vmem>>, vector<16x16x8xbf16>
    %c0_30 = arith.constant 0 : index
    %c2 = arith.constant 2 : index
    %c0_31 = arith.constant 0 : index
    %22 = vector.load %arg11[%c0_30, %c2, %c0_31] : memref<18x24x8xbf16, #tpu.memory_space<vmem>>, vector<16x16x8xbf16>
    %23 = tpu.concatenate %20, %21, %22 in 2 : vector<16x16x8xbf16>, vector<16x16x8xbf16>, vector<16x16x8xbf16> -> vector<16x16x24xbf16>
    %24 = vector.shape_cast %23 : vector<16x16x24xbf16> to vector<256x24xbf16>
    %c0_32 = arith.constant 0 : index
    %c0_33 = arith.constant 0 : index
    %c0_34 = arith.constant 0 : index
    %25 = vector.load %arg4[%c0_32, %c0_33, %c0_34] : memref<3x24x8xbf16, #tpu.memory_space<vmem>>, vector<1x24x8xbf16>
    %26 = vector.shape_cast %25 : vector<1x24x8xbf16> to vector<24x8xbf16>
    %cst_35 = arith.constant dense<0.000000e+00> : vector<256x8xf32>
    %27 = tpu.matmul %24, %26, %cst_35 {dimension_numbers = #tpu.dot_dimension_numbers<[1], [0], [0], [1], [0, 0, 1, 1], [], []>} : vector<256x24xbf16>, vector<24x8xbf16>, vector<256x8xf32> -> vector<256x8xf32>
    %28 = arith.addf %19, %27 : vector<256x8xf32>
    %c1_36 = arith.constant 1 : index
    %c0_37 = arith.constant 0 : index
    %c0_38 = arith.constant 0 : index
    %29 = vector.load %arg11[%c1_36, %c0_37, %c0_38] : memref<18x24x8xbf16, #tpu.memory_space<vmem>>, vector<16x16x8xbf16>
    %c1_39 = arith.constant 1 : index
    %c1_40 = arith.constant 1 : index
    %c0_41 = arith.constant 0 : index
    %30 = vector.load %arg11[%c1_39, %c1_40, %c0_41] : memref<18x24x8xbf16, #tpu.memory_space<vmem>>, vector<16x16x8xbf16>
    %c1_42 = arith.constant 1 : index
    %c2_43 = arith.constant 2 : index
    %c0_44 = arith.constant 0 : index
    %31 = vector.load %arg11[%c1_42, %c2_43, %c0_44] : memref<18x24x8xbf16, #tpu.memory_space<vmem>>, vector<16x16x8xbf16>
    %32 = tpu.concatenate %29, %30, %31 in 2 : vector<16x16x8xbf16>, vector<16x16x8xbf16>, vector<16x16x8xbf16> -> vector<16x16x24xbf16>
    %33 = vector.shape_cast %32 : vector<16x16x24xbf16> to vector<256x24xbf16>
    %c1_45 = arith.constant 1 : index
    %c0_46 = arith.constant 0 : index
    %c0_47 = arith.constant 0 : index
    %34 = vector.load %arg4[%c1_45, %c0_46, %c0_47] : memref<3x24x8xbf16, #tpu.memory_space<vmem>>, vector<1x24x8xbf16>
    %35 = vector.shape_cast %34 : vector<1x24x8xbf16> to vector<24x8xbf16>
    %cst_48 = arith.constant dense<0.000000e+00> : vector<256x8xf32>
    %36 = tpu.matmul %33, %35, %cst_48 {dimension_numbers = #tpu.dot_dimension_numbers<[1], [0], [0], [1], [0, 0, 1, 1], [], []>} : vector<256x24xbf16>, vector<24x8xbf16>, vector<256x8xf32> -> vector<256x8xf32>
    %37 = arith.addf %28, %36 : vector<256x8xf32>
    %c2_49 = arith.constant 2 : index
    %c0_50 = arith.constant 0 : index
    %c0_51 = arith.constant 0 : index
    %38 = vector.load %arg11[%c2_49, %c0_50, %c0_51] : memref<18x24x8xbf16, #tpu.memory_space<vmem>>, vector<16x16x8xbf16>
    %c2_52 = arith.constant 2 : index
    %c1_53 = arith.constant 1 : index
    %c0_54 = arith.constant 0 : index
    %39 = vector.load %arg11[%c2_52, %c1_53, %c0_54] : memref<18x24x8xbf16, #tpu.memory_space<vmem>>, vector<16x16x8xbf16>
    %c2_55 = arith.constant 2 : index
    %c2_56 = arith.constant 2 : index
    %c0_57 = arith.constant 0 : index
    %40 = vector.load %arg11[%c2_55, %c2_56, %c0_57] : memref<18x24x8xbf16, #tpu.memory_space<vmem>>, vector<16x16x8xbf16>
    %41 = tpu.concatenate %38, %39, %40 in 2 : vector<16x16x8xbf16>, vector<16x16x8xbf16>, vector<16x16x8xbf16> -> vector<16x16x24xbf16>
    %42 = vector.shape_cast %41 : vector<16x16x24xbf16> to vector<256x24xbf16>
    %c2_58 = arith.constant 2 : index
    %c0_59 = arith.constant 0 : index
    %c0_60 = arith.constant 0 : index
    %43 = vector.load %arg4[%c2_58, %c0_59, %c0_60] : memref<3x24x8xbf16, #tpu.memory_space<vmem>>, vector<1x24x8xbf16>
    %44 = vector.shape_cast %43 : vector<1x24x8xbf16> to vector<24x8xbf16>
    %cst_61 = arith.constant dense<0.000000e+00> : vector<256x8xf32>
    %45 = tpu.matmul %42, %44, %cst_61 {dimension_numbers = #tpu.dot_dimension_numbers<[1], [0], [0], [1], [0, 0, 1, 1], [], []>} : vector<256x24xbf16>, vector<24x8xbf16>, vector<256x8xf32> -> vector<256x8xf32>
    %46 = arith.addf %37, %45 : vector<256x8xf32>
    %c0_62 = arith.constant 0 : index
    %c0_63 = arith.constant 0 : index
    %47 = vector.load %arg5[%c0_62, %c0_63] : memref<1x8xf32, #tpu.memory_space<vmem>>, vector<1x8xf32>
    %48 = vector.broadcast %47 : vector<1x8xf32> to vector<256x8xf32>
    %49 = arith.addf %46, %48 : vector<256x8xf32>
    %cst_64 = arith.constant 0.000000e+00 : f32
    %50 = vector.broadcast %cst_64 : f32 to vector<256x8xf32>
    %51 = arith.maximumf %49, %50 : vector<256x8xf32>
    %52 = arith.truncf %51 : vector<256x8xf32> to vector<256x8xbf16>
    %c0_65 = arith.constant 0 : index
    %c0_66 = arith.constant 0 : index
    %53 = vector.load %arg6[%c0_65, %c0_66] : memref<8x32xbf16, #tpu.memory_space<vmem>>, vector<8x32xbf16>
    %cst_67 = arith.constant dense<0.000000e+00> : vector<256x32xf32>
    %54 = tpu.matmul %52, %53, %cst_67 {dimension_numbers = #tpu.dot_dimension_numbers<[1], [0], [0], [1], [0, 0, 1, 1], [], []>} : vector<256x8xbf16>, vector<8x32xbf16>, vector<256x32xf32> -> vector<256x32xf32>
    %c0_68 = arith.constant 0 : index
    %c0_69 = arith.constant 0 : index
    %55 = vector.load %arg7[%c0_68, %c0_69] : memref<1x32xf32, #tpu.memory_space<vmem>>, vector<1x32xf32>
    %56 = vector.broadcast %55 : vector<1x32xf32> to vector<256x32xf32>
    %57 = arith.addf %54, %56 : vector<256x32xf32>
    %c0_70 = arith.constant 0 : index
    %c0_71 = arith.constant 0 : index
    %58 = vector.load %arg8[%c0_70, %c0_71] : memref<16x32xbf16, #tpu.memory_space<vmem>>, vector<16x32xbf16>
    %cst_72 = arith.constant dense<0.000000e+00> : vector<256x32xf32>
    %59 = tpu.matmul %2, %58, %cst_72 {dimension_numbers = #tpu.dot_dimension_numbers<[1], [0], [0], [1], [0, 0, 1, 1], [], []>} : vector<256x16xbf16>, vector<16x32xbf16>, vector<256x32xf32> -> vector<256x32xf32>
    %60 = arith.addf %57, %59 : vector<256x32xf32>
    %c0_73 = arith.constant 0 : index
    %c0_74 = arith.constant 0 : index
    %61 = vector.load %arg9[%c0_73, %c0_74] : memref<1x32xf32, #tpu.memory_space<vmem>>, vector<1x32xf32>
    %62 = vector.broadcast %61 : vector<1x32xf32> to vector<256x32xf32>
    %63 = arith.addf %60, %62 : vector<256x32xf32>
    %cst_75 = arith.constant 0.000000e+00 : f32
    %64 = vector.broadcast %cst_75 : f32 to vector<256x32xf32>
    %65 = arith.maximumf %63, %64 : vector<256x32xf32>
    %c0_76 = arith.constant 0 : index
    %c0_77 = arith.constant 0 : index
    %c0_78 = arith.constant 0 : index
    %66 = vector.load %arg10[%c0_76, %c0_77, %c0_78] : memref<1x256x32xf32, #tpu.memory_space<vmem>>, vector<1x256x32xf32>
    %67 = vector.shape_cast %66 : vector<1x256x32xf32> to vector<256x32xf32>
    %68 = vector.shape_cast %65 : vector<256x32xf32> to vector<1x256x32xf32>
    tpu.vector_store %arg10[%c0_76, %c0_77, %c0_78], %68 {strides = array<i32>} : memref<1x256x32xf32, #tpu.memory_space<vmem>>, vector<1x256x32xf32>,
    return
  }
  func.func @transform_0(%arg0: i32) -> (i32, i32, i32, i32) {
    %c0_i32 = arith.constant 0 : i32
    %c0_i32_0 = arith.constant 0 : i32
    %c0_i32_1 = arith.constant 0 : i32
    %c0_i32_2 = arith.constant 0 : i32
    return %arg0, %c0_i32, %c0_i32_0, %c0_i32_1 : i32, i32, i32, i32
  }
  func.func @transform_1(%arg0: i32) -> (i32, i32) {
    %c0_i32 = arith.constant 0 : i32
    %c0_i32_0 = arith.constant 0 : i32
    %c0_i32_1 = arith.constant 0 : i32
    return %c0_i32, %c0_i32_0 : i32, i32
  }
  func.func @transform_2(%arg0: i32) -> (i32, i32) {
    %c0_i32 = arith.constant 0 : i32
    %c0_i32_0 = arith.constant 0 : i32
    %c0_i32_1 = arith.constant 0 : i32
    return %c0_i32, %c0_i32_0 : i32, i32
  }
  func.func @transform_3(%arg0: i32) -> (i32, i32, i32) {
    %c0_i32 = arith.constant 0 : i32
    %c0_i32_0 = arith.constant 0 : i32
    %c0_i32_1 = arith.constant 0 : i32
    %c0_i32_2 = arith.constant 0 : i32
    return %c0_i32, %c0_i32_0, %c0_i32_1 : i32, i32, i32
  }
  func.func @transform_4(%arg0: i32) -> (i32, i32) {
    %c0_i32 = arith.constant 0 : i32
    %c0_i32_0 = arith.constant 0 : i32
    %c0_i32_1 = arith.constant 0 : i32
    return %c0_i32, %c0_i32_0 : i32, i32
  }
  func.func @transform_5(%arg0: i32) -> (i32, i32) {
    %c0_i32 = arith.constant 0 : i32
    %c0_i32_0 = arith.constant 0 : i32
    %c0_i32_1 = arith.constant 0 : i32
    return %c0_i32, %c0_i32_0 : i32, i32
  }
  func.func @transform_6(%arg0: i32) -> (i32, i32) {
    %c0_i32 = arith.constant 0 : i32
    %c0_i32_0 = arith.constant 0 : i32
    %c0_i32_1 = arith.constant 0 : i32
    return %c0_i32, %c0_i32_0 : i32, i32
  }
  func.func @transform_7(%arg0: i32) -> (i32, i32) {
    %c0_i32 = arith.constant 0 : i32
    %c0_i32_0 = arith.constant 0 : i32
    %c0_i32_1 = arith.constant 0 : i32
    return %c0_i32, %c0_i32_0 : i32, i32
  }
  func.func @transform_8(%arg0: i32) -> (i32, i32) {
    %c0_i32 = arith.constant 0 : i32
    %c0_i32_0 = arith.constant 0 : i32
    %c0_i32_1 = arith.constant 0 : i32
    return %c0_i32, %c0_i32_0 : i32, i32
  }
  func.func @transform_9(%arg0: i32) -> (i32, i32, i32) {
    %c0_i32 = arith.constant 0 : i32
    %c0_i32_0 = arith.constant 0 : i32
    %c0_i32_1 = arith.constant 0 : i32
    return %arg0, %c0_i32, %c0_i32_0 : i32, i32, i32
  }
}

module attributes {stable_mosaic.version = 11 : i64} {
  func.func @_bottleneck_kernel(%arg0: i32, %arg1: memref<1x16x16x16xbf16, #tpu.memory_space<vmem>>, %arg2: memref<16x8xbf16, #tpu.memory_space<vmem>>, %arg3: memref<1x8xf32, #tpu.memory_space<vmem>>, %arg4: memref<3x24x8xbf16, #tpu.memory_space<vmem>>, %arg5: memref<1x8xf32, #tpu.memory_space<vmem>>, %arg6: memref<8x32xbf16, #tpu.memory_space<vmem>>, %arg7: memref<1x32xf32, #tpu.memory_space<vmem>>, %arg8: memref<16x32xbf16, #tpu.memory_space<vmem>>, %arg9: memref<1x32xf32, #tpu.memory_space<vmem>>, %arg10: memref<1x256x32xf32, #tpu.memory_space<vmem>>, %arg11: memref<18x24x8xbf16, #tpu.memory_space<vmem>>) attributes {dimension_semantics = [#tpu.dimension_semantics<parallel>], iteration_bounds = array<i64: 2>, scalar_prefetch = 0 : i64, scratch_operands = 1 : i64, tpu.core_type = #tpu.core_type<tc>, window_params = [{transform_indices = @transform_0, window_bounds = array<i64: 1, 16, 16, 16>}, {pipeline_mode = #tpu.pipeline_mode<synchronous>, transform_indices = @transform_1, window_bounds = array<i64: 16, 8>}, {pipeline_mode = #tpu.pipeline_mode<synchronous>, transform_indices = @transform_2, window_bounds = array<i64: 1, 8>}, {pipeline_mode = #tpu.pipeline_mode<synchronous>, transform_indices = @transform_3, window_bounds = array<i64: 3, 24, 8>}, {pipeline_mode = #tpu.pipeline_mode<synchronous>, transform_indices = @transform_4, window_bounds = array<i64: 1, 8>}, {pipeline_mode = #tpu.pipeline_mode<synchronous>, transform_indices = @transform_5, window_bounds = array<i64: 8, 32>}, {pipeline_mode = #tpu.pipeline_mode<synchronous>, transform_indices = @transform_6, window_bounds = array<i64: 1, 32>}, {pipeline_mode = #tpu.pipeline_mode<synchronous>, transform_indices = @transform_7, window_bounds = array<i64: 16, 32>}, {pipeline_mode = #tpu.pipeline_mode<synchronous>, transform_indices = @transform_8, window_bounds = array<i64: 1, 32>}, {transform_indices = @transform_9, window_bounds = array<i64: 1, 256, 32>}]} {
    %c0 = arith.constant 0 : index
    %c0_0 = arith.constant 0 : index
    %c0_1 = arith.constant 0 : index
    %c0_2 = arith.constant 0 : index
    %0 = vector.load %arg1[%c0, %c0_0, %c0_1, %c0_2] : memref<1x16x16x16xbf16, #tpu.memory_space<vmem>>, vector<1x16x16x16xbf16>
    %1 = vector.shape_cast %0 : vector<1x16x16x16xbf16> to vector<16x16x16xbf16>
    %2 = vector.shape_cast %1 : vector<16x16x16xbf16> to vector<256x16xbf16>
    %c0_3 = arith.constant 0 : index
    %c0_4 = arith.constant 0 : index
    %3 = vector.load %arg2[%c0_3, %c0_4] : memref<16x8xbf16, #tpu.memory_space<vmem>>, vector<16x8xbf16>
    %cst = arith.constant dense<0.000000e+00> : vector<256x8xf32>
    %4 = tpu.matmul %2, %3, %cst {dimension_numbers = #tpu.dot_dimension_numbers<[1], [0], [0], [1], [0, 0, 1, 1], [], []>} : vector<256x16xbf16>, vector<16x8xbf16>, vector<256x8xf32> -> vector<256x8xf32>
    %c0_5 = arith.constant 0 : index
    %c0_6 = arith.constant 0 : index
    %5 = vector.load %arg3[%c0_5, %c0_6] : memref<1x8xf32, #tpu.memory_space<vmem>>, vector<1x8xf32>
    %6 = vector.broadcast %5 : vector<1x8xf32> to vector<256x8xf32>
    %7 = arith.addf %4, %6 : vector<256x8xf32>
    %cst_7 = arith.constant 0.000000e+00 : f32
    %8 = vector.broadcast %cst_7 : f32 to vector<256x8xf32>
    %9 = arith.maximumf %7, %8 : vector<256x8xf32>
    %cst_8 = arith.constant 0.000000e+00 : bf16
    %10 = vector.broadcast %cst_8 : bf16 to vector<1x24x8xbf16>
    %c0_9 = arith.constant 0 : index
    %c0_10 = arith.constant 0 : index
    %c0_11 = arith.constant 0 : index
    %11 = vector.load %arg11[%c0_9, %c0_10, %c0_11] : memref<18x24x8xbf16, #tpu.memory_space<vmem>>, vector<1x24x8xbf16>
    tpu.vector_store %arg11[%c0_9, %c0_10, %c0_11], %10 {strides = array<i32>} : memref<18x24x8xbf16, #tpu.memory_space<vmem>>, vector<1x24x8xbf16>,
    %c17 = arith.constant 17 : index
    %c0_12 = arith.constant 0 : index
    %c0_13 = arith.constant 0 : index
    %12 = vector.load %arg11[%c17, %c0_12, %c0_13] : memref<18x24x8xbf16, #tpu.memory_space<vmem>>, vector<1x24x8xbf16>
    tpu.vector_store %arg11[%c17, %c0_12, %c0_13], %10 {strides = array<i32>} : memref<18x24x8xbf16, #tpu.memory_space<vmem>>, vector<1x24x8xbf16>,
    %cst_14 = arith.constant 0.000000e+00 : bf16
    %13 = vector.broadcast %cst_14 : bf16 to vector<16x1x8xbf16>
    %c1 = arith.constant 1 : index
    %c0_15 = arith.constant 0 : index
    %c0_16 = arith.constant 0 : index
    %14 = vector.load %arg11[%c1, %c0_15, %c0_16] : memref<18x24x8xbf16, #tpu.memory_space<vmem>>, vector<16x1x8xbf16>
    tpu.vector_store %arg11[%c1, %c0_15, %c0_16], %13 {strides = array<i32>} : memref<18x24x8xbf16, #tpu.memory_space<vmem>>, vector<16x1x8xbf16>,
    %c1_17 = arith.constant 1 : index
    %c17_18 = arith.constant 17 : index
    %c0_19 = arith.constant 0 : index
    %15 = vector.load %arg11[%c1_17, %c17_18, %c0_19] : memref<18x24x8xbf16, #tpu.memory_space<vmem>>, vector<16x1x8xbf16>
    tpu.vector_store %arg11[%c1_17, %c17_18, %c0_19], %13 {strides = array<i32>} : memref<18x24x8xbf16, #tpu.memory_space<vmem>>, vector<16x1x8xbf16>,
    %16 = vector.shape_cast %9 : vector<256x8xf32> to vector<16x16x8xf32>
    %17 = arith.truncf %16 : vector<16x16x8xf32> to vector<16x16x8xbf16>
    %c1_20 = arith.constant 1 : index
    %c1_21 = arith.constant 1 : index
    %c0_22 = arith.constant 0 : index
    %18 = vector.load %arg11[%c1_20, %c1_21, %c0_22] : memref<18x24x8xbf16, #tpu.memory_space<vmem>>, vector<16x16x8xbf16>
    tpu.vector_store %arg11[%c1_20, %c1_21, %c0_22], %17 {strides = array<i32>} : memref<18x24x8xbf16, #tpu.memory_space<vmem>>, vector<16x16x8xbf16>,
    %cst_23 = arith.constant 0.000000e+00 : f32
    %19 = vector.broadcast %cst_23 : f32 to vector<256x8xf32>
    %c0_24 = arith.constant 0 : index
    %c0_25 = arith.constant 0 : index
    %c0_26 = arith.constant 0 : index
    %20 = vector.load %arg11[%c0_24, %c0_25, %c0_26] : memref<18x24x8xbf16, #tpu.memory_space<vmem>>, vector<16x16x8xbf16>
    %c0_27 = arith.constant 0 : index
    %c1_28 = arith.constant 1 : index
    %c0_29 = arith.constant 0 : index
    %21 = vector.load %arg11[%c0_27, %c1_28, %c0_29] : memref<18x24x8xbf16, #tpu.memory_space<vmem>>, vector<16x16x8xbf16>
    %c0_30 = arith.constant 0 : index
    %c2 = arith.constant 2 : index
    %c0_31 = arith.constant 0 : index
    %22 = vector.load %arg11[%c0_30, %c2, %c0_31] : memref<18x24x8xbf16, #tpu.memory_space<vmem>>, vector<16x16x8xbf16>
    %23 = tpu.concatenate %20, %21, %22 in 2 : vector<16x16x8xbf16>, vector<16x16x8xbf16>, vector<16x16x8xbf16> -> vector<16x16x24xbf16>
    %24 = vector.shape_cast %23 : vector<16x16x24xbf16> to vector<256x24xbf16>
    %c0_32 = arith.constant 0 : index
    %c0_33 = arith.constant 0 : index
    %c0_34 = arith.constant 0 : index
    %25 = vector.load %arg4[%c0_32, %c0_33, %c0_34] : memref<3x24x8xbf16, #tpu.memory_space<vmem>>, vector<1x24x8xbf16>
    %26 = vector.shape_cast %25 : vector<1x24x8xbf16> to vector<24x8xbf16>
    %cst_35 = arith.constant dense<0.000000e+00> : vector<256x8xf32>
    %27 = tpu.matmul %24, %26, %cst_35 {dimension_numbers = #tpu.dot_dimension_numbers<[1], [0], [0], [1], [0, 0, 1, 1], [], []>} : vector<256x24xbf16>, vector<24x8xbf16>, vector<256x8xf32> -> vector<256x8xf32>
    %28 = arith.addf %19, %27 : vector<256x8xf32>
    %c1_36 = arith.constant 1 : index
    %c0_37 = arith.constant 0 : index
    %c0_38 = arith.constant 0 : index
    %29 = vector.load %arg11[%c1_36, %c0_37, %c0_38] : memref<18x24x8xbf16, #tpu.memory_space<vmem>>, vector<16x16x8xbf16>
    %c1_39 = arith.constant 1 : index
    %c1_40 = arith.constant 1 : index
    %c0_41 = arith.constant 0 : index
    %30 = vector.load %arg11[%c1_39, %c1_40, %c0_41] : memref<18x24x8xbf16, #tpu.memory_space<vmem>>, vector<16x16x8xbf16>
    %c1_42 = arith.constant 1 : index
    %c2_43 = arith.constant 2 : index
    %c0_44 = arith.constant 0 : index
    %31 = vector.load %arg11[%c1_42, %c2_43, %c0_44] : memref<18x24x8xbf16, #tpu.memory_space<vmem>>, vector<16x16x8xbf16>
    %32 = tpu.concatenate %29, %30, %31 in 2 : vector<16x16x8xbf16>, vector<16x16x8xbf16>, vector<16x16x8xbf16> -> vector<16x16x24xbf16>
    %33 = vector.shape_cast %32 : vector<16x16x24xbf16> to vector<256x24xbf16>
    %c1_45 = arith.constant 1 : index
    %c0_46 = arith.constant 0 : index
    %c0_47 = arith.constant 0 : index
    %34 = vector.load %arg4[%c1_45, %c0_46, %c0_47] : memref<3x24x8xbf16, #tpu.memory_space<vmem>>, vector<1x24x8xbf16>
    %35 = vector.shape_cast %34 : vector<1x24x8xbf16> to vector<24x8xbf16>
    %cst_48 = arith.constant dense<0.000000e+00> : vector<256x8xf32>
    %36 = tpu.matmul %33, %35, %cst_48 {dimension_numbers = #tpu.dot_dimension_numbers<[1], [0], [0], [1], [0, 0, 1, 1], [], []>} : vector<256x24xbf16>, vector<24x8xbf16>, vector<256x8xf32> -> vector<256x8xf32>
    %37 = arith.addf %28, %36 : vector<256x8xf32>
    %c2_49 = arith.constant 2 : index
    %c0_50 = arith.constant 0 : index
    %c0_51 = arith.constant 0 : index
    %38 = vector.load %arg11[%c2_49, %c0_50, %c0_51] : memref<18x24x8xbf16, #tpu.memory_space<vmem>>, vector<16x16x8xbf16>
    %c2_52 = arith.constant 2 : index
    %c1_53 = arith.constant 1 : index
    %c0_54 = arith.constant 0 : index
    %39 = vector.load %arg11[%c2_52, %c1_53, %c0_54] : memref<18x24x8xbf16, #tpu.memory_space<vmem>>, vector<16x16x8xbf16>
    %c2_55 = arith.constant 2 : index
    %c2_56 = arith.constant 2 : index
    %c0_57 = arith.constant 0 : index
    %40 = vector.load %arg11[%c2_55, %c2_56, %c0_57] : memref<18x24x8xbf16, #tpu.memory_space<vmem>>, vector<16x16x8xbf16>
    %41 = tpu.concatenate %38, %39, %40 in 2 : vector<16x16x8xbf16>, vector<16x16x8xbf16>, vector<16x16x8xbf16> -> vector<16x16x24xbf16>
    %42 = vector.shape_cast %41 : vector<16x16x24xbf16> to vector<256x24xbf16>
    %c2_58 = arith.constant 2 : index
    %c0_59 = arith.constant 0 : index
    %c0_60 = arith.constant 0 : index
    %43 = vector.load %arg4[%c2_58, %c0_59, %c0_60] : memref<3x24x8xbf16, #tpu.memory_space<vmem>>, vector<1x24x8xbf16>
    %44 = vector.shape_cast %43 : vector<1x24x8xbf16> to vector<24x8xbf16>
    %cst_61 = arith.constant dense<0.000000e+00> : vector<256x8xf32>
    %45 = tpu.matmul %42, %44, %cst_61 {dimension_numbers = #tpu.dot_dimension_numbers<[1], [0], [0], [1], [0, 0, 1, 1], [], []>} : vector<256x24xbf16>, vector<24x8xbf16>, vector<256x8xf32> -> vector<256x8xf32>
    %46 = arith.addf %37, %45 : vector<256x8xf32>
    %c0_62 = arith.constant 0 : index
    %c0_63 = arith.constant 0 : index
    %47 = vector.load %arg5[%c0_62, %c0_63] : memref<1x8xf32, #tpu.memory_space<vmem>>, vector<1x8xf32>
    %48 = vector.broadcast %47 : vector<1x8xf32> to vector<256x8xf32>
    %49 = arith.addf %46, %48 : vector<256x8xf32>
    %cst_64 = arith.constant 0.000000e+00 : f32
    %50 = vector.broadcast %cst_64 : f32 to vector<256x8xf32>
    %51 = arith.maximumf %49, %50 : vector<256x8xf32>
    %52 = arith.truncf %51 : vector<256x8xf32> to vector<256x8xbf16>
    %c0_65 = arith.constant 0 : index
    %c0_66 = arith.constant 0 : index
    %53 = vector.load %arg6[%c0_65, %c0_66] : memref<8x32xbf16, #tpu.memory_space<vmem>>, vector<8x32xbf16>
    %cst_67 = arith.constant dense<0.000000e+00> : vector<256x32xf32>
    %54 = tpu.matmul %52, %53, %cst_67 {dimension_numbers = #tpu.dot_dimension_numbers<[1], [0], [0], [1], [0, 0, 1, 1], [], []>} : vector<256x8xbf16>, vector<8x32xbf16>, vector<256x32xf32> -> vector<256x32xf32>
    %c0_68 = arith.constant 0 : index
    %c0_69 = arith.constant 0 : index
    %55 = vector.load %arg7[%c0_68, %c0_69] : memref<1x32xf32, #tpu.memory_space<vmem>>, vector<1x32xf32>
    %56 = vector.broadcast %55 : vector<1x32xf32> to vector<256x32xf32>
    %57 = arith.addf %54, %56 : vector<256x32xf32>
    %c0_70 = arith.constant 0 : index
    %c0_71 = arith.constant 0 : index
    %58 = vector.load %arg8[%c0_70, %c0_71] : memref<16x32xbf16, #tpu.memory_space<vmem>>, vector<16x32xbf16>
    %cst_72 = arith.constant dense<0.000000e+00> : vector<256x32xf32>
    %59 = tpu.matmul %2, %58, %cst_72 {dimension_numbers = #tpu.dot_dimension_numbers<[1], [0], [0], [1], [0, 0, 1, 1], [], []>} : vector<256x16xbf16>, vector<16x32xbf16>, vector<256x32xf32> -> vector<256x32xf32>
    %60 = arith.addf %57, %59 : vector<256x32xf32>
    %c0_73 = arith.constant 0 : index
    %c0_74 = arith.constant 0 : index
    %61 = vector.load %arg9[%c0_73, %c0_74] : memref<1x32xf32, #tpu.memory_space<vmem>>, vector<1x32xf32>
    %62 = vector.broadcast %61 : vector<1x32xf32> to vector<256x32xf32>
    %63 = arith.addf %60, %62 : vector<256x32xf32>
    %cst_75 = arith.constant 0.000000e+00 : f32
    %64 = vector.broadcast %cst_75 : f32 to vector<256x32xf32>
    %65 = arith.maximumf %63, %64 : vector<256x32xf32>
    %c0_76 = arith.constant 0 : index
    %c0_77 = arith.constant 0 : index
    %c0_78 = arith.constant 0 : index
    %66 = vector.load %arg10[%c0_76, %c0_77, %c0_78] : memref<1x256x32xf32, #tpu.memory_space<vmem>>, vector<1x256x32xf32>
    %67 = vector.shape_cast %66 : vector<1x256x32xf32> to vector<256x32xf32>
    %68 = vector.shape_cast %65 : vector<256x32xf32> to vector<1x256x32xf32>
    tpu.vector_store %arg10[%c0_76, %c0_77, %c0_78], %68 {strides = array<i32>} : memref<1x256x32xf32, #tpu.memory_space<vmem>>, vector<1x256x32xf32>,
    return
  }
  func.func @transform_0(%arg0: i32) -> (i32, i32, i32, i32) {
    %c0_i32 = arith.constant 0 : i32
    %c0_i32_0 = arith.constant 0 : i32
    %c0_i32_1 = arith.constant 0 : i32
    %c0_i32_2 = arith.constant 0 : i32
    return %arg0, %c0_i32, %c0_i32_0, %c0_i32_1 : i32, i32, i32, i32
  }
  func.func @transform_1(%arg0: i32) -> (i32, i32) {
    %c0_i32 = arith.constant 0 : i32
    %c0_i32_0 = arith.constant 0 : i32
    %c0_i32_1 = arith.constant 0 : i32
    return %c0_i32, %c0_i32_0 : i32, i32
  }
  func.func @transform_2(%arg0: i32) -> (i32, i32) {
    %c0_i32 = arith.constant 0 : i32
    %c0_i32_0 = arith.constant 0 : i32
    %c0_i32_1 = arith.constant 0 : i32
    return %c0_i32, %c0_i32_0 : i32, i32
  }
  func.func @transform_3(%arg0: i32) -> (i32, i32, i32) {
    %c0_i32 = arith.constant 0 : i32
    %c0_i32_0 = arith.constant 0 : i32
    %c0_i32_1 = arith.constant 0 : i32
    %c0_i32_2 = arith.constant 0 : i32
    return %c0_i32, %c0_i32_0, %c0_i32_1 : i32, i32, i32
  }
  func.func @transform_4(%arg0: i32) -> (i32, i32) {
    %c0_i32 = arith.constant 0 : i32
    %c0_i32_0 = arith.constant 0 : i32
    %c0_i32_1 = arith.constant 0 : i32
    return %c0_i32, %c0_i32_0 : i32, i32
  }
  func.func @transform_5(%arg0: i32) -> (i32, i32) {
    %c0_i32 = arith.constant 0 : i32
    %c0_i32_0 = arith.constant 0 : i32
    %c0_i32_1 = arith.constant 0 : i32
    return %c0_i32, %c0_i32_0 : i32, i32
  }
  func.func @transform_6(%arg0: i32) -> (i32, i32) {
    %c0_i32 = arith.constant 0 : i32
    %c0_i32_0 = arith.constant 0 : i32
    %c0_i32_1 = arith.constant 0 : i32
    return %c0_i32, %c0_i32_0 : i32, i32
  }
  func.func @transform_7(%arg0: i32) -> (i32, i32) {
    %c0_i32 = arith.constant 0 : i32
    %c0_i32_0 = arith.constant 0 : i32
    %c0_i32_1 = arith.constant 0 : i32
    return %c0_i32, %c0_i32_0 : i32, i32
  }
  func.func @transform_8(%arg0: i32) -> (i32, i32) {
    %c0_i32 = arith.constant 0 : i32
    %c0_i32_0 = arith.constant 0 : i32
    %c0_i32_1 = arith.constant 0 : i32
    return %c0_i32, %c0_i32_0 : i32, i32
  }
  func.func @transform_9(%arg0: i32) -> (i32, i32, i32) {
    %c0_i32 = arith.constant 0 : i32
    %c0_i32_0 = arith.constant 0 : i32
    %c0_i32_1 = arith.constant 0 : i32
    return %arg0, %c0_i32, %c0_i32_0 : i32, i32, i32
  }
}

</mosaic_0001>

<bundles_post_ra>
// kernel: tpu_custom_call.1
= control target key start
LH: loop header
LB: loop body
LE: loop exit
PB: predicated region body
PF: predicated region fallthrough
CT: control target
= control target key end

     0   :  { %14 = vsyncpa [#allocation4], 0  ;;  %s7317_s0 = inlined_call_operand.hbm [shape: bf16[2,16,16,16], index: 0, kind: input, shape index: {}]   ;;  %s7318_s1 = inlined_call_operand.vmem [shape: bf16[16,8], index: 1, kind: input, shape index: {}]   ;;  %s7319_s2 = inlined_call_operand.vmem [shape: f32[1,8], index: 2, kind: input, shape index: {}]   ;;  %s7320_s3 = inlined_call_operand.vmem [shape: bf16[3,24,8], index: 3, kind: input, shape index: {}]   ;;  %s7321_s4 = inlined_call_operand.vmem [shape: f32[1,8], index: 4, kind: input, shape index: {}]   ;;  %s7322_s5 = inlined_call_operand.vmem [shape: bf16[8,32], index: 5, kind: input, shape index: {}]   ;;  %s7323_s6 = inlined_call_operand.vmem [shape: f32[1,32], index: 6, kind: input, shape index: {}]   ;;  %s7324_s7 = inlined_call_operand.vmem [shape: bf16[16,32], index: 7, kind: input, shape index: {}]   ;;  %s7325_s8 = inlined_call_operand.vmem [shape: f32[1,32], index: 8, kind: input, shape index: {}]   ;;  %s7326_s9 = inlined_call_operand.vmem [shape: f32[2,256,32], index: 9, kind: output, shape index: {}]  }
   0x1   :  { %16 = vsyncpa [#allocation4 + $0x1], 0  ;;  %s5674_s30 = smov 0   ;;  %s5676_s10 = smov 0  }
   0x2   :  { %s5678_s11 = smov 0   ;;  %s5680_s12 = smov 0  }
   0x3 LB: > { %s5693_s13 = sadd.s32 4294967295, %s5616_s12   ;;  %s5696_s14 = sadd.s32 1, %s5616_s12   ;;  %s5616_s12 = sphi %s5680_s12, %s7350_s12   ;;  %s5612_s11 = sphi %s5678_s11, %s7349_s11   ;;  %s5608_s10 = sphi %s5676_s10, %s7348_s10   ;;  %s5604_s30 = sphi %s5674_s30, %s7347_s30  }
   0x4   : > { %s26_s15 = ssub.s32 %s5616_s12, %s5696_s14  ;;  %s29_s16 = sadd.s32 1, %s5612_s11 }
   0x5   : > { %p27_p0 = scmp.eq.s32.totalorder %s26_s15, 0  ;;  %p36_p1 = scmp.ne.s32.totalorder %s5612_s11, %s5608_s10 }
   0x6   : > { %p37_p2 = scmp.eq.s32.totalorder %s5616_s12, 0  ;;  %p42_p3 = scmp.ne.s32.totalorder %s5608_s10, %s5604_s30 }
   0x7   : > { %s5706_s17 = scalar_select %p27_p0, %s5612_s11, %s29_s16  }
   0x8   : > { %p38_p4 = por %p37_p2, %p36_p1  ;;  %p43_p5 = scmp.eq.s32.totalorder %s5693_s13, 0 }
   0x9   : > { %p5337_p6 = scmp.lt.s32.totalorder %s5616_s12, 2  ;;  %s284_s19 = sand.u32 1, %s5612_s11  }
   0xa   : > { %p5710_p7 = por %p43_p5, %p42_p3  ;;  %s4535_s20 = sshll.u32 %s284_s19, 7 }
   0xb   : > { %s4850_s21 = sshll.u32 %s5616_s12, 11  ;;  %s288_s25 = scalar_lea.vmem [#allocation3], %s4535_s20 }
   0xc   : > { %s5719_s24 = scalar_lea.hbm %s7317_s0, %s4850_s21  ;;  %s295_s26 = sshll.u32 %s288_s25, 4  ;;  %s5721_s26 = int_to_ptr.vmem [resolvable:$true] %s295_s26 }
   0xd   : > { %p5723_p8 = pnand %p5337_p6, %p38_p4  ;;  %s5728_s28 = scalar_lea.sflag [#allocation4], %s284_s19 }
   0xe   : > { %s5552_s29 = scalar_lea.hbm %s5719_s24, 2048  ;;  %s5557_s16 = scalar_lea.hbm %s7317_s0, 4096 }
   0xf   : > { %p5553_p10 = scmp.ne.s32.totalorder %s5719_s24, %s5552_s29  ;;  %p5554_p11 = pneg %p5723_p8 }
  0x10   : > { %p5558_p0 = scmp.lt.u32.totalorder %s5719_s24, %s7317_s0  ;;  %p5559_p1 = scmp.lt.u32.totalorder %s5557_s16, %s5552_s29 }
  0x11   : > { %p5555_p12 = pnand %p5554_p11, %p5553_p10  ;;  %p5561_p3 = scmp.lt.u32.totalorder %s5552_s29, %s5719_s24 }
  0x12   : > { %p5560_p2 = por %p5559_p1, %p5558_p0 }
  0x13   : > { %p5556_p13 = pneg %p5555_p12 }
  0x14   : > { %p5562_p4 = por %p5561_p3, %p5560_p2 }
  0x16   : > { %p5563_p5 = pnand %p5562_p4, %p5556_p13 }
  0x18   : > { %5566 = shalt.err (!%p5563_p5)
}
  0x19   : > { %s5567_s19 = scalar_lea.vmem %s5721_s26, 2048  ;;  %s5618_s22 = smov [#allocation3]  }
  0x1a   : > { %p5568_p6 = scmp.ne.s32.totalorder %s5721_s26, %s5567_s19  ;;  %s5572_s23 = sshll.u32 %s5618_s22, 4  ;;  %s5573_s23 = int_to_ptr.vmem [resolvable:$false] %s5572_s23 }
  0x1b   : > { %s5574_s25 = scalar_lea.vmem %s5573_s23, 4096  ;;  %p5575_p9 = scmp.lt.s32.totalorder %s5721_s26, %s5573_s23 }
  0x1c   : > { %p5570_p10 = pnand %p5568_p6, %p5554_p11  ;;  %p5576_p0 = scmp.lt.s32.totalorder %s5574_s25, %s5567_s19 }
  0x1e   : > { %p5571_p12 = pneg %p5570_p10  ;;  %p5577_p1 = por %p5576_p0, %p5575_p9 }
  0x20   : > { %p5578_p2 = pnand %p5577_p1, %p5571_p12 }
  0x22   : > { %5581 = shalt.err (!%p5578_p2)
}
  0x23   : > { %s5619_s29 = smov 64   ;;  %s5620_s30 = smov 4  }
  0x24   : > { %5336 = dma.hbm_to_vmem [thread:$0]  (!%p5723_p8), %s5719_s24, 2048, %s5721_s26, %s5728_s28, %s5619_s29, %s5619_s29, %s5620_s30  }
  0x25   : > { %p303_p11 = scmp.lt.s32.totalorder %s5616_s12, 3  ;;  %p7332_p13 = scmp.ge.s32.totalorder %s5616_s12, 1 }
  0x27   : > { %p304_p3 = pnand %p7332_p13, %p303_p11 }
  0x29   : > { %307 = sbr.rel (%p304_p3) target bundleno = 1162 (0x48a), region = 56 }
  0x30   : > { %s309_s15 = sand.u32 1, %s5608_s10  }
  0x31   : > { %s4539_s16 = sshll.u32 %s309_s15, 7  ;;  %s310_s20 = scalar_lea.sflag [#allocation4], %s309_s15 }
  0x32   : > { %s5760_s21 = scalar_lea.vmem [#allocation3], %s4539_s16 }
  0x33   : > { %5599 = dma.done.wait (%p5710_p7), %s310_s20, 2048  }
  0x34   : > { %5601 = vsyncadd (%p5710_p7), %s310_s20, 4294965248  ;;  %v5375_v0 = vld [vmem:[%s7318_s1] sm:$0xff]   ;;  %vm481_vm0 = vcmask 130048   ;;  %v5376_v1 = vld [vmem:[%s5760_s21] sm:$0xff]   ;;  %vm732_vm1 = vcmask 57344   ;;  %vm723_vm6 = vcmask 60416  }
  0x35   : > { %4989 = vmatprep.subr.bf16.mxu0 %v5375_v0  ;;  %v5377_v2 = vld [vmem:[%s5760_s21 + $0x8] sm:$0xff]   ;;  %4991 = vmatprep.mubr.msk.bf16.mxu0 %vm481_vm0, %v5376_v1  ;;  %v5378_v3 = vld [vmem:[%s5760_s21 + $0x10] sm:$0xff]   ;;  %v5379_v4 = vld [vmem:[%s5760_s21 + $0x18] sm:$0xff]   ;;  %vm733_vm2 = vsmask.f32 256  ;;  %vm1830_vm10 = vcmask 1046528  }
  0x36   : > { %4990 = vmatpush3.bf16.msra.mxu0 %v5375_v0  ;;  %v5380_v5 = vld [vmem:[%s5760_s21 + $0x20] sm:$0xff]   ;;  %v5381_v6 = vld [vmem:[%s5760_s21 + $0x28] sm:$0xff]   ;;  %v5382_v7 = vld [vmem:[%s5760_s21 + $0x30] sm:$0xff]   ;;  %vm783_vm4 = vsmask.f32 7938  ;;  %s5622_s24 = smov 16  }
  0x37   : > { %v5383_v8 = vld [vmem:[%s5760_s21 + $0x38] sm:$0xff]   ;;  %v5384_v9 = vld [vmem:[%s5760_s21 + $0x40] sm:$0xff]   ;;  %v5385_v10 = vld [vmem:[%s5760_s21 + $0x48] sm:$0xff]   ;;  %vm929_vm7 = vsmask.f32 4368  ;;  %s5623_s26 = smov 8  }
  0x38   : > { %v5386_v11 = vld [vmem:[%s5760_s21 + $0x50] sm:$0xff]   ;;  %v5387_v12 = vld [vmem:[%s5760_s21 + $0x58] sm:$0xff]   ;;  %v5388_v13 = vld [vmem:[%s5760_s21 + $0x60] sm:$0xff]   ;;  %vm1557_vm11 = vsmask.f32 7424  ;;  %vm1911_vm12 = vcmask 64512  }
  0x39   : > { %4992 = vmatmul.mubr.msk.bf16.vlgmr.msra.gmra.mrb[0].mxu0 %vm481_vm0, %v5377_v2  ;;  %v5389_v14 = vld [vmem:[%s5760_s21 + $0x68] sm:$0xff]   ;;  %v5390_v15 = vld [vmem:[%s5760_s21 + $0x70] sm:$0xff]   ;;  %v5391_v16 = vld [vmem:[%s5760_s21 + $0x78] sm:$0xff]   ;;  %vm2633_vm13 = vcmask 1043456   ;;  %vm2600_vm14 = vcmask 195584   ;;  %p348_p7 = scmp.lt.s32.totalorder %s5693_s13, 1 }
  0x3a   : > { %4995 = vmatprep.mubr.msk.bf16.mxu0 %vm481_vm0, %v5378_v3  ;;  %vm5802_vm3 = vmand %vm732_vm1, %vm733_vm2  ;;  %v738_v18 = vld [vmem:[#allocation2 + $0x18] sm:$0x1]  ;;  %v735_v21 = vld [vmem:[#allocation2 + $0xc] sm:$0x1]  ;;  %vm4432_vm15 = vcmask 261120  }
  0x3b   : > { %v739_v19 = vsel %vm5802_vm3, 0, %v738_v18  ;;  %vm5809_vm5 = vmand %vm732_vm1, %vm783_vm4  ;;  %v736_v22 = vsel %vm5802_vm3, 0, %v735_v21  ;;  %v788_v23 = vld [vmem:[#allocation2 + $0x20] sm:$0x1]  ;;  %v785_v25 = vld [vmem:[#allocation2 + $0x14] sm:$0x1] }
  0x3c   : > { %740 = vst [vmem:[#allocation2 + $0x18] sm:$0x1] %v739_v19  ;;  %737 = vst [vmem:[#allocation2 + $0xc] sm:$0x1] %v736_v22  ;;  %v789_v24 = vsel %vm5809_vm5, 0, %v788_v23  ;;  %v786_v26 = vsel %vm5809_vm5, 0, %v785_v25 }
  0x3d   : > { %790 = vst [vmem:[#allocation2 + $0x20] sm:$0x1] %v789_v24  ;;  %787 = vst [vmem:[#allocation2 + $0x14] sm:$0x1] %v786_v26  ;;  %v744_v27 = vld [vmem:[#allocation2 + $0x30] sm:$0x1] }
  0x3e   : > { %v745_v28 = vsel %vm5802_vm3, 0, %v744_v27  ;;  %v741_v29 = vld [vmem:[#allocation2 + $0x24] sm:$0x1]  ;;  %v794_v31 = vld [vmem:[#allocation2 + $0x38] sm:$0x1]  ;;  %vm5887_vm8 = vmand %vm723_vm6, %vm783_vm4  ;;  %s7352_s13 = smov (!%p348_p7, %s5693_s13), 1 }
  0x3f   : > { %746 = vst [vmem:[#allocation2 + $0x30] sm:$0x1] %v745_v28  ;;  %v742_v30 = vsel %vm5802_vm3, 0, %v741_v29  ;;  %v795_v32 = vsel %vm5809_vm5, 0, %v794_v31  ;;  %v791_v33 = vld [vmem:[#allocation2 + $0x2c] sm:$0x1]  ;;  %vm5894_vm9 = vmor %vm733_vm2, %vm929_vm7 }
  0x40   : > { %743 = vst [vmem:[#allocation2 + $0x24] sm:$0x1] %v742_v30  ;;  %796 = vst [vmem:[#allocation2 + $0x38] sm:$0x1] %v795_v32  ;;  %v792_v34 = vsel %vm5809_vm5, 0, %v791_v33  ;;  %s4851_s19 = sshll.u32 %s7352_s13, 8 }
  0x41   : > { %4996 = vmatmul.mubr.msk.bf16.gmra.mrb[4].mxu0 %vm481_vm0, %v5379_v4  ;;  %793 = vst [vmem:[#allocation2 + $0x2c] sm:$0x1] %v792_v34  ;;  %v750_v35 = vld [vmem:[#allocation2 + $0x48] sm:$0x1]  ;;  %v747_v37 = vld [vmem:[#allocation2 + $0x3c] sm:$0x1]  ;;  %s7178_s12 = scalar_lea.vmem %s7326_s9, %s4851_s19 }
  0x42   : > { %4999 = vmatprep.mubr.msk.bf16.mxu0 %vm481_vm0, %v5380_v5  ;;  %v751_v36 = vsel %vm5802_vm3, 0, %v750_v35  ;;  %v748_v38 = vsel %vm5802_vm3, 0, %v747_v37  ;;  %v800_v39 = vld [vmem:[#allocation2 + $0x50] sm:$0x1]  ;;  %v797_v41 = vld [vmem:[#allocation2 + $0x44] sm:$0x1] }
  0x43   : > { %752 = vst [vmem:[#allocation2 + $0x48] sm:$0x1] %v751_v36  ;;  %749 = vst [vmem:[#allocation2 + $0x3c] sm:$0x1] %v748_v38  ;;  %v801_v40 = vsel %vm5809_vm5, 0, %v800_v39  ;;  %v798_v42 = vsel %vm5809_vm5, 0, %v797_v41 }
  0x44   : > { %802 = vst [vmem:[#allocation2 + $0x50] sm:$0x1] %v801_v40  ;;  %799 = vst [vmem:[#allocation2 + $0x44] sm:$0x1] %v798_v42  ;;  %v756_v43 = vld [vmem:[#allocation2 + $0x60] sm:$0x1] }
  0x45   : > { %v757_v44 = vsel %vm5802_vm3, 0, %v756_v43  ;;  %v753_v45 = vld [vmem:[#allocation2 + $0x54] sm:$0x1]  ;;  %v806_v47 = vld [vmem:[#allocation2 + $0x68] sm:$0x1] }
  0x46   : > { %758 = vst [vmem:[#allocation2 + $0x60] sm:$0x1] %v757_v44  ;;  %v754_v46 = vsel %vm5802_vm3, 0, %v753_v45  ;;  %v807_v48 = vsel %vm5809_vm5, 0, %v806_v47  ;;  %v803_v49 = vld [vmem:[#allocation2 + $0x5c] sm:$0x1] }
  0x47   : > { %755 = vst [vmem:[#allocation2 + $0x54] sm:$0x1] %v754_v46  ;;  %808 = vst [vmem:[#allocation2 + $0x68] sm:$0x1] %v807_v48  ;;  %v804_v50 = vsel %vm5809_vm5, 0, %v803_v49 }
  0x48   : > { %805 = vst [vmem:[#allocation2 + $0x5c] sm:$0x1] %v804_v50  ;;  %v762_v51 = vld [vmem:[#allocation2 + $0x78] sm:$0x1]  ;;  %v759_v53 = vld [vmem:[#allocation2 + $0x6c] sm:$0x1] }
  0x49   : > { %5000 = vmatmul.mubr.msk.bf16.gmra.mrb[8].mxu0 %vm481_vm0, %v5381_v6  ;;  %v763_v52 = vsel %vm5802_vm3, 0, %v762_v51  ;;  %v760_v54 = vsel %vm5802_vm3, 0, %v759_v53  ;;  %v812_v55 = vld [vmem:[#allocation2 + $0x80] sm:$0x1]  ;;  %v809_v57 = vld [vmem:[#allocation2 + $0x74] sm:$0x1] }
  0x4a   : > { %5003 = vmatprep.mubr.msk.bf16.mxu0 %vm481_vm0, %v5382_v7  ;;  %764 = vst [vmem:[#allocation2 + $0x78] sm:$0x1] %v763_v52  ;;  %761 = vst [vmem:[#allocation2 + $0x6c] sm:$0x1] %v760_v54  ;;  %v813_v56 = vsel %vm5809_vm5, 0, %v812_v55  ;;  %v810_v58 = vsel %vm5809_vm5, 0, %v809_v57 }
  0x4b   : > { %814 = vst [vmem:[#allocation2 + $0x80] sm:$0x1] %v813_v56  ;;  %811 = vst [vmem:[#allocation2 + $0x74] sm:$0x1] %v810_v58  ;;  %v768_v59 = vld [vmem:[#allocation2 + $0x90] sm:$0x1] }
  0x4c   : > { %v769_v60 = vsel %vm5802_vm3, 0, %v768_v59  ;;  %v765_v61 = vld [vmem:[#allocation2 + $0x84] sm:$0x1]  ;;  %v818_v62 = vld [vmem:[#allocation2 + $0x98] sm:$0x1] }
  0x4d   : > { %770 = vst [vmem:[#allocation2 + $0x90] sm:$0x1] %v769_v60  ;;  %v766_v63 = vsel %vm5802_vm3, 0, %v765_v61  ;;  %v819_v0 = vsel %vm5809_vm5, 0, %v818_v62  ;;  %v815_v1 = vld [vmem:[#allocation2 + $0x8c] sm:$0x1] }
  0x4e   : > { %767 = vst [vmem:[#allocation2 + $0x84] sm:$0x1] %v766_v63  ;;  %820 = vst [vmem:[#allocation2 + $0x98] sm:$0x1] %v819_v0  ;;  %v816_v2 = vsel %vm5809_vm5, 0, %v815_v1 }
  0x4f   : > { %817 = vst [vmem:[#allocation2 + $0x8c] sm:$0x1] %v816_v2  ;;  %v774_v3 = vld [vmem:[#allocation2 + $0xa8] sm:$0x1]  ;;  %v771_v5 = vld [vmem:[#allocation2 + $0x9c] sm:$0x1] }
  0x50   : > { %v775_v4 = vsel %vm5802_vm3, 0, %v774_v3  ;;  %v772_v6 = vsel %vm5802_vm3, 0, %v771_v5  ;;  %v824_v7 = vld [vmem:[#allocation2 + $0xb0] sm:$0x1]  ;;  %v827_v18 = vld [vmem:[#allocation2 + $0xbc] sm:$0x1] }
  0x51   : > { %5004 = vmatmul.mubr.msk.bf16.gmra.mrb[12].mxu0 %vm481_vm0, %v5383_v8  ;;  %776 = vst [vmem:[#allocation2 + $0xa8] sm:$0x1] %v775_v4  ;;  %773 = vst [vmem:[#allocation2 + $0x9c] sm:$0x1] %v772_v6  ;;  %v825_v8 = vsel %vm5809_vm5, 0, %v824_v7  ;;  %v828_v19 = vsel %vm5809_vm5, 0, %v827_v18 }
  0x52   : > { %5007 = vmatprep.mubr.msk.bf16.mxu0 %vm481_vm0, %v5384_v9  ;;  %826 = vst [vmem:[#allocation2 + $0xb0] sm:$0x1] %v825_v8  ;;  %v821_v9 = vld [vmem:[#allocation2 + $0xa4] sm:$0x1]  ;;  %829 = vst [vmem:[#allocation2 + $0xbc] sm:$0x1] %v828_v19 }
  0x53   : > { %v5878_v21 = vld [vmem:[%s7319_s2] ss:$0 sm:$0xff]  ;;  %v1260_v48 = vld [vmem:[#allocation2 + $0x18] sm:$0xf]  ;;  %v1253_v56 = vld [vmem:[#allocation2 + $0xc] sm:$0xf] }
  0x54   : > { %v1264_v63 = vld [vmem:[#allocation2 + $0x20] sm:$0x1]  ;;  %v1257_v5 = vld [vmem:[#allocation2 + $0x14] sm:$0x1] }
  0x59   : > { %5008 = vmatmul.mubr.msk.bf16.gmra.mrb[16].mxu0 %vm481_vm0, %v5385_v10  ;;  %v822_v10 = vsel %vm5809_vm5, 0, %v821_v9 }
  0x5a   : > { %5011 = vmatprep.mubr.msk.bf16.mxu0 %vm481_vm0, %v5386_v11  ;;  %823 = vst [vmem:[#allocation2 + $0xa4] sm:$0x1] %v822_v10  ;;  %v780_v11 = vld [vmem:[#allocation2 + $0xc0] sm:$0x1] }
  0x61   : > { %5012 = vmatmul.mubr.msk.bf16.gmra.mrb[20].mxu0 %vm481_vm0, %v5387_v12  ;;  %v781_v12 = vsel %vm5802_vm3, 0, %v780_v11 }
  0x62   : > { %5015 = vmatprep.mubr.msk.bf16.mxu0 %vm481_vm0, %v5388_v13  ;;  %782 = vst [vmem:[#allocation2 + $0xc0] sm:$0x1] %v781_v12  ;;  %v777_v13 = vld [vmem:[#allocation2 + $0xb4] sm:$0x1] }
  0x69   : > { %5016 = vmatmul.mubr.msk.bf16.gmra.mrb[24].mxu0 %vm481_vm0, %v5389_v14  ;;  %v778_v14 = vsel %vm5802_vm3, 0, %v777_v13 }
  0x6a   : > { %5019 = vmatprep.mubr.msk.bf16.mxu0 %vm481_vm0, %v5390_v15  ;;  %v830_v15 = vld [vmem:[#allocation2 + $0xc8] sm:$0x1]  ;;  %779 = vst [vmem:[#allocation2 + $0xb4] sm:$0x1] %v778_v14 }
  0x71   : > { %5020 = vmatmul.mubr.msk.bf16.gmra.mrb[28].mxu0 %vm481_vm0, %v5391_v16  ;;  %v831_v16 = vsel %vm5809_vm5, 0, %v830_v15 }
  0x72   : > { %832 = vst [vmem:[#allocation2 + $0xc8] sm:$0x1] %v831_v16 }
 0x10c   : > { %v4993_v22 = vpop.f32.mrb[0].mxu0 }
 0x10d   : > { %v573_v23 = vadd.f32 %v4993_v22, %v5878_v21  ;;  %v564_v24 = vpop.f32.mrb[1].mxu0 }
 0x10e   : > { %v565_v25 = vadd.f32 %v5878_v21, %v564_v24  ;;  %v4994_v26 = vpop.f32.mrb[2].mxu0 }
 0x10f   : > { %v693_v27 = vmax.f32 %v573_v23, 0.0  ;;  %v576_v28 = vadd.f32 %v4994_v26, %v5878_v21  ;;  %v567_v29 = vpop.f32.mrb[3].mxu0 }
 0x110   : > { %v691_v30 = vmax.f32 %v565_v25, 0.0  ;;  %v568_v20 = vadd.f32 %v5878_v21, %v567_v29 }
 0x111   : > { %v4854_v31 = vpack.c.bf16 %v693_v27, %v693_v27  ;;  %v694_v32 = vmax.f32 %v576_v28, 0.0  ;;  %v1274_v27 = vld [vmem:[#allocation2 + $0x30] sm:$0xf] }
 0x112   : > { %v4852_v33 = vpack.c.bf16 %v691_v30, %v691_v30  ;;  %v692_v34 = vmax.f32 %v568_v20, 0.0 }
 0x113   : > { %v949_v35 = vshrl.u32 %v4854_v31, 16  ;;  %v4855_v36 = vpack.c.bf16 %v694_v32, %v694_v32  ;;  %v952_v37 = vshll.u32 %v4854_v31, 16 }
 0x114   : > { %v932_v38 = vshrl.u32 %v4852_v33, 16  ;;  %v935_v39 = vshll.u32 %v4852_v33, 16  ;;  %v4853_v40 = vpack.c.bf16 %v692_v34, %v692_v34  ;;  %v4997_v41 = vpop.f32.mrb[4].mxu0  ;;  %v1267_v33 = vld [vmem:[#allocation2 + $0x24] sm:$0xf] }
 0x115   : > { %v951_v42 = vrot.slane %v949_v35, 7  ;;  %v957_v43 = vshrl.u32 %v4855_v36, 16  ;;  %v960_v44 = vshll.u32 %v4855_v36, 16  ;;  %v589_v45 = vadd.f32 %v4997_v41, %v5878_v21  ;;  %v580_v46 = vpop.f32.mrb[5].mxu0 }
 0x116   : > { %v934_v49 = vrot.slane %v932_v38, 7  ;;  %v940_v50 = vshrl.u32 %v4853_v40, 16  ;;  %v943_v51 = vshll.u32 %v4853_v40, 16  ;;  %v581_v52 = vadd.f32 %v5878_v21, %v580_v46  ;;  %v4998_v53 = vpop.f32.mrb[6].mxu0 }
 0x117   : > { %v954_v54 = vor.u32 %v952_v37, %v951_v42  ;;  %v955_v55 = vrot.slane %v951_v42, 4  ;;  %v959_v57 = vrot.slane %v957_v43, 7  ;;  %v697_v58 = vmax.f32 %v589_v45, 0.0  ;;  %v583_v59 = vpop.f32.mrb[7].mxu0 }
 0x118   : > { %v937_v60 = vor.u32 %v935_v39, %v934_v49  ;;  %v938_v61 = vrot.slane %v934_v49, 4  ;;  %v942_v0 = vrot.slane %v940_v50, 7  ;;  %v695_v1 = vmax.f32 %v581_v52, 0.0 }
 0x119   : > { %v1261_v2 = vsel %vm5887_vm8, %v954_v54, %v1260_v48  ;;  %v962_v3 = vor.u32 %v960_v44, %v959_v57  ;;  %v964_v4 = vrot.slane %v959_v57, 4  ;;  %v4858_v6 = vpack.c.bf16 %v697_v58, %v697_v58 }
 0x11a   : > { %1262 = vst [vmem:[#allocation2 + $0x18] sm:$0xf] %v1261_v2  ;;  %v1254_v7 = vsel %vm5887_vm8, %v937_v60, %v1253_v56  ;;  %v945_v8 = vor.u32 %v943_v51, %v942_v0  ;;  %v947_v9 = vrot.slane %v942_v0, 4  ;;  %v4856_v10 = vpack.c.bf16 %v695_v1, %v695_v1  ;;  %v1271_v56 = vld [vmem:[#allocation2 + $0x2c] sm:$0x1] }
 0x11b   : > { %1255 = vst [vmem:[#allocation2 + $0xc] sm:$0xf] %v1254_v7  ;;  %v963_v11 = vsel %vm5894_vm9, %v955_v55, %v962_v3  ;;  %v1265_v12 = vsel %vm5802_vm3, %v964_v4, %v1264_v63  ;;  %v983_v13 = vshrl.u32 %v4858_v6, 16  ;;  %v986_v16 = vshll.u32 %v4858_v6, 16  ;;  %v1278_v55 = vld [vmem:[#allocation2 + $0x38] sm:$0x1] }
 0x11c   : > { %1263 = vst.msk [vmem:[#allocation2 + $0x1c] sm:$0xf] %vm723_vm6, %v963_v11  ;;  %1266 = vst [vmem:[#allocation2 + $0x20] sm:$0x1] %v1265_v12  ;;  %v946_v14 = vsel %vm5894_vm9, %v938_v61, %v945_v8  ;;  %v1258_v15 = vsel %vm5802_vm3, %v947_v9, %v1257_v5  ;;  %v966_v18 = vshrl.u32 %v4856_v10, 16  ;;  %v5001_v19 = vpop.f32.mrb[8].mxu0  ;;  %v592_v23 = vadd.f32 %v4998_v53, %v5878_v21 }
 0x11d   : > { %1256 = vst.msk [vmem:[#allocation2 + $0x10] sm:$0xf] %vm723_vm6, %v946_v14  ;;  %1259 = vst [vmem:[#allocation2 + $0x14] sm:$0x1] %v1258_v15  ;;  %v5912_v22 = vrot.slane %v983_v13, 7  ;;  %v584_v24 = vadd.f32 %v5878_v21, %v583_v59  ;;  %v605_v25 = vadd.f32 %v5001_v19, %v5878_v21  ;;  %v596_v26 = vpop.f32.mrb[9].mxu0 }
 0x11e   : > { %v5917_v28 = vrot.slane %v966_v18, 7  ;;  %v969_v29 = vshll.u32 %v4856_v10, 16  ;;  %v597_v30 = vadd.f32 %v5878_v21, %v596_v26  ;;  %v5002_v20 = vpop.f32.mrb[10].mxu0  ;;  %v698_v34 = vmax.f32 %v592_v23, 0.0  ;;  %v1288_v1 = vld [vmem:[#allocation2 + $0x48] sm:$0xf] }
 0x11f   : > { %v988_v31 = vor.u32 %v986_v16, %v5912_v22  ;;  %v989_v32 = vrot.slane %v5912_v22, 4  ;;  %v696_v35 = vmax.f32 %v584_v24, 0.0  ;;  %v599_v36 = vpop.f32.mrb[11].mxu0  ;;  %v5621_v37 = vmov 0   ;;  %v1281_v7 = vld [vmem:[#allocation2 + $0x3c] sm:$0xf] }
 0x120   : > { %724 = vst.msk [vmem:[#allocation2] sm:$0xf] %vm723_vm6, %v5621_v37  ;;  %725 = vst.msk [vmem:[#allocation2 + $0x4] sm:$0xf] %vm723_vm6, %v5621_v37  ;;  %v971_v38 = vor.u32 %v969_v29, %v5917_v28  ;;  %v972_v39 = vrot.slane %v5917_v28, 4  ;;  %v701_v40 = vmax.f32 %v605_v25, 0.0  ;;  %v4859_v43 = vpack.c.bf16 %v698_v34, %v698_v34 }
 0x121   : > { %726 = vst.msk [vmem:[#allocation2 + $0x8] sm:$0xf] %vm723_vm6, %v5621_v37  ;;  %728 = vst.msk [vmem:[#allocation2 + $0xcc] sm:$0xf] %vm723_vm6, %v5621_v37  ;;  %v699_v41 = vmax.f32 %v597_v30, 0.0  ;;  %v1275_v42 = vsel %vm5887_vm8, %v988_v31, %v1274_v27  ;;  %v4857_v44 = vpack.c.bf16 %v696_v35, %v696_v35  ;;  %v608_v45 = vadd.f32 %v5002_v20, %v5878_v21 }
 0x122   : > { %729 = vst.msk [vmem:[#allocation2 + $0xd0] sm:$0xf] %vm723_vm6, %v5621_v37  ;;  %730 = vst.msk [vmem:[#allocation2 + $0xd4] sm:$0xf] %vm723_vm6, %v5621_v37  ;;  %v1268_v46 = vsel %vm5887_vm8, %v971_v38, %v1267_v33  ;;  %v4862_v48 = vpack.c.bf16 %v701_v40, %v701_v40  ;;  %v600_v50 = vadd.f32 %v5878_v21, %v599_v36  ;;  %v991_v51 = vshrl.u32 %v4859_v43, 16 }
 0x123   : > { %1276 = vst [vmem:[#allocation2 + $0x30] sm:$0xf] %v1275_v42  ;;  %v4860_v49 = vpack.c.bf16 %v699_v41, %v699_v41  ;;  %1269 = vst [vmem:[#allocation2 + $0x24] sm:$0xf] %v1268_v46  ;;  %v994_v52 = vshll.u32 %v4859_v43, 16  ;;  %v974_v53 = vshrl.u32 %v4857_v44, 16 }
 0x124   : > { %v977_v54 = vshll.u32 %v4857_v44, 16  ;;  %v1017_v57 = vshrl.u32 %v4862_v48, 16  ;;  %v1020_v58 = vshll.u32 %v4862_v48, 16  ;;  %v5005_v61 = vpop.f32.mrb[12].mxu0  ;;  %v993_v63 = vrot.slane %v991_v51, 7 }
 0x125   : > { %v1000_v59 = vshrl.u32 %v4860_v49, 16  ;;  %v1003_v60 = vshll.u32 %v4860_v49, 16  ;;  %v976_v0 = vrot.slane %v974_v53, 7  ;;  %v702_v2 = vmax.f32 %v608_v45, 0.0  ;;  %v612_v4 = vpop.f32.mrb[13].mxu0 }
 0x126   : > { %v700_v3 = vmax.f32 %v600_v50, 0.0  ;;  %v5936_v5 = vrot.slane %v1017_v57, 7  ;;  %v621_v8 = vadd.f32 %v5005_v61, %v5878_v21  ;;  %v613_v9 = vadd.f32 %v5878_v21, %v612_v4  ;;  %v5006_v10 = vpop.f32.mrb[14].mxu0  ;;  %v5961_v33 = vld [vmem:[#allocation2 + $0x10] sm:$0xf] }
 0x127   : > { %v5938_v6 = vrot.slane %v1000_v59, 7  ;;  %v996_v11 = vor.u32 %v994_v52, %v993_v63  ;;  %v998_v12 = vrot.slane %v993_v63, 4  ;;  %v979_v13 = vor.u32 %v977_v54, %v976_v0  ;;  %v615_v15 = vpop.f32.mrb[15].mxu0  ;;  %v2027_v34 = vld [vmem:[#allocation2 + $0xc] sm:$0xe] }
 0x128   : > { %v981_v14 = vrot.slane %v976_v0, 4  ;;  %v1022_v16 = vor.u32 %v1020_v58, %v5936_v5  ;;  %v1023_v18 = vrot.slane %v5936_v5, 4  ;;  %v4863_v28 = vpack.c.bf16 %v702_v2, %v702_v2  ;;  %v1292_v40 = vld [vmem:[#allocation2 + $0x50] sm:$0x1]  ;;  %v1285_v51 = vld [vmem:[#allocation2 + $0x44] sm:$0x1] }
 0x129   : > { %v1005_v19 = vor.u32 %v1003_v60, %v5938_v6  ;;  %v997_v22 = vsel %vm5894_vm9, %v989_v32, %v996_v11  ;;  %v1279_v23 = vsel %vm5802_vm3, %v998_v12, %v1278_v55  ;;  %v980_v24 = vsel %vm5894_vm9, %v972_v39, %v979_v13  ;;  %v5964_v45 = vld [vmem:[#allocation2 + $0x14] ss:$0 sps:$4 sm:$0x11]  }
 0x12a   : > { %v1272_v25 = vsel %vm5802_vm3, %v981_v14, %v1271_v56  ;;  %1277 = vst.msk [vmem:[#allocation2 + $0x34] sm:$0xf] %vm723_vm6, %v997_v22  ;;  %1280 = vst [vmem:[#allocation2 + $0x38] sm:$0x1] %v1279_v23  ;;  %v1289_v26 = vsel %vm5887_vm8, %v1022_v16, %v1288_v1  ;;  %v4861_v29 = vpack.c.bf16 %v700_v3, %v700_v3  ;;  %v705_v30 = vmax.f32 %v621_v8, 0.0 }
 0x12b   : > { %1270 = vst.msk [vmem:[#allocation2 + $0x28] sm:$0xf] %vm723_vm6, %v980_v24  ;;  %1273 = vst [vmem:[#allocation2 + $0x2c] sm:$0x1] %v1272_v25  ;;  %v1282_v27 = vsel %vm5887_vm8, %v1005_v19, %v1281_v7  ;;  %v703_v20 = vmax.f32 %v613_v9, 0.0  ;;  %v624_v31 = vadd.f32 %v5006_v10, %v5878_v21  ;;  %v616_v32 = vadd.f32 %v5878_v21, %v615_v15 }
 0x12c   : > { %1290 = vst [vmem:[#allocation2 + $0x48] sm:$0xf] %v1289_v26  ;;  %1283 = vst [vmem:[#allocation2 + $0x3c] sm:$0xf] %v1282_v27  ;;  %v1006_v35 = vrot.slane %v5938_v6, 4  ;;  %v1025_v36 = vshrl.u32 %v4863_v28, 16  ;;  %v4866_v41 = vpack.c.bf16 %v705_v30, %v705_v30  ;;  %v4688_v52 = vcombine.low %v2027_v34, %v5961_v33 }
 0x12d   : > { %v1028_v37 = vshll.u32 %v4863_v28, 16  ;;  %v1008_v38 = vshrl.u32 %v4861_v29, 16  ;;  %v5009_v39 = vpop.f32.mrb[16].mxu0  ;;  %v4864_v42 = vpack.c.bf16 %v703_v20, %v703_v20  ;;  %v706_v43 = vmax.f32 %v624_v31, 0.0  ;;  %v1302_v8 = vld [vmem:[#allocation2 + $0x60] sm:$0xf] }
 0x12e   : > { %v704_v44 = vmax.f32 %v616_v32, 0.0  ;;  %v628_v46 = vpop.f32.mrb[17].mxu0  ;;  %v1027_v48 = vrot.slane %v1025_v36, 7  ;;  %v1011_v50 = vshll.u32 %v4861_v29, 16  ;;  %v1051_v54 = vshrl.u32 %v4866_v41, 16 }
 0x12f   : > { %v1010_v49 = vrot.slane %v1008_v38, 7  ;;  %v5010_v53 = vpop.f32.mrb[18].mxu0  ;;  %v1054_v55 = vshll.u32 %v4866_v41, 16  ;;  %v1034_v56 = vshrl.u32 %v4864_v42, 16  ;;  %v1037_v57 = vshll.u32 %v4864_v42, 16 }
 0x130   : > { %v5967_v58 = vpop.f32.mrb[19].mxu0  ;;  %v1030_v59 = vor.u32 %v1028_v37, %v1027_v48  ;;  %v1032_v60 = vrot.slane %v1027_v48, 4  ;;  %v1053_v0 = vrot.slane %v1051_v54, 7  ;;  %v4867_v2 = vpack.c.bf16 %v706_v43, %v706_v43  ;;  %v1295_v9 = vld [vmem:[#allocation2 + $0x54] sm:$0xf] }
 0x131   : > { %v1013_v61 = vor.u32 %v1011_v50, %v1010_v49  ;;  %v1015_v63 = vrot.slane %v1010_v49, 4  ;;  %v1036_v1 = vrot.slane %v1034_v56, 7  ;;  %v4865_v3 = vpack.c.bf16 %v704_v44, %v704_v44  ;;  %v1982_v14 = vld [vmem:[#allocation2 + $0x1c] sm:$0xf]  ;;  %v1306_v25 = vld [vmem:[#allocation2 + $0x68] sm:$0x1] }
 0x132   : > { %v1031_v4 = vsel %vm5894_vm9, %v1023_v18, %v1030_v59  ;;  %v1293_v5 = vsel %vm5802_vm3, %v1032_v60, %v1292_v40  ;;  %v1056_v10 = vor.u32 %v1054_v55, %v1053_v0  ;;  %v1057_v11 = vrot.slane %v1053_v0, 4  ;;  %v2028_v28 = vld [vmem:[#allocation2 + $0x18] sm:$0xe]  ;;  %v1979_v31 = vld [vmem:[#allocation2 + $0xc] sm:$0xf] }
 0x133   : > { %v1014_v6 = vsel %vm5894_vm9, %v1006_v35, %v1013_v61  ;;  %v1286_v7 = vsel %vm5802_vm3, %v1015_v63, %v1285_v51  ;;  %1291 = vst.msk [vmem:[#allocation2 + $0x4c] sm:$0xf] %vm723_vm6, %v1031_v4  ;;  %1294 = vst [vmem:[#allocation2 + $0x50] sm:$0x1] %v1293_v5  ;;  %v1039_v12 = vor.u32 %v1037_v57, %v1036_v1  ;;  %v2444_v13 = vrot.slane %v5964_v45, 1 }
 0x134   : > { %1284 = vst.msk [vmem:[#allocation2 + $0x40] sm:$0xf] %vm723_vm6, %v1014_v6  ;;  %1287 = vst [vmem:[#allocation2 + $0x44] sm:$0x1] %v1286_v7  ;;  %v1040_v15 = vrot.slane %v1036_v1, 4  ;;  %v1059_v16 = vshrl.u32 %v4867_v2, 16  ;;  %v1303_v23 = vsel %vm5887_vm8, %v1056_v10, %v1302_v8  ;;  %v637_v32 = vadd.f32 %v5009_v39, %v5878_v21 }
 0x135   : > { %v1062_v18 = vshll.u32 %v4867_v2, 16  ;;  %v1042_v19 = vshrl.u32 %v4865_v3, 16  ;;  %v5980_v22 = vpop.f32.mrb[20].mxu0  ;;  %v1296_v24 = vsel %vm5887_vm8, %v1039_v12, %v1295_v9  ;;  %v1045_v26 = vshll.u32 %v4865_v3, 16  ;;  %1304 = vst [vmem:[#allocation2 + $0x60] sm:$0xf] %v1303_v23 }
 0x136   : > { %v2443_v27 = vrot.slane %v4688_v52, 1  ;;  %v5986_v29 = vpop.f32.mrb[21].mxu0  ;;  %1297 = vst [vmem:[#allocation2 + $0x54] sm:$0xf] %v1296_v24  ;;  %v1061_v30 = vrot.slane %v1059_v16, 7  ;;  %v629_v34 = vadd.f32 %v5878_v21, %v628_v46  ;;  %v5994_v38 = vcombine.low %v1979_v31, %v5961_v33 }
 0x137   : > { %v1044_v20 = vrot.slane %v1042_v19, 7  ;;  %v5990_v35 = vpop.f32.mrb[22].mxu0  ;;  %v1299_v36 = vld [vmem:[#allocation2 + $0x5c] sm:$0x1]  ;;  %v640_v40 = vadd.f32 %v5010_v53, %v5878_v21  ;;  %v4689_v42 = vcombine.low %v2028_v28, %v1982_v14  ;;  %v709_v49 = vmax.f32 %v637_v32, 0.0 }
 0x138   : > { %v2445_v37 = vsel %vm1830_vm10, %v2443_v27, %v2444_v13  ;;  %v5997_v41 = vld [vmem:[#allocation2 + $0x20] ss:$0 sps:$4 sm:$0x11]   ;;  %v5999_v43 = vpop.f32.mrb[23].mxu0  ;;  %v1064_v44 = vor.u32 %v1062_v18, %v1061_v30  ;;  %v1066_v39 = vrot.slane %v1061_v30, 4  ;;  %v707_v50 = vmax.f32 %v629_v34, 0.0 }
 0x139   : > { %v1047_v48 = vor.u32 %v1045_v26, %v1044_v20  ;;  %v1049_v46 = vrot.slane %v1044_v20, 4  ;;  %2491 = vrot.lane.b32.xlu1 %v2445_v37, %s5622_s24  ;;  %v710_v51 = vmax.f32 %v640_v40, 0.0  ;;  %v2446_v33 = vrot.slane %v4689_v42, 1  ;;  %v1981_v60 = vld [vmem:[#allocation2 + $0x18] sm:$0xf] }
 0x13a   : > { %v1065_v52 = vsel %vm5894_vm9, %v1057_v11, %v1064_v44  ;;  %v1307_v53 = vsel %vm5802_vm3, %v1066_v39, %v1306_v25  ;;  %v4870_v56 = vpack.c.bf16 %v709_v49, %v709_v49  ;;  %v4868_v57 = vpack.c.bf16 %v707_v50, %v707_v50  ;;  %v1316_v9 = vld [vmem:[#allocation2 + $0x78] sm:$0xf]  ;;  %v1309_v19 = vld [vmem:[#allocation2 + $0x6c] sm:$0xf]  ;;  %v1320_v20 = vld [vmem:[#allocation2 + $0x80] sm:$0x1] }
 0x13b   : > { %v1048_v54 = vsel %vm5894_vm9, %v1040_v15, %v1047_v48  ;;  %v1300_v55 = vsel %vm5802_vm3, %v1049_v46, %v1299_v36  ;;  %1305 = vst.msk [vmem:[#allocation2 + $0x64] sm:$0xf] %vm723_vm6, %v1065_v52  ;;  %1308 = vst [vmem:[#allocation2 + $0x68] sm:$0x1] %v1307_v53  ;;  %v4871_v59 = vpack.c.bf16 %v710_v51, %v710_v51  ;;  %v2447_v61 = vrot.slane %v5997_v41, 1 }
 0x13c   : > { %1298 = vst.msk [vmem:[#allocation2 + $0x58] sm:$0xf] %vm723_vm6, %v1048_v54  ;;  %1301 = vst [vmem:[#allocation2 + $0x5c] sm:$0x1] %v1300_v55  ;;  %v6013_v63 = vcombine.low %v1981_v60, %v1982_v14  ;;  %v2174_v0 = vshll.u32 %v5994_v38, 16  ;;  %v2179_v1 = vshll.u32 %v5964_v45, 16  ;;  %v632_v2 = vadd.f32 %v5878_v21, %v5967_v58 }
 0x13d   : > { %v6019_v3 = vpop.f32.mrb[24].mxu0  ;;  %v1085_v4 = vshrl.u32 %v4870_v56, 16  ;;  %v1088_v5 = vshll.u32 %v4870_v56, 16  ;;  %v1068_v6 = vshrl.u32 %v4868_v57, 16  ;;  %v2172_v7 = vshrl.u32 %v5994_v38, 16 }
 0x13e   : > { %v6022_v8 = vpop.f32.mrb[25].mxu0  ;;  %v1071_v10 = vshll.u32 %v4868_v57, 16  ;;  %v1093_v11 = vshrl.u32 %v4871_v59, 16  ;;  %v2448_v12 = vsel %vm1830_vm10, %v2446_v33, %v2447_v61  ;;  %v2176_v13 = vrot.slane %v2174_v0, 1  ;;  %v6044_v46 = vld [vmem:[#allocation2 + $0x34] sm:$0xf] }
 0x13f   : > { %v6025_v14 = vpop.f32.mrb[26].mxu0  ;;  %v1087_v45 = vrot.slane %v1085_v4, 7  ;;  %v6027_v15 = vrot.slane %v1068_v6, 7  ;;  %v1096_v58 = vshll.u32 %v4871_v59, 16  ;;  %2493 = vrot.lane.b32.xlu1 %v2448_v12, %s5622_s24  ;;  %v708_v16 = vmax.f32 %v632_v2, 0.0 }
 0x140   : > { %v6030_v18 = vpop.f32.mrb[27].mxu0  ;;  %v1095_v23 = vrot.slane %v1093_v11, 7  ;;  %v2177_v24 = vor.u32 %v2176_v13, %v2172_v7  ;;  %v2181_v25 = vrot.slane %v2179_v1, 1  ;;  %v2186_v26 = vshll.u32 %v6013_v63, 16  ;;  %v1985_v52 = vld [vmem:[#allocation2 + $0x30] sm:$0xf] }
 0x141   : > { %v1090_v27 = vor.u32 %v1088_v5, %v1087_v45  ;;  %v1091_v28 = vrot.slane %v1087_v45, 4  ;;  %v1073_v30 = vor.u32 %v1071_v10, %v6027_v15  ;;  %v2184_v31 = vshrl.u32 %v6013_v63, 16  ;;  %v6036_v40 = vld [vmem:[#allocation2 + $0x38] ss:$0 sps:$4 sm:$0x11]  }
 0x142   : > { %v1098_v32 = vor.u32 %v1096_v58, %v1095_v23  ;;  %v1100_v34 = vrot.slane %v1095_v23, 4  ;;  %v2182_v36 = vsel %vm1557_vm11, %v2177_v24, %v2181_v25  ;;  %v4869_v37 = vpack.c.bf16 %v708_v16, %v708_v16  ;;  %v6057_v57 = vld [vmem:[#allocation2 + $0x28] sm:$0xf]  ;;  %v1313_v61 = vld [vmem:[#allocation2 + $0x74] sm:$0x1] }
 0x143   : > { %v1317_v42 = vsel %vm5887_vm8, %v1090_v27, %v1316_v9  ;;  %v1310_v44 = vsel %vm5887_vm8, %v1073_v30, %v1309_v19  ;;  %2363 = vrot.lane.b32.xlu0 %v2182_v36, %s5623_s26  ;;  %v2188_v39 = vrot.slane %v2186_v26, 1  ;;  %v2191_v48 = vshll.u32 %v5997_v41, 16  ;;  %v1983_v7 = vld [vmem:[#allocation2 + $0x24] sm:$0xf]  ;;  %v2030_v36 = vld [vmem:[#allocation2 + $0x30] sm:$0xe] }
 0x144   : > { %1318 = vst [vmem:[#allocation2 + $0x78] sm:$0xf] %v1317_v42  ;;  %1311 = vst [vmem:[#allocation2 + $0x6c] sm:$0xf] %v1310_v44  ;;  %v1099_v49 = vsel %vm5894_vm9, %v1091_v28, %v1098_v32  ;;  %v1321_v50 = vsel %vm5802_vm3, %v1100_v34, %v1320_v20  ;;  %v1076_v51 = vshrl.u32 %v4869_v37, 16  ;;  %v1079_v33 = vshll.u32 %v4869_v37, 16 }
 0x145   : > { %v6050_v53 = vpop.f32.mrb[28].mxu0  ;;  %1319 = vst.msk [vmem:[#allocation2 + $0x7c] sm:$0xf] %vm723_vm6, %v1099_v49  ;;  %1322 = vst [vmem:[#allocation2 + $0x80] sm:$0x1] %v1321_v50  ;;  %v2189_v54 = vor.u32 %v2188_v39, %v2184_v31  ;;  %v2193_v41 = vrot.slane %v2191_v48, 1  ;;  %v653_v55 = vadd.f32 %v5980_v22, %v5878_v21  ;;  %v645_v56 = vadd.f32 %v5878_v21, %v5986_v29 }
 0x146   : > { %v6059_v59 = vpop.f32.mrb[29].mxu0  ;;  %v1078_v60 = vrot.slane %v1076_v51, 7  ;;  %v6062_v0 = vcombine.low %v1985_v52, %v6044_v46  ;;  %v2215_v1 = vshll.u32 %v6036_v40, 16  ;;  %v656_v2 = vadd.f32 %v5990_v35, %v5878_v21  ;;  %v6078_v35 = vld [vmem:[#allocation2 + $0x2c] ss:$0 sps:$4 sm:$0x11]  }
 0x147   : > { %v6067_v4 = vpop.f32.mrb[30].mxu0  ;;  %v1074_v22 = vrot.slane %v6027_v15, 4  ;;  %v2194_v29 = vsel %vm1557_vm11, %v2189_v54, %v2193_v41  ;;  %v713_v5 = vmax.f32 %v653_v55, 0.0  ;;  %v711_v6 = vmax.f32 %v645_v56, 0.0  ;;  %v1330_v42 = vld [vmem:[#allocation2 + $0x90] sm:$0xf] }
 0x148   : > { %v6071_v9 = vpop.f32.mrb[31].mxu0  ;;  %v1081_v10 = vor.u32 %v1079_v33, %v1078_v60  ;;  %v1083_v11 = vrot.slane %v1078_v60, 4  ;;  %2365 = vrot.lane.b32.xlu0 %v2194_v29, %s5623_s26  ;;  %v2210_v12 = vshll.u32 %v6062_v0, 16  ;;  %v6076_v13 = vcombine.low %v1983_v7, %v6057_v57  ;;  %v5470_v49 = vld [vmem:[%s7320_s3 + $0xc] sm:$0xff]   ;;  %v1323_v50 = vld [vmem:[#allocation2 + $0x84] sm:$0xf] }
 0x149   : > { %v4874_v45 = vpack.c.bf16 %v713_v5, %v713_v5  ;;  %v4872_v15 = vpack.c.bf16 %v711_v6, %v711_v6  ;;  %v2208_v58 = vshrl.u32 %v6062_v0, 16  ;;  %v714_v16 = vmax.f32 %v656_v2, 0.0  ;;  %v1334_v60 = vld [vmem:[#allocation2 + $0x98] sm:$0x1]  ;;  %5023 = vmatprep.subr.bf16.mxu1 %v5470_v49 }
 0x14a   : > { %v1082_v19 = vsel %vm5894_vm9, %v1074_v22, %v1081_v10  ;;  %v1314_v23 = vsel %vm5802_vm3, %v1083_v11, %v1313_v61  ;;  %v2212_v24 = vrot.slane %v2210_v12, 1  ;;  %v2217_v25 = vrot.slane %v2215_v1, 1  ;;  %v2029_v22 = vld [vmem:[#allocation2 + $0x24] sm:$0xe]  ;;  %5024 = vmatpush3.bf16.msra.mxu1 %v5470_v49  ;;  %v6105_v10 = vld [vmem:[#allocation2 + $0x4c] sm:$0xf] }
 0x14b   : > { %1312 = vst.msk [vmem:[#allocation2 + $0x70] sm:$0xf] %vm723_vm6, %v1082_v19  ;;  %1315 = vst [vmem:[#allocation2 + $0x74] sm:$0x1] %v1314_v23  ;;  %v1119_v26 = vshrl.u32 %v4874_v45, 16  ;;  %v1122_v27 = vshll.u32 %v4874_v45, 16  ;;  %v4875_v31 = vpack.c.bf16 %v714_v16, %v714_v16  ;;  %v648_v39 = vadd.f32 %v5878_v21, %v5999_v43 }
 0x14c   : > { %v1102_v28 = vshrl.u32 %v4872_v15, 16  ;;  %v1105_v30 = vshll.u32 %v4872_v15, 16  ;;  %v2213_v20 = vor.u32 %v2212_v24, %v2208_v58  ;;  %v2198_v32 = vshll.u32 %v6076_v13, 16  ;;  %v6108_v58 = vld [vmem:[#allocation2 + $0x50] ss:$0 sps:$4 sm:$0x11]  }
 0x14d   : > { %v2203_v34 = vshll.u32 %v6078_v35, 16  ;;  %v1121_v37 = vrot.slane %v1119_v26, 7  ;;  %v4691_v48 = vcombine.low %v2030_v36, %v6044_v46  ;;  %v1127_v33 = vshrl.u32 %v4875_v31, 16 }
 0x14e   : > { %v6088_v44 = vrot.slane %v1102_v28, 7  ;;  %v2218_v51 = vsel %vm1557_vm11, %v2213_v20, %v2217_v25  ;;  %v2196_v52 = vshrl.u32 %v6076_v13, 16  ;;  %v2200_v54 = vrot.slane %v2198_v32, 1  ;;  %v1989_v28 = vld [vmem:[#allocation2 + $0x48] sm:$0xf] }
 0x14f   : > { %v1124_v41 = vor.u32 %v1122_v27, %v1121_v37  ;;  %v1125_v55 = vrot.slane %v1121_v37, 4  ;;  %2369 = vrot.lane.b32.xlu1 %v2218_v51, %s5623_s26  ;;  %v1130_v43 = vshll.u32 %v4875_v31, 16  ;;  %v1129_v46 = vrot.slane %v1127_v33, 7  ;;  %v1987_v31 = vld [vmem:[#allocation2 + $0x3c] sm:$0xf] }
 0x150   : > { %v1107_v56 = vor.u32 %v1105_v30, %v6088_v44  ;;  %v2201_v61 = vor.u32 %v2200_v54, %v2196_v52  ;;  %v2205_v1 = vrot.slane %v2203_v34, 1  ;;  %v712_v2 = vmax.f32 %v648_v39, 0.0  ;;  %v6122_v30 = vld [vmem:[#allocation2 + $0x40] sm:$0xf] }
 0x151   : > { %v1331_v29 = vsel %vm5887_vm8, %v1124_v41, %v1330_v42  ;;  %v2452_v6 = vrot.slane %v4691_v48, 1  ;;  %v2453_v7 = vrot.slane %v6036_v40, 1  ;;  %v1132_v11 = vor.u32 %v1130_v43, %v1129_v46  ;;  %v1327_v42 = vld [vmem:[#allocation2 + $0x8c] sm:$0x1] }
 0x152   : > { %v1324_v5 = vsel %vm5887_vm8, %v1107_v56, %v1323_v50  ;;  %1332 = vst [vmem:[#allocation2 + $0x90] sm:$0xf] %v1331_v29  ;;  %v1134_v12 = vrot.slane %v1129_v46, 4  ;;  %v2206_v45 = vsel %vm1557_vm11, %v2201_v61, %v2205_v1  ;;  %v4873_v15 = vpack.c.bf16 %v712_v2, %v712_v2  ;;  %v6140_v52 = vld [vmem:[#allocation2 + $0x44] ss:$0 sps:$4 sm:$0x11]  }
 0x153   : > { %1325 = vst [vmem:[#allocation2 + $0x84] sm:$0xf] %v1324_v5  ;;  %2367 = vrot.lane.b32.xlu0 %v2206_v45, %s5623_s26  ;;  %v2454_v16 = vsel %vm1830_vm10, %v2452_v6, %v2453_v7  ;;  %v4690_v19 = vcombine.low %v2029_v22, %v6057_v57  ;;  %v2450_v23 = vrot.slane %v6078_v35, 1  ;;  %v669_v40 = vadd.f32 %v6019_v3, %v5878_v21  ;;  %v1344_v29 = vld [vmem:[#allocation2 + $0xa8] sm:$0xf] }
 0x154   : > { %v1108_v24 = vrot.slane %v6088_v44, 4  ;;  %v1133_v25 = vsel %vm5894_vm9, %v1125_v55, %v1132_v11  ;;  %v1335_v26 = vsel %vm5802_vm3, %v1134_v12, %v1334_v60  ;;  %v1110_v27 = vshrl.u32 %v4873_v15, 16  ;;  %2497 = vrot.lane.b32.xlu1 %v2454_v16, %s5622_s24  ;;  %v1337_v16 = vld [vmem:[#allocation2 + $0x9c] sm:$0xf] }
 0x155   : > { %1333 = vst.msk [vmem:[#allocation2 + $0x94] sm:$0xf] %vm723_vm6, %v1133_v25  ;;  %1336 = vst [vmem:[#allocation2 + $0x98] sm:$0x1] %v1335_v26  ;;  %v2449_v57 = vrot.slane %v4690_v19, 1  ;;  %v717_v35 = vmax.f32 %v669_v40, 0.0  ;;  %v661_v3 = vadd.f32 %v5878_v21, %v6022_v8  ;;  %v6128_v20 = vcombine.low %v1989_v28, %v6105_v10 }
 0x156   : > { %v1112_v32 = vrot.slane %v1110_v27, 7  ;;  %v1113_v34 = vshll.u32 %v4873_v15, 16  ;;  %v2239_v36 = vshll.u32 %v6108_v58, 16  ;;  %v672_v37 = vadd.f32 %v6025_v14, %v5878_v21 }
 0x157   : > { %v2451_v44 = vsel %vm1830_vm10, %v2449_v57, %v2450_v23  ;;  %v4878_v39 = vpack.c.bf16 %v717_v35, %v717_v35  ;;  %v715_v48 = vmax.f32 %v661_v3, 0.0  ;;  %v6135_v49 = vcombine.low %v1987_v31, %v6122_v30  ;;  %v2032_v57 = vld [vmem:[#allocation2 + $0x48] sm:$0xe]  ;;  %v1348_v35 = vld [vmem:[#allocation2 + $0xb0] sm:$0x1] }
 0x158   : > { %v1115_v8 = vor.u32 %v1113_v34, %v1112_v32  ;;  %v1117_v50 = vrot.slane %v1112_v32, 4  ;;  %2495 = vrot.lane.b32.xlu0 %v2451_v44, %s5622_s24  ;;  %v2232_v51 = vshrl.u32 %v6128_v20, 16  ;;  %v2234_v33 = vshll.u32 %v6128_v20, 16 }
 0x159   : > { %v1153_v54 = vshrl.u32 %v4878_v39, 16  ;;  %v4876_v14 = vpack.c.bf16 %v715_v48, %v715_v48  ;;  %v2241_v41 = vrot.slane %v2239_v36, 1  ;;  %v718_v55 = vmax.f32 %v672_v37, 0.0  ;;  %v2031_v36 = vld [vmem:[#allocation2 + $0x3c] sm:$0xe] }
 0x15a   : > { %v1116_v56 = vsel %vm5894_vm9, %v1108_v24, %v1115_v8  ;;  %v1328_v43 = vsel %vm5802_vm3, %v1117_v50, %v1327_v42  ;;  %v1156_v60 = vshll.u32 %v4878_v39, 16  ;;  %v2236_v46 = vrot.slane %v2234_v33, 1  ;;  %v6164_v48 = vld [vmem:[#allocation2 + $0x68] ss:$0 sps:$4 sm:$0x11]  }
 0x15b   : > { %1326 = vst.msk [vmem:[#allocation2 + $0x88] sm:$0xf] %vm723_vm6, %v1116_v56  ;;  %1329 = vst [vmem:[#allocation2 + $0x8c] sm:$0x1] %v1328_v43  ;;  %v1155_v61 = vrot.slane %v1153_v54, 7  ;;  %v1136_v1 = vshrl.u32 %v4876_v14, 16  ;;  %v4879_v2 = vpack.c.bf16 %v718_v55, %v718_v55  ;;  %v664_v11 = vadd.f32 %v5878_v21, %v6030_v18 }
 0x15c   : > { %v2220_v22 = vshrl.u32 %v6135_v49, 16  ;;  %v2237_v5 = vor.u32 %v2236_v46, %v2232_v51  ;;  %v2222_v6 = vshll.u32 %v6135_v49, 16  ;;  %v2227_v7 = vshll.u32 %v6140_v52, 16  ;;  %v1993_v43 = vld [vmem:[#allocation2 + $0x60] sm:$0xf] }
 0x15d   : > { %v1158_v12 = vor.u32 %v1156_v60, %v1155_v61  ;;  %v6152_v45 = vrot.slane %v1136_v1, 7  ;;  %v1139_v15 = vshll.u32 %v4876_v14, 16  ;;  %v1161_v19 = vshrl.u32 %v4879_v2, 16  ;;  %v6182_v60 = vld [vmem:[#allocation2 + $0x58] sm:$0xf] }
 0x15e   : > { %v1159_v23 = vrot.slane %v1155_v61, 4  ;;  %v2242_v40 = vsel %vm1557_vm11, %v2237_v5, %v2241_v41  ;;  %v1164_v24 = vshll.u32 %v4879_v2, 16  ;;  %v2224_v25 = vrot.slane %v2222_v6, 1  ;;  %v1991_v5 = vld [vmem:[#allocation2 + $0x54] sm:$0xf] }
 0x15f   : > { %v1345_v26 = vsel %vm5887_vm8, %v1158_v12, %v1344_v29  ;;  %v1141_v27 = vor.u32 %v1139_v15, %v6152_v45  ;;  %2373 = vrot.lane.b32.xlu1 %v2242_v40, %s5623_s26  ;;  %v1163_v28 = vrot.slane %v1161_v19, 7  ;;  %v2229_v18 = vrot.slane %v2227_v7, 1  ;;  %v1341_v6 = vld [vmem:[#allocation2 + $0xa4] sm:$0x1] }
 0x160   : > { %1346 = vst [vmem:[#allocation2 + $0xa8] sm:$0xf] %v1345_v26  ;;  %v2225_v3 = vor.u32 %v2224_v25, %v2220_v22  ;;  %v716_v31 = vmax.f32 %v664_v11, 0.0  ;;  %v4693_v32 = vcombine.low %v2032_v57, %v6105_v10  ;;  %v2459_v34 = vrot.slane %v6108_v58, 1  ;;  %v6168_v10 = vld [vmem:[#allocation2 + $0x64] sm:$0xf] }
 0x161   : > { %v1338_v37 = vsel %vm5887_vm8, %v1141_v27, %v1337_v16  ;;  %v1166_v42 = vor.u32 %v1164_v24, %v1163_v28  ;;  %v1168_v44 = vrot.slane %v1163_v28, 4  ;;  %v4692_v39 = vcombine.low %v2031_v36, %v6122_v30  ;;  %v6200_v40 = vld [vmem:[#allocation2 + $0x5c] ss:$0 sps:$4 sm:$0x11]   ;;  %v1358_v36 = vld [vmem:[#allocation2 + $0xc0] sm:$0xf] }
 0x162   : > { %1339 = vst [vmem:[#allocation2 + $0x9c] sm:$0xf] %v1338_v37  ;;  %v2230_v8 = vsel %vm1557_vm11, %v2225_v3, %v2229_v18  ;;  %v4877_v50 = vpack.c.bf16 %v716_v31, %v716_v31  ;;  %v2458_v51 = vrot.slane %v4693_v32, 1  ;;  %v2456_v33 = vrot.slane %v6140_v52, 1 }
 0x163   : > { %v1167_v58 = vsel %vm5894_vm9, %v1159_v23, %v1166_v42  ;;  %v1349_v54 = vsel %vm5802_vm3, %v1168_v44, %v1348_v35  ;;  %2371 = vrot.lane.b32.xlu0 %v2230_v8, %s5623_s26  ;;  %v2455_v30 = vrot.slane %v4692_v39, 1  ;;  %v685_v14 = vadd.f32 %v6050_v53, %v5878_v21 }
 0x164   : > { %v1142_v41 = vrot.slane %v6152_v45, 4  ;;  %1347 = vst.msk [vmem:[#allocation2 + $0xac] sm:$0xf] %vm723_vm6, %v1167_v58  ;;  %1350 = vst [vmem:[#allocation2 + $0xb0] sm:$0x1] %v1349_v54  ;;  %v1144_v52 = vshrl.u32 %v4877_v50, 16  ;;  %v2460_v55 = vsel %vm1830_vm10, %v2458_v51, %v2459_v34  ;;  %v677_v56 = vadd.f32 %v5878_v21, %v6059_v59 }
 0x165   : > { %v1147_v46 = vshll.u32 %v4877_v50, 16  ;;  %2501 = vrot.lane.b32.xlu1 %v2460_v55, %s5622_s24  ;;  %v721_v61 = vmax.f32 %v685_v14, 0.0  ;;  %v6186_v53 = vcombine.low %v1993_v43, %v6168_v10  ;;  %v2263_v1 = vshll.u32 %v6164_v48, 16  ;;  %v5535_v21 = vld [vmem:[%s7319_s2] ss:$0 sm:$0xff] }
 0x166   : > { %v1146_v2 = vrot.slane %v1144_v52, 7  ;;  %v2457_v22 = vsel %vm1830_vm10, %v2455_v30, %v2456_v33  ;;  %v719_v29 = vmax.f32 %v677_v56, 0.0  ;;  %v688_v59 = vadd.f32 %v5535_v21, %v6067_v4  ;;  %v2034_v34 = vld [vmem:[#allocation2 + $0x60] sm:$0xe]  ;;  %v1351_v50 = vld [vmem:[#allocation2 + $0xb4] sm:$0xf] }
 0x167   : > { %2499 = vrot.lane.b32.xlu0 %v2457_v22, %s5622_s24  ;;  %v4882_v7 = vpack.c.bf16 %v721_v61, %v721_v61  ;;  %v2256_v11 = vshrl.u32 %v6186_v53, 16  ;;  %v2258_v12 = vshll.u32 %v6186_v53, 16  ;;  %v6198_v45 = vcombine.low %v1991_v5, %v6182_v60  ;;  %v2033_v55 = vld [vmem:[#allocation2 + $0x54] sm:$0xe]  ;;  %v6217_v56 = vld [vmem:[#allocation2 + $0x7c] sm:$0xf] }
 0x168   : > { %v1149_v15 = vor.u32 %v1147_v46, %v1146_v2  ;;  %v1151_v16 = vrot.slane %v1146_v2, 4  ;;  %v4880_v19 = vpack.c.bf16 %v719_v29, %v719_v29  ;;  %v722_v23 = vmax.f32 %v688_v59, 0.0  ;;  %v6224_v29 = vld [vmem:[#allocation2 + $0x80] ss:$0 sps:$4 sm:$0x11]  }
 0x169   : > { %v1187_v24 = vshrl.u32 %v4882_v7, 16  ;;  %v1190_v4 = vshll.u32 %v4882_v7, 16  ;;  %v2260_v25 = vrot.slane %v2258_v12, 1  ;;  %v2265_v26 = vrot.slane %v2263_v1, 1  ;;  %v1997_v7 = vld [vmem:[#allocation2 + $0x78] sm:$0xf] }
 0x16a   : > { %v1150_v27 = vsel %vm5894_vm9, %v1142_v41, %v1149_v15  ;;  %v1342_v28 = vsel %vm5802_vm3, %v1151_v16, %v1341_v6  ;;  %v1170_v18 = vshrl.u32 %v4880_v19, 16  ;;  %v1173_v57 = vshll.u32 %v4880_v19, 16  ;;  %v1362_v41 = vld [vmem:[#allocation2 + $0xc8] sm:$0x1] }
 0x16b   : > { %1340 = vst.msk [vmem:[#allocation2 + $0xa0] sm:$0xf] %vm723_vm6, %v1150_v27  ;;  %1343 = vst [vmem:[#allocation2 + $0xa4] sm:$0x1] %v1342_v28  ;;  %v1189_v35 = vrot.slane %v1187_v24, 7  ;;  %v2261_v3 = vor.u32 %v2260_v25, %v2256_v11  ;;  %v4883_v31 = vpack.c.bf16 %v722_v23, %v722_v23  ;;  %v2246_v32 = vshll.u32 %v6198_v45, 16 }
 0x16c   : > { %v6208_v37 = vrot.slane %v1170_v18, 7  ;;  %v2251_v42 = vshll.u32 %v6200_v40, 16  ;;  %v680_v44 = vadd.f32 %v5535_v21, %v6071_v9  ;;  %v4695_v39 = vcombine.low %v2034_v34, %v6168_v10  ;;  %v1996_v11 = vld [vmem:[#allocation2 + $0x70] sm:$0xf]  ;;  %v1995_v24 = vld [vmem:[#allocation2 + $0x6c] sm:$0xf] }
 0x16d   : > { %v1192_v8 = vor.u32 %v1190_v4, %v1189_v35  ;;  %v2266_v51 = vsel %vm1557_vm11, %v2261_v3, %v2265_v26  ;;  %v1195_v33 = vshrl.u32 %v4883_v31, 16  ;;  %v2244_v58 = vshrl.u32 %v6198_v45, 16 }
 0x16e   : > { %v1193_v54 = vrot.slane %v1189_v35, 4  ;;  %v1175_v30 = vor.u32 %v1173_v57, %v6208_v37  ;;  %2377 = vrot.lane.b32.xlu1 %v2266_v51, %s5623_s26  ;;  %v1198_v14 = vshll.u32 %v4883_v31, 16  ;;  %v2248_v52 = vrot.slane %v2246_v32, 1  ;;  %v2036_v35 = vld [vmem:[#allocation2 + $0x78] sm:$0xe] }
 0x16f   : > { %v1359_v9 = vsel %vm5887_vm8, %v1192_v8, %v1358_v36  ;;  %v1197_v10 = vrot.slane %v1195_v33, 7  ;;  %v2253_v43 = vrot.slane %v2251_v42, 1  ;;  %v720_v46 = vmax.f32 %v680_v44, 0.0  ;;  %v2035_v36 = vld [vmem:[#allocation2 + $0x6c] sm:$0xe] }
 0x170   : > { %1360 = vst [vmem:[#allocation2 + $0xc0] sm:$0xf] %v1359_v9  ;;  %v1352_v61 = vsel %vm5887_vm8, %v1175_v30, %v1351_v50  ;;  %v2249_v1 = vor.u32 %v2248_v52, %v2244_v58  ;;  %v2464_v2 = vrot.slane %v4695_v39, 1  ;;  %v2465_v22 = vrot.slane %v6164_v48, 1  ;;  %v2002_v42 = vld [vmem:[#allocation2 + $0x94] sm:$0xf] }
 0x171   : > { %1353 = vst [vmem:[#allocation2 + $0xb4] sm:$0xf] %v1352_v61  ;;  %v1200_v21 = vor.u32 %v1198_v14, %v1197_v10  ;;  %v1202_v59 = vrot.slane %v1197_v10, 4  ;;  %v4881_v5 = vpack.c.bf16 %v720_v46, %v720_v46  ;;  %v4694_v6 = vcombine.low %v2033_v55, %v6182_v60  ;;  %v6233_v48 = vld [vmem:[#allocation2 + $0x74] ss:$0 sps:$4 sm:$0x11]  }
 0x172   : > { %v2254_v12 = vsel %vm1557_vm11, %v2249_v1, %v2253_v43  ;;  %v2466_v15 = vsel %vm1830_vm10, %v2464_v2, %v2465_v22  ;;  %v2462_v47 = vrot.slane %v6200_v40, 1  ;;  %v6231_v16 = vcombine.low %v1997_v7, %v6217_v56  ;;  %v1355_v40 = vld [vmem:[#allocation2 + $0xbc] sm:$0x1]  ;;  %v6253_v51 = vld [vmem:[#allocation2 + $0x98] ss:$0 sps:$4 sm:$0x11]  }
 0x173   : > { %v1201_v19 = vsel %vm5894_vm9, %v1193_v54, %v1200_v21  ;;  %v1363_v23 = vsel %vm5802_vm3, %v1202_v59, %v1362_v41  ;;  %2375 = vrot.lane.b32.xlu0 %v2254_v12, %s5623_s26  ;;  %v1178_v60 = vshrl.u32 %v4881_v5, 16  ;;  %2505 = vrot.lane.b32.xlu1 %v2466_v15, %s5622_s24  ;;  %v2461_v4 = vrot.slane %v4694_v6, 1  ;;  %v2001_v14 = vld [vmem:[#allocation2 + $0x90] sm:$0xf]  ;;  %v2000_v41 = vld [vmem:[#allocation2 + $0x88] sm:$0xf] }
 0x174   : > { %1361 = vst.msk [vmem:[#allocation2 + $0xc4] sm:$0xf] %vm723_vm6, %v1201_v19  ;;  %1364 = vst [vmem:[#allocation2 + $0xc8] sm:$0x1] %v1363_v23  ;;  %v2282_v25 = vshll.u32 %v6231_v16, 16  ;;  %v2287_v26 = vshll.u32 %v6224_v29, 16  ;;  %v6245_v57 = vcombine.low %v1995_v24, %v1996_v11  ;;  %v4697_v34 = vcombine.low %v2036_v35, %v6217_v56 }
 0x175   : > { %v1180_v27 = vrot.slane %v1178_v60, 7  ;;  %v1181_v28 = vshll.u32 %v4881_v5, 16  ;;  %v2280_v18 = vshrl.u32 %v6231_v16, 16  ;;  %v2463_v3 = vsel %vm1830_vm10, %v2461_v4, %v2462_v47  ;;  %v6261_v9 = vld [vmem:[#allocation2 + $0x8c] ss:$0 sps:$4 sm:$0x11]  }
 0x176   : > { %v2284_v31 = vrot.slane %v2282_v25, 1  ;;  %v2275_v32 = vshll.u32 %v6233_v48, 16  ;;  %v1176_v44 = vrot.slane %v6208_v37, 4  ;;  %v2270_v50 = vshll.u32 %v6245_v57, 16  ;;  %v1999_v1 = vld [vmem:[#allocation2 + $0x84] sm:$0xf] }
 0x177   : > { %v1183_v39 = vor.u32 %v1181_v28, %v1180_v27  ;;  %v1185_v8 = vrot.slane %v1180_v27, 4  ;;  %2503 = vrot.lane.b32.xlu0 %v2463_v3, %s5622_s24  ;;  %v2289_v58 = vrot.slane %v2287_v26, 1  ;;  %v2471_v54 = vrot.slane %v6224_v29, 1  ;;  %v2038_v29 = vld [vmem:[#allocation2 + $0x90] sm:$0xe] }
 0x178   : > { %v2285_v33 = vor.u32 %v2284_v31, %v2280_v18  ;;  %v4696_v30 = vcombine.low %v2035_v36, %v1996_v11  ;;  %v2268_v55 = vshrl.u32 %v6245_v57, 16  ;;  %v2272_v56 = vrot.slane %v2270_v50, 1  ;;  %v2005_v5 = vld [vmem:[#allocation2 + $0xa8] sm:$0xf]  ;;  %v6273_v6 = vld [vmem:[#allocation2 + $0xac] sm:$0xf] }
 0x179   : > { %v1184_v52 = vsel %vm5894_vm9, %v1176_v44, %v1183_v39  ;;  %v1356_v37 = vsel %vm5802_vm3, %v1185_v8, %v1355_v40  ;;  %v2277_v43 = vrot.slane %v2275_v32, 1  ;;  %v2470_v46 = vrot.slane %v4697_v34, 1  ;;  %v6278_v47 = vld [vmem:[#allocation2 + $0xa0] sm:$0xf]  ;;  %v2037_v25 = vld [vmem:[#allocation2 + $0x84] sm:$0xe] }
 0x17a   : > { %1354 = vst.msk [vmem:[#allocation2 + $0xb8] sm:$0xf] %vm723_vm6, %v1184_v52  ;;  %1357 = vst [vmem:[#allocation2 + $0xbc] sm:$0x1] %v1356_v37  ;;  %v2290_v10 = vsel %vm1557_vm11, %v2285_v33, %v2289_v58  ;;  %v6265_v61 = vcombine.low %v2001_v14, %v2002_v42  ;;  %v2273_v62 = vor.u32 %v2272_v56, %v2268_v55  ;;  %v2467_v17 = vrot.slane %v4696_v30, 1 }
 0x17b   : > { %2381 = vrot.lane.b32.xlu1 %v2290_v10, %s5623_s26  ;;  %v2468_v2 = vrot.slane %v6233_v48, 1  ;;  %v6269_v22 = vcombine.low %v1999_v1, %v2000_v41  ;;  %v2311_v59 = vshll.u32 %v6253_v51, 16  ;;  %v2299_v12 = vshll.u32 %v6261_v9, 16  ;;  %v6283_v60 = vld [vmem:[#allocation2 + $0xb0] ss:$0 sps:$4 sm:$0x11]  }
 0x17c   : > { %v2306_v21 = vshll.u32 %v6265_v61, 16  ;;  %v2278_v7 = vsel %vm1557_vm11, %v2273_v62, %v2277_v43  ;;  %v4699_v15 = vcombine.low %v2038_v29, %v2002_v42  ;;  %v2472_v48 = vsel %vm1830_vm10, %v2470_v46, %v2471_v54  ;;  %v2003_v27 = vld [vmem:[#allocation2 + $0x9c] sm:$0xf]  ;;  %v6294_v31 = vld [vmem:[#allocation2 + $0xa4] ss:$0 sps:$4 sm:$0x11]  }
 0x17d   : > { %v2294_v11 = vshll.u32 %v6269_v22, 16  ;;  %2379 = vrot.lane.b32.xlu0 %v2278_v7, %s5623_s26  ;;  %v2304_v19 = vshrl.u32 %v6265_v61, 16  ;;  %v2469_v24 = vsel %vm1830_vm10, %v2467_v17, %v2468_v2  ;;  %v2292_v40 = vshrl.u32 %v6269_v22, 16  ;;  %v6297_v44 = vld [vmem:[#allocation2 + $0xc4] sm:$0xf] }
 0x17e   : > { %v2308_v23 = vrot.slane %v2306_v21, 1  ;;  %v6289_v26 = vcombine.low %v2005_v5, %v6273_v6  ;;  %v2313_v18 = vrot.slane %v2311_v59, 1  ;;  %v4698_v35 = vcombine.low %v2037_v25, %v2000_v41  ;;  %v2009_v14 = vld [vmem:[#allocation2 + $0xc0] sm:$0xf]  ;;  %v2040_v43 = vld [vmem:[#allocation2 + $0xa8] sm:$0xe] }
 0x17f   : > { %2509 = vrot.lane.b32.xlu1 %v2472_v48, %s5622_s24  ;;  %v2296_v4 = vrot.slane %v2294_v11, 1  ;;  %v6292_v3 = vcombine.low %v2003_v27, %v6278_v47  ;;  %v2301_v34 = vrot.slane %v2299_v12, 1  ;;  %v2476_v36 = vrot.slane %v4699_v15, 1  ;;  %v2007_v2 = vld [vmem:[#allocation2 + $0xb4] sm:$0xf] }
 0x180   : > { %v2309_v28 = vor.u32 %v2308_v23, %v2304_v19  ;;  %v2330_v42 = vshll.u32 %v6289_v26, 16  ;;  %v2477_v8 = vrot.slane %v6253_v51, 1  ;;  %v2335_v50 = vshll.u32 %v6283_v60, 16  ;;  %v6325_v5 = vld [vmem:[#allocation2 + $0x10] sm:$0xf] }
 0x181   : > { %v2297_v32 = vor.u32 %v2296_v4, %v2292_v40  ;;  %2507 = vrot.lane.b32.xlu0 %v2469_v24, %s5622_s24  ;;  %v2318_v33 = vshll.u32 %v6292_v3, 16  ;;  %v2328_v54 = vshrl.u32 %v6289_v26, 16  ;;  %v2473_v41 = vrot.slane %v4698_v35, 1  ;;  %v6308_v55 = vld [vmem:[#allocation2 + $0xb8] sm:$0xf] }
 0x182   : > { %v2314_v39 = vsel %vm1557_vm11, %v2309_v28, %v2313_v18  ;;  %v2332_v30 = vrot.slane %v2330_v42, 1  ;;  %v2474_v52 = vrot.slane %v6261_v9, 1  ;;  %v2316_v51 = vshrl.u32 %v6292_v3, 16  ;;  %v6318_v9 = vld [vmem:[#allocation2 + $0xc8] ss:$0 sps:$4 sm:$0x11]  }
 0x183   : > { %2385 = vrot.lane.b32.xlu1 %v2314_v39, %s5623_s26  ;;  %v2302_v58 = vsel %vm1557_vm11, %v2297_v32, %v2301_v34  ;;  %v2320_v37 = vrot.slane %v2318_v33, 1  ;;  %v2323_v10 = vshll.u32 %v6294_v31, 16  ;;  %v6313_v46 = vcombine.low %v2009_v14, %v6297_v44  ;;  %v2039_v12 = vld [vmem:[#allocation2 + $0x9c] sm:$0xe]  ;;  %v1367_v15 = vld [vmem:[#allocation2 + $0xc] sm:$0xf] }
 0x184   : > { %v2333_v56 = vor.u32 %v2332_v30, %v2328_v54  ;;  %v2478_v1 = vsel %vm1830_vm10, %v2476_v36, %v2477_v8  ;;  %v2337_v62 = vrot.slane %v2335_v50, 1  ;;  %v4701_v17 = vcombine.low %v2040_v43, %v6273_v6  ;;  %v1365_v6 = vld [vmem:[#allocation2] sm:$0xf]  ;;  %v6329_v48 = vld [vmem:[#allocation2 + $0x4] sm:$0xf] }
 0x185   : > { %2383 = vrot.lane.b32.xlu0 %v2302_v58, %s5623_s26  ;;  %v2321_v29 = vor.u32 %v2320_v37, %v2316_v51  ;;  %v2354_v21 = vshll.u32 %v6313_v46, 16  ;;  %v6323_v59 = vcombine.low %v2007_v2, %v6308_v55  ;;  %v2475_v7 = vsel %vm1830_vm10, %v2473_v41, %v2474_v52  ;;  %v6332_v40 = vld [vmem:[#allocation2 + $0xbc] ss:$0 sps:$4 sm:$0x11]   ;;  %v2042_v50 = vld [vmem:[#allocation2 + $0xc0] sm:$0xe] }
 0x186   : > { %v2338_v11 = vsel %vm1557_vm11, %v2333_v56, %v2337_v62  ;;  %v2325_v19 = vrot.slane %v2323_v10, 1  ;;  %v4700_v23 = vcombine.low %v2039_v12, %v6278_v47  ;;  %v2482_v25 = vrot.slane %v4701_v17, 1  ;;  %v6355_v41 = vld [vmem:[#allocation2 + $0x8] ss:$0 sps:$4 sm:$0x11]  }
 0x187   : > { %2513 = vrot.lane.b32.xlu1 %v2478_v1, %s5622_s24  ;;  %v2356_v24 = vrot.slane %v2354_v21, 1  ;;  %v2342_v4 = vshll.u32 %v6323_v59, 16  ;;  %v2483_v27 = vrot.slane %v6283_v60, 1  ;;  %v2352_v28 = vshrl.u32 %v6313_v46, 16  ;;  %v6358_v52 = vld [vmem:[#allocation2 + $0x28] sm:$0xf] }
 0x188   : > { %v2359_v18 = vshll.u32 %v6318_v9, 16  ;;  %v2326_v35 = vsel %vm1557_vm11, %v2321_v29, %v2325_v19  ;;  %v6342_v47 = vcombine.low %v1367_v15, %v6325_v5  ;;  %v6345_v36 = vcombine.low %v1365_v6, %v6329_v48  ;;  %v2041_v56 = vld [vmem:[#allocation2 + $0xb4] sm:$0xe]  ;;  %v5435_v51 = vld [vmem:[#allocation2 + $0x14] ss:$0 sps:$4 sm:$0x11]  }
 0x189   : > { %2511 = vrot.lane.b32.xlu0 %v2475_v7, %s5622_s24  ;;  %v2344_v32 = vrot.slane %v2342_v4, 1  ;;  %v2357_v34 = vor.u32 %v2356_v24, %v2352_v28  ;;  %v2479_v42 = vrot.slane %v4700_v23, 1  ;;  %v2480_v39 = vrot.slane %v6294_v31, 1  ;;  %v1371_v1 = vld [vmem:[#allocation2 + $0x24] sm:$0xf] }
 0x18a   : > { %v2340_v60 = vshrl.u32 %v6323_v59, 16  ;;  %v2347_v8 = vshll.u32 %v6332_v40, 16  ;;  %v2484_v33 = vsel %vm1830_vm10, %v2482_v25, %v2483_v27  ;;  %v2361_v58 = vrot.slane %v2359_v18, 1  ;;  %v6368_v21 = vld [vmem:[#allocation2 + $0x1c] sm:$0xf] }
 0x18b   : > { %2389 = vrot.lane.b32.xlu1 %v2338_v11, %s5623_s26  ;;  %v4703_v54 = vcombine.low %v2042_v50, %v6297_v44  ;;  %v1573_v30 = vshll.u32 %v6342_v47, 16  ;;  %v1561_v31 = vshll.u32 %v6345_v36, 16  ;;  %v2481_v10 = vsel %vm1830_vm10, %v2479_v42, %v2480_v39  ;;  %v1369_v15 = vld [vmem:[#allocation2 + $0x18] sm:$0xf]  ;;  %v1414_v4 = vld [vmem:[#allocation2 + $0xc] sm:$0xe] }
 0x18c   : > { %v2345_v14 = vor.u32 %v2344_v32, %v2340_v60  ;;  %v2362_v37 = vsel %vm1557_vm11, %v2357_v34, %v2361_v58  ;;  %v2349_v43 = vrot.slane %v2347_v8, 1  ;;  %v4702_v44 = vcombine.low %v2041_v56, %v6308_v55  ;;  %v5439_v60 = vld [vmem:[#allocation2 + $0x2c] ss:$0 sps:$4 sm:$0x11]   ;;  %v1375_v58 = vld [vmem:[#allocation2 + $0x3c] sm:$0xf] }
 0x18d   : > { %2387 = vrot.lane.b32.xlu0 %v2326_v35, %s5623_s26  ;;  %v2488_v62 = vrot.slane %v4703_v54, 1  ;;  %v2489_v17 = vrot.slane %v6318_v9, 1  ;;  %v1575_v2 = vrot.slane %v1573_v30, 1  ;;  %v6366_v29 = vcombine.low %v1371_v1, %v6358_v52  ;;  %v1413_v9 = vld [vmem:[#allocation2] sm:$0xe] }
 0x18e   : > { %v2350_v7 = vsel %vm1557_vm11, %v2345_v14, %v2349_v43  ;;  %v1559_v11 = vshrl.u32 %v6345_v36, 16  ;;  %v1563_v12 = vrot.slane %v1561_v31, 1  ;;  %v1566_v55 = vshll.u32 %v6355_v41, 16 }
 0x18f   : > { %2517 = vrot.lane.b32.xlu1 %v2484_v33, %s5622_s24  ;;  %v1571_v6 = vshrl.u32 %v6342_v47, 16  ;;  %v1578_v19 = vshll.u32 %v5435_v51, 16  ;;  %v2485_v23 = vrot.slane %v4702_v44, 1  ;;  %v2486_v24 = vrot.slane %v6332_v40, 1  ;;  %v6385_v40 = vld [vmem:[#allocation2 + $0x40] sm:$0xf] }
 0x190   : > { %v6377_v25 = vcombine.low %v1369_v15, %v6368_v21  ;;  %v2490_v27 = vsel %vm1830_vm10, %v2488_v62, %v2489_v17  ;;  %v4641_v18 = vcombine.low %v1414_v4, %v6325_v5  ;;  %v1597_v35 = vshll.u32 %v6366_v29, 16  ;;  %v1373_v44 = vld [vmem:[#allocation2 + $0x30] sm:$0xf]  ;;  %v1416_v62 = vld [vmem:[#allocation2 + $0x24] sm:$0xe] }
 0x191   : > { %2515 = vrot.lane.b32.xlu0 %v2481_v10, %s5622_s24  ;;  %v1576_v28 = vor.u32 %v1575_v2, %v1571_v6  ;;  %v1564_v32 = vor.u32 %v1563_v12, %v1559_v11  ;;  %v1568_v34 = vrot.slane %v1566_v55, 1  ;;  %v4640_v42 = vcombine.low %v1413_v9, %v6329_v48  ;;  %v6394_v48 = vld [vmem:[#allocation2 + $0x34] sm:$0xf]  ;;  %v1415_v6 = vld [vmem:[#allocation2 + $0x18] sm:$0xe] }
 0x192   : > { %v1580_v39 = vrot.slane %v1578_v19, 1  ;;  %v2487_v8 = vsel %vm1830_vm10, %v2485_v23, %v2486_v24  ;;  %v1835_v50 = vrot.slane %v5435_v51, 1  ;;  %v1585_v33 = vshll.u32 %v6377_v25, 16  ;;  %v5441_v51 = vld [vmem:[#allocation2 + $0x20] ss:$0 sps:$4 sm:$0x11]  }
 0x193   : > { %2393 = vrot.lane.b32.xlu1 %v2362_v37, %s5623_s26  ;;  %v1834_v54 = vrot.slane %v4641_v18, 1  ;;  %v1599_v30 = vrot.slane %v1597_v35, 1  ;;  %v6392_v14 = vcombine.low %v1375_v58, %v6385_v40  ;;  %v1569_v31 = vsel %vm1557_vm11, %v1564_v32, %v1568_v34  ;;  %v6410_v19 = vld [vmem:[#allocation2 + $0x58] sm:$0xf]  ;;  %v1377_v58 = vld [vmem:[#allocation2 + $0x48] sm:$0xf] }
 0x194   : > { %v1581_v5 = vsel %vm1557_vm11, %v1576_v28, %v1580_v39  ;;  %v1831_v37 = vrot.slane %v4640_v42, 1  ;;  %v1832_v56 = vrot.slane %v6355_v41, 1  ;;  %v1595_v10 = vshrl.u32 %v6366_v29, 16  ;;  %v6413_v24 = vld [vmem:[#allocation2 + $0x44] ss:$0 sps:$4 sm:$0x11]  }
 0x195   : > { %2391 = vrot.lane.b32.xlu0 %v2350_v7, %s5623_s26  ;;  %v1602_v43 = vshll.u32 %v5439_v60, 16  ;;  %v1587_v1 = vrot.slane %v1585_v33, 1  ;;  %v6401_v17 = vcombine.low %v1373_v44, %v6394_v48  ;;  %v1836_v2 = vsel %vm1830_vm10, %v1834_v54, %v1835_v50  ;;  %v1379_v28 = vld [vmem:[#allocation2 + $0x54] sm:$0xf]  ;;  %v6421_v42 = vld [vmem:[#allocation2 + $0x4c] sm:$0xf] }
 0x196   : > { %v1600_v7 = vor.u32 %v1599_v30, %v1595_v10  ;;  %v4643_v11 = vcombine.low %v1416_v62, %v6358_v52  ;;  %v1621_v12 = vshll.u32 %v6392_v14, 16  ;;  %v1833_v41 = vsel %vm1830_vm10, %v1831_v37, %v1832_v56  ;;  %v6424_v39 = vld [vmem:[#allocation2 + $0x38] ss:$0 sps:$4 sm:$0x11]   ;;  %v1418_v30 = vld [vmem:[#allocation2 + $0x3c] sm:$0xe] }
 0x197   : > { %2521 = vrot.lane.b32.xlu1 %v2490_v27, %s5622_s24  ;;  %v1583_v55 = vshrl.u32 %v6377_v25, 16  ;;  %v1590_v15 = vshll.u32 %v5441_v51, 16  ;;  %v1604_v9 = vrot.slane %v1602_v43, 1  ;;  %v4642_v23 = vcombine.low %v1415_v6, %v6368_v21 }
 0x198   : > { %v1841_v27 = vrot.slane %v5439_v60, 1  ;;  %v1609_v52 = vshll.u32 %v6401_v17, 16  ;;  %v1840_v35 = vrot.slane %v4643_v11, 1  ;;  %v1623_v32 = vrot.slane %v1621_v12, 1 }
 0x199   : > { %2519 = vrot.lane.b32.xlu0 %v2487_v8, %s5622_s24  ;;  %v1588_v4 = vor.u32 %v1587_v1, %v1583_v55  ;;  %v1605_v18 = vsel %vm1557_vm11, %v1600_v7, %v1604_v9  ;;  %v6419_v34 = vcombine.low %v1379_v28, %v6410_v19  ;;  %v1592_v21 = vrot.slane %v1590_v15, 1  ;;  %v6439_v1 = vld [vmem:[#allocation2 + $0x70] sm:$0xf]  ;;  %v5451_v11 = vld [vmem:[#allocation2 + $0x5c] ss:$0 sps:$4 sm:$0x11]  }
 0x19a   : > { %v1837_v60 = vrot.slane %v4642_v23, 1  ;;  %v1838_v8 = vrot.slane %v5441_v51, 1  ;;  %v1619_v50 = vshrl.u32 %v6392_v14, 16  ;;  %v1626_v33 = vshll.u32 %v6413_v24, 16  ;;  %v1417_v7 = vld [vmem:[#allocation2 + $0x30] sm:$0xe] }
 0x19b   : > { %1752 = vrot.lane.b32.xlu1 %v1581_v5, %s5623_s26  ;;  %v1593_v5 = vsel %vm1557_vm11, %v1588_v4, %v1592_v21  ;;  %v1611_v54 = vrot.slane %v1609_v52, 1  ;;  %v1842_v37 = vsel %vm1830_vm10, %v1840_v35, %v1841_v27  ;;  %v4645_v10 = vcombine.low %v1418_v30, %v6385_v40  ;;  %v1383_v15 = vld [vmem:[#allocation2 + $0x6c] sm:$0xf]  ;;  %v6450_v27 = vld [vmem:[#allocation2 + $0x64] sm:$0xf] }
 0x19c   : > { %v1624_v56 = vor.u32 %v1623_v32, %v1619_v50  ;;  %v1645_v51 = vshll.u32 %v6419_v34, 16  ;;  %v1607_v43 = vshrl.u32 %v6401_v17, 16  ;;  %v1614_v44 = vshll.u32 %v6424_v39, 16  ;;  %v1381_v21 = vld [vmem:[#allocation2 + $0x60] sm:$0xf] }
 0x19d   : > { %1750 = vrot.lane.b32.xlu0 %v1569_v31, %s5623_s26  ;;  %v6430_v31 = vcombine.low %v1377_v58, %v6421_v42  ;;  %v1839_v62 = vsel %vm1830_vm10, %v1837_v60, %v1838_v8  ;;  %v4644_v40 = vcombine.low %v1417_v7, %v6394_v48  ;;  %v1846_v9 = vrot.slane %v4645_v10, 1  ;;  %v1420_v48 = vld [vmem:[#allocation2 + $0x54] sm:$0xe]  ;;  %v6471_v10 = vld [vmem:[#allocation2 + $0x88] sm:$0xf] }
 0x19e   : > { %v1612_v12 = vor.u32 %v1611_v54, %v1607_v43  ;;  %v1647_v23 = vrot.slane %v1645_v51, 1  ;;  %v6448_v4 = vcombine.low %v1383_v15, %v6439_v1  ;;  %v1616_v52 = vrot.slane %v1614_v44, 1  ;;  %v1419_v54 = vld [vmem:[#allocation2 + $0x48] sm:$0xe] }
 0x19f   : > { %1881 = vrot.lane.b32.xlu1 %v1836_v2, %s5622_s24  ;;  %v1628_v2 = vrot.slane %v1626_v33, 1  ;;  %v1633_v55 = vshll.u32 %v6430_v31, 16  ;;  %v1844_v28 = vrot.slane %v6424_v39, 1  ;;  %v1650_v35 = vshll.u32 %v5451_v11, 16 }
 0x1a0   : > { %v4647_v32 = vcombine.low %v1420_v48, %v6410_v19  ;;  %v1617_v60 = vsel %vm1557_vm11, %v1612_v12, %v1616_v52  ;;  %v1843_v8 = vrot.slane %v4644_v40, 1  ;;  %v6460_v33 = vcombine.low %v1381_v21, %v6450_v27  ;;  %v6464_v39 = vld [vmem:[#allocation2 + $0x74] ss:$0 sps:$4 sm:$0x11]   ;;  %v1387_v12 = vld [vmem:[#allocation2 + $0x84] sm:$0xf] }
 0x1a1   : > { %1879 = vrot.lane.b32.xlu0 %v1833_v41, %s5622_s24  ;;  %v1847_v41 = vrot.slane %v6413_v24, 1  ;;  %v1629_v6 = vsel %vm1557_vm11, %v1624_v56, %v1628_v2  ;;  %v6453_v24 = vld [vmem:[#allocation2 + $0x50] ss:$0 sps:$4 sm:$0x11]   ;;  %v1635_v50 = vrot.slane %v1633_v55, 1  ;;  %v1669_v30 = vshll.u32 %v6448_v4, 16 }
 0x1a2   : > { %v1631_v19 = vshrl.u32 %v6430_v31, 16  ;;  %v4646_v56 = vcombine.low %v1419_v54, %v6421_v42  ;;  %v1652_v51 = vrot.slane %v1650_v35, 1  ;;  %v1852_v43 = vrot.slane %v4647_v32, 1  ;;  %v6480_v55 = vld [vmem:[#allocation2 + $0x68] ss:$0 sps:$4 sm:$0x11]  }
 0x1a3   : > { %1756 = vrot.lane.b32.xlu1 %v1605_v18, %s5623_s26  ;;  %v1643_v18 = vshrl.u32 %v6419_v34, 16  ;;  %v1848_v58 = vsel %vm1830_vm10, %v1846_v9, %v1847_v41  ;;  %v1853_v44 = vrot.slane %v5451_v11, 1  ;;  %v1657_v7 = vshll.u32 %v6460_v33, 16  ;;  %v5474_v41 = vld [vmem:[%s7320_s3 + $0x14] ss:$0 sps:$4 sm:$0xff]   ;;  %v5478_v32 = vld [vmem:[%s7320_s3] sm:$0xff]  }
 0x1a4   : > { %v1636_v2 = vor.u32 %v1635_v50, %v1631_v19  ;;  %v1671_v42 = vrot.slane %v1669_v30, 1  ;;  %v6483_v15 = vcombine.low %v1387_v12, %v6471_v10  ;;  %v6485_v11 = vld [vmem:[#allocation2 + $0x7c] sm:$0xf]  ;;  %v1849_v9 = vrot.slane %v4646_v56, 1  ;;  %v1422_v48 = vld [vmem:[#allocation2 + $0x6c] sm:$0xe]  ;;  %5327 = vmatprep.subr.msk.bf16.mxu1 %vm2633_vm13, %v5474_v41 }
 0x1a5   : > { %1754 = vrot.lane.b32.xlu0 %v1593_v5, %s5623_s26  ;;  %v1648_v5 = vor.u32 %v1647_v23, %v1643_v18  ;;  %v1850_v23 = vrot.slane %v6453_v24, 1  ;;  %v1674_v52 = vshll.u32 %v6464_v39, 16  ;;  %v1667_v18 = vshrl.u32 %v6448_v4, 16  ;;  %v1385_v35 = vld [vmem:[#allocation2 + $0x78] sm:$0xf] }
 0x1a6   : > { %v1421_v54 = vld [vmem:[#allocation2 + $0x60] sm:$0xe]  ;;  %v1693_v30 = vshll.u32 %v6483_v15, 16  ;;  %v1662_v56 = vshll.u32 %v6480_v55, 16 }
 0x1a7   : > { %1885 = vrot.lane.b32.xlu1 %v1842_v37, %s5622_s24  ;;  %v1638_v37 = vshll.u32 %v6453_v24, 16  ;;  %v1653_v40 = vsel %vm1557_vm11, %v1648_v5, %v1652_v51  ;;  %v6498_v24 = vcombine.low %v1385_v35, %v6485_v11  ;;  %v1672_v5 = vor.u32 %v1671_v42, %v1667_v18  ;;  %v6509_v51 = vld [vmem:[#allocation2 + $0xa0] sm:$0xf]  ;;  %v1391_v42 = vld [vmem:[#allocation2 + $0x9c] sm:$0xf] }
 0x1a8   : > { %v4648_v12 = vcombine.low %v1421_v54, %v6450_v27  ;;  %v1664_v27 = vrot.slane %v1662_v56, 1  ;;  %v1423_v56 = vld [vmem:[#allocation2 + $0x78] sm:$0xe] }
 0x1a9   : > { %1883 = vrot.lane.b32.xlu0 %v1839_v62, %s5622_s24  ;;  %v1845_v62 = vsel %vm1830_vm10, %v1843_v8, %v1844_v28  ;;  %v1854_v28 = vsel %vm1830_vm10, %v1852_v43, %v1853_v44  ;;  %v4649_v8 = vcombine.low %v1422_v48, %v6439_v1  ;;  %v1655_v1 = vshrl.u32 %v6460_v33, 16  ;;  %v6526_v48 = vld [vmem:[#allocation2 + $0x94] sm:$0xf] }
 0x1aa   : > { %v1851_v44 = vsel %vm1830_vm10, %v1849_v9, %v1850_v23  ;;  %v1695_v23 = vrot.slane %v1693_v30, 1  ;;  %v1855_v54 = vrot.slane %v4648_v12, 1 }
 0x1ab   : > { %1760 = vrot.lane.b32.xlu1 %v1629_v6, %s5623_s26  ;;  %v1640_v6 = vrot.slane %v1638_v37, 1  ;;  %v2492_v50 = vpop.permute.xlu1 %2491  ;;  %v2635_v37 = vsel %vm2633_vm13, %v5474_v41, 0  ;;  %v6517_v41 = vld [vmem:[#allocation2 + $0x80] ss:$0 sps:$4 sm:$0x11]   ;;  %v1858_v9 = vrot.slane %v4649_v8, 1 }
 0x1ac   : > { %5026 = vmatpush3.bf16.msra.mxu1 %v2635_v37  ;;  %v1691_v8 = vshrl.u32 %v6483_v15, 16 }
 0x1ad   : > { %1758 = vrot.lane.b32.xlu0 %v1617_v60, %s5623_s26  ;;  %v1641_v21 = vsel %vm1557_vm11, %v1636_v2, %v1640_v6  ;;  %v1659_v60 = vrot.slane %v1657_v7, 1  ;;  %v6513_v2 = vld [vmem:[#allocation2 + $0x8c] ss:$0 sps:$4 sm:$0x11]   ;;  %5059 = vmatprep.subr.bf16.mxu1 %v5478_v32  ;;  %v1859_v7 = vrot.slane %v6464_v39, 1 }
 0x1ae   : > { %v1696_v37 = vor.u32 %v1695_v23, %v1691_v8 }
 0x1af   : > { %1889 = vrot.lane.b32.xlu1 %v1848_v58, %s5622_s24 }
 0x1b1   : > { %1887 = vrot.lane.b32.xlu0 %v1845_v62, %s5622_s24  ;;  %v1676_v62 = vrot.slane %v1674_v52, 1  ;;  %v6524_v52 = vcombine.low %v1391_v42, %v6509_v51  ;;  %v2494_v18 = vpop.permute.xlu1 %2493 }
 0x1b3   : > { %1764 = vrot.lane.b32.xlu1 %v1653_v40, %s5623_s26  ;;  %v1681_v40 = vshll.u32 %v6498_v24, 16  ;;  %v1677_v6 = vsel %vm1557_vm11, %v1672_v5, %v1676_v62  ;;  %v1686_v62 = vshll.u32 %v6517_v41, 16 }
 0x1b5   : > { %v2364_v58 = vpop.permute.xlu0 %2363  ;;  %1762 = vrot.lane.b32.xlu0 %v1641_v21, %s5623_s26  ;;  %v6534_v21 = vld [vmem:[%s7320_s3 + $0x8] ss:$0 sps:$4 sm:$0xff]   ;;  %v1683_v30 = vrot.slane %v1681_v40, 1  ;;  %v6557_v40 = vld [vmem:[#allocation2 + $0xa4] ss:$0 sps:$4 sm:$0x11]  }
 0x1b6   : > { %v2524_v19 = vsel %vm1911_vm12, %v5994_v38, %v2364_v58  ;;  %v1660_v38 = vor.u32 %v1659_v60, %v1655_v1  ;;  %v1856_v60 = vrot.slane %v6480_v55, 1  ;;  %v1860_v55 = vsel %vm1830_vm10, %v1858_v9, %v1859_v7  ;;  %v1395_v9 = vld [vmem:[#allocation2 + $0xb4] sm:$0xf] }
 0x1b7   : > { %1893 = vrot.lane.b32.xlu1 %v1854_v28, %s5622_s24  ;;  %v2556_v43 = vsel %vm481_vm0, %v2524_v19, %v2492_v50  ;;  %v1389_v28 = vld [vmem:[#allocation2 + $0x90] sm:$0xf]  ;;  %v1698_v50 = vshll.u32 %v6513_v2, 16  ;;  %v1424_v19 = vld [vmem:[#allocation2 + $0x84] sm:$0xe]  ;;  %v4650_v7 = vcombine.low %v1423_v56, %v6485_v11 }
 0x1b8   : > { %5027 = vmatprep.mubr.msk.bf16.mxu1 %vm2600_vm14, %v2556_v43  ;;  %v1665_v5 = vsel %vm1557_vm11, %v1660_v38, %v1664_v27  ;;  %v4651_v1 = vcombine.low %v1424_v19, %v6471_v10  ;;  %v1717_v43 = vshll.u32 %v6524_v52, 16  ;;  %v6552_v38 = vld [vmem:[#allocation2 + $0xb8] sm:$0xf]  ;;  %v1857_v10 = vsel %vm1830_vm10, %v1855_v54, %v1856_v60  ;;  %v6567_v11 = vld [vmem:[#allocation2 + $0xac] sm:$0xf] }
 0x1b9   : > { %1891 = vrot.lane.b32.xlu0 %v1851_v44, %s5622_s24  ;;  %v1679_v44 = vshrl.u32 %v6498_v24, 16  ;;  %v1700_v12 = vrot.slane %v1698_v50, 1  ;;  %v6570_v60 = vld [vmem:[#allocation2 + $0x98] ss:$0 sps:$4 sm:$0x11]   ;;  %v1861_v8 = vrot.slane %v4650_v7, 1 }
 0x1ba   : > { %v2366_v39 = vpop.permute.xlu0 %2365  ;;  %v1719_v27 = vrot.slane %v1717_v43, 1  ;;  %v1862_v50 = vrot.slane %v6517_v41, 1  ;;  %v1393_v54 = vld [vmem:[#allocation2 + $0xa8] sm:$0xf] }
 0x1bb   : > { %1768 = vrot.lane.b32.xlu1 %v1677_v6, %s5623_s26  ;;  %v2526_v35 = vsel %vm1911_vm12, %v6013_v63, %v2366_v39  ;;  %v6542_v63 = vcombine.low %v1389_v28, %v6526_v48  ;;  %v1684_v42 = vor.u32 %v1683_v30, %v1679_v44  ;;  %v1701_v23 = vsel %vm1557_vm11, %v1696_v37, %v1700_v12  ;;  %v1426_v28 = vld [vmem:[#allocation2 + $0x9c] sm:$0xe]  ;;  %v1425_v12 = vld [vmem:[#allocation2 + $0x90] sm:$0xe]  ;;  %v6586_v7 = vld [vmem:[#allocation2 + $0x28] sm:$0xf] }
 0x1bc   : > { %v2558_v58 = vsel %vm481_vm0, %v2526_v35, %v2494_v18  ;;  %v1864_v39 = vrot.slane %v4651_v1, 1  ;;  %v6565_v18 = vcombine.low %v1395_v9, %v6552_v38  ;;  %v1688_v35 = vrot.slane %v1686_v62, 1 }
 0x1bd   : > { %5028 = vmatmul.mubr.msk.bf16.vlgmr.msra.gmra.mrb[0].mxu1 %vm2600_vm14, %v2558_v58  ;;  %1766 = vrot.lane.b32.xlu0 %v1665_v5, %s5623_s26  ;;  %v1705_v6 = vshll.u32 %v6542_v63, 16  ;;  %v1715_v58 = vshrl.u32 %v6524_v52, 16  ;;  %v1722_v5 = vshll.u32 %v6557_v40, 16  ;;  %v6578_v37 = vcombine.low %v1393_v54, %v6567_v11 }
 0x1be   : > { %5060 = vmatpush3.bf16.msra.mxu1 %v5478_v32  ;;  %v1865_v32 = vrot.slane %v6513_v2, 1  ;;  %v1689_v30 = vsel %vm1557_vm11, %v1684_v42, %v1688_v35  ;;  %v1741_v41 = vshll.u32 %v6565_v18, 16  ;;  %v1703_v44 = vshrl.u32 %v6542_v63, 16  ;;  %v6594_v35 = vld [vmem:[#allocation2 + $0x1c] sm:$0xf] }
 0x1bf   : > { %1897 = vrot.lane.b32.xlu1 %v1860_v55, %s5622_s24  ;;  %5328 = vmatprep.subr.msk.bf16.mxu1 %vm2633_vm13, %v6534_v21  ;;  %v1707_v19 = vrot.slane %v1705_v6, 1  ;;  %v4653_v55 = vcombine.low %v1426_v28, %v6509_v51  ;;  %v1720_v43 = vor.u32 %v1719_v27, %v1715_v58  ;;  %v1710_v62 = vshll.u32 %v6570_v60, 16  ;;  %v6590_v6 = vld [vmem:[#allocation2 + $0xbc] ss:$0 sps:$4 sm:$0x11]  }
 0x1c0   : > { %v1866_v56 = vsel %vm1830_vm10, %v1864_v39, %v1865_v32  ;;  %v1863_v51 = vsel %vm1830_vm10, %v1861_v8, %v1862_v50  ;;  %v1871_v42 = vrot.slane %v6557_v40, 1  ;;  %v1729_v39 = vshll.u32 %v6578_v37, 16  ;;  %v3006_v28 = vld [vmem:[#allocation2 + $0x24] sm:$0xf] }
 0x1c1   : > { %1895 = vrot.lane.b32.xlu0 %v1857_v10, %s5622_s24  ;;  %v2370_v2 = vpop.permute.xlu1 %2369  ;;  %v1724_v10 = vrot.slane %v1722_v5, 1  ;;  %v1708_v32 = vor.u32 %v1707_v19, %v1703_v44  ;;  %v1870_v9 = vrot.slane %v4653_v55, 1  ;;  %v1743_v8 = vrot.slane %v1741_v41, 1  ;;  %v6598_v50 = vld [vmem:[#allocation2 + $0xb0] ss:$0 sps:$4 sm:$0x11]  }
 0x1c2   : > { %v6603_v54 = vcombine.low %v3006_v28, %v6586_v7  ;;  %v2530_v19 = vsel %vm1911_vm12, %v6062_v0, %v2370_v2  ;;  %v1746_v41 = vshll.u32 %v6590_v6, 16  ;;  %v1727_v28 = vshrl.u32 %v6578_v37, 16 }
 0x1c3   : > { %1772 = vrot.lane.b32.xlu1 %v1701_v23, %s5623_s26  ;;  %v4652_v23 = vcombine.low %v1425_v12, %v6526_v48  ;;  %v1725_v58 = vsel %vm1557_vm11, %v1720_v43, %v1724_v10  ;;  %v1712_v48 = vrot.slane %v1710_v62, 1  ;;  %v1739_v43 = vshrl.u32 %v6565_v18, 16  ;;  %v6622_v10 = vld [vmem:[#allocation2 + $0x2c] ss:$0 sps:$4 sm:$0x11]  }
 0x1c4   : > { %v1731_v12 = vrot.slane %v1729_v39, 1  ;;  %v1872_v2 = vsel %vm1830_vm10, %v1870_v9, %v1871_v42  ;;  %v6628_v39 = vld [vmem:[#allocation2 + $0x40] sm:$0xf] }
 0x1c5   : > { %v2368_v1 = vpop.permute.xlu0 %2367  ;;  %1770 = vrot.lane.b32.xlu0 %v1689_v30, %s5623_s26  ;;  %v1868_v30 = vrot.slane %v6570_v60, 1  ;;  %v1713_v60 = vsel %vm1557_vm11, %v1708_v32, %v1712_v48  ;;  %v1867_v62 = vrot.slane %v4652_v23, 1  ;;  %v1734_v32 = vshll.u32 %v6598_v50, 16  ;;  %v1427_v23 = vld [vmem:[#allocation2 + $0xa8] sm:$0xe] }
 0x1c6   : > { %v2498_v27 = vpop.permute.xlu1 %2497  ;;  %v2528_v40 = vsel %vm1911_vm12, %v6076_v13, %v2368_v1  ;;  %v1428_v13 = vld [vmem:[#allocation2 + $0xb4] sm:$0xe]  ;;  %v1732_v9 = vor.u32 %v1731_v12, %v1727_v28  ;;  %v3209_v12 = vshrl.u32 %v6603_v54, 16 }
 0x1c7   : > { %1901 = vrot.lane.b32.xlu1 %v1866_v56, %s5622_s24  ;;  %v3004_v56 = vld [vmem:[#allocation2 + $0x18] sm:$0xf]  ;;  %v2562_v1 = vsel %vm481_vm0, %v2530_v19, %v2498_v27  ;;  %v4655_v0 = vcombine.low %v1428_v13, %v6552_v38  ;;  %v3211_v27 = vshll.u32 %v6603_v54, 16  ;;  %v1748_v38 = vrot.slane %v1746_v41, 1 }
 0x1c8   : > { %v6614_v44 = vcombine.low %v3004_v56, %v6594_v35  ;;  %v1869_v42 = vsel %vm1830_vm10, %v1867_v62, %v1868_v30  ;;  %v1877_v19 = vrot.slane %v6590_v6, 1  ;;  %v1736_v30 = vrot.slane %v1734_v32, 1 }
 0x1c9   : > { %1899 = vrot.lane.b32.xlu0 %v1863_v51, %s5622_s24  ;;  %v1744_v51 = vor.u32 %v1743_v8, %v1739_v43  ;;  %v1876_v8 = vrot.slane %v4655_v0, 1  ;;  %v3053_v43 = vld [vmem:[#allocation2 + $0x24] sm:$0xe]  ;;  %v3216_v13 = vshll.u32 %v6622_v10, 16  ;;  %v1874_v62 = vrot.slane %v6598_v50, 1 }
 0x1ca   : > { %v2496_v5 = vpop.permute.xlu0 %2495  ;;  %v4776_v28 = vcombine.low %v3053_v43, %v6586_v7  ;;  %v6671_v43 = vld [vmem:[#allocation2 + $0x44] ss:$0 sps:$4 sm:$0x11]  }
 0x1cb   : > { %1776 = vrot.lane.b32.xlu1 %v1725_v58, %s5623_s26  ;;  %v2560_v55 = vsel %vm481_vm0, %v2528_v40, %v2496_v5  ;;  %v4654_v58 = vcombine.low %v1427_v23, %v6567_v11  ;;  %v3199_v40 = vshll.u32 %v6614_v44, 16  ;;  %v3010_v5 = vld [vmem:[#allocation2 + $0x3c] sm:$0xf]  ;;  %v1749_v48 = vsel %vm1557_vm11, %v1744_v51, %v1748_v38  ;;  %v6639_v11 = vld [vmem:[#allocation2 + $0x34] sm:$0xf] }
 0x1cc   : > { %5031 = vmatprep.mubr.msk.bf16.mxu1 %vm2600_vm14, %v2560_v55  ;;  %v3213_v55 = vrot.slane %v3211_v27, 1  ;;  %v6637_v41 = vcombine.low %v3010_v5, %v6628_v39  ;;  %v1737_v51 = vsel %vm1557_vm11, %v1732_v9, %v1736_v30  ;;  %v2840_v23 = vsel %vm2633_vm13, %v6534_v21, 0  ;;  %v3052_v5 = vld [vmem:[#allocation2 + $0x18] sm:$0xe]  ;;  %v3014_v30 = vld [vmem:[#allocation2 + $0x54] sm:$0xf] }
 0x1cd   : > { %5032 = vmatmul.mubr.msk.bf16.gmra.mrb[4].mxu1 %vm2600_vm14, %v2562_v1  ;;  %1774 = vrot.lane.b32.xlu0 %v1713_v60, %s5623_s26  ;;  %v6643_v1 = vld [vmem:[#allocation2 + $0x20] ss:$0 sps:$4 sm:$0x11]   ;;  %v6648_v60 = vld [vmem:[%s7320_s3 + $0x18] sm:$0xff]   ;;  %v1873_v6 = vrot.slane %v4654_v58, 1  ;;  %v3201_v0 = vrot.slane %v3199_v40, 1  ;;  %v1878_v38 = vsel %vm1830_vm10, %v1876_v8, %v1877_v19  ;;  %v4775_v19 = vcombine.low %v3052_v5, %v6594_v35 }
 0x1ce   : > { %v3214_v50 = vor.u32 %v3213_v55, %v3209_v12  ;;  %v3197_v58 = vshrl.u32 %v6614_v44, 16  ;;  %v3235_v40 = vshll.u32 %v6637_v41, 16  ;;  %5062 = vmatpush3.bf16.msra.mxu1 %v2840_v23  ;;  %v3218_v7 = vrot.slane %v3216_v13, 1 }
 0x1cf   : > { %1905 = vrot.lane.b32.xlu1 %v1872_v2, %s5622_s24  ;;  %v3008_v2 = vld [vmem:[#allocation2 + $0x30] sm:$0xf]  ;;  %v3204_v9 = vshll.u32 %v6643_v1, 16  ;;  %5095 = vmatprep.subr.bf16.mxu1 %v6648_v60  ;;  %v1875_v21 = vsel %vm1830_vm10, %v1873_v6, %v1874_v62  ;;  %v3472_v8 = vrot.slane %v6622_v10, 1  ;;  %v3471_v13 = vrot.slane %v4776_v28, 1 }
 0x1d0   : > { %v6655_v32 = vcombine.low %v3008_v2, %v6639_v11  ;;  %v3219_v10 = vsel %vm1557_vm11, %v3214_v50, %v3218_v7  ;;  %v3237_v62 = vrot.slane %v3235_v40, 1  ;;  %v6688_v28 = vld [vmem:[#allocation2 + $0x38] ss:$0 sps:$4 sm:$0x11]   ;;  %v3469_v50 = vrot.slane %v6643_v1, 1 }
 0x1d1   : > { %1903 = vrot.lane.b32.xlu0 %v1869_v42, %s5622_s24  ;;  %v2374_v56 = vpop.permute.xlu1 %2373  ;;  %v6663_v42 = vld [vmem:[#allocation2 + $0x58] sm:$0xf]  ;;  %v3473_v1 = vsel %vm1830_vm10, %v3471_v13, %v3472_v8 }
 0x1d2   : > { %v6677_v23 = vcombine.low %v3014_v30, %v6663_v42  ;;  %v2534_v35 = vsel %vm1911_vm12, %v6128_v20, %v2374_v56  ;;  %v3240_v20 = vshll.u32 %v6671_v43, 16  ;;  %v3012_v56 = vld [vmem:[#allocation2 + $0x48] sm:$0xf]  ;;  %v6703_v30 = vld [vmem:[#allocation2 + $0x5c] ss:$0 sps:$4 sm:$0x11]  }
 0x1d3   : > { %1780 = vrot.lane.b32.xlu1 %v1749_v48, %s5623_s26  ;;  %v3202_v48 = vor.u32 %v3201_v0, %v3197_v58  ;;  %v6684_v0 = vld [vmem:[#allocation2 + $0x4c] sm:$0xf]  ;;  %v3233_v58 = vshrl.u32 %v6637_v41, 16 }
 0x1d4   : > { %7341 = vst [vmem:[#allocation6_spill] sm:$0xff] %v6677_v23  ;;  %v3259_v5 = vshll.u32 %v6677_v23, 16 }
 0x1d5   : > { %v2372_v27 = vpop.permute.xlu0 %2371  ;;  %1778 = vrot.lane.b32.xlu0 %v1737_v51, %s5623_s26  ;;  %v3223_v51 = vshll.u32 %v6655_v32, 16 }
 0x1d6   : > { %v2532_v12 = vsel %vm1911_vm12, %v6135_v49, %v2372_v27  ;;  %v3206_v49 = vrot.slane %v3204_v9, 1  ;;  %v3055_v9 = vld [vmem:[#allocation2 + $0x3c] sm:$0xe] }
 0x1d7   : > { %1909 = vrot.lane.b32.xlu1 %v1878_v38, %s5622_s24  ;;  %v2502_v55 = vpop.permute.xlu1 %2501  ;;  %v3468_v38 = vrot.slane %v4775_v19, 1  ;;  %v3225_v7 = vrot.slane %v3223_v51, 1  ;;  %v3238_v19 = vor.u32 %v3237_v62, %v3233_v58  ;;  %v6708_v51 = vld [vmem:[#allocation2 + $0x70] sm:$0xf]  ;;  %v3261_v62 = vrot.slane %v3259_v5, 1 }
 0x1d8   : > { %v2566_v27 = vsel %vm481_vm0, %v2534_v35, %v2502_v55  ;;  %v3207_v40 = vsel %vm1557_vm11, %v3202_v48, %v3206_v49  ;;  %v4778_v55 = vcombine.low %v3055_v9, %v6628_v39  ;;  %v3221_v48 = vshrl.u32 %v6655_v32, 16  ;;  %v3018_v49 = vld [vmem:[#allocation2 + $0x6c] sm:$0xf]  ;;  %v6724_v9 = vld [vmem:[#allocation2 + $0x50] ss:$0 sps:$4 sm:$0x11]  }
 0x1d9   : > { %v2500_v2 = vpop.permute.xlu0 %2499  ;;  %1907 = vrot.lane.b32.xlu0 %v1875_v21, %s5622_s24  ;;  %v6698_v21 = vcombine.low %v3012_v56, %v6684_v0  ;;  %v3478_v56 = vrot.slane %v6671_v43, 1 }
 0x1da   : > { %v2564_v6 = vsel %vm481_vm0, %v2532_v12, %v2500_v2  ;;  %v3228_v12 = vshll.u32 %v6688_v28, 16  ;;  %v3054_v2 = vld [vmem:[#allocation2 + $0x30] sm:$0xe]  ;;  %v3226_v8 = vor.u32 %v3225_v7, %v3221_v48  ;;  %v3477_v58 = vrot.slane %v4778_v55, 1 }
 0x1db   : > { %3390 = vrot.lane.b32.xlu1 %v3219_v10, %s5623_s26  ;;  %5035 = vmatprep.mubr.msk.bf16.mxu1 %vm2600_vm14, %v2564_v6  ;;  %7342 = vst [vmem:[#allocation7_spill] sm:$0xff] %v6698_v21  ;;  %v3242_v10 = vrot.slane %v3240_v20, 1  ;;  %v4777_v35 = vcombine.low %v3054_v2, %v6639_v11  ;;  %v3470_v6 = vsel %vm1830_vm10, %v3468_v38, %v3469_v50  ;;  %v3247_v39 = vshll.u32 %v6698_v21, 16  ;;  %v6719_v11 = vld [vmem:[#allocation2 + $0x64] sm:$0xf] }
 0x1dc   : > { %5036 = vmatmul.mubr.msk.bf16.gmra.mrb[8].mxu1 %vm2600_vm14, %v2566_v27  ;;  %v6717_v20 = vcombine.low %v3018_v49, %v6708_v51  ;;  %v3230_v38 = vrot.slane %v3228_v12, 1  ;;  %v3257_v50 = vshrl.u32 %v6677_v23, 16  ;;  %v3264_v7 = vshll.u32 %v6703_v30, 16  ;;  %v3056_v49 = vld [vmem:[#allocation2 + $0x48] sm:$0xe] }
 0x1dd   : > { %3388 = vrot.lane.b32.xlu0 %v3207_v40, %s5623_s26  ;;  %v3243_v27 = vsel %vm1557_vm11, %v3238_v19, %v3242_v10  ;;  %v3057_v40 = vld [vmem:[#allocation2 + $0x54] sm:$0xe]  ;;  %v3474_v5 = vrot.slane %v4777_v35, 1  ;;  %v3016_v19 = vld [vmem:[#allocation2 + $0x60] sm:$0xf]  ;;  %v3249_v10 = vrot.slane %v3247_v39, 1  ;;  %v3479_v12 = vsel %vm1830_vm10, %v3477_v58, %v3478_v56 }
 0x1de   : > { %v4780_v43 = vcombine.low %v3057_v40, %v6663_v42  ;;  %v3231_v55 = vsel %vm1557_vm11, %v3226_v8, %v3230_v38  ;;  %v3262_v2 = vor.u32 %v3261_v62, %v3257_v50  ;;  %v3283_v35 = vshll.u32 %v6717_v20, 16  ;;  %v6738_v62 = vld [vmem:[#allocation2 + $0x88] sm:$0xf]  ;;  %v5502_v56 = vld [vmem:[#allocation2 + $0x74] ss:$0 sps:$4 sm:$0x11]  }
 0x1df   : > { %3518 = vrot.lane.b32.xlu1 %v3473_v1, %s5622_s24  ;;  %v3475_v1 = vrot.slane %v6688_v28, 1  ;;  %v3266_v42 = vrot.slane %v3264_v7, 1  ;;  %v3252_v8 = vshll.u32 %v6724_v9, 16  ;;  %v3484_v38 = vrot.slane %v6703_v30, 1 }
 0x1e0   : > { %v2378_v13 = vpop.permute.xlu1 %2377  ;;  %v3483_v40 = vrot.slane %v4780_v43, 1  ;;  %v4779_v58 = vcombine.low %v3056_v49, %v6684_v0  ;;  %v3285_v30 = vrot.slane %v3283_v35, 1  ;;  %v6756_v43 = vld [vmem:[#allocation2 + $0x7c] sm:$0xf]  ;;  %v3288_v49 = vshll.u32 %v5502_v56, 16 }
 0x1e1   : > { %3516 = vrot.lane.b32.xlu0 %v3470_v6, %s5622_s24  ;;  %v6730_v6 = vcombine.low %v3016_v19, %v6719_v11  ;;  %v3476_v39 = vsel %vm1830_vm10, %v3474_v5, %v3475_v1  ;;  %v3267_v7 = vsel %vm1557_vm11, %v3262_v2, %v3266_v42  ;;  %v2538_v5 = vsel %vm1911_vm12, %v6186_v53, %v2378_v13  ;;  %v3059_v1 = vld [vmem:[#allocation2 + $0x6c] sm:$0xe] }
 0x1e2   : > { %v3254_v2 = vrot.slane %v3252_v8, 1  ;;  %v4782_v53 = vcombine.low %v3059_v1, %v6708_v51  ;;  %v3481_v13 = vrot.slane %v6724_v9, 1  ;;  %v3485_v51 = vsel %vm1830_vm10, %v3483_v40, %v3484_v38  ;;  %v6780_v40 = vld [vmem:[#allocation2 + $0x80] ss:$0 sps:$4 sm:$0x11]  }
 0x1e3   : > { %3394 = vrot.lane.b32.xlu1 %v3243_v27, %s5623_s26  ;;  %v3245_v27 = vshrl.u32 %v6698_v21, 16  ;;  %v3271_v23 = vshll.u32 %v6730_v6, 16  ;;  %v3022_v21 = vld [vmem:[#allocation2 + $0x84] sm:$0xf] }
 0x1e5   : > { %v2376_v48 = vpop.permute.xlu0 %2375  ;;  %3392 = vrot.lane.b32.xlu0 %v3231_v55, %s5623_s26  ;;  %v2506_v28 = vpop.permute.xlu1 %2505  ;;  %v3250_v55 = vor.u32 %v3249_v10, %v3245_v27  ;;  %v3281_v10 = vshrl.u32 %v6717_v20, 16  ;;  %v3480_v27 = vrot.slane %v4779_v58, 1  ;;  %v3269_v58 = vshrl.u32 %v6730_v6, 16 }
 0x1e6   : > { %v2536_v50 = vsel %vm1911_vm12, %v6198_v45, %v2376_v48  ;;  %v6754_v45 = vcombine.low %v3022_v21, %v6738_v62  ;;  %v2570_v48 = vsel %vm481_vm0, %v2538_v5, %v2506_v28  ;;  %v3020_v21 = vld [vmem:[#allocation2 + $0x78] sm:$0xf]  ;;  %v3273_v28 = vrot.slane %v3271_v23, 1 }
 0x1e7   : > { %3522 = vrot.lane.b32.xlu1 %v3479_v12, %s5622_s24  ;;  %v6746_v12 = vld [vmem:[#allocation2 + $0x68] ss:$0 sps:$4 sm:$0x11]   ;;  %v3255_v35 = vsel %vm1557_vm11, %v3250_v55, %v3254_v2  ;;  %v6767_v8 = vcombine.low %v3020_v21, %v6756_v43  ;;  %v3489_v23 = vrot.slane %v4782_v53, 1  ;;  %v3490_v55 = vrot.slane %v5502_v56, 1 }
 0x1e8   : > { %7343 = vst [vmem:[#allocation8_spill] sm:$0xff] %v6754_v45  ;;  %v3276_v9 = vshll.u32 %v6746_v12, 16  ;;  %v3482_v38 = vsel %vm1830_vm10, %v3480_v27, %v3481_v13  ;;  %v3274_v2 = vor.u32 %v3273_v28, %v3269_v58  ;;  %v3026_v21 = vld [vmem:[#allocation2 + $0x9c] sm:$0xf]  ;;  %v3487_v28 = vrot.slane %v6746_v12, 1 }
 0x1e9   : > { %v2504_v19 = vpop.permute.xlu0 %2503  ;;  %3520 = vrot.lane.b32.xlu0 %v3476_v39, %s5622_s24  ;;  %v3058_v39 = vld [vmem:[#allocation2 + $0x60] sm:$0xe]  ;;  %v3491_v13 = vsel %vm1830_vm10, %v3489_v23, %v3490_v55  ;;  %v3024_v58 = vld [vmem:[#allocation2 + $0x90] sm:$0xf] }
 0x1ea   : > { %v2568_v0 = vsel %vm481_vm0, %v2536_v50, %v2504_v19  ;;  %v3286_v50 = vor.u32 %v3285_v30, %v3281_v10  ;;  %v6772_v19 = vld [vmem:[#allocation2 + $0x8c] ss:$0 sps:$4 sm:$0x11]   ;;  %v4781_v5 = vcombine.low %v3058_v39, %v6719_v11  ;;  %v3295_v10 = vshll.u32 %v6767_v8, 16  ;;  %v3061_v39 = vld [vmem:[#allocation2 + $0x84] sm:$0xe] }
 0x1eb   : > { %3398 = vrot.lane.b32.xlu1 %v3267_v7, %s5623_s26  ;;  %5039 = vmatprep.mubr.msk.bf16.mxu1 %vm2600_vm14, %v2568_v0  ;;  %v3307_v7 = vshll.u32 %v6754_v45, 16  ;;  %v6778_v0 = vld [vmem:[#allocation2 + $0xa0] sm:$0xf]  ;;  %v3278_v11 = vrot.slane %v3276_v9, 1  ;;  %v3305_v9 = vshrl.u32 %v6754_v45, 16 }
 0x1ec   : > { %5040 = vmatmul.mubr.msk.bf16.gmra.mrb[12].mxu1 %vm2600_vm14, %v2570_v48  ;;  %v3290_v48 = vrot.slane %v3288_v49, 1  ;;  %v6789_v49 = vcombine.low %v3026_v21, %v6778_v0  ;;  %v3486_v27 = vrot.slane %v4781_v5, 1  ;;  %v3297_v21 = vrot.slane %v3295_v10, 1  ;;  %v6819_v10 = vld [vmem:[#allocation2 + $0xb8] sm:$0xf] }
 0x1ed   : > { %v2382_v42 = vpop.permute.xlu1 %2381  ;;  %3396 = vrot.lane.b32.xlu0 %v3255_v35, %s5623_s26  ;;  %v6784_v35 = vld [vmem:[#allocation2 + $0x94] sm:$0xf]  ;;  %v3309_v53 = vrot.slane %v3307_v7, 1  ;;  %v4784_v7 = vcombine.low %v3061_v39, %v6738_v62  ;;  %v3279_v12 = vsel %vm1557_vm11, %v3274_v2, %v3278_v11  ;;  %v6810_v39 = vld [vmem:[#allocation2 + $0xa4] ss:$0 sps:$4 sm:$0x11]  }
 0x1ee   : > { %v3291_v56 = vsel %vm1557_vm11, %v3286_v50, %v3290_v48  ;;  %v6800_v48 = vcombine.low %v3024_v58, %v6784_v35  ;;  %v2542_v23 = vsel %vm1911_vm12, %v6231_v16, %v2382_v42  ;;  %v3331_v16 = vshll.u32 %v6789_v49, 16  ;;  %v3063_v45 = vld [vmem:[#allocation2 + $0x9c] sm:$0xe] }
 0x1ef   : > { %3526 = vrot.lane.b32.xlu1 %v3485_v51, %s5622_s24  ;;  %v2380_v1 = vpop.permute.xlu0 %2379  ;;  %v3312_v51 = vshll.u32 %v6772_v19, 16  ;;  %v3310_v62 = vor.u32 %v3309_v53, %v3305_v9  ;;  %v3293_v42 = vshrl.u32 %v6767_v8, 16  ;;  %v3495_v58 = vrot.slane %v4784_v7, 1 }
 0x1f0   : > { %v3488_v9 = vsel %vm1830_vm10, %v3486_v27, %v3487_v28  ;;  %v3329_v28 = vshrl.u32 %v6789_v49, 16  ;;  %v4786_v7 = vcombine.low %v3063_v45, %v6778_v0  ;;  %v3034_v0 = vld [vmem:[#allocation2 + $0xcc] sm:$0xf] }
 0x1f1   : > { %v2510_v30 = vpop.permute.xlu1 %2509  ;;  %3524 = vrot.lane.b32.xlu0 %v3482_v38, %s5622_s24  ;;  %v2540_v38 = vsel %vm1911_vm12, %v6245_v57, %v2380_v1  ;;  %v3300_v1 = vshll.u32 %v6780_v40, 16  ;;  %v3314_v53 = vrot.slane %v3312_v51, 1 }
 0x1f2   : > { %v2574_v57 = vsel %vm481_vm0, %v2542_v23, %v2510_v30  ;;  %v6817_v30 = vld [vmem:[#allocation2 + $0x98] ss:$0 sps:$4 sm:$0x11]  }
 0x1f3   : > { %3402 = vrot.lane.b32.xlu1 %v3291_v56, %s5623_s26  ;;  %v2508_v50 = vpop.permute.xlu0 %2507  ;;  %v3060_v56 = vld [vmem:[#allocation2 + $0x78] sm:$0xe] }
 0x1f4   : > { %v2572_v55 = vsel %vm481_vm0, %v2540_v38, %v2508_v50  ;;  %v4783_v2 = vcombine.low %v3060_v56, %v6756_v43  ;;  %v3496_v38 = vrot.slane %v6772_v19, 1  ;;  %v3319_v50 = vshll.u32 %v6800_v48, 16  ;;  %v6830_v19 = vld [vmem:[#allocation2 + $0xac] sm:$0xf] }
 0x1f5   : > { %v2386_v5 = vpop.permute.xlu1 %2385  ;;  %3400 = vrot.lane.b32.xlu0 %v3279_v12, %s5623_s26  ;;  %5043 = vmatprep.mubr.msk.bf16.mxu1 %vm2600_vm14, %v2572_v55  ;;  %v3298_v55 = vor.u32 %v3297_v21, %v3293_v42  ;;  %v3030_v12 = vld [vmem:[#allocation2 + $0xb4] sm:$0xf]  ;;  %v3315_v43 = vsel %vm1557_vm11, %v3310_v62, %v3314_v53  ;;  %v3302_v56 = vrot.slane %v3300_v1, 1  ;;  %v3324_v42 = vshll.u32 %v6817_v30, 16  ;;  %v3028_v53 = vld [vmem:[#allocation2 + $0xa8] sm:$0xf] }
 0x1f6   : > { %5044 = vmatmul.mubr.msk.bf16.gmra.mrb[16].mxu1 %vm2600_vm14, %v2574_v57  ;;  %v3333_v57 = vrot.slane %v3331_v16, 1  ;;  %v6828_v51 = vcombine.low %v3030_v12, %v6819_v10  ;;  %v3492_v27 = vrot.slane %v4783_v2, 1  ;;  %v3497_v1 = vsel %vm1830_vm10, %v3495_v58, %v3496_v38 }
 0x1f7   : > { %3530 = vrot.lane.b32.xlu1 %v3491_v13, %s5622_s24  ;;  %v2384_v11 = vpop.permute.xlu0 %2383  ;;  %v3493_v13 = vrot.slane %v6780_v40, 1  ;;  %v3336_v40 = vshll.u32 %v6810_v39, 16  ;;  %v3321_v16 = vrot.slane %v3319_v50, 1  ;;  %v3303_v12 = vsel %vm1557_vm11, %v3298_v55, %v3302_v56 }
 0x1f8   : > { %v2544_v21 = vsel %vm1911_vm12, %v6269_v22, %v2384_v11  ;;  %v6845_v45 = vcombine.low %v3028_v53, %v6830_v19  ;;  %v6847_v22 = vld [vmem:[#allocation2 + $0xd0] sm:$0xf]  ;;  %v3334_v58 = vor.u32 %v3333_v57, %v3329_v28  ;;  %v3355_v38 = vshll.u32 %v6828_v51, 16 }
 0x1f9   : > { %v2514_v23 = vpop.permute.xlu1 %2513  ;;  %3528 = vrot.lane.b32.xlu0 %v3488_v9, %s5622_s24  ;;  %v2546_v9 = vsel %vm1911_vm12, %v6265_v61, %v2386_v5  ;;  %v3317_v61 = vshrl.u32 %v6800_v48, 16  ;;  %v3062_v5 = vld [vmem:[#allocation2 + $0x90] sm:$0xe]  ;;  %v3501_v50 = vrot.slane %v4786_v7, 1  ;;  %v3502_v55 = vrot.slane %v6810_v39, 1 }
 0x1fa   : > { %v2578_v11 = vsel %vm481_vm0, %v2546_v9, %v2514_v23  ;;  %v4785_v56 = vcombine.low %v3062_v5, %v6784_v35  ;;  %v6858_v23 = vld [vmem:[#allocation2 + $0xbc] ss:$0 sps:$4 sm:$0x11]   ;;  %v6861_v57 = vcombine.low %v3034_v0, %v6847_v22  ;;  %v3494_v28 = vsel %vm1830_vm10, %v3492_v27, %v3493_v13  ;;  %v3032_v0 = vld [vmem:[#allocation2 + $0xc0] sm:$0xf] }
 0x1fb   : > { %3406 = vrot.lane.b32.xlu1 %v3315_v43, %s5623_s26  ;;  %v2512_v62 = vpop.permute.xlu0 %2511  ;;  %v3322_v53 = vor.u32 %v3321_v16, %v3317_v61  ;;  %v3326_v35 = vrot.slane %v3324_v42, 1  ;;  %v3357_v7 = vrot.slane %v3355_v38, 1  ;;  %v3499_v13 = vrot.slane %v6817_v30, 1  ;;  %v6879_v5 = vld [vmem:[#allocation2 + $0xd4] ss:$0 sps:$4 sm:$0x11]  }
 0x1fc   : > { %v2576_v2 = vsel %vm481_vm0, %v2544_v21, %v2512_v62  ;;  %v3338_v62 = vrot.slane %v3336_v40, 1  ;;  %v3503_v40 = vsel %vm1830_vm10, %v3501_v50, %v3502_v55  ;;  %v3498_v16 = vrot.slane %v4785_v56, 1 }
 0x1fd   : > { %v2390_v43 = vpop.permute.xlu1 %2389  ;;  %3404 = vrot.lane.b32.xlu0 %v3303_v12, %s5623_s26  ;;  %5047 = vmatprep.mubr.msk.bf16.mxu1 %vm2600_vm14, %v2576_v2  ;;  %v6864_v2 = vld [vmem:[#allocation2 + $0xb0] ss:$0 sps:$4 sm:$0x11]   ;;  %v6869_v12 = vld [vmem:[#allocation2 + $0xc4] sm:$0xf]  ;;  %v3360_v27 = vshll.u32 %v6858_v23, 16 }
 0x1fe   : > { %5048 = vmatmul.mubr.msk.bf16.gmra.mrb[20].mxu1 %vm2600_vm14, %v2578_v11  ;;  %v3339_v39 = vsel %vm1557_vm11, %v3334_v58, %v3338_v62  ;;  %v3327_v58 = vsel %vm1557_vm11, %v3322_v53, %v3326_v35  ;;  %v3353_v42 = vshrl.u32 %v6828_v51, 16  ;;  %v3379_v38 = vshll.u32 %v6861_v57, 16  ;;  %v3065_v62 = vld [vmem:[#allocation2 + $0xb4] sm:$0xe] }
 0x1ff   : > { %3534 = vrot.lane.b32.xlu1 %v3497_v1, %s5622_s24  ;;  %v2388_v21 = vpop.permute.xlu0 %2387  ;;  %v3343_v1 = vshll.u32 %v6845_v45, 16  ;;  %v2550_v50 = vsel %vm1911_vm12, %v6289_v26, %v2390_v43  ;;  %v4788_v53 = vcombine.low %v3065_v62, %v6819_v10  ;;  %v3341_v26 = vshrl.u32 %v6845_v45, 16 }
 0x200   : > { %v2548_v11 = vsel %vm1911_vm12, %v6292_v3, %v2388_v21  ;;  %v3358_v21 = vor.u32 %v3357_v7, %v3353_v42  ;;  %v3348_v43 = vshll.u32 %v6864_v2, 16  ;;  %v3384_v7 = vshll.u32 %v6879_v5, 16 }
 0x201   : > { %v2518_v9 = vpop.permute.xlu1 %2517  ;;  %3532 = vrot.lane.b32.xlu0 %v3494_v28, %s5622_s24  ;;  %v3345_v56 = vrot.slane %v3343_v1, 1  ;;  %v6886_v28 = vcombine.low %v3032_v0, %v6869_v12  ;;  %v3377_v0 = vshrl.u32 %v6861_v57, 16  ;;  %v3500_v10 = vsel %vm1830_vm10, %v3498_v16, %v3499_v13 }
 0x202   : > { %v2582_v3 = vsel %vm481_vm0, %v2550_v50, %v2518_v9  ;;  %v3362_v9 = vrot.slane %v3360_v27, 1  ;;  %v3350_v27 = vrot.slane %v3348_v43, 1  ;;  %v3505_v62 = vrot.slane %v6864_v2, 1 }
 0x203   : > { %3410 = vrot.lane.b32.xlu1 %v3339_v39, %s5623_s26  ;;  %v2516_v61 = vpop.permute.xlu0 %2515  ;;  %v3064_v39 = vld [vmem:[#allocation2 + $0xa8] sm:$0xe]  ;;  %v3367_v42 = vshll.u32 %v6886_v28, 16 }
 0x204   : > { %v2580_v30 = vsel %vm481_vm0, %v2548_v11, %v2516_v61  ;;  %v4787_v1 = vcombine.low %v3064_v39, %v6830_v19  ;;  %v3381_v11 = vrot.slane %v3379_v38, 1  ;;  %v3363_v50 = vsel %vm1557_vm11, %v3358_v21, %v3362_v9 }
 0x205   : > { %v2394_v55 = vpop.permute.xlu1 %2393  ;;  %3408 = vrot.lane.b32.xlu0 %v3327_v58, %s5623_s26  ;;  %5051 = vmatprep.mubr.msk.bf16.mxu1 %vm2600_vm14, %v2580_v30  ;;  %v3346_v58 = vor.u32 %v3345_v56, %v3341_v26  ;;  %v3507_v30 = vrot.slane %v4788_v53, 1  ;;  %v3508_v19 = vrot.slane %v6858_v23, 1  ;;  %v3386_v39 = vrot.slane %v3384_v7, 1  ;;  %v3066_v7 = vld [vmem:[#allocation2 + $0xc0] sm:$0xe] }
 0x206   : > { %5052 = vmatmul.mubr.msk.bf16.gmra.mrb[24].mxu1 %vm2600_vm14, %v2582_v3  ;;  %v3504_v38 = vrot.slane %v4787_v1, 1  ;;  %v5529_v3 = vld [vmem:[#allocation2 + $0xc8] ss:$0 sps:$4 sm:$0x11]   ;;  %v3382_v56 = vor.u32 %v3381_v11, %v3377_v0  ;;  %v2554_v21 = vsel %vm1911_vm12, %v6313_v46, %v2394_v55  ;;  %v3369_v1 = vrot.slane %v3367_v42, 1 }
 0x207   : > { %3538 = vrot.lane.b32.xlu1 %v3503_v40, %s5622_s24  ;;  %v2392_v35 = vpop.permute.xlu0 %2391  ;;  %v3067_v40 = vld [vmem:[#allocation2 + $0xcc] sm:$0xe]  ;;  %v3351_v53 = vsel %vm1557_vm11, %v3346_v58, %v3350_v27  ;;  %v3365_v46 = vshrl.u32 %v6886_v28, 16  ;;  %v3940_v55 = vld [vmem:[%s7322_s5] sm:$0xf]  ;;  %v3514_v11 = vrot.slane %v6879_v5, 1 }
 0x208   : > { %v2552_v16 = vsel %vm1911_vm12, %v6323_v59, %v2392_v35  ;;  %v4790_v26 = vcombine.low %v3067_v40, %v6847_v22  ;;  %v3509_v59 = vsel %vm1830_vm10, %v3507_v30, %v3508_v19  ;;  %v3372_v22 = vshll.u32 %v5529_v3, 16  ;;  %5330 = vmatprep.subr.msk.bf16.mxu0 %vm2633_vm13, %v3940_v55 }
 0x209   : > { %v2522_v61 = vpop.permute.xlu1 %2521  ;;  %3536 = vrot.lane.b32.xlu0 %v3500_v10, %s5622_s24  ;;  %v3387_v9 = vsel %vm1557_vm11, %v3382_v56, %v3386_v39  ;;  %v3997_v10 = vsel %vm2633_vm13, %v3940_v55, 0  ;;  %v3370_v42 = vor.u32 %v3369_v1, %v3365_v46  ;;  %v4789_v40 = vcombine.low %v3066_v7, %v6869_v12  ;;  %v5533_v56 = vld [vmem:[%s7320_s3 + $0x20] ss:$0 sps:$4 sm:$0xff]  }
 0x20a   : > { %v2586_v2 = vsel %vm481_vm0, %v2554_v21, %v2522_v61  ;;  %v3513_v0 = vrot.slane %v4790_v26, 1  ;;  %v3506_v61 = vsel %vm1830_vm10, %v3504_v38, %v3505_v62  ;;  %5132 = vmatpush3.bf16.msra.mxu0 %v3997_v10  ;;  %v3511_v27 = vrot.slane %v5529_v3, 1 }
 0x20b   : > { %3414 = vrot.lane.b32.xlu1 %v3363_v50, %s5623_s26  ;;  %v2520_v13 = vpop.permute.xlu0 %2519  ;;  %v3374_v50 = vrot.slane %v3372_v22, 1  ;;  %v3658_v26 = vsel %vm2633_vm13, %v5533_v56, 0 }
 0x20c   : > { %v2584_v23 = vsel %vm481_vm0, %v2552_v16, %v2520_v13  ;;  %v3515_v19 = vsel %vm1830_vm10, %v3513_v0, %v3514_v11  ;;  %v3510_v13 = vrot.slane %v4789_v40, 1 }
 0x20d   : > { %v1753_v43 = vpop.permute.xlu1 %1752  ;;  %3412 = vrot.lane.b32.xlu0 %v3351_v53, %s5623_s26  ;;  %5055 = vmatprep.mubr.msk.bf16.mxu1 %vm2600_vm14, %v2584_v23  ;;  %v3375_v12 = vsel %vm1557_vm11, %v3370_v42, %v3374_v50 }
 0x20e   : > { %5056 = vmatmul.mubr.msk.bf16.gmra.mrb[28].mxu1 %vm2600_vm14, %v2586_v2  ;;  %v1915_v38 = vsel %vm1911_vm12, %v6342_v47, %v1753_v43 }
 0x20f   : > { %3542 = vrot.lane.b32.xlu1 %v3509_v59, %s5622_s24  ;;  %v1751_v35 = vpop.permute.xlu0 %1750 }
 0x210   : > { %v1913_v5 = vsel %vm1911_vm12, %v6345_v36, %v1751_v35  ;;  %v3512_v36 = vsel %vm1830_vm10, %v3510_v13, %v3511_v27 }
 0x211   : > { %v1882_v58 = vpop.permute.xlu1 %1881  ;;  %3540 = vrot.lane.b32.xlu0 %v3506_v61, %s5622_s24 }
 0x212   : > { %v1947_v39 = vsel %vm481_vm0, %v1915_v38, %v1882_v58 }
 0x213   : > { %3418 = vrot.lane.b32.xlu1 %v3387_v9, %s5623_s26  ;;  %v1880_v30 = vpop.permute.xlu0 %1879 }
 0x214   : > { %v1945_v62 = vsel %vm481_vm0, %v1913_v5, %v1880_v30 }
 0x215   : > { %v1757_v16 = vpop.permute.xlu1 %1756  ;;  %3416 = vrot.lane.b32.xlu0 %v3375_v12, %s5623_s26  ;;  %5063 = vmatprep.mubr.msk.bf16.mxu1 %vm2600_vm14, %v1945_v62 }
 0x216   : > { %5064 = vmatmul.mubr.msk.bf16.vlgmr.msra.gmra.mrb[0].mxu1 %vm2600_vm14, %v1947_v39  ;;  %v1919_v53 = vsel %vm1911_vm12, %v6366_v29, %v1757_v16 }
 0x217   : > { %3546 = vrot.lane.b32.xlu1 %v3515_v19, %s5622_s24  ;;  %5096 = vmatpush3.bf16.msra.mxu1 %v6648_v60  ;;  %v1755_v47 = vpop.permute.xlu0 %1754 }
 0x218   : > { %5329 = vmatprep.subr.msk.bf16.mxu1 %vm2633_vm13, %v5533_v56  ;;  %v1917_v21 = vsel %vm1911_vm12, %v6377_v25, %v1755_v47 }
 0x219   : > { %v1886_v3 = vpop.permute.xlu1 %1885  ;;  %3544 = vrot.lane.b32.xlu0 %v3512_v36, %s5622_s24 }
 0x21a   : > { %v1951_v1 = vsel %vm481_vm0, %v1919_v53, %v1886_v3 }
 0x21b   : > { %v1884_v23 = vpop.permute.xlu0 %1883  ;;  %5098 = vmatpush3.bf16.msra.mxu1 %v3658_v26 }
 0x21c   : > { %v1949_v60 = vsel %vm481_vm0, %v1917_v21, %v1884_v23 }
 0x21d   : > { %v1761_v43 = vpop.permute.xlu1 %1760  ;;  %5067 = vmatprep.mubr.msk.bf16.mxu1 %vm2600_vm14, %v1949_v60 }
 0x21e   : > { %5068 = vmatmul.mubr.msk.bf16.gmra.mrb[4].mxu1 %vm2600_vm14, %v1951_v1  ;;  %v1923_v22 = vsel %vm1911_vm12, %v6392_v14, %v1761_v43 }
 0x21f   : > { %v1759_v2 = vpop.permute.xlu0 %1758 }
 0x220   : > { %v1921_v46 = vsel %vm1911_vm12, %v6401_v17, %v1759_v2 }
 0x221   : > { %v1890_v59 = vpop.permute.xlu1 %1889 }
 0x222   : > { %v1955_v35 = vsel %vm481_vm0, %v1923_v22, %v1890_v59 }
 0x223   : > { %v1888_v25 = vpop.permute.xlu0 %1887 }
 0x224   : > { %v1953_v29 = vsel %vm481_vm0, %v1921_v46, %v1888_v25 }
 0x225   : > { %v1765_v55 = vpop.permute.xlu1 %1764  ;;  %5071 = vmatprep.mubr.msk.bf16.mxu1 %vm2600_vm14, %v1953_v29 }
 0x226   : > { %5072 = vmatmul.mubr.msk.bf16.gmra.mrb[8].mxu1 %vm2600_vm14, %v1955_v35  ;;  %v1927_v17 = vsel %vm1911_vm12, %v6419_v34, %v1765_v55 }
 0x227   : > { %v1763_v9 = vpop.permute.xlu0 %1762 }
 0x228   : > { %v1925_v11 = vsel %vm1911_vm12, %v6430_v31, %v1763_v9 }
 0x229   : > { %v1894_v0 = vpop.permute.xlu1 %1893 }
 0x22a   : > { %v1959_v61 = vsel %vm481_vm0, %v1927_v17, %v1894_v0 }
 0x22b   : > { %v1892_v7 = vpop.permute.xlu0 %1891 }
 0x22c   : > { %v1957_v14 = vsel %vm481_vm0, %v1925_v11, %v1892_v7 }
 0x22d   : > { %v1769_v10 = vpop.permute.xlu1 %1768  ;;  %5075 = vmatprep.mubr.msk.bf16.mxu1 %vm2600_vm14, %v1957_v14  ;;  %v7344_v14 = vld [vmem:[#allocation7_spill] sm:$0xff] }
 0x22e   : > { %5076 = vmatmul.mubr.msk.bf16.gmra.mrb[12].mxu1 %vm2600_vm14, %v1959_v61  ;;  %v1931_v31 = vsel %vm1911_vm12, %v6448_v4, %v1769_v10 }
 0x22f   : > { %v1767_v58 = vpop.permute.xlu0 %1766 }
 0x230   : > { %v1929_v40 = vsel %vm1911_vm12, %v6460_v33, %v1767_v58 }
 0x231   : > { %v1898_v42 = vpop.permute.xlu1 %1897 }
 0x232   : > { %v1963_v30 = vsel %vm481_vm0, %v1931_v31, %v1898_v42 }
 0x233   : > { %v1896_v50 = vpop.permute.xlu0 %1895 }
 0x234   : > { %v1961_v34 = vsel %vm481_vm0, %v1929_v40, %v1896_v50 }
 0x235   : > { %v1773_v5 = vpop.permute.xlu1 %1772  ;;  %5079 = vmatprep.mubr.msk.bf16.mxu1 %vm2600_vm14, %v1961_v34 }
 0x236   : > { %5080 = vmatmul.mubr.msk.bf16.gmra.mrb[16].mxu1 %vm2600_vm14, %v1963_v30  ;;  %v1935_v33 = vsel %vm1911_vm12, %v6483_v15, %v1773_v5 }
 0x237   : > { %v1771_v19 = vpop.permute.xlu0 %1770 }
 0x238   : > { %v1933_v38 = vsel %vm1911_vm12, %v6498_v24, %v1771_v19 }
 0x239   : > { %v1902_v27 = vpop.permute.xlu1 %1901 }
 0x23a   : > { %v1967_v16 = vsel %vm481_vm0, %v1935_v33, %v1902_v27 }
 0x23b   : > { %v1900_v62 = vpop.permute.xlu0 %1899 }
 0x23c   : > { %v1965_v4 = vsel %vm481_vm0, %v1933_v38, %v1900_v62 }
 0x23d   : > { %v1777_v12 = vpop.permute.xlu1 %1776  ;;  %5083 = vmatprep.mubr.msk.bf16.mxu1 %vm2600_vm14, %v1965_v4 }
 0x23e   : > { %5084 = vmatmul.mubr.msk.bf16.gmra.mrb[20].mxu1 %vm2600_vm14, %v1967_v16  ;;  %v1939_v24 = vsel %vm1911_vm12, %v6524_v52, %v1777_v12 }
 0x23f   : > { %v1775_v13 = vpop.permute.xlu0 %1774 }
 0x240   : > { %v1937_v39 = vsel %vm1911_vm12, %v6542_v63, %v1775_v13 }
 0x241   : > { %v1906_v56 = vpop.permute.xlu1 %1905 }
 0x242   : > { %v1971_v3 = vsel %vm481_vm0, %v1939_v24, %v1906_v56 }
 0x243   : > { %v1904_v47 = vpop.permute.xlu0 %1903 }
 0x244   : > { %v1969_v15 = vsel %vm481_vm0, %v1937_v39, %v1904_v47 }
 0x245   : > { %v1781_v36 = vpop.permute.xlu1 %1780  ;;  %5087 = vmatprep.mubr.msk.bf16.mxu1 %vm2600_vm14, %v1969_v15 }
 0x246   : > { %5088 = vmatmul.mubr.msk.bf16.gmra.mrb[24].mxu1 %vm2600_vm14, %v1971_v3  ;;  %v1943_v63 = vsel %vm1911_vm12, %v6565_v18, %v1781_v36 }
 0x247   : > { %v1779_v26 = vpop.permute.xlu0 %1778 }
 0x248   : > { %v1941_v23 = vsel %vm1911_vm12, %v6578_v37, %v1779_v26 }
 0x249   : > { %v1910_v21 = vpop.permute.xlu1 %1909 }
 0x24a   : > { %v1975_v43 = vsel %vm481_vm0, %v1943_v63, %v1910_v21 }
 0x24b   : > { %v1908_v53 = vpop.permute.xlu0 %1907 }
 0x24c   : > { %v1973_v52 = vsel %vm481_vm0, %v1941_v23, %v1908_v53 }
 0x24d   : > { %v3391_v60 = vpop.permute.xlu1 %3390  ;;  %5091 = vmatprep.mubr.msk.bf16.mxu1 %vm2600_vm14, %v1973_v52 }
 0x24e   : > { %5092 = vmatmul.mubr.msk.bf16.gmra.mrb[28].mxu1 %vm2600_vm14, %v1975_v43  ;;  %v3551_v37 = vsel %vm1911_vm12, %v6603_v54, %v3391_v60 }
 0x24f   : > { %v3389_v1 = vpop.permute.xlu0 %3388 }
 0x250   : > { %v3549_v59 = vsel %vm1911_vm12, %v6614_v44, %v3389_v1 }
 0x251   : > { %v3519_v2 = vpop.permute.xlu1 %3518 }
 0x252   : > { %v3583_v22 = vsel %vm481_vm0, %v3551_v37, %v3519_v2  ;;  %v5534_v37 = vld [vmem:[%s7324_s7] sm:$0xff]  }
 0x253   : > { %v3517_v46 = vpop.permute.xlu0 %3516  ;;  %5165 = vmatprep.subr.bf16.mxu0 %v5534_v37 }
 0x254   : > { %v3581_v18 = vsel %vm481_vm0, %v3549_v59, %v3517_v46 }
 0x255   : > { %v3395_v25 = vpop.permute.xlu1 %3394  ;;  %5099 = vmatprep.mubr.msk.bf16.mxu1 %vm2600_vm14, %v3581_v18 }
 0x256   : > { %5100 = vmatmul.mubr.msk.bf16.vlgmr.msra.gmra.mrb[0].mxu1 %vm2600_vm14, %v3583_v22  ;;  %v3555_v44 = vsel %vm1911_vm12, %v6637_v41, %v3395_v25 }
 0x257   : > { %v3393_v29 = vpop.permute.xlu0 %3392 }
 0x258   : > { %v3553_v35 = vsel %vm1911_vm12, %v6655_v32, %v3393_v29  ;;  %v7345_v32 = vld [vmem:[#allocation6_spill] sm:$0xff] }
 0x259   : > { %v3523_v55 = vpop.permute.xlu1 %3522 }
 0x25a   : > { %v3587_v11 = vsel %vm481_vm0, %v3555_v44, %v3523_v55 }
 0x25b   : > { %v3521_v9 = vpop.permute.xlu0 %3520 }
 0x25c   : > { %v3585_v54 = vsel %vm481_vm0, %v3553_v35, %v3521_v9 }
 0x25d   : > { %v3399_v0 = vpop.permute.xlu1 %3398  ;;  %5103 = vmatprep.mubr.msk.bf16.mxu1 %vm2600_vm14, %v3585_v54 }
 0x25e   : > { %5104 = vmatmul.mubr.msk.bf16.gmra.mrb[4].mxu1 %vm2600_vm14, %v3587_v11  ;;  %v3559_v58 = vsel %vm1911_vm12, %v7345_v32, %v3399_v0 }
 0x25f   : > { %v3397_v7 = vpop.permute.xlu0 %3396 }
 0x260   : > { %v3557_v10 = vsel %vm1911_vm12, %v7344_v14, %v3397_v7 }
 0x261   : > { %v3527_v17 = vpop.permute.xlu1 %3526 }
 0x262   : > { %v3591_v40 = vsel %vm481_vm0, %v3559_v58, %v3527_v17 }
 0x263   : > { %v3525_v61 = vpop.permute.xlu0 %3524 }
 0x264   : > { %v3589_v41 = vsel %vm481_vm0, %v3557_v10, %v3525_v61 }
 0x265   : > { %v3403_v42 = vpop.permute.xlu1 %3402  ;;  %5107 = vmatprep.mubr.msk.bf16.mxu1 %vm2600_vm14, %v3589_v41 }
 0x266   : > { %5108 = vmatmul.mubr.msk.bf16.gmra.mrb[8].mxu1 %vm2600_vm14, %v3591_v40  ;;  %v3563_v30 = vsel %vm1911_vm12, %v6717_v20, %v3403_v42 }
 0x267   : > { %v3401_v50 = vpop.permute.xlu0 %3400 }
 0x268   : > { %v3561_v34 = vsel %vm1911_vm12, %v6730_v6, %v3401_v50  ;;  %v7346_v6 = vld [vmem:[#allocation8_spill] sm:$0xff] }
 0x269   : > { %v3531_v31 = vpop.permute.xlu1 %3530 }
 0x26a   : > { %v3595_v38 = vsel %vm481_vm0, %v3563_v30, %v3531_v31 }
 0x26b   : > { %v3529_v5 = vpop.permute.xlu0 %3528 }
 0x26c   : > { %v3593_v19 = vsel %vm481_vm0, %v3561_v34, %v3529_v5 }
 0x26d   : > { %v3407_v27 = vpop.permute.xlu1 %3406  ;;  %5111 = vmatprep.mubr.msk.bf16.mxu1 %vm2600_vm14, %v3593_v19 }
 0x26e   : > { %5112 = vmatmul.mubr.msk.bf16.gmra.mrb[12].mxu1 %vm2600_vm14, %v3595_v38  ;;  %v3567_v16 = vsel %vm1911_vm12, %v7346_v6, %v3407_v27 }
 0x26f   : > { %v3405_v62 = vpop.permute.xlu0 %3404 }
 0x270   : > { %v3565_v4 = vsel %vm1911_vm12, %v6767_v8, %v3405_v62 }
 0x271   : > { %v3535_v33 = vpop.permute.xlu1 %3534 }
 0x272   : > { %v3599_v56 = vsel %vm481_vm0, %v3567_v16, %v3535_v33 }
 0x273   : > { %v3533_v12 = vpop.permute.xlu0 %3532 }
 0x274   : > { %v3597_v20 = vsel %vm481_vm0, %v3565_v4, %v3533_v12 }
 0x275   : > { %v3411_v13 = vpop.permute.xlu1 %3410  ;;  %5115 = vmatprep.mubr.msk.bf16.mxu1 %vm2600_vm14, %v3597_v20 }
 0x276   : > { %5116 = vmatmul.mubr.msk.bf16.gmra.mrb[16].mxu1 %vm2600_vm14, %v3599_v56  ;;  %v3571_v8 = vsel %vm1911_vm12, %v6789_v49, %v3411_v13 }
 0x277   : > { %v3409_v39 = vpop.permute.xlu0 %3408 }
 0x278   : > { %v3569_v24 = vsel %vm1911_vm12, %v6800_v48, %v3409_v39 }
 0x279   : > { %v3539_v47 = vpop.permute.xlu1 %3538 }
 0x27a   : > { %v3603_v26 = vsel %vm481_vm0, %v3571_v8, %v3539_v47 }
 0x27b   : > { %v3537_v15 = vpop.permute.xlu0 %3536 }
 0x27c   : > { %v3601_v36 = vsel %vm481_vm0, %v3569_v24, %v3537_v15 }
 0x27d   : > { %v3415_v3 = vpop.permute.xlu1 %3414  ;;  %5119 = vmatprep.mubr.msk.bf16.mxu1 %vm2600_vm14, %v3601_v36 }
 0x27e   : > { %5120 = vmatmul.mubr.msk.bf16.gmra.mrb[20].mxu1 %vm2600_vm14, %v3603_v26  ;;  %v3575_v48 = vsel %vm1911_vm12, %v6828_v51, %v3415_v3 }
 0x27f   : > { %v3413_v21 = vpop.permute.xlu0 %3412 }
 0x280   : > { %v3573_v53 = vsel %vm1911_vm12, %v6845_v45, %v3413_v21 }
 0x281   : > { %v3543_v23 = vpop.permute.xlu1 %3542 }
 0x282   : > { %v3607_v60 = vsel %vm481_vm0, %v3575_v48, %v3543_v23 }
 0x283   : > { %v3541_v63 = vpop.permute.xlu0 %3540 }
 0x284   : > { %v3605_v49 = vsel %vm481_vm0, %v3573_v53, %v3541_v63 }
 0x285   : > { %v3419_v52 = vpop.permute.xlu1 %3418  ;;  %5123 = vmatprep.mubr.msk.bf16.mxu1 %vm2600_vm14, %v3605_v49 }
 0x286   : > { %5124 = vmatmul.mubr.msk.bf16.gmra.mrb[24].mxu1 %vm2600_vm14, %v3607_v60  ;;  %v3579_v1 = vsel %vm1911_vm12, %v6861_v57, %v3419_v52  ;;  %v7077_v57 = vld [vmem:[%s7321_s4] ss:$0 sm:$0xff] }
 0x287   : > { %v3417_v43 = vpop.permute.xlu0 %3416 }
 0x288   : > { %v3577_v45 = vsel %vm1911_vm12, %v6886_v28, %v3417_v43 }
 0x289   : > { %v3547_v2 = vpop.permute.xlu1 %3546 }
 0x28a   : > { %v3611_v46 = vsel %vm481_vm0, %v3579_v1, %v3547_v2 }
 0x28b   : > { %v3545_v59 = vpop.permute.xlu0 %3544 }
 0x28c   : > { %v3609_v51 = vsel %vm481_vm0, %v3577_v45, %v3545_v59 }
 0x28d   : > { %5127 = vmatprep.mubr.msk.bf16.mxu1 %vm2600_vm14, %v3609_v51 }
 0x28e   : > { %5128 = vmatmul.mubr.msk.bf16.gmra.mrb[28].mxu1 %vm2600_vm14, %v3611_v46 }
 0x329   : > { %v5101_v28 = vpop.f32.mrb[0].mxu1 }
 0x32a   : > { %v3862_v18 = vadd.f32 %v5101_v28, %v7077_v57  ;;  %v3694_v25 = vpop.f32.mrb[1].mxu1 }
 0x32b   : > { %v3860_v22 = vadd.f32 %v7077_v57, %v3694_v25  ;;  %v5102_v29 = vpop.f32.mrb[2].mxu1 }
 0x32c   : > { %v3863_v55 = vadd.f32 %v5102_v29, %v7077_v57  ;;  %v3697_v35 = vpop.f32.mrb[3].mxu1  ;;  %v3894_v44 = vmax.f32 %v3862_v18, 0.0 }
 0x32d   : > { %v3861_v9 = vadd.f32 %v7077_v57, %v3697_v35  ;;  %v3892_v0 = vmax.f32 %v3860_v22, 0.0 }
 0x32e   : > { %v3895_v54 = vmax.f32 %v3863_v55, 0.0 }
 0x32f   : > { %v3893_v11 = vmax.f32 %v3861_v9, 0.0 }
 0x330   : > { %v3925_v7 = vpack.c.bf16 %v3895_v54, %v3894_v44 }
 0x331   : > { %v3924_v17 = vpack.c.bf16 %v3893_v11, %v3892_v0  ;;  %v5105_v14 = vpop.f32.mrb[4].mxu1 }
 0x332   : > { %v3866_v10 = vadd.f32 %v5105_v14, %v7077_v57  ;;  %v3710_v61 = vpop.f32.mrb[5].mxu1 }
 0x333   : > { %v3864_v32 = vadd.f32 %v7077_v57, %v3710_v61  ;;  %v5106_v58 = vpop.f32.mrb[6].mxu1  ;;  %5133 = vmatprep.mubr.msk.bf16.mxu0 %vm1911_vm12, %v3924_v17 }
 0x334   : > { %v3867_v41 = vadd.f32 %v5106_v58, %v7077_v57  ;;  %v3713_v42 = vpop.f32.mrb[7].mxu1  ;;  %5134 = vmatmul.mubr.msk.bf16.vlgmr.msra.gmra.mrb[32].mxu0 %vm1911_vm12, %v3925_v7  ;;  %v3898_v50 = vmax.f32 %v3866_v10, 0.0 }
 0x335   : > { %v3865_v40 = vadd.f32 %v7077_v57, %v3713_v42  ;;  %5166 = vmatpush3.bf16.msra.mxu0 %v5534_v37  ;;  %v3896_v34 = vmax.f32 %v3864_v32, 0.0 }
 0x336   : > { %v3899_v31 = vmax.f32 %v3867_v41, 0.0 }
 0x337   : > { %v3897_v5 = vmax.f32 %v3865_v40, 0.0 }
 0x338   : > { %v3927_v30 = vpack.c.bf16 %v3899_v31, %v3898_v50 }
 0x339   : > { %v3926_v19 = vpack.c.bf16 %v3897_v5, %v3896_v34  ;;  %v5109_v27 = vpop.f32.mrb[8].mxu1 }
 0x33a   : > { %v3870_v38 = vadd.f32 %v5109_v27, %v7077_v57  ;;  %v3726_v62 = vpop.f32.mrb[9].mxu1 }
 0x33b   : > { %v3868_v33 = vadd.f32 %v7077_v57, %v3726_v62  ;;  %v5110_v4 = vpop.f32.mrb[10].mxu1  ;;  %5137 = vmatprep.mubr.msk.bf16.mxu0 %vm1911_vm12, %v3926_v19 }
 0x33c   : > { %v3871_v12 = vadd.f32 %v5110_v4, %v7077_v57  ;;  %v3729_v6 = vpop.f32.mrb[11].mxu1  ;;  %5138 = vmatmul.mubr.msk.bf16.gmra.mrb[36].mxu0 %vm1911_vm12, %v3927_v30  ;;  %v3902_v20 = vmax.f32 %v3870_v38, 0.0 }
 0x33d   : > { %v3869_v16 = vadd.f32 %v7077_v57, %v3729_v6  ;;  %v3900_v56 = vmax.f32 %v3868_v33, 0.0 }
 0x33e   : > { %v3903_v13 = vmax.f32 %v3871_v12, 0.0 }
 0x33f   : > { %v3901_v39 = vmax.f32 %v3869_v16, 0.0 }
 0x340   : > { %v3929_v47 = vpack.c.bf16 %v3903_v13, %v3902_v20 }
 0x341   : > { %v3928_v24 = vpack.c.bf16 %v3901_v39, %v3900_v56  ;;  %v5113_v15 = vpop.f32.mrb[12].mxu1 }
 0x342   : > { %v3874_v8 = vadd.f32 %v5113_v15, %v7077_v57  ;;  %v3742_v36 = vpop.f32.mrb[13].mxu1 }
 0x343   : > { %v3872_v3 = vadd.f32 %v7077_v57, %v3742_v36  ;;  %v5114_v26 = vpop.f32.mrb[14].mxu1  ;;  %5141 = vmatprep.mubr.msk.bf16.mxu0 %vm1911_vm12, %v3928_v24 }
 0x344   : > { %v3875_v21 = vadd.f32 %v5114_v26, %v7077_v57  ;;  %v3745_v23 = vpop.f32.mrb[15].mxu1  ;;  %5142 = vmatmul.mubr.msk.bf16.gmra.mrb[40].mxu0 %vm1911_vm12, %v3929_v47  ;;  %v3906_v63 = vmax.f32 %v3874_v8, 0.0 }
 0x345   : > { %v3873_v53 = vadd.f32 %v7077_v57, %v3745_v23  ;;  %v3904_v49 = vmax.f32 %v3872_v3, 0.0 }
 0x346   : > { %v3907_v48 = vmax.f32 %v3875_v21, 0.0 }
 0x347   : > { %v3905_v52 = vmax.f32 %v3873_v53, 0.0  ;;  %v5536_v53 = vld [vmem:[%s5760_s21] sm:$0xff]  }
 0x348   : > { %v3931_v60 = vpack.c.bf16 %v3907_v48, %v3906_v63  ;;  %v5537_v63 = vld [vmem:[%s5760_s21 + $0x8] sm:$0xff]   ;;  %v5539_v48 = vld [vmem:[%s5760_s21 + $0x18] sm:$0xff]  }
 0x349   : > { %v3930_v43 = vpack.c.bf16 %v3905_v52, %v3904_v49  ;;  %v5117_v1 = vpop.f32.mrb[16].mxu1  ;;  %v5540_v49 = vld [vmem:[%s5760_s21 + $0x20] sm:$0xff]   ;;  %v5541_v52 = vld [vmem:[%s5760_s21 + $0x28] sm:$0xff]  }
 0x34a   : > { %v3878_v2 = vadd.f32 %v5117_v1, %v7077_v57  ;;  %v3758_v45 = vpop.f32.mrb[17].mxu1  ;;  %v5544_v1 = vld [vmem:[%s5760_s21 + $0x40] sm:$0xff]  }
 0x34b   : > { %v3876_v59 = vadd.f32 %v7077_v57, %v3758_v45  ;;  %v5118_v51 = vpop.f32.mrb[18].mxu1  ;;  %5145 = vmatprep.mubr.msk.bf16.mxu0 %vm1911_vm12, %v3930_v43  ;;  %v5543_v43 = vld [vmem:[%s5760_s21 + $0x38] sm:$0xff]   ;;  %v5546_v45 = vld [vmem:[%s5760_s21 + $0x50] sm:$0xff]  }
 0x34c   : > { %v3879_v46 = vadd.f32 %v5118_v51, %v7077_v57  ;;  %v3761_v37 = vpop.f32.mrb[19].mxu1  ;;  %5146 = vmatmul.mubr.msk.bf16.gmra.mrb[44].mxu0 %vm1911_vm12, %v3931_v60  ;;  %v3910_v18 = vmax.f32 %v3878_v2, 0.0  ;;  %v5542_v60 = vld [vmem:[%s5760_s21 + $0x30] sm:$0xff]   ;;  %v5545_v2 = vld [vmem:[%s5760_s21 + $0x48] sm:$0xff]   ;;  %v5548_v51 = vld [vmem:[%s5760_s21 + $0x60] sm:$0xff]  }
 0x34d   : > { %v3877_v28 = vadd.f32 %v7077_v57, %v3761_v37  ;;  %v3908_v22 = vmax.f32 %v3876_v59, 0.0  ;;  %v5547_v59 = vld [vmem:[%s5760_s21 + $0x58] sm:$0xff]   ;;  %v5550_v37 = vld [vmem:[%s5760_s21 + $0x70] sm:$0xff]  }
 0x34e   : > { %v3911_v25 = vmax.f32 %v3879_v46, 0.0  ;;  %v5549_v46 = vld [vmem:[%s5760_s21 + $0x68] sm:$0xff]  }
 0x34f   : > { %v3909_v29 = vmax.f32 %v3877_v28, 0.0  ;;  %v5551_v28 = vld [vmem:[%s5760_s21 + $0x78] sm:$0xff]  }
 0x350   : > { %v3933_v55 = vpack.c.bf16 %v3911_v25, %v3910_v18  ;;  %v7164_v18 = vld [vmem:[%s7323_s6] ss:$0 sm:$0xff] }
 0x351   : > { %v3932_v35 = vpack.c.bf16 %v3909_v29, %v3908_v22  ;;  %v5121_v9 = vpop.f32.mrb[20].mxu1  ;;  %v7169_v22 = vld [vmem:[%s7325_s8] ss:$0 sm:$0xff] }
 0x352   : > { %v3882_v44 = vadd.f32 %v5121_v9, %v7077_v57  ;;  %v3774_v54 = vpop.f32.mrb[21].mxu1 }
 0x353   : > { %v3880_v0 = vadd.f32 %v7077_v57, %v3774_v54  ;;  %v5122_v11 = vpop.f32.mrb[22].mxu1  ;;  %5149 = vmatprep.mubr.msk.bf16.mxu0 %vm1911_vm12, %v3932_v35 }
 0x354   : > { %v3883_v7 = vadd.f32 %v5122_v11, %v7077_v57  ;;  %v3777_v17 = vpop.f32.mrb[23].mxu1  ;;  %5150 = vmatmul.mubr.msk.bf16.gmra.mrb[48].mxu0 %vm1911_vm12, %v3933_v55  ;;  %v3914_v10 = vmax.f32 %v3882_v44, 0.0 }
 0x355   : > { %v3881_v14 = vadd.f32 %v7077_v57, %v3777_v17  ;;  %v3912_v32 = vmax.f32 %v3880_v0, 0.0 }
 0x356   : > { %v3915_v61 = vmax.f32 %v3883_v7, 0.0 }
 0x357   : > { %v3913_v58 = vmax.f32 %v3881_v14, 0.0 }
 0x358   : > { %v3935_v41 = vpack.c.bf16 %v3915_v61, %v3914_v10 }
 0x359   : > { %v3934_v42 = vpack.c.bf16 %v3913_v58, %v3912_v32  ;;  %v5125_v40 = vpop.f32.mrb[24].mxu1 }
 0x35a   : > { %v3886_v50 = vadd.f32 %v5125_v40, %v7077_v57  ;;  %v3790_v31 = vpop.f32.mrb[25].mxu1 }
 0x35b   : > { %v3884_v34 = vadd.f32 %v7077_v57, %v3790_v31  ;;  %v5126_v5 = vpop.f32.mrb[26].mxu1  ;;  %5153 = vmatprep.mubr.msk.bf16.mxu0 %vm1911_vm12, %v3934_v42 }
 0x35c   : > { %v3887_v30 = vadd.f32 %v5126_v5, %v7077_v57  ;;  %v3793_v19 = vpop.f32.mrb[27].mxu1  ;;  %5154 = vmatmul.mubr.msk.bf16.gmra.mrb[52].mxu0 %vm1911_vm12, %v3935_v41  ;;  %v3918_v38 = vmax.f32 %v3886_v50, 0.0 }
 0x35d   : > { %v3885_v27 = vadd.f32 %v7077_v57, %v3793_v19  ;;  %v3916_v33 = vmax.f32 %v3884_v34, 0.0 }
 0x35e   : > { %v3919_v62 = vmax.f32 %v3887_v30, 0.0 }
 0x35f   : > { %v3917_v4 = vmax.f32 %v3885_v27, 0.0 }
 0x360   : > { %v3937_v12 = vpack.c.bf16 %v3919_v62, %v3918_v38 }
 0x361   : > { %v3936_v6 = vpack.c.bf16 %v3917_v4, %v3916_v33  ;;  %v5129_v16 = vpop.f32.mrb[28].mxu1 }
 0x362   : > { %v3890_v20 = vadd.f32 %v5129_v16, %v7077_v57  ;;  %v3806_v13 = vpop.f32.mrb[29].mxu1 }
 0x363   : > { %v3888_v56 = vadd.f32 %v7077_v57, %v3806_v13  ;;  %v5130_v39 = vpop.f32.mrb[30].mxu1  ;;  %5157 = vmatprep.mubr.msk.bf16.mxu0 %vm1911_vm12, %v3936_v6 }
 0x364   : > { %v3891_v47 = vadd.f32 %v5130_v39, %v7077_v57  ;;  %v3809_v24 = vpop.f32.mrb[31].mxu1  ;;  %5158 = vmatmul.mubr.msk.bf16.gmra.mrb[56].mxu0 %vm1911_vm12, %v3937_v12  ;;  %v3922_v8 = vmax.f32 %v3890_v20, 0.0 }
 0x365   : > { %v3889_v15 = vadd.f32 %v7077_v57, %v3809_v24  ;;  %v3920_v3 = vmax.f32 %v3888_v56, 0.0  ;;  %v5538_v57 = vld [vmem:[%s5760_s21 + $0x10] sm:$0xff]  }
 0x366   : > { %v3923_v36 = vmax.f32 %v3891_v47, 0.0 }
 0x367   : > { %v3921_v26 = vmax.f32 %v3889_v15, 0.0 }
 0x368   : > { %v3939_v21 = vpack.c.bf16 %v3923_v36, %v3922_v8 }
 0x369   : > { %v3938_v23 = vpack.c.bf16 %v3921_v26, %v3920_v3 }
 0x36b   : > { %5161 = vmatprep.mubr.msk.bf16.mxu0 %vm1911_vm12, %v3938_v23 }
 0x36c   : > { %5162 = vmatmul.mubr.msk.bf16.gmra.mrb[60].mxu0 %vm1911_vm12, %v3939_v21 }
 0x36d   : > { %5167 = vmatprep.mubr.msk.bf16.mxu0 %vm481_vm0, %v5536_v53 }
 0x374   : > { %5168 = vmatmul.mubr.msk.bf16.vlgmr.msra.gmra.mrb[32].mxu0 %vm481_vm0, %v5537_v63 }
 0x375   : > { %5171 = vmatprep.mubr.msk.bf16.mxu0 %vm481_vm0, %v5538_v57 }
 0x37c   : > { %5172 = vmatmul.mubr.msk.bf16.gmra.mrb[36].mxu0 %vm481_vm0, %v5539_v48 }
 0x37d   : > { %5175 = vmatprep.mubr.msk.bf16.mxu0 %vm481_vm0, %v5540_v49 }
 0x384   : > { %5176 = vmatmul.mubr.msk.bf16.gmra.mrb[40].mxu0 %vm481_vm0, %v5541_v52 }
 0x385   : > { %5179 = vmatprep.mubr.msk.bf16.mxu0 %vm481_vm0, %v5542_v60 }
 0x38c   : > { %5180 = vmatmul.mubr.msk.bf16.gmra.mrb[44].mxu0 %vm481_vm0, %v5543_v43 }
 0x38d   : > { %5183 = vmatprep.mubr.msk.bf16.mxu0 %vm481_vm0, %v5544_v1 }
 0x394   : > { %5184 = vmatmul.mubr.msk.bf16.gmra.mrb[48].mxu0 %vm481_vm0, %v5545_v2 }
 0x395   : > { %5187 = vmatprep.mubr.msk.bf16.mxu0 %vm481_vm0, %v5546_v45 }
 0x39c   : > { %5188 = vmatmul.mubr.msk.bf16.gmra.mrb[52].mxu0 %vm481_vm0, %v5547_v59 }
 0x39d   : > { %5191 = vmatprep.mubr.msk.bf16.mxu0 %vm481_vm0, %v5548_v51 }
 0x3a4   : > { %5192 = vmatmul.mubr.msk.bf16.gmra.mrb[56].mxu0 %vm481_vm0, %v5549_v46 }
 0x3a5   : > { %5195 = vmatprep.mubr.msk.bf16.mxu0 %vm481_vm0, %v5550_v37 }
 0x3ac   : > { %5196 = vmatmul.mubr.msk.bf16.gmra.mrb[60].mxu0 %vm481_vm0, %v5551_v28 }
 0x447   : > { %v5169_v25 = vpop.f32.mrb[32].mxu0 }
 0x448   : > { %v5199_v29 = vadd.f32 %v5169_v25, %v7164_v18  ;;  %v4202_v55 = vpop.f32.mrb[33].mxu0 }
 0x449   : > { %v5200_v35 = vadd.f32 %v7164_v18, %v4202_v55  ;;  %v5170_v9 = vpop.f32.mrb[34].mxu0 }
 0x44a   : > { %v4370_v44 = vadd.f32 %v5199_v29, %v7169_v22  ;;  %v5201_v54 = vadd.f32 %v5170_v9, %v7164_v18  ;;  %v4205_v0 = vpop.f32.mrb[35].mxu0 }
 0x44b   : > { %v4368_v11 = vadd.f32 %v5200_v35, %v7169_v22  ;;  %v5202_v7 = vadd.f32 %v7164_v18, %v4205_v0 }
 0x44c   : > { %v4402_v17 = vmax.f32 %v4370_v44, 0.0  ;;  %v4371_v14 = vadd.f32 %v5201_v54, %v7169_v22 }
 0x44d   : > { %v4400_v10 = vmax.f32 %v4368_v11, 0.0  ;;  %v4369_v61 = vadd.f32 %v5202_v7, %v7169_v22 }
 0x44e   : > { %4435 = vst.msk [vmem:[%s7178_s12 + $0x10] sm:$0xff] %vm4432_vm15, %v4402_v17  ;;  %v4403_v32 = vmax.f32 %v4371_v14, 0.0 }
 0x44f   : > { %4433 = vst.msk [vmem:[%s7178_s12] sm:$0xff] %vm4432_vm15, %v4400_v10  ;;  %v4401_v58 = vmax.f32 %v4369_v61, 0.0  ;;  %v5173_v41 = vpop.f32.mrb[36].mxu0 }
 0x450   : > { %4436 = vst.msk [vmem:[%s7178_s12 + $0x18] sm:$0xff] %vm4432_vm15, %v4403_v32  ;;  %v5203_v42 = vadd.f32 %v5173_v41, %v7164_v18  ;;  %v4218_v40 = vpop.f32.mrb[37].mxu0 }
 0x451   : > { %4434 = vst.msk [vmem:[%s7178_s12 + $0x8] sm:$0xff] %vm4432_vm15, %v4401_v58  ;;  %v5204_v50 = vadd.f32 %v7164_v18, %v4218_v40  ;;  %v5174_v31 = vpop.f32.mrb[38].mxu0 }
 0x452   : > { %v4374_v34 = vadd.f32 %v5203_v42, %v7169_v22  ;;  %v5205_v5 = vadd.f32 %v5174_v31, %v7164_v18  ;;  %v4221_v30 = vpop.f32.mrb[39].mxu0 }
 0x453   : > { %v4372_v19 = vadd.f32 %v5204_v50, %v7169_v22  ;;  %v5206_v27 = vadd.f32 %v7164_v18, %v4221_v30 }
 0x454   : > { %v4406_v38 = vmax.f32 %v4374_v34, 0.0  ;;  %v4375_v62 = vadd.f32 %v5205_v5, %v7169_v22 }
 0x455   : > { %v4404_v33 = vmax.f32 %v4372_v19, 0.0  ;;  %v4373_v4 = vadd.f32 %v5206_v27, %v7169_v22 }
 0x456   : > { %4439 = vst.msk [vmem:[%s7178_s12 + $0x30] sm:$0xff] %vm4432_vm15, %v4406_v38  ;;  %v4407_v12 = vmax.f32 %v4375_v62, 0.0 }
 0x457   : > { %4437 = vst.msk [vmem:[%s7178_s12 + $0x20] sm:$0xff] %vm4432_vm15, %v4404_v33  ;;  %v4405_v6 = vmax.f32 %v4373_v4, 0.0  ;;  %v5177_v16 = vpop.f32.mrb[40].mxu0 }
 0x458   : > { %4440 = vst.msk [vmem:[%s7178_s12 + $0x38] sm:$0xff] %vm4432_vm15, %v4407_v12  ;;  %v5207_v20 = vadd.f32 %v5177_v16, %v7164_v18  ;;  %v4234_v13 = vpop.f32.mrb[41].mxu0 }
 0x459   : > { %4438 = vst.msk [vmem:[%s7178_s12 + $0x28] sm:$0xff] %vm4432_vm15, %v4405_v6  ;;  %v5208_v56 = vadd.f32 %v7164_v18, %v4234_v13  ;;  %v5178_v39 = vpop.f32.mrb[42].mxu0 }
 0x45a   : > { %v4378_v47 = vadd.f32 %v5207_v20, %v7169_v22  ;;  %v5209_v24 = vadd.f32 %v5178_v39, %v7164_v18  ;;  %v4237_v15 = vpop.f32.mrb[43].mxu0 }
 0x45b   : > { %v4376_v8 = vadd.f32 %v5208_v56, %v7169_v22  ;;  %v5210_v36 = vadd.f32 %v7164_v18, %v4237_v15 }
 0x45c   : > { %v4410_v3 = vmax.f32 %v4378_v47, 0.0  ;;  %v4379_v26 = vadd.f32 %v5209_v24, %v7169_v22 }
 0x45d   : > { %v4408_v21 = vmax.f32 %v4376_v8, 0.0  ;;  %v4377_v23 = vadd.f32 %v5210_v36, %v7169_v22 }
 0x45e   : > { %4443 = vst.msk [vmem:[%s7178_s12 + $0x50] sm:$0xff] %vm4432_vm15, %v4410_v3  ;;  %v4411_v53 = vmax.f32 %v4379_v26, 0.0 }
 0x45f   : > { %4441 = vst.msk [vmem:[%s7178_s12 + $0x40] sm:$0xff] %vm4432_vm15, %v4408_v21  ;;  %v4409_v63 = vmax.f32 %v4377_v23, 0.0  ;;  %v5181_v57 = vpop.f32.mrb[44].mxu0 }
 0x460   : > { %4444 = vst.msk [vmem:[%s7178_s12 + $0x58] sm:$0xff] %vm4432_vm15, %v4411_v53  ;;  %v5211_v48 = vadd.f32 %v5181_v57, %v7164_v18  ;;  %v4250_v49 = vpop.f32.mrb[45].mxu0 }
 0x461   : > { %4442 = vst.msk [vmem:[%s7178_s12 + $0x48] sm:$0xff] %vm4432_vm15, %v4409_v63  ;;  %v5212_v52 = vadd.f32 %v7164_v18, %v4250_v49  ;;  %v5182_v60 = vpop.f32.mrb[46].mxu0 }
 0x462   : > { %v4382_v43 = vadd.f32 %v5211_v48, %v7169_v22  ;;  %v5213_v1 = vadd.f32 %v5182_v60, %v7164_v18  ;;  %v4253_v2 = vpop.f32.mrb[47].mxu0 }
 0x463   : > { %v4380_v45 = vadd.f32 %v5212_v52, %v7169_v22  ;;  %v5214_v59 = vadd.f32 %v7164_v18, %v4253_v2 }
 0x464   : > { %v4414_v51 = vmax.f32 %v4382_v43, 0.0  ;;  %v4383_v46 = vadd.f32 %v5213_v1, %v7169_v22 }
 0x465   : > { %v4412_v37 = vmax.f32 %v4380_v45, 0.0  ;;  %v4381_v28 = vadd.f32 %v5214_v59, %v7169_v22 }
 0x466   : > { %4447 = vst.msk [vmem:[%s7178_s12 + $0x70] sm:$0xff] %vm4432_vm15, %v4414_v51  ;;  %v4415_v25 = vmax.f32 %v4383_v46, 0.0 }
 0x467   : > { %4445 = vst.msk [vmem:[%s7178_s12 + $0x60] sm:$0xff] %vm4432_vm15, %v4412_v37  ;;  %v4413_v29 = vmax.f32 %v4381_v28, 0.0  ;;  %v5185_v55 = vpop.f32.mrb[48].mxu0 }
 0x468   : > { %4448 = vst.msk [vmem:[%s7178_s12 + $0x78] sm:$0xff] %vm4432_vm15, %v4415_v25  ;;  %v5215_v35 = vadd.f32 %v5185_v55, %v7164_v18  ;;  %v4266_v9 = vpop.f32.mrb[49].mxu0 }
 0x469   : > { %4446 = vst.msk [vmem:[%s7178_s12 + $0x68] sm:$0xff] %vm4432_vm15, %v4413_v29  ;;  %v5216_v44 = vadd.f32 %v7164_v18, %v4266_v9  ;;  %v5186_v54 = vpop.f32.mrb[50].mxu0 }
 0x46a   : > { %v4386_v0 = vadd.f32 %v5215_v35, %v7169_v22  ;;  %v5217_v11 = vadd.f32 %v5186_v54, %v7164_v18  ;;  %v4269_v7 = vpop.f32.mrb[51].mxu0 }
 0x46b   : > { %v4384_v17 = vadd.f32 %v5216_v44, %v7169_v22  ;;  %v5218_v14 = vadd.f32 %v7164_v18, %v4269_v7 }
 0x46c   : > { %v4418_v10 = vmax.f32 %v4386_v0, 0.0  ;;  %v4387_v61 = vadd.f32 %v5217_v11, %v7169_v22 }
 0x46d   : > { %v4416_v32 = vmax.f32 %v4384_v17, 0.0  ;;  %v4385_v58 = vadd.f32 %v5218_v14, %v7169_v22 }
 0x46e   : > { %4451 = vst.msk [vmem:[%s7178_s12 + $0x90] sm:$0xff] %vm4432_vm15, %v4418_v10  ;;  %v4419_v41 = vmax.f32 %v4387_v61, 0.0 }
 0x46f   : > { %4449 = vst.msk [vmem:[%s7178_s12 + $0x80] sm:$0xff] %vm4432_vm15, %v4416_v32  ;;  %v4417_v42 = vmax.f32 %v4385_v58, 0.0  ;;  %v5189_v40 = vpop.f32.mrb[52].mxu0 }
 0x470   : > { %4452 = vst.msk [vmem:[%s7178_s12 + $0x98] sm:$0xff] %vm4432_vm15, %v4419_v41  ;;  %v5219_v50 = vadd.f32 %v5189_v40, %v7164_v18  ;;  %v4282_v31 = vpop.f32.mrb[53].mxu0 }
 0x471   : > { %4450 = vst.msk [vmem:[%s7178_s12 + $0x88] sm:$0xff] %vm4432_vm15, %v4417_v42  ;;  %v5220_v34 = vadd.f32 %v7164_v18, %v4282_v31  ;;  %v5190_v5 = vpop.f32.mrb[54].mxu0 }
 0x472   : > { %v4390_v30 = vadd.f32 %v5219_v50, %v7169_v22  ;;  %v5221_v19 = vadd.f32 %v5190_v5, %v7164_v18  ;;  %v4285_v27 = vpop.f32.mrb[55].mxu0 }
 0x473   : > { %v4388_v38 = vadd.f32 %v5220_v34, %v7169_v22  ;;  %v5222_v62 = vadd.f32 %v7164_v18, %v4285_v27 }
 0x474   : > { %v4422_v33 = vmax.f32 %v4390_v30, 0.0  ;;  %v4391_v4 = vadd.f32 %v5221_v19, %v7169_v22 }
 0x475   : > { %v4420_v12 = vmax.f32 %v4388_v38, 0.0  ;;  %v4389_v6 = vadd.f32 %v5222_v62, %v7169_v22 }
 0x476   : > { %4455 = vst.msk [vmem:[%s7178_s12 + $0xb0] sm:$0xff] %vm4432_vm15, %v4422_v33  ;;  %v4423_v16 = vmax.f32 %v4391_v4, 0.0 }
 0x477   : > { %4453 = vst.msk [vmem:[%s7178_s12 + $0xa0] sm:$0xff] %vm4432_vm15, %v4420_v12  ;;  %v4421_v20 = vmax.f32 %v4389_v6, 0.0  ;;  %v5193_v13 = vpop.f32.mrb[56].mxu0 }
 0x478   : > { %4456 = vst.msk [vmem:[%s7178_s12 + $0xb8] sm:$0xff] %vm4432_vm15, %v4423_v16  ;;  %v5223_v56 = vadd.f32 %v5193_v13, %v7164_v18  ;;  %v4298_v39 = vpop.f32.mrb[57].mxu0 }
 0x479   : > { %4454 = vst.msk [vmem:[%s7178_s12 + $0xa8] sm:$0xff] %vm4432_vm15, %v4421_v20  ;;  %v5224_v47 = vadd.f32 %v7164_v18, %v4298_v39  ;;  %v5194_v24 = vpop.f32.mrb[58].mxu0 }
 0x47a   : > { %v4394_v15 = vadd.f32 %v5223_v56, %v7169_v22  ;;  %v5225_v8 = vadd.f32 %v5194_v24, %v7164_v18  ;;  %v4301_v36 = vpop.f32.mrb[59].mxu0 }
 0x47b   : > { %v4392_v3 = vadd.f32 %v5224_v47, %v7169_v22  ;;  %v5226_v26 = vadd.f32 %v7164_v18, %v4301_v36 }
 0x47c   : > { %v4426_v21 = vmax.f32 %v4394_v15, 0.0  ;;  %v4395_v23 = vadd.f32 %v5225_v8, %v7169_v22 }
 0x47d   : > { %v4424_v53 = vmax.f32 %v4392_v3, 0.0  ;;  %v4393_v63 = vadd.f32 %v5226_v26, %v7169_v22 }
 0x47e   : > { %4459 = vst.msk [vmem:[%s7178_s12 + $0xd0] sm:$0xff] %vm4432_vm15, %v4426_v21  ;;  %v4427_v57 = vmax.f32 %v4395_v23, 0.0 }
 0x47f   : > { %4457 = vst.msk [vmem:[%s7178_s12 + $0xc0] sm:$0xff] %vm4432_vm15, %v4424_v53  ;;  %v4425_v48 = vmax.f32 %v4393_v63, 0.0  ;;  %v5197_v49 = vpop.f32.mrb[60].mxu0 }
 0x480   : > { %4460 = vst.msk [vmem:[%s7178_s12 + $0xd8] sm:$0xff] %vm4432_vm15, %v4427_v57  ;;  %v5227_v52 = vadd.f32 %v5197_v49, %v7164_v18  ;;  %v4314_v60 = vpop.f32.mrb[61].mxu0 }
 0x481   : > { %4458 = vst.msk [vmem:[%s7178_s12 + $0xc8] sm:$0xff] %vm4432_vm15, %v4425_v48  ;;  %v5228_v43 = vadd.f32 %v7164_v18, %v4314_v60  ;;  %v5198_v1 = vpop.f32.mrb[62].mxu0 }
 0x482   : > { %v4398_v2 = vadd.f32 %v5227_v52, %v7169_v22  ;;  %v5229_v45 = vadd.f32 %v5198_v1, %v7164_v18  ;;  %v4317_v59 = vpop.f32.mrb[63].mxu0 }
 0x483   : > { %v4396_v51 = vadd.f32 %v5228_v43, %v7169_v22  ;;  %v5230_v46 = vadd.f32 %v7164_v18, %v4317_v59 }
 0x484   : > { %v4430_v37 = vmax.f32 %v4398_v2, 0.0  ;;  %v4399_v28 = vadd.f32 %v5229_v45, %v7169_v22 }
 0x485   : > { %v4428_v25 = vmax.f32 %v4396_v51, 0.0  ;;  %v4397_v29 = vadd.f32 %v5230_v46, %v7169_v22 }
 0x486   : > { %4463 = vst.msk [vmem:[%s7178_s12 + $0xf0] sm:$0xff] %vm4432_vm15, %v4430_v37  ;;  %v4431_v55 = vmax.f32 %v4399_v28, 0.0 }
 0x487   : > { %4461 = vst.msk [vmem:[%s7178_s12 + $0xe0] sm:$0xff] %vm4432_vm15, %v4428_v25  ;;  %v4429_v35 = vmax.f32 %v4397_v29, 0.0 }
 0x488   : > { %4464 = vst.msk [vmem:[%s7178_s12 + $0xf8] sm:$0xff] %vm4432_vm15, %v4431_v55 }
 0x489   : > { %4462 = vst.msk [vmem:[%s7178_s12 + $0xe8] sm:$0xff] %vm4432_vm15, %v4429_v35 }
 0x48a PF: > { %p19_p8 = scmp.ge.s32.totalorder %s5696_s14, 4   ;;  %s7347_s30 = smov %s5608_s10 }
 0x48b   : > { %s7348_s10 = smov %s5612_s11  ;;  %s7349_s11 = smov %s5706_s17 }
 0x48c   : > { %s7350_s12 = smov %s5696_s14  ;;  %21 = sbr.rel (!%p19_p8) target bundleno = 3 (0x3), region = 101 }
 0x493   :  { %4486 = vsyncpa [#allocation4], 1 }
 0x494   :  { %4488 = vsyncpa [#allocation4 + $0x1], 1 }

// kernel: tpu_custom_call.1
= control target key start
LH: loop header
LB: loop body
LE: loop exit
PB: predicated region body
PF: predicated region fallthrough
CT: control target
= control target key end

     0   :  { %14 = vsyncpa [#allocation4], 0  ;;  %s7317_s0 = inlined_call_operand.hbm [shape: bf16[2,16,16,16], index: 0, kind: input, shape index: {}]   ;;  %s7318_s1 = inlined_call_operand.vmem [shape: bf16[16,8], index: 1, kind: input, shape index: {}]   ;;  %s7319_s2 = inlined_call_operand.vmem [shape: f32[1,8], index: 2, kind: input, shape index: {}]   ;;  %s7320_s3 = inlined_call_operand.vmem [shape: bf16[3,24,8], index: 3, kind: input, shape index: {}]   ;;  %s7321_s4 = inlined_call_operand.vmem [shape: f32[1,8], index: 4, kind: input, shape index: {}]   ;;  %s7322_s5 = inlined_call_operand.vmem [shape: bf16[8,32], index: 5, kind: input, shape index: {}]   ;;  %s7323_s6 = inlined_call_operand.vmem [shape: f32[1,32], index: 6, kind: input, shape index: {}]   ;;  %s7324_s7 = inlined_call_operand.vmem [shape: bf16[16,32], index: 7, kind: input, shape index: {}]   ;;  %s7325_s8 = inlined_call_operand.vmem [shape: f32[1,32], index: 8, kind: input, shape index: {}]   ;;  %s7326_s9 = inlined_call_operand.vmem [shape: f32[2,256,32], index: 9, kind: output, shape index: {}]  }
   0x1   :  { %16 = vsyncpa [#allocation4 + $0x1], 0  ;;  %s5674_s30 = smov 0   ;;  %s5676_s10 = smov 0  }
   0x2   :  { %s5678_s11 = smov 0   ;;  %s5680_s12 = smov 0  }
   0x3 LB: > { %s5693_s13 = sadd.s32 4294967295, %s5616_s12   ;;  %s5696_s14 = sadd.s32 1, %s5616_s12   ;;  %s5616_s12 = sphi %s5680_s12, %s7350_s12   ;;  %s5612_s11 = sphi %s5678_s11, %s7349_s11   ;;  %s5608_s10 = sphi %s5676_s10, %s7348_s10   ;;  %s5604_s30 = sphi %s5674_s30, %s7347_s30  }
   0x4   : > { %s26_s15 = ssub.s32 %s5616_s12, %s5696_s14  ;;  %s29_s16 = sadd.s32 1, %s5612_s11 }
   0x5   : > { %p27_p0 = scmp.eq.s32.totalorder %s26_s15, 0  ;;  %p36_p1 = scmp.ne.s32.totalorder %s5612_s11, %s5608_s10 }
   0x6   : > { %p37_p2 = scmp.eq.s32.totalorder %s5616_s12, 0  ;;  %p42_p3 = scmp.ne.s32.totalorder %s5608_s10, %s5604_s30 }
   0x7   : > { %s5706_s17 = scalar_select %p27_p0, %s5612_s11, %s29_s16  }
   0x8   : > { %p38_p4 = por %p37_p2, %p36_p1  ;;  %p43_p5 = scmp.eq.s32.totalorder %s5693_s13, 0 }
   0x9   : > { %p5337_p6 = scmp.lt.s32.totalorder %s5616_s12, 2  ;;  %s284_s19 = sand.u32 1, %s5612_s11  }
   0xa   : > { %p5710_p7 = por %p43_p5, %p42_p3  ;;  %s4535_s20 = sshll.u32 %s284_s19, 7 }
   0xb   : > { %s4850_s21 = sshll.u32 %s5616_s12, 11  ;;  %s288_s25 = scalar_lea.vmem [#allocation3], %s4535_s20 }
   0xc   : > { %s5719_s24 = scalar_lea.hbm %s7317_s0, %s4850_s21  ;;  %s295_s26 = sshll.u32 %s288_s25, 4  ;;  %s5721_s26 = int_to_ptr.vmem [resolvable:$true] %s295_s26 }
   0xd   : > { %p5723_p8 = pnand %p5337_p6, %p38_p4  ;;  %s5728_s28 = scalar_lea.sflag [#allocation4], %s284_s19 }
   0xe   : > { %s5552_s29 = scalar_lea.hbm %s5719_s24, 2048  ;;  %s5557_s16 = scalar_lea.hbm %s7317_s0, 4096 }
   0xf   : > { %p5553_p10 = scmp.ne.s32.totalorder %s5719_s24, %s5552_s29  ;;  %p5554_p11 = pneg %p5723_p8 }
  0x10   : > { %p5558_p0 = scmp.lt.u32.totalorder %s5719_s24, %s7317_s0  ;;  %p5559_p1 = scmp.lt.u32.totalorder %s5557_s16, %s5552_s29 }
  0x11   : > { %p5555_p12 = pnand %p5554_p11, %p5553_p10  ;;  %p5561_p3 = scmp.lt.u32.totalorder %s5552_s29, %s5719_s24 }
  0x12   : > { %p5560_p2 = por %p5559_p1, %p5558_p0 }
  0x13   : > { %p5556_p13 = pneg %p5555_p12 }
  0x14   : > { %p5562_p4 = por %p5561_p3, %p5560_p2 }
  0x16   : > { %p5563_p5 = pnand %p5562_p4, %p5556_p13 }
  0x18   : > { %5566 = shalt.err (!%p5563_p5)
}
  0x19   : > { %s5567_s19 = scalar_lea.vmem %s5721_s26, 2048  ;;  %s5618_s22 = smov [#allocation3]  }
  0x1a   : > { %p5568_p6 = scmp.ne.s32.totalorder %s5721_s26, %s5567_s19  ;;  %s5572_s23 = sshll.u32 %s5618_s22, 4  ;;  %s5573_s23 = int_to_ptr.vmem [resolvable:$false] %s5572_s23 }
  0x1b   : > { %s5574_s25 = scalar_lea.vmem %s5573_s23, 4096  ;;  %p5575_p9 = scmp.lt.s32.totalorder %s5721_s26, %s5573_s23 }
  0x1c   : > { %p5570_p10 = pnand %p5568_p6, %p5554_p11  ;;  %p5576_p0 = scmp.lt.s32.totalorder %s5574_s25, %s5567_s19 }
  0x1e   : > { %p5571_p12 = pneg %p5570_p10  ;;  %p5577_p1 = por %p5576_p0, %p5575_p9 }
  0x20   : > { %p5578_p2 = pnand %p5577_p1, %p5571_p12 }
  0x22   : > { %5581 = shalt.err (!%p5578_p2)
}
  0x23   : > { %s5619_s29 = smov 64   ;;  %s5620_s30 = smov 4  }
  0x24   : > { %5336 = dma.hbm_to_vmem [thread:$0]  (!%p5723_p8), %s5719_s24, 2048, %s5721_s26, %s5728_s28, %s5619_s29, %s5619_s29, %s5620_s30  }
  0x25   : > { %p303_p11 = scmp.lt.s32.totalorder %s5616_s12, 3  ;;  %p7332_p13 = scmp.ge.s32.totalorder %s5616_s12, 1 }
  0x27   : > { %p304_p3 = pnand %p7332_p13, %p303_p11 }
  0x29   : > { %307 = sbr.rel (%p304_p3) target bundleno = 1162 (0x48a), region = 56 }
  0x30   : > { %s309_s15 = sand.u32 1, %s5608_s10  }
  0x31   : > { %s4539_s16 = sshll.u32 %s309_s15, 7  ;;  %s310_s20 = scalar_lea.sflag [#allocation4], %s309_s15 }
  0x32   : > { %s5760_s21 = scalar_lea.vmem [#allocation3], %s4539_s16 }
  0x33   : > { %5599 = dma.done.wait (%p5710_p7), %s310_s20, 2048  }
  0x34   : > { %5601 = vsyncadd (%p5710_p7), %s310_s20, 4294965248  ;;  %v5375_v0 = vld [vmem:[%s7318_s1] sm:$0xff]   ;;  %vm481_vm0 = vcmask 130048   ;;  %v5376_v1 = vld [vmem:[%s5760_s21] sm:$0xff]   ;;  %vm732_vm1 = vcmask 57344   ;;  %vm723_vm6 = vcmask 60416  }
  0x35   : > { %4989 = vmatprep.subr.bf16.mxu0 %v5375_v0  ;;  %v5377_v2 = vld [vmem:[%s5760_s21 + $0x8] sm:$0xff]   ;;  %4991 = vmatprep.mubr.msk.bf16.mxu0 %vm481_vm0, %v5376_v1  ;;  %v5378_v3 = vld [vmem:[%s5760_s21 + $0x10] sm:$0xff]   ;;  %v5379_v4 = vld [vmem:[%s5760_s21 + $0x18] sm:$0xff]   ;;  %vm733_vm2 = vsmask.f32 256  ;;  %vm1830_vm10 = vcmask 1046528  }
  0x36   : > { %4990 = vmatpush3.bf16.msra.mxu0 %v5375_v0  ;;  %v5380_v5 = vld [vmem:[%s5760_s21 + $0x20] sm:$0xff]   ;;  %v5381_v6 = vld [vmem:[%s5760_s21 + $0x28] sm:$0xff]   ;;  %v5382_v7 = vld [vmem:[%s5760_s21 + $0x30] sm:$0xff]   ;;  %vm783_vm4 = vsmask.f32 7938  ;;  %s5622_s24 = smov 16  }
  0x37   : > { %v5383_v8 = vld [vmem:[%s5760_s21 + $0x38] sm:$0xff]   ;;  %v5384_v9 = vld [vmem:[%s5760_s21 + $0x40] sm:$0xff]   ;;  %v5385_v10 = vld [vmem:[%s5760_s21 + $0x48] sm:$0xff]   ;;  %vm929_vm7 = vsmask.f32 4368  ;;  %s5623_s26 = smov 8  }
  0x38   : > { %v5386_v11 = vld [vmem:[%s5760_s21 + $0x50] sm:$0xff]   ;;  %v5387_v12 = vld [vmem:[%s5760_s21 + $0x58] sm:$0xff]   ;;  %v5388_v13 = vld [vmem:[%s5760_s21 + $0x60] sm:$0xff]   ;;  %vm1557_vm11 = vsmask.f32 7424  ;;  %vm1911_vm12 = vcmask 64512  }
  0x39   : > { %4992 = vmatmul.mubr.msk.bf16.vlgmr.msra.gmra.mrb[0].mxu0 %vm481_vm0, %v5377_v2  ;;  %v5389_v14 = vld [vmem:[%s5760_s21 + $0x68] sm:$0xff]   ;;  %v5390_v15 = vld [vmem:[%s5760_s21 + $0x70] sm:$0xff]   ;;  %v5391_v16 = vld [vmem:[%s5760_s21 + $0x78] sm:$0xff]   ;;  %vm2633_vm13 = vcmask 1043456   ;;  %vm2600_vm14 = vcmask 195584   ;;  %p348_p7 = scmp.lt.s32.totalorder %s5693_s13, 1 }
  0x3a   : > { %4995 = vmatprep.mubr.msk.bf16.mxu0 %vm481_vm0, %v5378_v3  ;;  %vm5802_vm3 = vmand %vm732_vm1, %vm733_vm2  ;;  %v738_v18 = vld [vmem:[#allocation2 + $0x18] sm:$0x1]  ;;  %v735_v21 = vld [vmem:[#allocation2 + $0xc] sm:$0x1]  ;;  %vm4432_vm15 = vcmask 261120  }
  0x3b   : > { %v739_v19 = vsel %vm5802_vm3, 0, %v738_v18  ;;  %vm5809_vm5 = vmand %vm732_vm1, %vm783_vm4  ;;  %v736_v22 = vsel %vm5802_vm3, 0, %v735_v21  ;;  %v788_v23 = vld [vmem:[#allocation2 + $0x20] sm:$0x1]  ;;  %v785_v25 = vld [vmem:[#allocation2 + $0x14] sm:$0x1] }
  0x3c   : > { %740 = vst [vmem:[#allocation2 + $0x18] sm:$0x1] %v739_v19  ;;  %737 = vst [vmem:[#allocation2 + $0xc] sm:$0x1] %v736_v22  ;;  %v789_v24 = vsel %vm5809_vm5, 0, %v788_v23  ;;  %v786_v26 = vsel %vm5809_vm5, 0, %v785_v25 }
  0x3d   : > { %790 = vst [vmem:[#allocation2 + $0x20] sm:$0x1] %v789_v24  ;;  %787 = vst [vmem:[#allocation2 + $0x14] sm:$0x1] %v786_v26  ;;  %v744_v27 = vld [vmem:[#allocation2 + $0x30] sm:$0x1] }
  0x3e   : > { %v745_v28 = vsel %vm5802_vm3, 0, %v744_v27  ;;  %v741_v29 = vld [vmem:[#allocation2 + $0x24] sm:$0x1]  ;;  %v794_v31 = vld [vmem:[#allocation2 + $0x38] sm:$0x1]  ;;  %vm5887_vm8 = vmand %vm723_vm6, %vm783_vm4  ;;  %s7352_s13 = smov (!%p348_p7, %s5693_s13), 1 }
  0x3f   : > { %746 = vst [vmem:[#allocation2 + $0x30] sm:$0x1] %v745_v28  ;;  %v742_v30 = vsel %vm5802_vm3, 0, %v741_v29  ;;  %v795_v32 = vsel %vm5809_vm5, 0, %v794_v31  ;;  %v791_v33 = vld [vmem:[#allocation2 + $0x2c] sm:$0x1]  ;;  %vm5894_vm9 = vmor %vm733_vm2, %vm929_vm7 }
  0x40   : > { %743 = vst [vmem:[#allocation2 + $0x24] sm:$0x1] %v742_v30  ;;  %796 = vst [vmem:[#allocation2 + $0x38] sm:$0x1] %v795_v32  ;;  %v792_v34 = vsel %vm5809_vm5, 0, %v791_v33  ;;  %s4851_s19 = sshll.u32 %s7352_s13, 8 }
  0x41   : > { %4996 = vmatmul.mubr.msk.bf16.gmra.mrb[4].mxu0 %vm481_vm0, %v5379_v4  ;;  %793 = vst [vmem:[#allocation2 + $0x2c] sm:$0x1] %v792_v34  ;;  %v750_v35 = vld [vmem:[#allocation2 + $0x48] sm:$0x1]  ;;  %v747_v37 = vld [vmem:[#allocation2 + $0x3c] sm:$0x1]  ;;  %s7178_s12 = scalar_lea.vmem %s7326_s9, %s4851_s19 }
  0x42   : > { %4999 = vmatprep.mubr.msk.bf16.mxu0 %vm481_vm0, %v5380_v5  ;;  %v751_v36 = vsel %vm5802_vm3, 0, %v750_v35  ;;  %v748_v38 = vsel %vm5802_vm3, 0, %v747_v37  ;;  %v800_v39 = vld [vmem:[#allocation2 + $0x50] sm:$0x1]  ;;  %v797_v41 = vld [vmem:[#allocation2 + $0x44] sm:$0x1] }
  0x43   : > { %752 = vst [vmem:[#allocation2 + $0x48] sm:$0x1] %v751_v36  ;;  %749 = vst [vmem:[#allocation2 + $0x3c] sm:$0x1] %v748_v38  ;;  %v801_v40 = vsel %vm5809_vm5, 0, %v800_v39  ;;  %v798_v42 = vsel %vm5809_vm5, 0, %v797_v41 }
  0x44   : > { %802 = vst [vmem:[#allocation2 + $0x50] sm:$0x1] %v801_v40  ;;  %799 = vst [vmem:[#allocation2 + $0x44] sm:$0x1] %v798_v42  ;;  %v756_v43 = vld [vmem:[#allocation2 + $0x60] sm:$0x1] }
  0x45   : > { %v757_v44 = vsel %vm5802_vm3, 0, %v756_v43  ;;  %v753_v45 = vld [vmem:[#allocation2 + $0x54] sm:$0x1]  ;;  %v806_v47 = vld [vmem:[#allocation2 + $0x68] sm:$0x1] }
  0x46   : > { %758 = vst [vmem:[#allocation2 + $0x60] sm:$0x1] %v757_v44  ;;  %v754_v46 = vsel %vm5802_vm3, 0, %v753_v45  ;;  %v807_v48 = vsel %vm5809_vm5, 0, %v806_v47  ;;  %v803_v49 = vld [vmem:[#allocation2 + $0x5c] sm:$0x1] }
  0x47   : > { %755 = vst [vmem:[#allocation2 + $0x54] sm:$0x1] %v754_v46  ;;  %808 = vst [vmem:[#allocation2 + $0x68] sm:$0x1] %v807_v48  ;;  %v804_v50 = vsel %vm5809_vm5, 0, %v803_v49 }
  0x48   : > { %805 = vst [vmem:[#allocation2 + $0x5c] sm:$0x1] %v804_v50  ;;  %v762_v51 = vld [vmem:[#allocation2 + $0x78] sm:$0x1]  ;;  %v759_v53 = vld [vmem:[#allocation2 + $0x6c] sm:$0x1] }
  0x49   : > { %5000 = vmatmul.mubr.msk.bf16.gmra.mrb[8].mxu0 %vm481_vm0, %v5381_v6  ;;  %v763_v52 = vsel %vm5802_vm3, 0, %v762_v51  ;;  %v760_v54 = vsel %vm5802_vm3, 0, %v759_v53  ;;  %v812_v55 = vld [vmem:[#allocation2 + $0x80] sm:$0x1]  ;;  %v809_v57 = vld [vmem:[#allocation2 + $0x74] sm:$0x1] }
  0x4a   : > { %5003 = vmatprep.mubr.msk.bf16.mxu0 %vm481_vm0, %v5382_v7  ;;  %764 = vst [vmem:[#allocation2 + $0x78] sm:$0x1] %v763_v52  ;;  %761 = vst [vmem:[#allocation2 + $0x6c] sm:$0x1] %v760_v54  ;;  %v813_v56 = vsel %vm5809_vm5, 0, %v812_v55  ;;  %v810_v58 = vsel %vm5809_vm5, 0, %v809_v57 }
  0x4b   : > { %814 = vst [vmem:[#allocation2 + $0x80] sm:$0x1] %v813_v56  ;;  %811 = vst [vmem:[#allocation2 + $0x74] sm:$0x1] %v810_v58  ;;  %v768_v59 = vld [vmem:[#allocation2 + $0x90] sm:$0x1] }
  0x4c   : > { %v769_v60 = vsel %vm5802_vm3, 0, %v768_v59  ;;  %v765_v61 = vld [vmem:[#allocation2 + $0x84] sm:$0x1]  ;;  %v818_v62 = vld [vmem:[#allocation2 + $0x98] sm:$0x1] }
  0x4d   : > { %770 = vst [vmem:[#allocation2 + $0x90] sm:$0x1] %v769_v60  ;;  %v766_v63 = vsel %vm5802_vm3, 0, %v765_v61  ;;  %v819_v0 = vsel %vm5809_vm5, 0, %v818_v62  ;;  %v815_v1 = vld [vmem:[#allocation2 + $0x8c] sm:$0x1] }
  0x4e   : > { %767 = vst [vmem:[#allocation2 + $0x84] sm:$0x1] %v766_v63  ;;  %820 = vst [vmem:[#allocation2 + $0x98] sm:$0x1] %v819_v0  ;;  %v816_v2 = vsel %vm5809_vm5, 0, %v815_v1 }
  0x4f   : > { %817 = vst [vmem:[#allocation2 + $0x8c] sm:$0x1] %v816_v2  ;;  %v774_v3 = vld [vmem:[#allocation2 + $0xa8] sm:$0x1]  ;;  %v771_v5 = vld [vmem:[#allocation2 + $0x9c] sm:$0x1] }
  0x50   : > { %v775_v4 = vsel %vm5802_vm3, 0, %v774_v3  ;;  %v772_v6 = vsel %vm5802_vm3, 0, %v771_v5  ;;  %v824_v7 = vld [vmem:[#allocation2 + $0xb0] sm:$0x1]  ;;  %v827_v18 = vld [vmem:[#allocation2 + $0xbc] sm:$0x1] }
  0x51   : > { %5004 = vmatmul.mubr.msk.bf16.gmra.mrb[12].mxu0 %vm481_vm0, %v5383_v8  ;;  %776 = vst [vmem:[#allocation2 + $0xa8] sm:$0x1] %v775_v4  ;;  %773 = vst [vmem:[#allocation2 + $0x9c] sm:$0x1] %v772_v6  ;;  %v825_v8 = vsel %vm5809_vm5, 0, %v824_v7  ;;  %v828_v19 = vsel %vm5809_vm5, 0, %v827_v18 }
  0x52   : > { %5007 = vmatprep.mubr.msk.bf16.mxu0 %vm481_vm0, %v5384_v9  ;;  %826 = vst [vmem:[#allocation2 + $0xb0] sm:$0x1] %v825_v8  ;;  %v821_v9 = vld [vmem:[#allocation2 + $0xa4] sm:$0x1]  ;;  %829 = vst [vmem:[#allocation2 + $0xbc] sm:$0x1] %v828_v19 }
  0x53   : > { %v5878_v21 = vld [vmem:[%s7319_s2] ss:$0 sm:$0xff]  ;;  %v1260_v48 = vld [vmem:[#allocation2 + $0x18] sm:$0xf]  ;;  %v1253_v56 = vld [vmem:[#allocation2 + $0xc] sm:$0xf] }
  0x54   : > { %v1264_v63 = vld [vmem:[#allocation2 + $0x20] sm:$0x1]  ;;  %v1257_v5 = vld [vmem:[#allocation2 + $0x14] sm:$0x1] }
  0x59   : > { %5008 = vmatmul.mubr.msk.bf16.gmra.mrb[16].mxu0 %vm481_vm0, %v5385_v10  ;;  %v822_v10 = vsel %vm5809_vm5, 0, %v821_v9 }
  0x5a   : > { %5011 = vmatprep.mubr.msk.bf16.mxu0 %vm481_vm0, %v5386_v11  ;;  %823 = vst [vmem:[#allocation2 + $0xa4] sm:$0x1] %v822_v10  ;;  %v780_v11 = vld [vmem:[#allocation2 + $0xc0] sm:$0x1] }
  0x61   : > { %5012 = vmatmul.mubr.msk.bf16.gmra.mrb[20].mxu0 %vm481_vm0, %v5387_v12  ;;  %v781_v12 = vsel %vm5802_vm3, 0, %v780_v11 }
  0x62   : > { %5015 = vmatprep.mubr.msk.bf16.mxu0 %vm481_vm0, %v5388_v13  ;;  %782 = vst [vmem:[#allocation2 + $0xc0] sm:$0x1] %v781_v12  ;;  %v777_v13 = vld [vmem:[#allocation2 + $0xb4] sm:$0x1] }
  0x69   : > { %5016 = vmatmul.mubr.msk.bf16.gmra.mrb[24].mxu0 %vm481_vm0, %v5389_v14  ;;  %v778_v14 = vsel %vm5802_vm3, 0, %v777_v13 }
  0x6a   : > { %5019 = vmatprep.mubr.msk.bf16.mxu0 %vm481_vm0, %v5390_v15  ;;  %v830_v15 = vld [vmem:[#allocation2 + $0xc8] sm:$0x1]  ;;  %779 = vst [vmem:[#allocation2 + $0xb4] sm:$0x1] %v778_v14 }
  0x71   : > { %5020 = vmatmul.mubr.msk.bf16.gmra.mrb[28].mxu0 %vm481_vm0, %v5391_v16  ;;  %v831_v16 = vsel %vm5809_vm5, 0, %v830_v15 }
  0x72   : > { %832 = vst [vmem:[#allocation2 + $0xc8] sm:$0x1] %v831_v16 }
 0x10c   : > { %v4993_v22 = vpop.f32.mrb[0].mxu0 }
 0x10d   : > { %v573_v23 = vadd.f32 %v4993_v22, %v5878_v21  ;;  %v564_v24 = vpop.f32.mrb[1].mxu0 }
 0x10e   : > { %v565_v25 = vadd.f32 %v5878_v21, %v564_v24  ;;  %v4994_v26 = vpop.f32.mrb[2].mxu0 }
 0x10f   : > { %v693_v27 = vmax.f32 %v573_v23, 0.0  ;;  %v576_v28 = vadd.f32 %v4994_v26, %v5878_v21  ;;  %v567_v29 = vpop.f32.mrb[3].mxu0 }
 0x110   : > { %v691_v30 = vmax.f32 %v565_v25, 0.0  ;;  %v568_v20 = vadd.f32 %v5878_v21, %v567_v29 }
 0x111   : > { %v4854_v31 = vpack.c.bf16 %v693_v27, %v693_v27  ;;  %v694_v32 = vmax.f32 %v576_v28, 0.0  ;;  %v1274_v27 = vld [vmem:[#allocation2 + $0x30] sm:$0xf] }
 0x112   : > { %v4852_v33 = vpack.c.bf16 %v691_v30, %v691_v30  ;;  %v692_v34 = vmax.f32 %v568_v20, 0.0 }
 0x113   : > { %v949_v35 = vshrl.u32 %v4854_v31, 16  ;;  %v4855_v36 = vpack.c.bf16 %v694_v32, %v694_v32  ;;  %v952_v37 = vshll.u32 %v4854_v31, 16 }
 0x114   : > { %v932_v38 = vshrl.u32 %v4852_v33, 16  ;;  %v935_v39 = vshll.u32 %v4852_v33, 16  ;;  %v4853_v40 = vpack.c.bf16 %v692_v34, %v692_v34  ;;  %v4997_v41 = vpop.f32.mrb[4].mxu0  ;;  %v1267_v33 = vld [vmem:[#allocation2 + $0x24] sm:$0xf] }
 0x115   : > { %v951_v42 = vrot.slane %v949_v35, 7  ;;  %v957_v43 = vshrl.u32 %v4855_v36, 16  ;;  %v960_v44 = vshll.u32 %v4855_v36, 16  ;;  %v589_v45 = vadd.f32 %v4997_v41, %v5878_v21  ;;  %v580_v46 = vpop.f32.mrb[5].mxu0 }
 0x116   : > { %v934_v49 = vrot.slane %v932_v38, 7  ;;  %v940_v50 = vshrl.u32 %v4853_v40, 16  ;;  %v943_v51 = vshll.u32 %v4853_v40, 16  ;;  %v581_v52 = vadd.f32 %v5878_v21, %v580_v46  ;;  %v4998_v53 = vpop.f32.mrb[6].mxu0 }
 0x117   : > { %v954_v54 = vor.u32 %v952_v37, %v951_v42  ;;  %v955_v55 = vrot.slane %v951_v42, 4  ;;  %v959_v57 = vrot.slane %v957_v43, 7  ;;  %v697_v58 = vmax.f32 %v589_v45, 0.0  ;;  %v583_v59 = vpop.f32.mrb[7].mxu0 }
 0x118   : > { %v937_v60 = vor.u32 %v935_v39, %v934_v49  ;;  %v938_v61 = vrot.slane %v934_v49, 4  ;;  %v942_v0 = vrot.slane %v940_v50, 7  ;;  %v695_v1 = vmax.f32 %v581_v52, 0.0 }
 0x119   : > { %v1261_v2 = vsel %vm5887_vm8, %v954_v54, %v1260_v48  ;;  %v962_v3 = vor.u32 %v960_v44, %v959_v57  ;;  %v964_v4 = vrot.slane %v959_v57, 4  ;;  %v4858_v6 = vpack.c.bf16 %v697_v58, %v697_v58 }
 0x11a   : > { %1262 = vst [vmem:[#allocation2 + $0x18] sm:$0xf] %v1261_v2  ;;  %v1254_v7 = vsel %vm5887_vm8, %v937_v60, %v1253_v56  ;;  %v945_v8 = vor.u32 %v943_v51, %v942_v0  ;;  %v947_v9 = vrot.slane %v942_v0, 4  ;;  %v4856_v10 = vpack.c.bf16 %v695_v1, %v695_v1  ;;  %v1271_v56 = vld [vmem:[#allocation2 + $0x2c] sm:$0x1] }
 0x11b   : > { %1255 = vst [vmem:[#allocation2 + $0xc] sm:$0xf] %v1254_v7  ;;  %v963_v11 = vsel %vm5894_vm9, %v955_v55, %v962_v3  ;;  %v1265_v12 = vsel %vm5802_vm3, %v964_v4, %v1264_v63  ;;  %v983_v13 = vshrl.u32 %v4858_v6, 16  ;;  %v986_v16 = vshll.u32 %v4858_v6, 16  ;;  %v1278_v55 = vld [vmem:[#allocation2 + $0x38] sm:$0x1] }
 0x11c   : > { %1263 = vst.msk [vmem:[#allocation2 + $0x1c] sm:$0xf] %vm723_vm6, %v963_v11  ;;  %1266 = vst [vmem:[#allocation2 + $0x20] sm:$0x1] %v1265_v12  ;;  %v946_v14 = vsel %vm5894_vm9, %v938_v61, %v945_v8  ;;  %v1258_v15 = vsel %vm5802_vm3, %v947_v9, %v1257_v5  ;;  %v966_v18 = vshrl.u32 %v4856_v10, 16  ;;  %v5001_v19 = vpop.f32.mrb[8].mxu0  ;;  %v592_v23 = vadd.f32 %v4998_v53, %v5878_v21 }
 0x11d   : > { %1256 = vst.msk [vmem:[#allocation2 + $0x10] sm:$0xf] %vm723_vm6, %v946_v14  ;;  %1259 = vst [vmem:[#allocation2 + $0x14] sm:$0x1] %v1258_v15  ;;  %v5912_v22 = vrot.slane %v983_v13, 7  ;;  %v584_v24 = vadd.f32 %v5878_v21, %v583_v59  ;;  %v605_v25 = vadd.f32 %v5001_v19, %v5878_v21  ;;  %v596_v26 = vpop.f32.mrb[9].mxu0 }
 0x11e   : > { %v5917_v28 = vrot.slane %v966_v18, 7  ;;  %v969_v29 = vshll.u32 %v4856_v10, 16  ;;  %v597_v30 = vadd.f32 %v5878_v21, %v596_v26  ;;  %v5002_v20 = vpop.f32.mrb[10].mxu0  ;;  %v698_v34 = vmax.f32 %v592_v23, 0.0  ;;  %v1288_v1 = vld [vmem:[#allocation2 + $0x48] sm:$0xf] }
 0x11f   : > { %v988_v31 = vor.u32 %v986_v16, %v5912_v22  ;;  %v989_v32 = vrot.slane %v5912_v22, 4  ;;  %v696_v35 = vmax.f32 %v584_v24, 0.0  ;;  %v599_v36 = vpop.f32.mrb[11].mxu0  ;;  %v5621_v37 = vmov 0   ;;  %v1281_v7 = vld [vmem:[#allocation2 + $0x3c] sm:$0xf] }
 0x120   : > { %724 = vst.msk [vmem:[#allocation2] sm:$0xf] %vm723_vm6, %v5621_v37  ;;  %725 = vst.msk [vmem:[#allocation2 + $0x4] sm:$0xf] %vm723_vm6, %v5621_v37  ;;  %v971_v38 = vor.u32 %v969_v29, %v5917_v28  ;;  %v972_v39 = vrot.slane %v5917_v28, 4  ;;  %v701_v40 = vmax.f32 %v605_v25, 0.0  ;;  %v4859_v43 = vpack.c.bf16 %v698_v34, %v698_v34 }
 0x121   : > { %726 = vst.msk [vmem:[#allocation2 + $0x8] sm:$0xf] %vm723_vm6, %v5621_v37  ;;  %728 = vst.msk [vmem:[#allocation2 + $0xcc] sm:$0xf] %vm723_vm6, %v5621_v37  ;;  %v699_v41 = vmax.f32 %v597_v30, 0.0  ;;  %v1275_v42 = vsel %vm5887_vm8, %v988_v31, %v1274_v27  ;;  %v4857_v44 = vpack.c.bf16 %v696_v35, %v696_v35  ;;  %v608_v45 = vadd.f32 %v5002_v20, %v5878_v21 }
 0x122   : > { %729 = vst.msk [vmem:[#allocation2 + $0xd0] sm:$0xf] %vm723_vm6, %v5621_v37  ;;  %730 = vst.msk [vmem:[#allocation2 + $0xd4] sm:$0xf] %vm723_vm6, %v5621_v37  ;;  %v1268_v46 = vsel %vm5887_vm8, %v971_v38, %v1267_v33  ;;  %v4862_v48 = vpack.c.bf16 %v701_v40, %v701_v40  ;;  %v600_v50 = vadd.f32 %v5878_v21, %v599_v36  ;;  %v991_v51 = vshrl.u32 %v4859_v43, 16 }
 0x123   : > { %1276 = vst [vmem:[#allocation2 + $0x30] sm:$0xf] %v1275_v42  ;;  %v4860_v49 = vpack.c.bf16 %v699_v41, %v699_v41  ;;  %1269 = vst [vmem:[#allocation2 + $0x24] sm:$0xf] %v1268_v46  ;;  %v994_v52 = vshll.u32 %v4859_v43, 16  ;;  %v974_v53 = vshrl.u32 %v4857_v44, 16 }
 0x124   : > { %v977_v54 = vshll.u32 %v4857_v44, 16  ;;  %v1017_v57 = vshrl.u32 %v4862_v48, 16  ;;  %v1020_v58 = vshll.u32 %v4862_v48, 16  ;;  %v5005_v61 = vpop.f32.mrb[12].mxu0  ;;  %v993_v63 = vrot.slane %v991_v51, 7 }
 0x125   : > { %v1000_v59 = vshrl.u32 %v4860_v49, 16  ;;  %v1003_v60 = vshll.u32 %v4860_v49, 16  ;;  %v976_v0 = vrot.slane %v974_v53, 7  ;;  %v702_v2 = vmax.f32 %v608_v45, 0.0  ;;  %v612_v4 = vpop.f32.mrb[13].mxu0 }
 0x126   : > { %v700_v3 = vmax.f32 %v600_v50, 0.0  ;;  %v5936_v5 = vrot.slane %v1017_v57, 7  ;;  %v621_v8 = vadd.f32 %v5005_v61, %v5878_v21  ;;  %v613_v9 = vadd.f32 %v5878_v21, %v612_v4  ;;  %v5006_v10 = vpop.f32.mrb[14].mxu0  ;;  %v5961_v33 = vld [vmem:[#allocation2 + $0x10] sm:$0xf] }
 0x127   : > { %v5938_v6 = vrot.slane %v1000_v59, 7  ;;  %v996_v11 = vor.u32 %v994_v52, %v993_v63  ;;  %v998_v12 = vrot.slane %v993_v63, 4  ;;  %v979_v13 = vor.u32 %v977_v54, %v976_v0  ;;  %v615_v15 = vpop.f32.mrb[15].mxu0  ;;  %v2027_v34 = vld [vmem:[#allocation2 + $0xc] sm:$0xe] }
 0x128   : > { %v981_v14 = vrot.slane %v976_v0, 4  ;;  %v1022_v16 = vor.u32 %v1020_v58, %v5936_v5  ;;  %v1023_v18 = vrot.slane %v5936_v5, 4  ;;  %v4863_v28 = vpack.c.bf16 %v702_v2, %v702_v2  ;;  %v1292_v40 = vld [vmem:[#allocation2 + $0x50] sm:$0x1]  ;;  %v1285_v51 = vld [vmem:[#allocation2 + $0x44] sm:$0x1] }
 0x129   : > { %v1005_v19 = vor.u32 %v1003_v60, %v5938_v6  ;;  %v997_v22 = vsel %vm5894_vm9, %v989_v32, %v996_v11  ;;  %v1279_v23 = vsel %vm5802_vm3, %v998_v12, %v1278_v55  ;;  %v980_v24 = vsel %vm5894_vm9, %v972_v39, %v979_v13  ;;  %v5964_v45 = vld [vmem:[#allocation2 + $0x14] ss:$0 sps:$4 sm:$0x11]  }
 0x12a   : > { %v1272_v25 = vsel %vm5802_vm3, %v981_v14, %v1271_v56  ;;  %1277 = vst.msk [vmem:[#allocation2 + $0x34] sm:$0xf] %vm723_vm6, %v997_v22  ;;  %1280 = vst [vmem:[#allocation2 + $0x38] sm:$0x1] %v1279_v23  ;;  %v1289_v26 = vsel %vm5887_vm8, %v1022_v16, %v1288_v1  ;;  %v4861_v29 = vpack.c.bf16 %v700_v3, %v700_v3  ;;  %v705_v30 = vmax.f32 %v621_v8, 0.0 }
 0x12b   : > { %1270 = vst.msk [vmem:[#allocation2 + $0x28] sm:$0xf] %vm723_vm6, %v980_v24  ;;  %1273 = vst [vmem:[#allocation2 + $0x2c] sm:$0x1] %v1272_v25  ;;  %v1282_v27 = vsel %vm5887_vm8, %v1005_v19, %v1281_v7  ;;  %v703_v20 = vmax.f32 %v613_v9, 0.0  ;;  %v624_v31 = vadd.f32 %v5006_v10, %v5878_v21  ;;  %v616_v32 = vadd.f32 %v5878_v21, %v615_v15 }
 0x12c   : > { %1290 = vst [vmem:[#allocation2 + $0x48] sm:$0xf] %v1289_v26  ;;  %1283 = vst [vmem:[#allocation2 + $0x3c] sm:$0xf] %v1282_v27  ;;  %v1006_v35 = vrot.slane %v5938_v6, 4  ;;  %v1025_v36 = vshrl.u32 %v4863_v28, 16  ;;  %v4866_v41 = vpack.c.bf16 %v705_v30, %v705_v30  ;;  %v4688_v52 = vcombine.low %v2027_v34, %v5961_v33 }
 0x12d   : > { %v1028_v37 = vshll.u32 %v4863_v28, 16  ;;  %v1008_v38 = vshrl.u32 %v4861_v29, 16  ;;  %v5009_v39 = vpop.f32.mrb[16].mxu0  ;;  %v4864_v42 = vpack.c.bf16 %v703_v20, %v703_v20  ;;  %v706_v43 = vmax.f32 %v624_v31, 0.0  ;;  %v1302_v8 = vld [vmem:[#allocation2 + $0x60] sm:$0xf] }
 0x12e   : > { %v704_v44 = vmax.f32 %v616_v32, 0.0  ;;  %v628_v46 = vpop.f32.mrb[17].mxu0  ;;  %v1027_v48 = vrot.slane %v1025_v36, 7  ;;  %v1011_v50 = vshll.u32 %v4861_v29, 16  ;;  %v1051_v54 = vshrl.u32 %v4866_v41, 16 }
 0x12f   : > { %v1010_v49 = vrot.slane %v1008_v38, 7  ;;  %v5010_v53 = vpop.f32.mrb[18].mxu0  ;;  %v1054_v55 = vshll.u32 %v4866_v41, 16  ;;  %v1034_v56 = vshrl.u32 %v4864_v42, 16  ;;  %v1037_v57 = vshll.u32 %v4864_v42, 16 }
 0x130   : > { %v5967_v58 = vpop.f32.mrb[19].mxu0  ;;  %v1030_v59 = vor.u32 %v1028_v37, %v1027_v48  ;;  %v1032_v60 = vrot.slane %v1027_v48, 4  ;;  %v1053_v0 = vrot.slane %v1051_v54, 7  ;;  %v4867_v2 = vpack.c.bf16 %v706_v43, %v706_v43  ;;  %v1295_v9 = vld [vmem:[#allocation2 + $0x54] sm:$0xf] }
 0x131   : > { %v1013_v61 = vor.u32 %v1011_v50, %v1010_v49  ;;  %v1015_v63 = vrot.slane %v1010_v49, 4  ;;  %v1036_v1 = vrot.slane %v1034_v56, 7  ;;  %v4865_v3 = vpack.c.bf16 %v704_v44, %v704_v44  ;;  %v1982_v14 = vld [vmem:[#allocation2 + $0x1c] sm:$0xf]  ;;  %v1306_v25 = vld [vmem:[#allocation2 + $0x68] sm:$0x1] }
 0x132   : > { %v1031_v4 = vsel %vm5894_vm9, %v1023_v18, %v1030_v59  ;;  %v1293_v5 = vsel %vm5802_vm3, %v1032_v60, %v1292_v40  ;;  %v1056_v10 = vor.u32 %v1054_v55, %v1053_v0  ;;  %v1057_v11 = vrot.slane %v1053_v0, 4  ;;  %v2028_v28 = vld [vmem:[#allocation2 + $0x18] sm:$0xe]  ;;  %v1979_v31 = vld [vmem:[#allocation2 + $0xc] sm:$0xf] }
 0x133   : > { %v1014_v6 = vsel %vm5894_vm9, %v1006_v35, %v1013_v61  ;;  %v1286_v7 = vsel %vm5802_vm3, %v1015_v63, %v1285_v51  ;;  %1291 = vst.msk [vmem:[#allocation2 + $0x4c] sm:$0xf] %vm723_vm6, %v1031_v4  ;;  %1294 = vst [vmem:[#allocation2 + $0x50] sm:$0x1] %v1293_v5  ;;  %v1039_v12 = vor.u32 %v1037_v57, %v1036_v1  ;;  %v2444_v13 = vrot.slane %v5964_v45, 1 }
 0x134   : > { %1284 = vst.msk [vmem:[#allocation2 + $0x40] sm:$0xf] %vm723_vm6, %v1014_v6  ;;  %1287 = vst [vmem:[#allocation2 + $0x44] sm:$0x1] %v1286_v7  ;;  %v1040_v15 = vrot.slane %v1036_v1, 4  ;;  %v1059_v16 = vshrl.u32 %v4867_v2, 16  ;;  %v1303_v23 = vsel %vm5887_vm8, %v1056_v10, %v1302_v8  ;;  %v637_v32 = vadd.f32 %v5009_v39, %v5878_v21 }
 0x135   : > { %v1062_v18 = vshll.u32 %v4867_v2, 16  ;;  %v1042_v19 = vshrl.u32 %v4865_v3, 16  ;;  %v5980_v22 = vpop.f32.mrb[20].mxu0  ;;  %v1296_v24 = vsel %vm5887_vm8, %v1039_v12, %v1295_v9  ;;  %v1045_v26 = vshll.u32 %v4865_v3, 16  ;;  %1304 = vst [vmem:[#allocation2 + $0x60] sm:$0xf] %v1303_v23 }
 0x136   : > { %v2443_v27 = vrot.slane %v4688_v52, 1  ;;  %v5986_v29 = vpop.f32.mrb[21].mxu0  ;;  %1297 = vst [vmem:[#allocation2 + $0x54] sm:$0xf] %v1296_v24  ;;  %v1061_v30 = vrot.slane %v1059_v16, 7  ;;  %v629_v34 = vadd.f32 %v5878_v21, %v628_v46  ;;  %v5994_v38 = vcombine.low %v1979_v31, %v5961_v33 }
 0x137   : > { %v1044_v20 = vrot.slane %v1042_v19, 7  ;;  %v5990_v35 = vpop.f32.mrb[22].mxu0  ;;  %v1299_v36 = vld [vmem:[#allocation2 + $0x5c] sm:$0x1]  ;;  %v640_v40 = vadd.f32 %v5010_v53, %v5878_v21  ;;  %v4689_v42 = vcombine.low %v2028_v28, %v1982_v14  ;;  %v709_v49 = vmax.f32 %v637_v32, 0.0 }
 0x138   : > { %v2445_v37 = vsel %vm1830_vm10, %v2443_v27, %v2444_v13  ;;  %v5997_v41 = vld [vmem:[#allocation2 + $0x20] ss:$0 sps:$4 sm:$0x11]   ;;  %v5999_v43 = vpop.f32.mrb[23].mxu0  ;;  %v1064_v44 = vor.u32 %v1062_v18, %v1061_v30  ;;  %v1066_v39 = vrot.slane %v1061_v30, 4  ;;  %v707_v50 = vmax.f32 %v629_v34, 0.0 }
 0x139   : > { %v1047_v48 = vor.u32 %v1045_v26, %v1044_v20  ;;  %v1049_v46 = vrot.slane %v1044_v20, 4  ;;  %2491 = vrot.lane.b32.xlu1 %v2445_v37, %s5622_s24  ;;  %v710_v51 = vmax.f32 %v640_v40, 0.0  ;;  %v2446_v33 = vrot.slane %v4689_v42, 1  ;;  %v1981_v60 = vld [vmem:[#allocation2 + $0x18] sm:$0xf] }
 0x13a   : > { %v1065_v52 = vsel %vm5894_vm9, %v1057_v11, %v1064_v44  ;;  %v1307_v53 = vsel %vm5802_vm3, %v1066_v39, %v1306_v25  ;;  %v4870_v56 = vpack.c.bf16 %v709_v49, %v709_v49  ;;  %v4868_v57 = vpack.c.bf16 %v707_v50, %v707_v50  ;;  %v1316_v9 = vld [vmem:[#allocation2 + $0x78] sm:$0xf]  ;;  %v1309_v19 = vld [vmem:[#allocation2 + $0x6c] sm:$0xf]  ;;  %v1320_v20 = vld [vmem:[#allocation2 + $0x80] sm:$0x1] }
 0x13b   : > { %v1048_v54 = vsel %vm5894_vm9, %v1040_v15, %v1047_v48  ;;  %v1300_v55 = vsel %vm5802_vm3, %v1049_v46, %v1299_v36  ;;  %1305 = vst.msk [vmem:[#allocation2 + $0x64] sm:$0xf] %vm723_vm6, %v1065_v52  ;;  %1308 = vst [vmem:[#allocation2 + $0x68] sm:$0x1] %v1307_v53  ;;  %v4871_v59 = vpack.c.bf16 %v710_v51, %v710_v51  ;;  %v2447_v61 = vrot.slane %v5997_v41, 1 }
 0x13c   : > { %1298 = vst.msk [vmem:[#allocation2 + $0x58] sm:$0xf] %vm723_vm6, %v1048_v54  ;;  %1301 = vst [vmem:[#allocation2 + $0x5c] sm:$0x1] %v1300_v55  ;;  %v6013_v63 = vcombine.low %v1981_v60, %v1982_v14  ;;  %v2174_v0 = vshll.u32 %v5994_v38, 16  ;;  %v2179_v1 = vshll.u32 %v5964_v45, 16  ;;  %v632_v2 = vadd.f32 %v5878_v21, %v5967_v58 }
 0x13d   : > { %v6019_v3 = vpop.f32.mrb[24].mxu0  ;;  %v1085_v4 = vshrl.u32 %v4870_v56, 16  ;;  %v1088_v5 = vshll.u32 %v4870_v56, 16  ;;  %v1068_v6 = vshrl.u32 %v4868_v57, 16  ;;  %v2172_v7 = vshrl.u32 %v5994_v38, 16 }
 0x13e   : > { %v6022_v8 = vpop.f32.mrb[25].mxu0  ;;  %v1071_v10 = vshll.u32 %v4868_v57, 16  ;;  %v1093_v11 = vshrl.u32 %v4871_v59, 16  ;;  %v2448_v12 = vsel %vm1830_vm10, %v2446_v33, %v2447_v61  ;;  %v2176_v13 = vrot.slane %v2174_v0, 1  ;;  %v6044_v46 = vld [vmem:[#allocation2 + $0x34] sm:$0xf] }
 0x13f   : > { %v6025_v14 = vpop.f32.mrb[26].mxu0  ;;  %v1087_v45 = vrot.slane %v1085_v4, 7  ;;  %v6027_v15 = vrot.slane %v1068_v6, 7  ;;  %v1096_v58 = vshll.u32 %v4871_v59, 16  ;;  %2493 = vrot.lane.b32.xlu1 %v2448_v12, %s5622_s24  ;;  %v708_v16 = vmax.f32 %v632_v2, 0.0 }
 0x140   : > { %v6030_v18 = vpop.f32.mrb[27].mxu0  ;;  %v1095_v23 = vrot.slane %v1093_v11, 7  ;;  %v2177_v24 = vor.u32 %v2176_v13, %v2172_v7  ;;  %v2181_v25 = vrot.slane %v2179_v1, 1  ;;  %v2186_v26 = vshll.u32 %v6013_v63, 16  ;;  %v1985_v52 = vld [vmem:[#allocation2 + $0x30] sm:$0xf] }
 0x141   : > { %v1090_v27 = vor.u32 %v1088_v5, %v1087_v45  ;;  %v1091_v28 = vrot.slane %v1087_v45, 4  ;;  %v1073_v30 = vor.u32 %v1071_v10, %v6027_v15  ;;  %v2184_v31 = vshrl.u32 %v6013_v63, 16  ;;  %v6036_v40 = vld [vmem:[#allocation2 + $0x38] ss:$0 sps:$4 sm:$0x11]  }
 0x142   : > { %v1098_v32 = vor.u32 %v1096_v58, %v1095_v23  ;;  %v1100_v34 = vrot.slane %v1095_v23, 4  ;;  %v2182_v36 = vsel %vm1557_vm11, %v2177_v24, %v2181_v25  ;;  %v4869_v37 = vpack.c.bf16 %v708_v16, %v708_v16  ;;  %v6057_v57 = vld [vmem:[#allocation2 + $0x28] sm:$0xf]  ;;  %v1313_v61 = vld [vmem:[#allocation2 + $0x74] sm:$0x1] }
 0x143   : > { %v1317_v42 = vsel %vm5887_vm8, %v1090_v27, %v1316_v9  ;;  %v1310_v44 = vsel %vm5887_vm8, %v1073_v30, %v1309_v19  ;;  %2363 = vrot.lane.b32.xlu0 %v2182_v36, %s5623_s26  ;;  %v2188_v39 = vrot.slane %v2186_v26, 1  ;;  %v2191_v48 = vshll.u32 %v5997_v41, 16  ;;  %v1983_v7 = vld [vmem:[#allocation2 + $0x24] sm:$0xf]  ;;  %v2030_v36 = vld [vmem:[#allocation2 + $0x30] sm:$0xe] }
 0x144   : > { %1318 = vst [vmem:[#allocation2 + $0x78] sm:$0xf] %v1317_v42  ;;  %1311 = vst [vmem:[#allocation2 + $0x6c] sm:$0xf] %v1310_v44  ;;  %v1099_v49 = vsel %vm5894_vm9, %v1091_v28, %v1098_v32  ;;  %v1321_v50 = vsel %vm5802_vm3, %v1100_v34, %v1320_v20  ;;  %v1076_v51 = vshrl.u32 %v4869_v37, 16  ;;  %v1079_v33 = vshll.u32 %v4869_v37, 16 }
 0x145   : > { %v6050_v53 = vpop.f32.mrb[28].mxu0  ;;  %1319 = vst.msk [vmem:[#allocation2 + $0x7c] sm:$0xf] %vm723_vm6, %v1099_v49  ;;  %1322 = vst [vmem:[#allocation2 + $0x80] sm:$0x1] %v1321_v50  ;;  %v2189_v54 = vor.u32 %v2188_v39, %v2184_v31  ;;  %v2193_v41 = vrot.slane %v2191_v48, 1  ;;  %v653_v55 = vadd.f32 %v5980_v22, %v5878_v21  ;;  %v645_v56 = vadd.f32 %v5878_v21, %v5986_v29 }
 0x146   : > { %v6059_v59 = vpop.f32.mrb[29].mxu0  ;;  %v1078_v60 = vrot.slane %v1076_v51, 7  ;;  %v6062_v0 = vcombine.low %v1985_v52, %v6044_v46  ;;  %v2215_v1 = vshll.u32 %v6036_v40, 16  ;;  %v656_v2 = vadd.f32 %v5990_v35, %v5878_v21  ;;  %v6078_v35 = vld [vmem:[#allocation2 + $0x2c] ss:$0 sps:$4 sm:$0x11]  }
 0x147   : > { %v6067_v4 = vpop.f32.mrb[30].mxu0  ;;  %v1074_v22 = vrot.slane %v6027_v15, 4  ;;  %v2194_v29 = vsel %vm1557_vm11, %v2189_v54, %v2193_v41  ;;  %v713_v5 = vmax.f32 %v653_v55, 0.0  ;;  %v711_v6 = vmax.f32 %v645_v56, 0.0  ;;  %v1330_v42 = vld [vmem:[#allocation2 + $0x90] sm:$0xf] }
 0x148   : > { %v6071_v9 = vpop.f32.mrb[31].mxu0  ;;  %v1081_v10 = vor.u32 %v1079_v33, %v1078_v60  ;;  %v1083_v11 = vrot.slane %v1078_v60, 4  ;;  %2365 = vrot.lane.b32.xlu0 %v2194_v29, %s5623_s26  ;;  %v2210_v12 = vshll.u32 %v6062_v0, 16  ;;  %v6076_v13 = vcombine.low %v1983_v7, %v6057_v57  ;;  %v5470_v49 = vld [vmem:[%s7320_s3 + $0xc] sm:$0xff]   ;;  %v1323_v50 = vld [vmem:[#allocation2 + $0x84] sm:$0xf] }
 0x149   : > { %v4874_v45 = vpack.c.bf16 %v713_v5, %v713_v5  ;;  %v4872_v15 = vpack.c.bf16 %v711_v6, %v711_v6  ;;  %v2208_v58 = vshrl.u32 %v6062_v0, 16  ;;  %v714_v16 = vmax.f32 %v656_v2, 0.0  ;;  %v1334_v60 = vld [vmem:[#allocation2 + $0x98] sm:$0x1]  ;;  %5023 = vmatprep.subr.bf16.mxu1 %v5470_v49 }
 0x14a   : > { %v1082_v19 = vsel %vm5894_vm9, %v1074_v22, %v1081_v10  ;;  %v1314_v23 = vsel %vm5802_vm3, %v1083_v11, %v1313_v61  ;;  %v2212_v24 = vrot.slane %v2210_v12, 1  ;;  %v2217_v25 = vrot.slane %v2215_v1, 1  ;;  %v2029_v22 = vld [vmem:[#allocation2 + $0x24] sm:$0xe]  ;;  %5024 = vmatpush3.bf16.msra.mxu1 %v5470_v49  ;;  %v6105_v10 = vld [vmem:[#allocation2 + $0x4c] sm:$0xf] }
 0x14b   : > { %1312 = vst.msk [vmem:[#allocation2 + $0x70] sm:$0xf] %vm723_vm6, %v1082_v19  ;;  %1315 = vst [vmem:[#allocation2 + $0x74] sm:$0x1] %v1314_v23  ;;  %v1119_v26 = vshrl.u32 %v4874_v45, 16  ;;  %v1122_v27 = vshll.u32 %v4874_v45, 16  ;;  %v4875_v31 = vpack.c.bf16 %v714_v16, %v714_v16  ;;  %v648_v39 = vadd.f32 %v5878_v21, %v5999_v43 }
 0x14c   : > { %v1102_v28 = vshrl.u32 %v4872_v15, 16  ;;  %v1105_v30 = vshll.u32 %v4872_v15, 16  ;;  %v2213_v20 = vor.u32 %v2212_v24, %v2208_v58  ;;  %v2198_v32 = vshll.u32 %v6076_v13, 16  ;;  %v6108_v58 = vld [vmem:[#allocation2 + $0x50] ss:$0 sps:$4 sm:$0x11]  }
 0x14d   : > { %v2203_v34 = vshll.u32 %v6078_v35, 16  ;;  %v1121_v37 = vrot.slane %v1119_v26, 7  ;;  %v4691_v48 = vcombine.low %v2030_v36, %v6044_v46  ;;  %v1127_v33 = vshrl.u32 %v4875_v31, 16 }
 0x14e   : > { %v6088_v44 = vrot.slane %v1102_v28, 7  ;;  %v2218_v51 = vsel %vm1557_vm11, %v2213_v20, %v2217_v25  ;;  %v2196_v52 = vshrl.u32 %v6076_v13, 16  ;;  %v2200_v54 = vrot.slane %v2198_v32, 1  ;;  %v1989_v28 = vld [vmem:[#allocation2 + $0x48] sm:$0xf] }
 0x14f   : > { %v1124_v41 = vor.u32 %v1122_v27, %v1121_v37  ;;  %v1125_v55 = vrot.slane %v1121_v37, 4  ;;  %2369 = vrot.lane.b32.xlu1 %v2218_v51, %s5623_s26  ;;  %v1130_v43 = vshll.u32 %v4875_v31, 16  ;;  %v1129_v46 = vrot.slane %v1127_v33, 7  ;;  %v1987_v31 = vld [vmem:[#allocation2 + $0x3c] sm:$0xf] }
 0x150   : > { %v1107_v56 = vor.u32 %v1105_v30, %v6088_v44  ;;  %v2201_v61 = vor.u32 %v2200_v54, %v2196_v52  ;;  %v2205_v1 = vrot.slane %v2203_v34, 1  ;;  %v712_v2 = vmax.f32 %v648_v39, 0.0  ;;  %v6122_v30 = vld [vmem:[#allocation2 + $0x40] sm:$0xf] }
 0x151   : > { %v1331_v29 = vsel %vm5887_vm8, %v1124_v41, %v1330_v42  ;;  %v2452_v6 = vrot.slane %v4691_v48, 1  ;;  %v2453_v7 = vrot.slane %v6036_v40, 1  ;;  %v1132_v11 = vor.u32 %v1130_v43, %v1129_v46  ;;  %v1327_v42 = vld [vmem:[#allocation2 + $0x8c] sm:$0x1] }
 0x152   : > { %v1324_v5 = vsel %vm5887_vm8, %v1107_v56, %v1323_v50  ;;  %1332 = vst [vmem:[#allocation2 + $0x90] sm:$0xf] %v1331_v29  ;;  %v1134_v12 = vrot.slane %v1129_v46, 4  ;;  %v2206_v45 = vsel %vm1557_vm11, %v2201_v61, %v2205_v1  ;;  %v4873_v15 = vpack.c.bf16 %v712_v2, %v712_v2  ;;  %v6140_v52 = vld [vmem:[#allocation2 + $0x44] ss:$0 sps:$4 sm:$0x11]  }
 0x153   : > { %1325 = vst [vmem:[#allocation2 + $0x84] sm:$0xf] %v1324_v5  ;;  %2367 = vrot.lane.b32.xlu0 %v2206_v45, %s5623_s26  ;;  %v2454_v16 = vsel %vm1830_vm10, %v2452_v6, %v2453_v7  ;;  %v4690_v19 = vcombine.low %v2029_v22, %v6057_v57  ;;  %v2450_v23 = vrot.slane %v6078_v35, 1  ;;  %v669_v40 = vadd.f32 %v6019_v3, %v5878_v21  ;;  %v1344_v29 = vld [vmem:[#allocation2 + $0xa8] sm:$0xf] }
 0x154   : > { %v1108_v24 = vrot.slane %v6088_v44, 4  ;;  %v1133_v25 = vsel %vm5894_vm9, %v1125_v55, %v1132_v11  ;;  %v1335_v26 = vsel %vm5802_vm3, %v1134_v12, %v1334_v60  ;;  %v1110_v27 = vshrl.u32 %v4873_v15, 16  ;;  %2497 = vrot.lane.b32.xlu1 %v2454_v16, %s5622_s24  ;;  %v1337_v16 = vld [vmem:[#allocation2 + $0x9c] sm:$0xf] }
 0x155   : > { %1333 = vst.msk [vmem:[#allocation2 + $0x94] sm:$0xf] %vm723_vm6, %v1133_v25  ;;  %1336 = vst [vmem:[#allocation2 + $0x98] sm:$0x1] %v1335_v26  ;;  %v2449_v57 = vrot.slane %v4690_v19, 1  ;;  %v717_v35 = vmax.f32 %v669_v40, 0.0  ;;  %v661_v3 = vadd.f32 %v5878_v21, %v6022_v8  ;;  %v6128_v20 = vcombine.low %v1989_v28, %v6105_v10 }
 0x156   : > { %v1112_v32 = vrot.slane %v1110_v27, 7  ;;  %v1113_v34 = vshll.u32 %v4873_v15, 16  ;;  %v2239_v36 = vshll.u32 %v6108_v58, 16  ;;  %v672_v37 = vadd.f32 %v6025_v14, %v5878_v21 }
 0x157   : > { %v2451_v44 = vsel %vm1830_vm10, %v2449_v57, %v2450_v23  ;;  %v4878_v39 = vpack.c.bf16 %v717_v35, %v717_v35  ;;  %v715_v48 = vmax.f32 %v661_v3, 0.0  ;;  %v6135_v49 = vcombine.low %v1987_v31, %v6122_v30  ;;  %v2032_v57 = vld [vmem:[#allocation2 + $0x48] sm:$0xe]  ;;  %v1348_v35 = vld [vmem:[#allocation2 + $0xb0] sm:$0x1] }
 0x158   : > { %v1115_v8 = vor.u32 %v1113_v34, %v1112_v32  ;;  %v1117_v50 = vrot.slane %v1112_v32, 4  ;;  %2495 = vrot.lane.b32.xlu0 %v2451_v44, %s5622_s24  ;;  %v2232_v51 = vshrl.u32 %v6128_v20, 16  ;;  %v2234_v33 = vshll.u32 %v6128_v20, 16 }
 0x159   : > { %v1153_v54 = vshrl.u32 %v4878_v39, 16  ;;  %v4876_v14 = vpack.c.bf16 %v715_v48, %v715_v48  ;;  %v2241_v41 = vrot.slane %v2239_v36, 1  ;;  %v718_v55 = vmax.f32 %v672_v37, 0.0  ;;  %v2031_v36 = vld [vmem:[#allocation2 + $0x3c] sm:$0xe] }
 0x15a   : > { %v1116_v56 = vsel %vm5894_vm9, %v1108_v24, %v1115_v8  ;;  %v1328_v43 = vsel %vm5802_vm3, %v1117_v50, %v1327_v42  ;;  %v1156_v60 = vshll.u32 %v4878_v39, 16  ;;  %v2236_v46 = vrot.slane %v2234_v33, 1  ;;  %v6164_v48 = vld [vmem:[#allocation2 + $0x68] ss:$0 sps:$4 sm:$0x11]  }
 0x15b   : > { %1326 = vst.msk [vmem:[#allocation2 + $0x88] sm:$0xf] %vm723_vm6, %v1116_v56  ;;  %1329 = vst [vmem:[#allocation2 + $0x8c] sm:$0x1] %v1328_v43  ;;  %v1155_v61 = vrot.slane %v1153_v54, 7  ;;  %v1136_v1 = vshrl.u32 %v4876_v14, 16  ;;  %v4879_v2 = vpack.c.bf16 %v718_v55, %v718_v55  ;;  %v664_v11 = vadd.f32 %v5878_v21, %v6030_v18 }
 0x15c   : > { %v2220_v22 = vshrl.u32 %v6135_v49, 16  ;;  %v2237_v5 = vor.u32 %v2236_v46, %v2232_v51  ;;  %v2222_v6 = vshll.u32 %v6135_v49, 16  ;;  %v2227_v7 = vshll.u32 %v6140_v52, 16  ;;  %v1993_v43 = vld [vmem:[#allocation2 + $0x60] sm:$0xf] }
 0x15d   : > { %v1158_v12 = vor.u32 %v1156_v60, %v1155_v61  ;;  %v6152_v45 = vrot.slane %v1136_v1, 7  ;;  %v1139_v15 = vshll.u32 %v4876_v14, 16  ;;  %v1161_v19 = vshrl.u32 %v4879_v2, 16  ;;  %v6182_v60 = vld [vmem:[#allocation2 + $0x58] sm:$0xf] }
 0x15e   : > { %v1159_v23 = vrot.slane %v1155_v61, 4  ;;  %v2242_v40 = vsel %vm1557_vm11, %v2237_v5, %v2241_v41  ;;  %v1164_v24 = vshll.u32 %v4879_v2, 16  ;;  %v2224_v25 = vrot.slane %v2222_v6, 1  ;;  %v1991_v5 = vld [vmem:[#allocation2 + $0x54] sm:$0xf] }
 0x15f   : > { %v1345_v26 = vsel %vm5887_vm8, %v1158_v12, %v1344_v29  ;;  %v1141_v27 = vor.u32 %v1139_v15, %v6152_v45  ;;  %2373 = vrot.lane.b32.xlu1 %v2242_v40, %s5623_s26  ;;  %v1163_v28 = vrot.slane %v1161_v19, 7  ;;  %v2229_v18 = vrot.slane %v2227_v7, 1  ;;  %v1341_v6 = vld [vmem:[#allocation2 + $0xa4] sm:$0x1] }
 0x160   : > { %1346 = vst [vmem:[#allocation2 + $0xa8] sm:$0xf] %v1345_v26  ;;  %v2225_v3 = vor.u32 %v2224_v25, %v2220_v22  ;;  %v716_v31 = vmax.f32 %v664_v11, 0.0  ;;  %v4693_v32 = vcombine.low %v2032_v57, %v6105_v10  ;;  %v2459_v34 = vrot.slane %v6108_v58, 1  ;;  %v6168_v10 = vld [vmem:[#allocation2 + $0x64] sm:$0xf] }
 0x161   : > { %v1338_v37 = vsel %vm5887_vm8, %v1141_v27, %v1337_v16  ;;  %v1166_v42 = vor.u32 %v1164_v24, %v1163_v28  ;;  %v1168_v44 = vrot.slane %v1163_v28, 4  ;;  %v4692_v39 = vcombine.low %v2031_v36, %v6122_v30  ;;  %v6200_v40 = vld [vmem:[#allocation2 + $0x5c] ss:$0 sps:$4 sm:$0x11]   ;;  %v1358_v36 = vld [vmem:[#allocation2 + $0xc0] sm:$0xf] }
 0x162   : > { %1339 = vst [vmem:[#allocation2 + $0x9c] sm:$0xf] %v1338_v37  ;;  %v2230_v8 = vsel %vm1557_vm11, %v2225_v3, %v2229_v18  ;;  %v4877_v50 = vpack.c.bf16 %v716_v31, %v716_v31  ;;  %v2458_v51 = vrot.slane %v4693_v32, 1  ;;  %v2456_v33 = vrot.slane %v6140_v52, 1 }
 0x163   : > { %v1167_v58 = vsel %vm5894_vm9, %v1159_v23, %v1166_v42  ;;  %v1349_v54 = vsel %vm5802_vm3, %v1168_v44, %v1348_v35  ;;  %2371 = vrot.lane.b32.xlu0 %v2230_v8, %s5623_s26  ;;  %v2455_v30 = vrot.slane %v4692_v39, 1  ;;  %v685_v14 = vadd.f32 %v6050_v53, %v5878_v21 }
 0x164   : > { %v1142_v41 = vrot.slane %v6152_v45, 4  ;;  %1347 = vst.msk [vmem:[#allocation2 + $0xac] sm:$0xf] %vm723_vm6, %v1167_v58  ;;  %1350 = vst [vmem:[#allocation2 + $0xb0] sm:$0x1] %v1349_v54  ;;  %v1144_v52 = vshrl.u32 %v4877_v50, 16  ;;  %v2460_v55 = vsel %vm1830_vm10, %v2458_v51, %v2459_v34  ;;  %v677_v56 = vadd.f32 %v5878_v21, %v6059_v59 }
 0x165   : > { %v1147_v46 = vshll.u32 %v4877_v50, 16  ;;  %2501 = vrot.lane.b32.xlu1 %v2460_v55, %s5622_s24  ;;  %v721_v61 = vmax.f32 %v685_v14, 0.0  ;;  %v6186_v53 = vcombine.low %v1993_v43, %v6168_v10  ;;  %v2263_v1 = vshll.u32 %v6164_v48, 16  ;;  %v5535_v21 = vld [vmem:[%s7319_s2] ss:$0 sm:$0xff] }
 0x166   : > { %v1146_v2 = vrot.slane %v1144_v52, 7  ;;  %v2457_v22 = vsel %vm1830_vm10, %v2455_v30, %v2456_v33  ;;  %v719_v29 = vmax.f32 %v677_v56, 0.0  ;;  %v688_v59 = vadd.f32 %v5535_v21, %v6067_v4  ;;  %v2034_v34 = vld [vmem:[#allocation2 + $0x60] sm:$0xe]  ;;  %v1351_v50 = vld [vmem:[#allocation2 + $0xb4] sm:$0xf] }
 0x167   : > { %2499 = vrot.lane.b32.xlu0 %v2457_v22, %s5622_s24  ;;  %v4882_v7 = vpack.c.bf16 %v721_v61, %v721_v61  ;;  %v2256_v11 = vshrl.u32 %v6186_v53, 16  ;;  %v2258_v12 = vshll.u32 %v6186_v53, 16  ;;  %v6198_v45 = vcombine.low %v1991_v5, %v6182_v60  ;;  %v2033_v55 = vld [vmem:[#allocation2 + $0x54] sm:$0xe]  ;;  %v6217_v56 = vld [vmem:[#allocation2 + $0x7c] sm:$0xf] }
 0x168   : > { %v1149_v15 = vor.u32 %v1147_v46, %v1146_v2  ;;  %v1151_v16 = vrot.slane %v1146_v2, 4  ;;  %v4880_v19 = vpack.c.bf16 %v719_v29, %v719_v29  ;;  %v722_v23 = vmax.f32 %v688_v59, 0.0  ;;  %v6224_v29 = vld [vmem:[#allocation2 + $0x80] ss:$0 sps:$4 sm:$0x11]  }
 0x169   : > { %v1187_v24 = vshrl.u32 %v4882_v7, 16  ;;  %v1190_v4 = vshll.u32 %v4882_v7, 16  ;;  %v2260_v25 = vrot.slane %v2258_v12, 1  ;;  %v2265_v26 = vrot.slane %v2263_v1, 1  ;;  %v1997_v7 = vld [vmem:[#allocation2 + $0x78] sm:$0xf] }
 0x16a   : > { %v1150_v27 = vsel %vm5894_vm9, %v1142_v41, %v1149_v15  ;;  %v1342_v28 = vsel %vm5802_vm3, %v1151_v16, %v1341_v6  ;;  %v1170_v18 = vshrl.u32 %v4880_v19, 16  ;;  %v1173_v57 = vshll.u32 %v4880_v19, 16  ;;  %v1362_v41 = vld [vmem:[#allocation2 + $0xc8] sm:$0x1] }
 0x16b   : > { %1340 = vst.msk [vmem:[#allocation2 + $0xa0] sm:$0xf] %vm723_vm6, %v1150_v27  ;;  %1343 = vst [vmem:[#allocation2 + $0xa4] sm:$0x1] %v1342_v28  ;;  %v1189_v35 = vrot.slane %v1187_v24, 7  ;;  %v2261_v3 = vor.u32 %v2260_v25, %v2256_v11  ;;  %v4883_v31 = vpack.c.bf16 %v722_v23, %v722_v23  ;;  %v2246_v32 = vshll.u32 %v6198_v45, 16 }
 0x16c   : > { %v6208_v37 = vrot.slane %v1170_v18, 7  ;;  %v2251_v42 = vshll.u32 %v6200_v40, 16  ;;  %v680_v44 = vadd.f32 %v5535_v21, %v6071_v9  ;;  %v4695_v39 = vcombine.low %v2034_v34, %v6168_v10  ;;  %v1996_v11 = vld [vmem:[#allocation2 + $0x70] sm:$0xf]  ;;  %v1995_v24 = vld [vmem:[#allocation2 + $0x6c] sm:$0xf] }
 0x16d   : > { %v1192_v8 = vor.u32 %v1190_v4, %v1189_v35  ;;  %v2266_v51 = vsel %vm1557_vm11, %v2261_v3, %v2265_v26  ;;  %v1195_v33 = vshrl.u32 %v4883_v31, 16  ;;  %v2244_v58 = vshrl.u32 %v6198_v45, 16 }
 0x16e   : > { %v1193_v54 = vrot.slane %v1189_v35, 4  ;;  %v1175_v30 = vor.u32 %v1173_v57, %v6208_v37  ;;  %2377 = vrot.lane.b32.xlu1 %v2266_v51, %s5623_s26  ;;  %v1198_v14 = vshll.u32 %v4883_v31, 16  ;;  %v2248_v52 = vrot.slane %v2246_v32, 1  ;;  %v2036_v35 = vld [vmem:[#allocation2 + $0x78] sm:$0xe] }
 0x16f   : > { %v1359_v9 = vsel %vm5887_vm8, %v1192_v8, %v1358_v36  ;;  %v1197_v10 = vrot.slane %v1195_v33, 7  ;;  %v2253_v43 = vrot.slane %v2251_v42, 1  ;;  %v720_v46 = vmax.f32 %v680_v44, 0.0  ;;  %v2035_v36 = vld [vmem:[#allocation2 + $0x6c] sm:$0xe] }
 0x170   : > { %1360 = vst [vmem:[#allocation2 + $0xc0] sm:$0xf] %v1359_v9  ;;  %v1352_v61 = vsel %vm5887_vm8, %v1175_v30, %v1351_v50  ;;  %v2249_v1 = vor.u32 %v2248_v52, %v2244_v58  ;;  %v2464_v2 = vrot.slane %v4695_v39, 1  ;;  %v2465_v22 = vrot.slane %v6164_v48, 1  ;;  %v2002_v42 = vld [vmem:[#allocation2 + $0x94] sm:$0xf] }
 0x171   : > { %1353 = vst [vmem:[#allocation2 + $0xb4] sm:$0xf] %v1352_v61  ;;  %v1200_v21 = vor.u32 %v1198_v14, %v1197_v10  ;;  %v1202_v59 = vrot.slane %v1197_v10, 4  ;;  %v4881_v5 = vpack.c.bf16 %v720_v46, %v720_v46  ;;  %v4694_v6 = vcombine.low %v2033_v55, %v6182_v60  ;;  %v6233_v48 = vld [vmem:[#allocation2 + $0x74] ss:$0 sps:$4 sm:$0x11]  }
 0x172   : > { %v2254_v12 = vsel %vm1557_vm11, %v2249_v1, %v2253_v43  ;;  %v2466_v15 = vsel %vm1830_vm10, %v2464_v2, %v2465_v22  ;;  %v2462_v47 = vrot.slane %v6200_v40, 1  ;;  %v6231_v16 = vcombine.low %v1997_v7, %v6217_v56  ;;  %v1355_v40 = vld [vmem:[#allocation2 + $0xbc] sm:$0x1]  ;;  %v6253_v51 = vld [vmem:[#allocation2 + $0x98] ss:$0 sps:$4 sm:$0x11]  }
 0x173   : > { %v1201_v19 = vsel %vm5894_vm9, %v1193_v54, %v1200_v21  ;;  %v1363_v23 = vsel %vm5802_vm3, %v1202_v59, %v1362_v41  ;;  %2375 = vrot.lane.b32.xlu0 %v2254_v12, %s5623_s26  ;;  %v1178_v60 = vshrl.u32 %v4881_v5, 16  ;;  %2505 = vrot.lane.b32.xlu1 %v2466_v15, %s5622_s24  ;;  %v2461_v4 = vrot.slane %v4694_v6, 1  ;;  %v2001_v14 = vld [vmem:[#allocation2 + $0x90] sm:$0xf]  ;;  %v2000_v41 = vld [vmem:[#allocation2 + $0x88] sm:$0xf] }
 0x174   : > { %1361 = vst.msk [vmem:[#allocation2 + $0xc4] sm:$0xf] %vm723_vm6, %v1201_v19  ;;  %1364 = vst [vmem:[#allocation2 + $0xc8] sm:$0x1] %v1363_v23  ;;  %v2282_v25 = vshll.u32 %v6231_v16, 16  ;;  %v2287_v26 = vshll.u32 %v6224_v29, 16  ;;  %v6245_v57 = vcombine.low %v1995_v24, %v1996_v11  ;;  %v4697_v34 = vcombine.low %v2036_v35, %v6217_v56 }
 0x175   : > { %v1180_v27 = vrot.slane %v1178_v60, 7  ;;  %v1181_v28 = vshll.u32 %v4881_v5, 16  ;;  %v2280_v18 = vshrl.u32 %v6231_v16, 16  ;;  %v2463_v3 = vsel %vm1830_vm10, %v2461_v4, %v2462_v47  ;;  %v6261_v9 = vld [vmem:[#allocation2 + $0x8c] ss:$0 sps:$4 sm:$0x11]  }
 0x176   : > { %v2284_v31 = vrot.slane %v2282_v25, 1  ;;  %v2275_v32 = vshll.u32 %v6233_v48, 16  ;;  %v1176_v44 = vrot.slane %v6208_v37, 4  ;;  %v2270_v50 = vshll.u32 %v6245_v57, 16  ;;  %v1999_v1 = vld [vmem:[#allocation2 + $0x84] sm:$0xf] }
 0x177   : > { %v1183_v39 = vor.u32 %v1181_v28, %v1180_v27  ;;  %v1185_v8 = vrot.slane %v1180_v27, 4  ;;  %2503 = vrot.lane.b32.xlu0 %v2463_v3, %s5622_s24  ;;  %v2289_v58 = vrot.slane %v2287_v26, 1  ;;  %v2471_v54 = vrot.slane %v6224_v29, 1  ;;  %v2038_v29 = vld [vmem:[#allocation2 + $0x90] sm:$0xe] }
 0x178   : > { %v2285_v33 = vor.u32 %v2284_v31, %v2280_v18  ;;  %v4696_v30 = vcombine.low %v2035_v36, %v1996_v11  ;;  %v2268_v55 = vshrl.u32 %v6245_v57, 16  ;;  %v2272_v56 = vrot.slane %v2270_v50, 1  ;;  %v2005_v5 = vld [vmem:[#allocation2 + $0xa8] sm:$0xf]  ;;  %v6273_v6 = vld [vmem:[#allocation2 + $0xac] sm:$0xf] }
 0x179   : > { %v1184_v52 = vsel %vm5894_vm9, %v1176_v44, %v1183_v39  ;;  %v1356_v37 = vsel %vm5802_vm3, %v1185_v8, %v1355_v40  ;;  %v2277_v43 = vrot.slane %v2275_v32, 1  ;;  %v2470_v46 = vrot.slane %v4697_v34, 1  ;;  %v6278_v47 = vld [vmem:[#allocation2 + $0xa0] sm:$0xf]  ;;  %v2037_v25 = vld [vmem:[#allocation2 + $0x84] sm:$0xe] }
 0x17a   : > { %1354 = vst.msk [vmem:[#allocation2 + $0xb8] sm:$0xf] %vm723_vm6, %v1184_v52  ;;  %1357 = vst [vmem:[#allocation2 + $0xbc] sm:$0x1] %v1356_v37  ;;  %v2290_v10 = vsel %vm1557_vm11, %v2285_v33, %v2289_v58  ;;  %v6265_v61 = vcombine.low %v2001_v14, %v2002_v42  ;;  %v2273_v62 = vor.u32 %v2272_v56, %v2268_v55  ;;  %v2467_v17 = vrot.slane %v4696_v30, 1 }
 0x17b   : > { %2381 = vrot.lane.b32.xlu1 %v2290_v10, %s5623_s26  ;;  %v2468_v2 = vrot.slane %v6233_v48, 1  ;;  %v6269_v22 = vcombine.low %v1999_v1, %v2000_v41  ;;  %v2311_v59 = vshll.u32 %v6253_v51, 16  ;;  %v2299_v12 = vshll.u32 %v6261_v9, 16  ;;  %v6283_v60 = vld [vmem:[#allocation2 + $0xb0] ss:$0 sps:$4 sm:$0x11]  }
 0x17c   : > { %v2306_v21 = vshll.u32 %v6265_v61, 16  ;;  %v2278_v7 = vsel %vm1557_vm11, %v2273_v62, %v2277_v43  ;;  %v4699_v15 = vcombine.low %v2038_v29, %v2002_v42  ;;  %v2472_v48 = vsel %vm1830_vm10, %v2470_v46, %v2471_v54  ;;  %v2003_v27 = vld [vmem:[#allocation2 + $0x9c] sm:$0xf]  ;;  %v6294_v31 = vld [vmem:[#allocation2 + $0xa4] ss:$0 sps:$4 sm:$0x11]  }
 0x17d   : > { %v2294_v11 = vshll.u32 %v6269_v22, 16  ;;  %2379 = vrot.lane.b32.xlu0 %v2278_v7, %s5623_s26  ;;  %v2304_v19 = vshrl.u32 %v6265_v61, 16  ;;  %v2469_v24 = vsel %vm1830_vm10, %v2467_v17, %v2468_v2  ;;  %v2292_v40 = vshrl.u32 %v6269_v22, 16  ;;  %v6297_v44 = vld [vmem:[#allocation2 + $0xc4] sm:$0xf] }
 0x17e   : > { %v2308_v23 = vrot.slane %v2306_v21, 1  ;;  %v6289_v26 = vcombine.low %v2005_v5, %v6273_v6  ;;  %v2313_v18 = vrot.slane %v2311_v59, 1  ;;  %v4698_v35 = vcombine.low %v2037_v25, %v2000_v41  ;;  %v2009_v14 = vld [vmem:[#allocation2 + $0xc0] sm:$0xf]  ;;  %v2040_v43 = vld [vmem:[#allocation2 + $0xa8] sm:$0xe] }
 0x17f   : > { %2509 = vrot.lane.b32.xlu1 %v2472_v48, %s5622_s24  ;;  %v2296_v4 = vrot.slane %v2294_v11, 1  ;;  %v6292_v3 = vcombine.low %v2003_v27, %v6278_v47  ;;  %v2301_v34 = vrot.slane %v2299_v12, 1  ;;  %v2476_v36 = vrot.slane %v4699_v15, 1  ;;  %v2007_v2 = vld [vmem:[#allocation2 + $0xb4] sm:$0xf] }
 0x180   : > { %v2309_v28 = vor.u32 %v2308_v23, %v2304_v19  ;;  %v2330_v42 = vshll.u32 %v6289_v26, 16  ;;  %v2477_v8 = vrot.slane %v6253_v51, 1  ;;  %v2335_v50 = vshll.u32 %v6283_v60, 16  ;;  %v6325_v5 = vld [vmem:[#allocation2 + $0x10] sm:$0xf] }
 0x181   : > { %v2297_v32 = vor.u32 %v2296_v4, %v2292_v40  ;;  %2507 = vrot.lane.b32.xlu0 %v2469_v24, %s5622_s24  ;;  %v2318_v33 = vshll.u32 %v6292_v3, 16  ;;  %v2328_v54 = vshrl.u32 %v6289_v26, 16  ;;  %v2473_v41 = vrot.slane %v4698_v35, 1  ;;  %v6308_v55 = vld [vmem:[#allocation2 + $0xb8] sm:$0xf] }
 0x182   : > { %v2314_v39 = vsel %vm1557_vm11, %v2309_v28, %v2313_v18  ;;  %v2332_v30 = vrot.slane %v2330_v42, 1  ;;  %v2474_v52 = vrot.slane %v6261_v9, 1  ;;  %v2316_v51 = vshrl.u32 %v6292_v3, 16  ;;  %v6318_v9 = vld [vmem:[#allocation2 + $0xc8] ss:$0 sps:$4 sm:$0x11]  }
 0x183   : > { %2385 = vrot.lane.b32.xlu1 %v2314_v39, %s5623_s26  ;;  %v2302_v58 = vsel %vm1557_vm11, %v2297_v32, %v2301_v34  ;;  %v2320_v37 = vrot.slane %v2318_v33, 1  ;;  %v2323_v10 = vshll.u32 %v6294_v31, 16  ;;  %v6313_v46 = vcombine.low %v2009_v14, %v6297_v44  ;;  %v2039_v12 = vld [vmem:[#allocation2 + $0x9c] sm:$0xe]  ;;  %v1367_v15 = vld [vmem:[#allocation2 + $0xc] sm:$0xf] }
 0x184   : > { %v2333_v56 = vor.u32 %v2332_v30, %v2328_v54  ;;  %v2478_v1 = vsel %vm1830_vm10, %v2476_v36, %v2477_v8  ;;  %v2337_v62 = vrot.slane %v2335_v50, 1  ;;  %v4701_v17 = vcombine.low %v2040_v43, %v6273_v6  ;;  %v1365_v6 = vld [vmem:[#allocation2] sm:$0xf]  ;;  %v6329_v48 = vld [vmem:[#allocation2 + $0x4] sm:$0xf] }
 0x185   : > { %2383 = vrot.lane.b32.xlu0 %v2302_v58, %s5623_s26  ;;  %v2321_v29 = vor.u32 %v2320_v37, %v2316_v51  ;;  %v2354_v21 = vshll.u32 %v6313_v46, 16  ;;  %v6323_v59 = vcombine.low %v2007_v2, %v6308_v55  ;;  %v2475_v7 = vsel %vm1830_vm10, %v2473_v41, %v2474_v52  ;;  %v6332_v40 = vld [vmem:[#allocation2 + $0xbc] ss:$0 sps:$4 sm:$0x11]   ;;  %v2042_v50 = vld [vmem:[#allocation2 + $0xc0] sm:$0xe] }
 0x186   : > { %v2338_v11 = vsel %vm1557_vm11, %v2333_v56, %v2337_v62  ;;  %v2325_v19 = vrot.slane %v2323_v10, 1  ;;  %v4700_v23 = vcombine.low %v2039_v12, %v6278_v47  ;;  %v2482_v25 = vrot.slane %v4701_v17, 1  ;;  %v6355_v41 = vld [vmem:[#allocation2 + $0x8] ss:$0 sps:$4 sm:$0x11]  }
 0x187   : > { %2513 = vrot.lane.b32.xlu1 %v2478_v1, %s5622_s24  ;;  %v2356_v24 = vrot.slane %v2354_v21, 1  ;;  %v2342_v4 = vshll.u32 %v6323_v59, 16  ;;  %v2483_v27 = vrot.slane %v6283_v60, 1  ;;  %v2352_v28 = vshrl.u32 %v6313_v46, 16  ;;  %v6358_v52 = vld [vmem:[#allocation2 + $0x28] sm:$0xf] }
 0x188   : > { %v2359_v18 = vshll.u32 %v6318_v9, 16  ;;  %v2326_v35 = vsel %vm1557_vm11, %v2321_v29, %v2325_v19  ;;  %v6342_v47 = vcombine.low %v1367_v15, %v6325_v5  ;;  %v6345_v36 = vcombine.low %v1365_v6, %v6329_v48  ;;  %v2041_v56 = vld [vmem:[#allocation2 + $0xb4] sm:$0xe]  ;;  %v5435_v51 = vld [vmem:[#allocation2 + $0x14] ss:$0 sps:$4 sm:$0x11]  }
 0x189   : > { %2511 = vrot.lane.b32.xlu0 %v2475_v7, %s5622_s24  ;;  %v2344_v32 = vrot.slane %v2342_v4, 1  ;;  %v2357_v34 = vor.u32 %v2356_v24, %v2352_v28  ;;  %v2479_v42 = vrot.slane %v4700_v23, 1  ;;  %v2480_v39 = vrot.slane %v6294_v31, 1  ;;  %v1371_v1 = vld [vmem:[#allocation2 + $0x24] sm:$0xf] }
 0x18a   : > { %v2340_v60 = vshrl.u32 %v6323_v59, 16  ;;  %v2347_v8 = vshll.u32 %v6332_v40, 16  ;;  %v2484_v33 = vsel %vm1830_vm10, %v2482_v25, %v2483_v27  ;;  %v2361_v58 = vrot.slane %v2359_v18, 1  ;;  %v6368_v21 = vld [vmem:[#allocation2 + $0x1c] sm:$0xf] }
 0x18b   : > { %2389 = vrot.lane.b32.xlu1 %v2338_v11, %s5623_s26  ;;  %v4703_v54 = vcombine.low %v2042_v50, %v6297_v44  ;;  %v1573_v30 = vshll.u32 %v6342_v47, 16  ;;  %v1561_v31 = vshll.u32 %v6345_v36, 16  ;;  %v2481_v10 = vsel %vm1830_vm10, %v2479_v42, %v2480_v39  ;;  %v1369_v15 = vld [vmem:[#allocation2 + $0x18] sm:$0xf]  ;;  %v1414_v4 = vld [vmem:[#allocation2 + $0xc] sm:$0xe] }
 0x18c   : > { %v2345_v14 = vor.u32 %v2344_v32, %v2340_v60  ;;  %v2362_v37 = vsel %vm1557_vm11, %v2357_v34, %v2361_v58  ;;  %v2349_v43 = vrot.slane %v2347_v8, 1  ;;  %v4702_v44 = vcombine.low %v2041_v56, %v6308_v55  ;;  %v5439_v60 = vld [vmem:[#allocation2 + $0x2c] ss:$0 sps:$4 sm:$0x11]   ;;  %v1375_v58 = vld [vmem:[#allocation2 + $0x3c] sm:$0xf] }
 0x18d   : > { %2387 = vrot.lane.b32.xlu0 %v2326_v35, %s5623_s26  ;;  %v2488_v62 = vrot.slane %v4703_v54, 1  ;;  %v2489_v17 = vrot.slane %v6318_v9, 1  ;;  %v1575_v2 = vrot.slane %v1573_v30, 1  ;;  %v6366_v29 = vcombine.low %v1371_v1, %v6358_v52  ;;  %v1413_v9 = vld [vmem:[#allocation2] sm:$0xe] }
 0x18e   : > { %v2350_v7 = vsel %vm1557_vm11, %v2345_v14, %v2349_v43  ;;  %v1559_v11 = vshrl.u32 %v6345_v36, 16  ;;  %v1563_v12 = vrot.slane %v1561_v31, 1  ;;  %v1566_v55 = vshll.u32 %v6355_v41, 16 }
 0x18f   : > { %2517 = vrot.lane.b32.xlu1 %v2484_v33, %s5622_s24  ;;  %v1571_v6 = vshrl.u32 %v6342_v47, 16  ;;  %v1578_v19 = vshll.u32 %v5435_v51, 16  ;;  %v2485_v23 = vrot.slane %v4702_v44, 1  ;;  %v2486_v24 = vrot.slane %v6332_v40, 1  ;;  %v6385_v40 = vld [vmem:[#allocation2 + $0x40] sm:$0xf] }
 0x190   : > { %v6377_v25 = vcombine.low %v1369_v15, %v6368_v21  ;;  %v2490_v27 = vsel %vm1830_vm10, %v2488_v62, %v2489_v17  ;;  %v4641_v18 = vcombine.low %v1414_v4, %v6325_v5  ;;  %v1597_v35 = vshll.u32 %v6366_v29, 16  ;;  %v1373_v44 = vld [vmem:[#allocation2 + $0x30] sm:$0xf]  ;;  %v1416_v62 = vld [vmem:[#allocation2 + $0x24] sm:$0xe] }
 0x191   : > { %2515 = vrot.lane.b32.xlu0 %v2481_v10, %s5622_s24  ;;  %v1576_v28 = vor.u32 %v1575_v2, %v1571_v6  ;;  %v1564_v32 = vor.u32 %v1563_v12, %v1559_v11  ;;  %v1568_v34 = vrot.slane %v1566_v55, 1  ;;  %v4640_v42 = vcombine.low %v1413_v9, %v6329_v48  ;;  %v6394_v48 = vld [vmem:[#allocation2 + $0x34] sm:$0xf]  ;;  %v1415_v6 = vld [vmem:[#allocation2 + $0x18] sm:$0xe] }
 0x192   : > { %v1580_v39 = vrot.slane %v1578_v19, 1  ;;  %v2487_v8 = vsel %vm1830_vm10, %v2485_v23, %v2486_v24  ;;  %v1835_v50 = vrot.slane %v5435_v51, 1  ;;  %v1585_v33 = vshll.u32 %v6377_v25, 16  ;;  %v5441_v51 = vld [vmem:[#allocation2 + $0x20] ss:$0 sps:$4 sm:$0x11]  }
 0x193   : > { %2393 = vrot.lane.b32.xlu1 %v2362_v37, %s5623_s26  ;;  %v1834_v54 = vrot.slane %v4641_v18, 1  ;;  %v1599_v30 = vrot.slane %v1597_v35, 1  ;;  %v6392_v14 = vcombine.low %v1375_v58, %v6385_v40  ;;  %v1569_v31 = vsel %vm1557_vm11, %v1564_v32, %v1568_v34  ;;  %v6410_v19 = vld [vmem:[#allocation2 + $0x58] sm:$0xf]  ;;  %v1377_v58 = vld [vmem:[#allocation2 + $0x48] sm:$0xf] }
 0x194   : > { %v1581_v5 = vsel %vm1557_vm11, %v1576_v28, %v1580_v39  ;;  %v1831_v37 = vrot.slane %v4640_v42, 1  ;;  %v1832_v56 = vrot.slane %v6355_v41, 1  ;;  %v1595_v10 = vshrl.u32 %v6366_v29, 16  ;;  %v6413_v24 = vld [vmem:[#allocation2 + $0x44] ss:$0 sps:$4 sm:$0x11]  }
 0x195   : > { %2391 = vrot.lane.b32.xlu0 %v2350_v7, %s5623_s26  ;;  %v1602_v43 = vshll.u32 %v5439_v60, 16  ;;  %v1587_v1 = vrot.slane %v1585_v33, 1  ;;  %v6401_v17 = vcombine.low %v1373_v44, %v6394_v48  ;;  %v1836_v2 = vsel %vm1830_vm10, %v1834_v54, %v1835_v50  ;;  %v1379_v28 = vld [vmem:[#allocation2 + $0x54] sm:$0xf]  ;;  %v6421_v42 = vld [vmem:[#allocation2 + $0x4c] sm:$0xf] }
 0x196   : > { %v1600_v7 = vor.u32 %v1599_v30, %v1595_v10  ;;  %v4643_v11 = vcombine.low %v1416_v62, %v6358_v52  ;;  %v1621_v12 = vshll.u32 %v6392_v14, 16  ;;  %v1833_v41 = vsel %vm1830_vm10, %v1831_v37, %v1832_v56  ;;  %v6424_v39 = vld [vmem:[#allocation2 + $0x38] ss:$0 sps:$4 sm:$0x11]   ;;  %v1418_v30 = vld [vmem:[#allocation2 + $0x3c] sm:$0xe] }
 0x197   : > { %2521 = vrot.lane.b32.xlu1 %v2490_v27, %s5622_s24  ;;  %v1583_v55 = vshrl.u32 %v6377_v25, 16  ;;  %v1590_v15 = vshll.u32 %v5441_v51, 16  ;;  %v1604_v9 = vrot.slane %v1602_v43, 1  ;;  %v4642_v23 = vcombine.low %v1415_v6, %v6368_v21 }
 0x198   : > { %v1841_v27 = vrot.slane %v5439_v60, 1  ;;  %v1609_v52 = vshll.u32 %v6401_v17, 16  ;;  %v1840_v35 = vrot.slane %v4643_v11, 1  ;;  %v1623_v32 = vrot.slane %v1621_v12, 1 }
 0x199   : > { %2519 = vrot.lane.b32.xlu0 %v2487_v8, %s5622_s24  ;;  %v1588_v4 = vor.u32 %v1587_v1, %v1583_v55  ;;  %v1605_v18 = vsel %vm1557_vm11, %v1600_v7, %v1604_v9  ;;  %v6419_v34 = vcombine.low %v1379_v28, %v6410_v19  ;;  %v1592_v21 = vrot.slane %v1590_v15, 1  ;;  %v6439_v1 = vld [vmem:[#allocation2 + $0x70] sm:$0xf]  ;;  %v5451_v11 = vld [vmem:[#allocation2 + $0x5c] ss:$0 sps:$4 sm:$0x11]  }
 0x19a   : > { %v1837_v60 = vrot.slane %v4642_v23, 1  ;;  %v1838_v8 = vrot.slane %v5441_v51, 1  ;;  %v1619_v50 = vshrl.u32 %v6392_v14, 16  ;;  %v1626_v33 = vshll.u32 %v6413_v24, 16  ;;  %v1417_v7 = vld [vmem:[#allocation2 + $0x30] sm:$0xe] }
 0x19b   : > { %1752 = vrot.lane.b32.xlu1 %v1581_v5, %s5623_s26  ;;  %v1593_v5 = vsel %vm1557_vm11, %v1588_v4, %v1592_v21  ;;  %v1611_v54 = vrot.slane %v1609_v52, 1  ;;  %v1842_v37 = vsel %vm1830_vm10, %v1840_v35, %v1841_v27  ;;  %v4645_v10 = vcombine.low %v1418_v30, %v6385_v40  ;;  %v1383_v15 = vld [vmem:[#allocation2 + $0x6c] sm:$0xf]  ;;  %v6450_v27 = vld [vmem:[#allocation2 + $0x64] sm:$0xf] }
 0x19c   : > { %v1624_v56 = vor.u32 %v1623_v32, %v1619_v50  ;;  %v1645_v51 = vshll.u32 %v6419_v34, 16  ;;  %v1607_v43 = vshrl.u32 %v6401_v17, 16  ;;  %v1614_v44 = vshll.u32 %v6424_v39, 16  ;;  %v1381_v21 = vld [vmem:[#allocation2 + $0x60] sm:$0xf] }
 0x19d   : > { %1750 = vrot.lane.b32.xlu0 %v1569_v31, %s5623_s26  ;;  %v6430_v31 = vcombine.low %v1377_v58, %v6421_v42  ;;  %v1839_v62 = vsel %vm1830_vm10, %v1837_v60, %v1838_v8  ;;  %v4644_v40 = vcombine.low %v1417_v7, %v6394_v48  ;;  %v1846_v9 = vrot.slane %v4645_v10, 1  ;;  %v1420_v48 = vld [vmem:[#allocation2 + $0x54] sm:$0xe]  ;;  %v6471_v10 = vld [vmem:[#allocation2 + $0x88] sm:$0xf] }
 0x19e   : > { %v1612_v12 = vor.u32 %v1611_v54, %v1607_v43  ;;  %v1647_v23 = vrot.slane %v1645_v51, 1  ;;  %v6448_v4 = vcombine.low %v1383_v15, %v6439_v1  ;;  %v1616_v52 = vrot.slane %v1614_v44, 1  ;;  %v1419_v54 = vld [vmem:[#allocation2 + $0x48] sm:$0xe] }
 0x19f   : > { %1881 = vrot.lane.b32.xlu1 %v1836_v2, %s5622_s24  ;;  %v1628_v2 = vrot.slane %v1626_v33, 1  ;;  %v1633_v55 = vshll.u32 %v6430_v31, 16  ;;  %v1844_v28 = vrot.slane %v6424_v39, 1  ;;  %v1650_v35 = vshll.u32 %v5451_v11, 16 }
 0x1a0   : > { %v4647_v32 = vcombine.low %v1420_v48, %v6410_v19  ;;  %v1617_v60 = vsel %vm1557_vm11, %v1612_v12, %v1616_v52  ;;  %v1843_v8 = vrot.slane %v4644_v40, 1  ;;  %v6460_v33 = vcombine.low %v1381_v21, %v6450_v27  ;;  %v6464_v39 = vld [vmem:[#allocation2 + $0x74] ss:$0 sps:$4 sm:$0x11]   ;;  %v1387_v12 = vld [vmem:[#allocation2 + $0x84] sm:$0xf] }
 0x1a1   : > { %1879 = vrot.lane.b32.xlu0 %v1833_v41, %s5622_s24  ;;  %v1847_v41 = vrot.slane %v6413_v24, 1  ;;  %v1629_v6 = vsel %vm1557_vm11, %v1624_v56, %v1628_v2  ;;  %v6453_v24 = vld [vmem:[#allocation2 + $0x50] ss:$0 sps:$4 sm:$0x11]   ;;  %v1635_v50 = vrot.slane %v1633_v55, 1  ;;  %v1669_v30 = vshll.u32 %v6448_v4, 16 }
 0x1a2   : > { %v1631_v19 = vshrl.u32 %v6430_v31, 16  ;;  %v4646_v56 = vcombine.low %v1419_v54, %v6421_v42  ;;  %v1652_v51 = vrot.slane %v1650_v35, 1  ;;  %v1852_v43 = vrot.slane %v4647_v32, 1  ;;  %v6480_v55 = vld [vmem:[#allocation2 + $0x68] ss:$0 sps:$4 sm:$0x11]  }
 0x1a3   : > { %1756 = vrot.lane.b32.xlu1 %v1605_v18, %s5623_s26  ;;  %v1643_v18 = vshrl.u32 %v6419_v34, 16  ;;  %v1848_v58 = vsel %vm1830_vm10, %v1846_v9, %v1847_v41  ;;  %v1853_v44 = vrot.slane %v5451_v11, 1  ;;  %v1657_v7 = vshll.u32 %v6460_v33, 16  ;;  %v5474_v41 = vld [vmem:[%s7320_s3 + $0x14] ss:$0 sps:$4 sm:$0xff]   ;;  %v5478_v32 = vld [vmem:[%s7320_s3] sm:$0xff]  }
 0x1a4   : > { %v1636_v2 = vor.u32 %v1635_v50, %v1631_v19  ;;  %v1671_v42 = vrot.slane %v1669_v30, 1  ;;  %v6483_v15 = vcombine.low %v1387_v12, %v6471_v10  ;;  %v6485_v11 = vld [vmem:[#allocation2 + $0x7c] sm:$0xf]  ;;  %v1849_v9 = vrot.slane %v4646_v56, 1  ;;  %v1422_v48 = vld [vmem:[#allocation2 + $0x6c] sm:$0xe]  ;;  %5327 = vmatprep.subr.msk.bf16.mxu1 %vm2633_vm13, %v5474_v41 }
 0x1a5   : > { %1754 = vrot.lane.b32.xlu0 %v1593_v5, %s5623_s26  ;;  %v1648_v5 = vor.u32 %v1647_v23, %v1643_v18  ;;  %v1850_v23 = vrot.slane %v6453_v24, 1  ;;  %v1674_v52 = vshll.u32 %v6464_v39, 16  ;;  %v1667_v18 = vshrl.u32 %v6448_v4, 16  ;;  %v1385_v35 = vld [vmem:[#allocation2 + $0x78] sm:$0xf] }
 0x1a6   : > { %v1421_v54 = vld [vmem:[#allocation2 + $0x60] sm:$0xe]  ;;  %v1693_v30 = vshll.u32 %v6483_v15, 16  ;;  %v1662_v56 = vshll.u32 %v6480_v55, 16 }
 0x1a7   : > { %1885 = vrot.lane.b32.xlu1 %v1842_v37, %s5622_s24  ;;  %v1638_v37 = vshll.u32 %v6453_v24, 16  ;;  %v1653_v40 = vsel %vm1557_vm11, %v1648_v5, %v1652_v51  ;;  %v6498_v24 = vcombine.low %v1385_v35, %v6485_v11  ;;  %v1672_v5 = vor.u32 %v1671_v42, %v1667_v18  ;;  %v6509_v51 = vld [vmem:[#allocation2 + $0xa0] sm:$0xf]  ;;  %v1391_v42 = vld [vmem:[#allocation2 + $0x9c] sm:$0xf] }
 0x1a8   : > { %v4648_v12 = vcombine.low %v1421_v54, %v6450_v27  ;;  %v1664_v27 = vrot.slane %v1662_v56, 1  ;;  %v1423_v56 = vld [vmem:[#allocation2 + $0x78] sm:$0xe] }
 0x1a9   : > { %1883 = vrot.lane.b32.xlu0 %v1839_v62, %s5622_s24  ;;  %v1845_v62 = vsel %vm1830_vm10, %v1843_v8, %v1844_v28  ;;  %v1854_v28 = vsel %vm1830_vm10, %v1852_v43, %v1853_v44  ;;  %v4649_v8 = vcombine.low %v1422_v48, %v6439_v1  ;;  %v1655_v1 = vshrl.u32 %v6460_v33, 16  ;;  %v6526_v48 = vld [vmem:[#allocation2 + $0x94] sm:$0xf] }
 0x1aa   : > { %v1851_v44 = vsel %vm1830_vm10, %v1849_v9, %v1850_v23  ;;  %v1695_v23 = vrot.slane %v1693_v30, 1  ;;  %v1855_v54 = vrot.slane %v4648_v12, 1 }
 0x1ab   : > { %1760 = vrot.lane.b32.xlu1 %v1629_v6, %s5623_s26  ;;  %v1640_v6 = vrot.slane %v1638_v37, 1  ;;  %v2492_v50 = vpop.permute.xlu1 %2491  ;;  %v2635_v37 = vsel %vm2633_vm13, %v5474_v41, 0  ;;  %v6517_v41 = vld [vmem:[#allocation2 + $0x80] ss:$0 sps:$4 sm:$0x11]   ;;  %v1858_v9 = vrot.slane %v4649_v8, 1 }
 0x1ac   : > { %5026 = vmatpush3.bf16.msra.mxu1 %v2635_v37  ;;  %v1691_v8 = vshrl.u32 %v6483_v15, 16 }
 0x1ad   : > { %1758 = vrot.lane.b32.xlu0 %v1617_v60, %s5623_s26  ;;  %v1641_v21 = vsel %vm1557_vm11, %v1636_v2, %v1640_v6  ;;  %v1659_v60 = vrot.slane %v1657_v7, 1  ;;  %v6513_v2 = vld [vmem:[#allocation2 + $0x8c] ss:$0 sps:$4 sm:$0x11]   ;;  %5059 = vmatprep.subr.bf16.mxu1 %v5478_v32  ;;  %v1859_v7 = vrot.slane %v6464_v39, 1 }
 0x1ae   : > { %v1696_v37 = vor.u32 %v1695_v23, %v1691_v8 }
 0x1af   : > { %1889 = vrot.lane.b32.xlu1 %v1848_v58, %s5622_s24 }
 0x1b1   : > { %1887 = vrot.lane.b32.xlu0 %v1845_v62, %s5622_s24  ;;  %v1676_v62 = vrot.slane %v1674_v52, 1  ;;  %v6524_v52 = vcombine.low %v1391_v42, %v6509_v51  ;;  %v2494_v18 = vpop.permute.xlu1 %2493 }
 0x1b3   : > { %1764 = vrot.lane.b32.xlu1 %v1653_v40, %s5623_s26  ;;  %v1681_v40 = vshll.u32 %v6498_v24, 16  ;;  %v1677_v6 = vsel %vm1557_vm11, %v1672_v5, %v1676_v62  ;;  %v1686_v62 = vshll.u32 %v6517_v41, 16 }
 0x1b5   : > { %v2364_v58 = vpop.permute.xlu0 %2363  ;;  %1762 = vrot.lane.b32.xlu0 %v1641_v21, %s5623_s26  ;;  %v6534_v21 = vld [vmem:[%s7320_s3 + $0x8] ss:$0 sps:$4 sm:$0xff]   ;;  %v1683_v30 = vrot.slane %v1681_v40, 1  ;;  %v6557_v40 = vld [vmem:[#allocation2 + $0xa4] ss:$0 sps:$4 sm:$0x11]  }
 0x1b6   : > { %v2524_v19 = vsel %vm1911_vm12, %v5994_v38, %v2364_v58  ;;  %v1660_v38 = vor.u32 %v1659_v60, %v1655_v1  ;;  %v1856_v60 = vrot.slane %v6480_v55, 1  ;;  %v1860_v55 = vsel %vm1830_vm10, %v1858_v9, %v1859_v7  ;;  %v1395_v9 = vld [vmem:[#allocation2 + $0xb4] sm:$0xf] }
 0x1b7   : > { %1893 = vrot.lane.b32.xlu1 %v1854_v28, %s5622_s24  ;;  %v2556_v43 = vsel %vm481_vm0, %v2524_v19, %v2492_v50  ;;  %v1389_v28 = vld [vmem:[#allocation2 + $0x90] sm:$0xf]  ;;  %v1698_v50 = vshll.u32 %v6513_v2, 16  ;;  %v1424_v19 = vld [vmem:[#allocation2 + $0x84] sm:$0xe]  ;;  %v4650_v7 = vcombine.low %v1423_v56, %v6485_v11 }
 0x1b8   : > { %5027 = vmatprep.mubr.msk.bf16.mxu1 %vm2600_vm14, %v2556_v43  ;;  %v1665_v5 = vsel %vm1557_vm11, %v1660_v38, %v1664_v27  ;;  %v4651_v1 = vcombine.low %v1424_v19, %v6471_v10  ;;  %v1717_v43 = vshll.u32 %v6524_v52, 16  ;;  %v6552_v38 = vld [vmem:[#allocation2 + $0xb8] sm:$0xf]  ;;  %v1857_v10 = vsel %vm1830_vm10, %v1855_v54, %v1856_v60  ;;  %v6567_v11 = vld [vmem:[#allocation2 + $0xac] sm:$0xf] }
 0x1b9   : > { %1891 = vrot.lane.b32.xlu0 %v1851_v44, %s5622_s24  ;;  %v1679_v44 = vshrl.u32 %v6498_v24, 16  ;;  %v1700_v12 = vrot.slane %v1698_v50, 1  ;;  %v6570_v60 = vld [vmem:[#allocation2 + $0x98] ss:$0 sps:$4 sm:$0x11]   ;;  %v1861_v8 = vrot.slane %v4650_v7, 1 }
 0x1ba   : > { %v2366_v39 = vpop.permute.xlu0 %2365  ;;  %v1719_v27 = vrot.slane %v1717_v43, 1  ;;  %v1862_v50 = vrot.slane %v6517_v41, 1  ;;  %v1393_v54 = vld [vmem:[#allocation2 + $0xa8] sm:$0xf] }
 0x1bb   : > { %1768 = vrot.lane.b32.xlu1 %v1677_v6, %s5623_s26  ;;  %v2526_v35 = vsel %vm1911_vm12, %v6013_v63, %v2366_v39  ;;  %v6542_v63 = vcombine.low %v1389_v28, %v6526_v48  ;;  %v1684_v42 = vor.u32 %v1683_v30, %v1679_v44  ;;  %v1701_v23 = vsel %vm1557_vm11, %v1696_v37, %v1700_v12  ;;  %v1426_v28 = vld [vmem:[#allocation2 + $0x9c] sm:$0xe]  ;;  %v1425_v12 = vld [vmem:[#allocation2 + $0x90] sm:$0xe]  ;;  %v6586_v7 = vld [vmem:[#allocation2 + $0x28] sm:$0xf] }
 0x1bc   : > { %v2558_v58 = vsel %vm481_vm0, %v2526_v35, %v2494_v18  ;;  %v1864_v39 = vrot.slane %v4651_v1, 1  ;;  %v6565_v18 = vcombine.low %v1395_v9, %v6552_v38  ;;  %v1688_v35 = vrot.slane %v1686_v62, 1 }
 0x1bd   : > { %5028 = vmatmul.mubr.msk.bf16.vlgmr.msra.gmra.mrb[0].mxu1 %vm2600_vm14, %v2558_v58  ;;  %1766 = vrot.lane.b32.xlu0 %v1665_v5, %s5623_s26  ;;  %v1705_v6 = vshll.u32 %v6542_v63, 16  ;;  %v1715_v58 = vshrl.u32 %v6524_v52, 16  ;;  %v1722_v5 = vshll.u32 %v6557_v40, 16  ;;  %v6578_v37 = vcombine.low %v1393_v54, %v6567_v11 }
 0x1be   : > { %5060 = vmatpush3.bf16.msra.mxu1 %v5478_v32  ;;  %v1865_v32 = vrot.slane %v6513_v2, 1  ;;  %v1689_v30 = vsel %vm1557_vm11, %v1684_v42, %v1688_v35  ;;  %v1741_v41 = vshll.u32 %v6565_v18, 16  ;;  %v1703_v44 = vshrl.u32 %v6542_v63, 16  ;;  %v6594_v35 = vld [vmem:[#allocation2 + $0x1c] sm:$0xf] }
 0x1bf   : > { %1897 = vrot.lane.b32.xlu1 %v1860_v55, %s5622_s24  ;;  %5328 = vmatprep.subr.msk.bf16.mxu1 %vm2633_vm13, %v6534_v21  ;;  %v1707_v19 = vrot.slane %v1705_v6, 1  ;;  %v4653_v55 = vcombine.low %v1426_v28, %v6509_v51  ;;  %v1720_v43 = vor.u32 %v1719_v27, %v1715_v58  ;;  %v1710_v62 = vshll.u32 %v6570_v60, 16  ;;  %v6590_v6 = vld [vmem:[#allocation2 + $0xbc] ss:$0 sps:$4 sm:$0x11]  }
 0x1c0   : > { %v1866_v56 = vsel %vm1830_vm10, %v1864_v39, %v1865_v32  ;;  %v1863_v51 = vsel %vm1830_vm10, %v1861_v8, %v1862_v50  ;;  %v1871_v42 = vrot.slane %v6557_v40, 1  ;;  %v1729_v39 = vshll.u32 %v6578_v37, 16  ;;  %v3006_v28 = vld [vmem:[#allocation2 + $0x24] sm:$0xf] }
 0x1c1   : > { %1895 = vrot.lane.b32.xlu0 %v1857_v10, %s5622_s24  ;;  %v2370_v2 = vpop.permute.xlu1 %2369  ;;  %v1724_v10 = vrot.slane %v1722_v5, 1  ;;  %v1708_v32 = vor.u32 %v1707_v19, %v1703_v44  ;;  %v1870_v9 = vrot.slane %v4653_v55, 1  ;;  %v1743_v8 = vrot.slane %v1741_v41, 1  ;;  %v6598_v50 = vld [vmem:[#allocation2 + $0xb0] ss:$0 sps:$4 sm:$0x11]  }
 0x1c2   : > { %v6603_v54 = vcombine.low %v3006_v28, %v6586_v7  ;;  %v2530_v19 = vsel %vm1911_vm12, %v6062_v0, %v2370_v2  ;;  %v1746_v41 = vshll.u32 %v6590_v6, 16  ;;  %v1727_v28 = vshrl.u32 %v6578_v37, 16 }
 0x1c3   : > { %1772 = vrot.lane.b32.xlu1 %v1701_v23, %s5623_s26  ;;  %v4652_v23 = vcombine.low %v1425_v12, %v6526_v48  ;;  %v1725_v58 = vsel %vm1557_vm11, %v1720_v43, %v1724_v10  ;;  %v1712_v48 = vrot.slane %v1710_v62, 1  ;;  %v1739_v43 = vshrl.u32 %v6565_v18, 16  ;;  %v6622_v10 = vld [vmem:[#allocation2 + $0x2c] ss:$0 sps:$4 sm:$0x11]  }
 0x1c4   : > { %v1731_v12 = vrot.slane %v1729_v39, 1  ;;  %v1872_v2 = vsel %vm1830_vm10, %v1870_v9, %v1871_v42  ;;  %v6628_v39 = vld [vmem:[#allocation2 + $0x40] sm:$0xf] }
 0x1c5   : > { %v2368_v1 = vpop.permute.xlu0 %2367  ;;  %1770 = vrot.lane.b32.xlu0 %v1689_v30, %s5623_s26  ;;  %v1868_v30 = vrot.slane %v6570_v60, 1  ;;  %v1713_v60 = vsel %vm1557_vm11, %v1708_v32, %v1712_v48  ;;  %v1867_v62 = vrot.slane %v4652_v23, 1  ;;  %v1734_v32 = vshll.u32 %v6598_v50, 16  ;;  %v1427_v23 = vld [vmem:[#allocation2 + $0xa8] sm:$0xe] }
 0x1c6   : > { %v2498_v27 = vpop.permute.xlu1 %2497  ;;  %v2528_v40 = vsel %vm1911_vm12, %v6076_v13, %v2368_v1  ;;  %v1428_v13 = vld [vmem:[#allocation2 + $0xb4] sm:$0xe]  ;;  %v1732_v9 = vor.u32 %v1731_v12, %v1727_v28  ;;  %v3209_v12 = vshrl.u32 %v6603_v54, 16 }
 0x1c7   : > { %1901 = vrot.lane.b32.xlu1 %v1866_v56, %s5622_s24  ;;  %v3004_v56 = vld [vmem:[#allocation2 + $0x18] sm:$0xf]  ;;  %v2562_v1 = vsel %vm481_vm0, %v2530_v19, %v2498_v27  ;;  %v4655_v0 = vcombine.low %v1428_v13, %v6552_v38  ;;  %v3211_v27 = vshll.u32 %v6603_v54, 16  ;;  %v1748_v38 = vrot.slane %v1746_v41, 1 }
 0x1c8   : > { %v6614_v44 = vcombine.low %v3004_v56, %v6594_v35  ;;  %v1869_v42 = vsel %vm1830_vm10, %v1867_v62, %v1868_v30  ;;  %v1877_v19 = vrot.slane %v6590_v6, 1  ;;  %v1736_v30 = vrot.slane %v1734_v32, 1 }
 0x1c9   : > { %1899 = vrot.lane.b32.xlu0 %v1863_v51, %s5622_s24  ;;  %v1744_v51 = vor.u32 %v1743_v8, %v1739_v43  ;;  %v1876_v8 = vrot.slane %v4655_v0, 1  ;;  %v3053_v43 = vld [vmem:[#allocation2 + $0x24] sm:$0xe]  ;;  %v3216_v13 = vshll.u32 %v6622_v10, 16  ;;  %v1874_v62 = vrot.slane %v6598_v50, 1 }
 0x1ca   : > { %v2496_v5 = vpop.permute.xlu0 %2495  ;;  %v4776_v28 = vcombine.low %v3053_v43, %v6586_v7  ;;  %v6671_v43 = vld [vmem:[#allocation2 + $0x44] ss:$0 sps:$4 sm:$0x11]  }
 0x1cb   : > { %1776 = vrot.lane.b32.xlu1 %v1725_v58, %s5623_s26  ;;  %v2560_v55 = vsel %vm481_vm0, %v2528_v40, %v2496_v5  ;;  %v4654_v58 = vcombine.low %v1427_v23, %v6567_v11  ;;  %v3199_v40 = vshll.u32 %v6614_v44, 16  ;;  %v3010_v5 = vld [vmem:[#allocation2 + $0x3c] sm:$0xf]  ;;  %v1749_v48 = vsel %vm1557_vm11, %v1744_v51, %v1748_v38  ;;  %v6639_v11 = vld [vmem:[#allocation2 + $0x34] sm:$0xf] }
 0x1cc   : > { %5031 = vmatprep.mubr.msk.bf16.mxu1 %vm2600_vm14, %v2560_v55  ;;  %v3213_v55 = vrot.slane %v3211_v27, 1  ;;  %v6637_v41 = vcombine.low %v3010_v5, %v6628_v39  ;;  %v1737_v51 = vsel %vm1557_vm11, %v1732_v9, %v1736_v30  ;;  %v2840_v23 = vsel %vm2633_vm13, %v6534_v21, 0  ;;  %v3052_v5 = vld [vmem:[#allocation2 + $0x18] sm:$0xe]  ;;  %v3014_v30 = vld [vmem:[#allocation2 + $0x54] sm:$0xf] }
 0x1cd   : > { %5032 = vmatmul.mubr.msk.bf16.gmra.mrb[4].mxu1 %vm2600_vm14, %v2562_v1  ;;  %1774 = vrot.lane.b32.xlu0 %v1713_v60, %s5623_s26  ;;  %v6643_v1 = vld [vmem:[#allocation2 + $0x20] ss:$0 sps:$4 sm:$0x11]   ;;  %v6648_v60 = vld [vmem:[%s7320_s3 + $0x18] sm:$0xff]   ;;  %v1873_v6 = vrot.slane %v4654_v58, 1  ;;  %v3201_v0 = vrot.slane %v3199_v40, 1  ;;  %v1878_v38 = vsel %vm1830_vm10, %v1876_v8, %v1877_v19  ;;  %v4775_v19 = vcombine.low %v3052_v5, %v6594_v35 }
 0x1ce   : > { %v3214_v50 = vor.u32 %v3213_v55, %v3209_v12  ;;  %v3197_v58 = vshrl.u32 %v6614_v44, 16  ;;  %v3235_v40 = vshll.u32 %v6637_v41, 16  ;;  %5062 = vmatpush3.bf16.msra.mxu1 %v2840_v23  ;;  %v3218_v7 = vrot.slane %v3216_v13, 1 }
 0x1cf   : > { %1905 = vrot.lane.b32.xlu1 %v1872_v2, %s5622_s24  ;;  %v3008_v2 = vld [vmem:[#allocation2 + $0x30] sm:$0xf]  ;;  %v3204_v9 = vshll.u32 %v6643_v1, 16  ;;  %5095 = vmatprep.subr.bf16.mxu1 %v6648_v60  ;;  %v1875_v21 = vsel %vm1830_vm10, %v1873_v6, %v1874_v62  ;;  %v3472_v8 = vrot.slane %v6622_v10, 1  ;;  %v3471_v13 = vrot.slane %v4776_v28, 1 }
 0x1d0   : > { %v6655_v32 = vcombine.low %v3008_v2, %v6639_v11  ;;  %v3219_v10 = vsel %vm1557_vm11, %v3214_v50, %v3218_v7  ;;  %v3237_v62 = vrot.slane %v3235_v40, 1  ;;  %v6688_v28 = vld [vmem:[#allocation2 + $0x38] ss:$0 sps:$4 sm:$0x11]   ;;  %v3469_v50 = vrot.slane %v6643_v1, 1 }
 0x1d1   : > { %1903 = vrot.lane.b32.xlu0 %v1869_v42, %s5622_s24  ;;  %v2374_v56 = vpop.permute.xlu1 %2373  ;;  %v6663_v42 = vld [vmem:[#allocation2 + $0x58] sm:$0xf]  ;;  %v3473_v1 = vsel %vm1830_vm10, %v3471_v13, %v3472_v8 }
 0x1d2   : > { %v6677_v23 = vcombine.low %v3014_v30, %v6663_v42  ;;  %v2534_v35 = vsel %vm1911_vm12, %v6128_v20, %v2374_v56  ;;  %v3240_v20 = vshll.u32 %v6671_v43, 16  ;;  %v3012_v56 = vld [vmem:[#allocation2 + $0x48] sm:$0xf]  ;;  %v6703_v30 = vld [vmem:[#allocation2 + $0x5c] ss:$0 sps:$4 sm:$0x11]  }
 0x1d3   : > { %1780 = vrot.lane.b32.xlu1 %v1749_v48, %s5623_s26  ;;  %v3202_v48 = vor.u32 %v3201_v0, %v3197_v58  ;;  %v6684_v0 = vld [vmem:[#allocation2 + $0x4c] sm:$0xf]  ;;  %v3233_v58 = vshrl.u32 %v6637_v41, 16 }
 0x1d4   : > { %7341 = vst [vmem:[#allocation6_spill] sm:$0xff] %v6677_v23  ;;  %v3259_v5 = vshll.u32 %v6677_v23, 16 }
 0x1d5   : > { %v2372_v27 = vpop.permute.xlu0 %2371  ;;  %1778 = vrot.lane.b32.xlu0 %v1737_v51, %s5623_s26  ;;  %v3223_v51 = vshll.u32 %v6655_v32, 16 }
 0x1d6   : > { %v2532_v12 = vsel %vm1911_vm12, %v6135_v49, %v2372_v27  ;;  %v3206_v49 = vrot.slane %v3204_v9, 1  ;;  %v3055_v9 = vld [vmem:[#allocation2 + $0x3c] sm:$0xe] }
 0x1d7   : > { %1909 = vrot.lane.b32.xlu1 %v1878_v38, %s5622_s24  ;;  %v2502_v55 = vpop.permute.xlu1 %2501  ;;  %v3468_v38 = vrot.slane %v4775_v19, 1  ;;  %v3225_v7 = vrot.slane %v3223_v51, 1  ;;  %v3238_v19 = vor.u32 %v3237_v62, %v3233_v58  ;;  %v6708_v51 = vld [vmem:[#allocation2 + $0x70] sm:$0xf]  ;;  %v3261_v62 = vrot.slane %v3259_v5, 1 }
 0x1d8   : > { %v2566_v27 = vsel %vm481_vm0, %v2534_v35, %v2502_v55  ;;  %v3207_v40 = vsel %vm1557_vm11, %v3202_v48, %v3206_v49  ;;  %v4778_v55 = vcombine.low %v3055_v9, %v6628_v39  ;;  %v3221_v48 = vshrl.u32 %v6655_v32, 16  ;;  %v3018_v49 = vld [vmem:[#allocation2 + $0x6c] sm:$0xf]  ;;  %v6724_v9 = vld [vmem:[#allocation2 + $0x50] ss:$0 sps:$4 sm:$0x11]  }
 0x1d9   : > { %v2500_v2 = vpop.permute.xlu0 %2499  ;;  %1907 = vrot.lane.b32.xlu0 %v1875_v21, %s5622_s24  ;;  %v6698_v21 = vcombine.low %v3012_v56, %v6684_v0  ;;  %v3478_v56 = vrot.slane %v6671_v43, 1 }
 0x1da   : > { %v2564_v6 = vsel %vm481_vm0, %v2532_v12, %v2500_v2  ;;  %v3228_v12 = vshll.u32 %v6688_v28, 16  ;;  %v3054_v2 = vld [vmem:[#allocation2 + $0x30] sm:$0xe]  ;;  %v3226_v8 = vor.u32 %v3225_v7, %v3221_v48  ;;  %v3477_v58 = vrot.slane %v4778_v55, 1 }
 0x1db   : > { %3390 = vrot.lane.b32.xlu1 %v3219_v10, %s5623_s26  ;;  %5035 = vmatprep.mubr.msk.bf16.mxu1 %vm2600_vm14, %v2564_v6  ;;  %7342 = vst [vmem:[#allocation7_spill] sm:$0xff] %v6698_v21  ;;  %v3242_v10 = vrot.slane %v3240_v20, 1  ;;  %v4777_v35 = vcombine.low %v3054_v2, %v6639_v11  ;;  %v3470_v6 = vsel %vm1830_vm10, %v3468_v38, %v3469_v50  ;;  %v3247_v39 = vshll.u32 %v6698_v21, 16  ;;  %v6719_v11 = vld [vmem:[#allocation2 + $0x64] sm:$0xf] }
 0x1dc   : > { %5036 = vmatmul.mubr.msk.bf16.gmra.mrb[8].mxu1 %vm2600_vm14, %v2566_v27  ;;  %v6717_v20 = vcombine.low %v3018_v49, %v6708_v51  ;;  %v3230_v38 = vrot.slane %v3228_v12, 1  ;;  %v3257_v50 = vshrl.u32 %v6677_v23, 16  ;;  %v3264_v7 = vshll.u32 %v6703_v30, 16  ;;  %v3056_v49 = vld [vmem:[#allocation2 + $0x48] sm:$0xe] }
 0x1dd   : > { %3388 = vrot.lane.b32.xlu0 %v3207_v40, %s5623_s26  ;;  %v3243_v27 = vsel %vm1557_vm11, %v3238_v19, %v3242_v10  ;;  %v3057_v40 = vld [vmem:[#allocation2 + $0x54] sm:$0xe]  ;;  %v3474_v5 = vrot.slane %v4777_v35, 1  ;;  %v3016_v19 = vld [vmem:[#allocation2 + $0x60] sm:$0xf]  ;;  %v3249_v10 = vrot.slane %v3247_v39, 1  ;;  %v3479_v12 = vsel %vm1830_vm10, %v3477_v58, %v3478_v56 }
 0x1de   : > { %v4780_v43 = vcombine.low %v3057_v40, %v6663_v42  ;;  %v3231_v55 = vsel %vm1557_vm11, %v3226_v8, %v3230_v38  ;;  %v3262_v2 = vor.u32 %v3261_v62, %v3257_v50  ;;  %v3283_v35 = vshll.u32 %v6717_v20, 16  ;;  %v6738_v62 = vld [vmem:[#allocation2 + $0x88] sm:$0xf]  ;;  %v5502_v56 = vld [vmem:[#allocation2 + $0x74] ss:$0 sps:$4 sm:$0x11]  }
 0x1df   : > { %3518 = vrot.lane.b32.xlu1 %v3473_v1, %s5622_s24  ;;  %v3475_v1 = vrot.slane %v6688_v28, 1  ;;  %v3266_v42 = vrot.slane %v3264_v7, 1  ;;  %v3252_v8 = vshll.u32 %v6724_v9, 16  ;;  %v3484_v38 = vrot.slane %v6703_v30, 1 }
 0x1e0   : > { %v2378_v13 = vpop.permute.xlu1 %2377  ;;  %v3483_v40 = vrot.slane %v4780_v43, 1  ;;  %v4779_v58 = vcombine.low %v3056_v49, %v6684_v0  ;;  %v3285_v30 = vrot.slane %v3283_v35, 1  ;;  %v6756_v43 = vld [vmem:[#allocation2 + $0x7c] sm:$0xf]  ;;  %v3288_v49 = vshll.u32 %v5502_v56, 16 }
 0x1e1   : > { %3516 = vrot.lane.b32.xlu0 %v3470_v6, %s5622_s24  ;;  %v6730_v6 = vcombine.low %v3016_v19, %v6719_v11  ;;  %v3476_v39 = vsel %vm1830_vm10, %v3474_v5, %v3475_v1  ;;  %v3267_v7 = vsel %vm1557_vm11, %v3262_v2, %v3266_v42  ;;  %v2538_v5 = vsel %vm1911_vm12, %v6186_v53, %v2378_v13  ;;  %v3059_v1 = vld [vmem:[#allocation2 + $0x6c] sm:$0xe] }
 0x1e2   : > { %v3254_v2 = vrot.slane %v3252_v8, 1  ;;  %v4782_v53 = vcombine.low %v3059_v1, %v6708_v51  ;;  %v3481_v13 = vrot.slane %v6724_v9, 1  ;;  %v3485_v51 = vsel %vm1830_vm10, %v3483_v40, %v3484_v38  ;;  %v6780_v40 = vld [vmem:[#allocation2 + $0x80] ss:$0 sps:$4 sm:$0x11]  }
 0x1e3   : > { %3394 = vrot.lane.b32.xlu1 %v3243_v27, %s5623_s26  ;;  %v3245_v27 = vshrl.u32 %v6698_v21, 16  ;;  %v3271_v23 = vshll.u32 %v6730_v6, 16  ;;  %v3022_v21 = vld [vmem:[#allocation2 + $0x84] sm:$0xf] }
 0x1e5   : > { %v2376_v48 = vpop.permute.xlu0 %2375  ;;  %3392 = vrot.lane.b32.xlu0 %v3231_v55, %s5623_s26  ;;  %v2506_v28 = vpop.permute.xlu1 %2505  ;;  %v3250_v55 = vor.u32 %v3249_v10, %v3245_v27  ;;  %v3281_v10 = vshrl.u32 %v6717_v20, 16  ;;  %v3480_v27 = vrot.slane %v4779_v58, 1  ;;  %v3269_v58 = vshrl.u32 %v6730_v6, 16 }
 0x1e6   : > { %v2536_v50 = vsel %vm1911_vm12, %v6198_v45, %v2376_v48  ;;  %v6754_v45 = vcombine.low %v3022_v21, %v6738_v62  ;;  %v2570_v48 = vsel %vm481_vm0, %v2538_v5, %v2506_v28  ;;  %v3020_v21 = vld [vmem:[#allocation2 + $0x78] sm:$0xf]  ;;  %v3273_v28 = vrot.slane %v3271_v23, 1 }
 0x1e7   : > { %3522 = vrot.lane.b32.xlu1 %v3479_v12, %s5622_s24  ;;  %v6746_v12 = vld [vmem:[#allocation2 + $0x68] ss:$0 sps:$4 sm:$0x11]   ;;  %v3255_v35 = vsel %vm1557_vm11, %v3250_v55, %v3254_v2  ;;  %v6767_v8 = vcombine.low %v3020_v21, %v6756_v43  ;;  %v3489_v23 = vrot.slane %v4782_v53, 1  ;;  %v3490_v55 = vrot.slane %v5502_v56, 1 }
 0x1e8   : > { %7343 = vst [vmem:[#allocation8_spill] sm:$0xff] %v6754_v45  ;;  %v3276_v9 = vshll.u32 %v6746_v12, 16  ;;  %v3482_v38 = vsel %vm1830_vm10, %v3480_v27, %v3481_v13  ;;  %v3274_v2 = vor.u32 %v3273_v28, %v3269_v58  ;;  %v3026_v21 = vld [vmem:[#allocation2 + $0x9c] sm:$0xf]  ;;  %v3487_v28 = vrot.slane %v6746_v12, 1 }
 0x1e9   : > { %v2504_v19 = vpop.permute.xlu0 %2503  ;;  %3520 = vrot.lane.b32.xlu0 %v3476_v39, %s5622_s24  ;;  %v3058_v39 = vld [vmem:[#allocation2 + $0x60] sm:$0xe]  ;;  %v3491_v13 = vsel %vm1830_vm10, %v3489_v23, %v3490_v55  ;;  %v3024_v58 = vld [vmem:[#allocation2 + $0x90] sm:$0xf] }
 0x1ea   : > { %v2568_v0 = vsel %vm481_vm0, %v2536_v50, %v2504_v19  ;;  %v3286_v50 = vor.u32 %v3285_v30, %v3281_v10  ;;  %v6772_v19 = vld [vmem:[#allocation2 + $0x8c] ss:$0 sps:$4 sm:$0x11]   ;;  %v4781_v5 = vcombine.low %v3058_v39, %v6719_v11  ;;  %v3295_v10 = vshll.u32 %v6767_v8, 16  ;;  %v3061_v39 = vld [vmem:[#allocation2 + $0x84] sm:$0xe] }
 0x1eb   : > { %3398 = vrot.lane.b32.xlu1 %v3267_v7, %s5623_s26  ;;  %5039 = vmatprep.mubr.msk.bf16.mxu1 %vm2600_vm14, %v2568_v0  ;;  %v3307_v7 = vshll.u32 %v6754_v45, 16  ;;  %v6778_v0 = vld [vmem:[#allocation2 + $0xa0] sm:$0xf]  ;;  %v3278_v11 = vrot.slane %v3276_v9, 1  ;;  %v3305_v9 = vshrl.u32 %v6754_v45, 16 }
 0x1ec   : > { %5040 = vmatmul.mubr.msk.bf16.gmra.mrb[12].mxu1 %vm2600_vm14, %v2570_v48  ;;  %v3290_v48 = vrot.slane %v3288_v49, 1  ;;  %v6789_v49 = vcombine.low %v3026_v21, %v6778_v0  ;;  %v3486_v27 = vrot.slane %v4781_v5, 1  ;;  %v3297_v21 = vrot.slane %v3295_v10, 1  ;;  %v6819_v10 = vld [vmem:[#allocation2 + $0xb8] sm:$0xf] }
 0x1ed   : > { %v2382_v42 = vpop.permute.xlu1 %2381  ;;  %3396 = vrot.lane.b32.xlu0 %v3255_v35, %s5623_s26  ;;  %v6784_v35 = vld [vmem:[#allocation2 + $0x94] sm:$0xf]  ;;  %v3309_v53 = vrot.slane %v3307_v7, 1  ;;  %v4784_v7 = vcombine.low %v3061_v39, %v6738_v62  ;;  %v3279_v12 = vsel %vm1557_vm11, %v3274_v2, %v3278_v11  ;;  %v6810_v39 = vld [vmem:[#allocation2 + $0xa4] ss:$0 sps:$4 sm:$0x11]  }
 0x1ee   : > { %v3291_v56 = vsel %vm1557_vm11, %v3286_v50, %v3290_v48  ;;  %v6800_v48 = vcombine.low %v3024_v58, %v6784_v35  ;;  %v2542_v23 = vsel %vm1911_vm12, %v6231_v16, %v2382_v42  ;;  %v3331_v16 = vshll.u32 %v6789_v49, 16  ;;  %v3063_v45 = vld [vmem:[#allocation2 + $0x9c] sm:$0xe] }
 0x1ef   : > { %3526 = vrot.lane.b32.xlu1 %v3485_v51, %s5622_s24  ;;  %v2380_v1 = vpop.permute.xlu0 %2379  ;;  %v3312_v51 = vshll.u32 %v6772_v19, 16  ;;  %v3310_v62 = vor.u32 %v3309_v53, %v3305_v9  ;;  %v3293_v42 = vshrl.u32 %v6767_v8, 16  ;;  %v3495_v58 = vrot.slane %v4784_v7, 1 }
 0x1f0   : > { %v3488_v9 = vsel %vm1830_vm10, %v3486_v27, %v3487_v28  ;;  %v3329_v28 = vshrl.u32 %v6789_v49, 16  ;;  %v4786_v7 = vcombine.low %v3063_v45, %v6778_v0  ;;  %v3034_v0 = vld [vmem:[#allocation2 + $0xcc] sm:$0xf] }
 0x1f1   : > { %v2510_v30 = vpop.permute.xlu1 %2509  ;;  %3524 = vrot.lane.b32.xlu0 %v3482_v38, %s5622_s24  ;;  %v2540_v38 = vsel %vm1911_vm12, %v6245_v57, %v2380_v1  ;;  %v3300_v1 = vshll.u32 %v6780_v40, 16  ;;  %v3314_v53 = vrot.slane %v3312_v51, 1 }
 0x1f2   : > { %v2574_v57 = vsel %vm481_vm0, %v2542_v23, %v2510_v30  ;;  %v6817_v30 = vld [vmem:[#allocation2 + $0x98] ss:$0 sps:$4 sm:$0x11]  }
 0x1f3   : > { %3402 = vrot.lane.b32.xlu1 %v3291_v56, %s5623_s26  ;;  %v2508_v50 = vpop.permute.xlu0 %2507  ;;  %v3060_v56 = vld [vmem:[#allocation2 + $0x78] sm:$0xe] }
 0x1f4   : > { %v2572_v55 = vsel %vm481_vm0, %v2540_v38, %v2508_v50  ;;  %v4783_v2 = vcombine.low %v3060_v56, %v6756_v43  ;;  %v3496_v38 = vrot.slane %v6772_v19, 1  ;;  %v3319_v50 = vshll.u32 %v6800_v48, 16  ;;  %v6830_v19 = vld [vmem:[#allocation2 + $0xac] sm:$0xf] }
 0x1f5   : > { %v2386_v5 = vpop.permute.xlu1 %2385  ;;  %3400 = vrot.lane.b32.xlu0 %v3279_v12, %s5623_s26  ;;  %5043 = vmatprep.mubr.msk.bf16.mxu1 %vm2600_vm14, %v2572_v55  ;;  %v3298_v55 = vor.u32 %v3297_v21, %v3293_v42  ;;  %v3030_v12 = vld [vmem:[#allocation2 + $0xb4] sm:$0xf]  ;;  %v3315_v43 = vsel %vm1557_vm11, %v3310_v62, %v3314_v53  ;;  %v3302_v56 = vrot.slane %v3300_v1, 1  ;;  %v3324_v42 = vshll.u32 %v6817_v30, 16  ;;  %v3028_v53 = vld [vmem:[#allocation2 + $0xa8] sm:$0xf] }
 0x1f6   : > { %5044 = vmatmul.mubr.msk.bf16.gmra.mrb[16].mxu1 %vm2600_vm14, %v2574_v57  ;;  %v3333_v57 = vrot.slane %v3331_v16, 1  ;;  %v6828_v51 = vcombine.low %v3030_v12, %v6819_v10  ;;  %v3492_v27 = vrot.slane %v4783_v2, 1  ;;  %v3497_v1 = vsel %vm1830_vm10, %v3495_v58, %v3496_v38 }
 0x1f7   : > { %3530 = vrot.lane.b32.xlu1 %v3491_v13, %s5622_s24  ;;  %v2384_v11 = vpop.permute.xlu0 %2383  ;;  %v3493_v13 = vrot.slane %v6780_v40, 1  ;;  %v3336_v40 = vshll.u32 %v6810_v39, 16  ;;  %v3321_v16 = vrot.slane %v3319_v50, 1  ;;  %v3303_v12 = vsel %vm1557_vm11, %v3298_v55, %v3302_v56 }
 0x1f8   : > { %v2544_v21 = vsel %vm1911_vm12, %v6269_v22, %v2384_v11  ;;  %v6845_v45 = vcombine.low %v3028_v53, %v6830_v19  ;;  %v6847_v22 = vld [vmem:[#allocation2 + $0xd0] sm:$0xf]  ;;  %v3334_v58 = vor.u32 %v3333_v57, %v3329_v28  ;;  %v3355_v38 = vshll.u32 %v6828_v51, 16 }
 0x1f9   : > { %v2514_v23 = vpop.permute.xlu1 %2513  ;;  %3528 = vrot.lane.b32.xlu0 %v3488_v9, %s5622_s24  ;;  %v2546_v9 = vsel %vm1911_vm12, %v6265_v61, %v2386_v5  ;;  %v3317_v61 = vshrl.u32 %v6800_v48, 16  ;;  %v3062_v5 = vld [vmem:[#allocation2 + $0x90] sm:$0xe]  ;;  %v3501_v50 = vrot.slane %v4786_v7, 1  ;;  %v3502_v55 = vrot.slane %v6810_v39, 1 }
 0x1fa   : > { %v2578_v11 = vsel %vm481_vm0, %v2546_v9, %v2514_v23  ;;  %v4785_v56 = vcombine.low %v3062_v5, %v6784_v35  ;;  %v6858_v23 = vld [vmem:[#allocation2 + $0xbc] ss:$0 sps:$4 sm:$0x11]   ;;  %v6861_v57 = vcombine.low %v3034_v0, %v6847_v22  ;;  %v3494_v28 = vsel %vm1830_vm10, %v3492_v27, %v3493_v13  ;;  %v3032_v0 = vld [vmem:[#allocation2 + $0xc0] sm:$0xf] }
 0x1fb   : > { %3406 = vrot.lane.b32.xlu1 %v3315_v43, %s5623_s26  ;;  %v2512_v62 = vpop.permute.xlu0 %2511  ;;  %v3322_v53 = vor.u32 %v3321_v16, %v3317_v61  ;;  %v3326_v35 = vrot.slane %v3324_v42, 1  ;;  %v3357_v7 = vrot.slane %v3355_v38, 1  ;;  %v3499_v13 = vrot.slane %v6817_v30, 1  ;;  %v6879_v5 = vld [vmem:[#allocation2 + $0xd4] ss:$0 sps:$4 sm:$0x11]  }
 0x1fc   : > { %v2576_v2 = vsel %vm481_vm0, %v2544_v21, %v2512_v62  ;;  %v3338_v62 = vrot.slane %v3336_v40, 1  ;;  %v3503_v40 = vsel %vm1830_vm10, %v3501_v50, %v3502_v55  ;;  %v3498_v16 = vrot.slane %v4785_v56, 1 }
 0x1fd   : > { %v2390_v43 = vpop.permute.xlu1 %2389  ;;  %3404 = vrot.lane.b32.xlu0 %v3303_v12, %s5623_s26  ;;  %5047 = vmatprep.mubr.msk.bf16.mxu1 %vm2600_vm14, %v2576_v2  ;;  %v6864_v2 = vld [vmem:[#allocation2 + $0xb0] ss:$0 sps:$4 sm:$0x11]   ;;  %v6869_v12 = vld [vmem:[#allocation2 + $0xc4] sm:$0xf]  ;;  %v3360_v27 = vshll.u32 %v6858_v23, 16 }
 0x1fe   : > { %5048 = vmatmul.mubr.msk.bf16.gmra.mrb[20].mxu1 %vm2600_vm14, %v2578_v11  ;;  %v3339_v39 = vsel %vm1557_vm11, %v3334_v58, %v3338_v62  ;;  %v3327_v58 = vsel %vm1557_vm11, %v3322_v53, %v3326_v35  ;;  %v3353_v42 = vshrl.u32 %v6828_v51, 16  ;;  %v3379_v38 = vshll.u32 %v6861_v57, 16  ;;  %v3065_v62 = vld [vmem:[#allocation2 + $0xb4] sm:$0xe] }
 0x1ff   : > { %3534 = vrot.lane.b32.xlu1 %v3497_v1, %s5622_s24  ;;  %v2388_v21 = vpop.permute.xlu0 %2387  ;;  %v3343_v1 = vshll.u32 %v6845_v45, 16  ;;  %v2550_v50 = vsel %vm1911_vm12, %v6289_v26, %v2390_v43  ;;  %v4788_v53 = vcombine.low %v3065_v62, %v6819_v10  ;;  %v3341_v26 = vshrl.u32 %v6845_v45, 16 }
 0x200   : > { %v2548_v11 = vsel %vm1911_vm12, %v6292_v3, %v2388_v21  ;;  %v3358_v21 = vor.u32 %v3357_v7, %v3353_v42  ;;  %v3348_v43 = vshll.u32 %v6864_v2, 16  ;;  %v3384_v7 = vshll.u32 %v6879_v5, 16 }
 0x201   : > { %v2518_v9 = vpop.permute.xlu1 %2517  ;;  %3532 = vrot.lane.b32.xlu0 %v3494_v28, %s5622_s24  ;;  %v3345_v56 = vrot.slane %v3343_v1, 1  ;;  %v6886_v28 = vcombine.low %v3032_v0, %v6869_v12  ;;  %v3377_v0 = vshrl.u32 %v6861_v57, 16  ;;  %v3500_v10 = vsel %vm1830_vm10, %v3498_v16, %v3499_v13 }
 0x202   : > { %v2582_v3 = vsel %vm481_vm0, %v2550_v50, %v2518_v9  ;;  %v3362_v9 = vrot.slane %v3360_v27, 1  ;;  %v3350_v27 = vrot.slane %v3348_v43, 1  ;;  %v3505_v62 = vrot.slane %v6864_v2, 1 }
 0x203   : > { %3410 = vrot.lane.b32.xlu1 %v3339_v39, %s5623_s26  ;;  %v2516_v61 = vpop.permute.xlu0 %2515  ;;  %v3064_v39 = vld [vmem:[#allocation2 + $0xa8] sm:$0xe]  ;;  %v3367_v42 = vshll.u32 %v6886_v28, 16 }
 0x204   : > { %v2580_v30 = vsel %vm481_vm0, %v2548_v11, %v2516_v61  ;;  %v4787_v1 = vcombine.low %v3064_v39, %v6830_v19  ;;  %v3381_v11 = vrot.slane %v3379_v38, 1  ;;  %v3363_v50 = vsel %vm1557_vm11, %v3358_v21, %v3362_v9 }
 0x205   : > { %v2394_v55 = vpop.permute.xlu1 %2393  ;;  %3408 = vrot.lane.b32.xlu0 %v3327_v58, %s5623_s26  ;;  %5051 = vmatprep.mubr.msk.bf16.mxu1 %vm2600_vm14, %v2580_v30  ;;  %v3346_v58 = vor.u32 %v3345_v56, %v3341_v26  ;;  %v3507_v30 = vrot.slane %v4788_v53, 1  ;;  %v3508_v19 = vrot.slane %v6858_v23, 1  ;;  %v3386_v39 = vrot.slane %v3384_v7, 1  ;;  %v3066_v7 = vld [vmem:[#allocation2 + $0xc0] sm:$0xe] }
 0x206   : > { %5052 = vmatmul.mubr.msk.bf16.gmra.mrb[24].mxu1 %vm2600_vm14, %v2582_v3  ;;  %v3504_v38 = vrot.slane %v4787_v1, 1  ;;  %v5529_v3 = vld [vmem:[#allocation2 + $0xc8] ss:$0 sps:$4 sm:$0x11]   ;;  %v3382_v56 = vor.u32 %v3381_v11, %v3377_v0  ;;  %v2554_v21 = vsel %vm1911_vm12, %v6313_v46, %v2394_v55  ;;  %v3369_v1 = vrot.slane %v3367_v42, 1 }
 0x207   : > { %3538 = vrot.lane.b32.xlu1 %v3503_v40, %s5622_s24  ;;  %v2392_v35 = vpop.permute.xlu0 %2391  ;;  %v3067_v40 = vld [vmem:[#allocation2 + $0xcc] sm:$0xe]  ;;  %v3351_v53 = vsel %vm1557_vm11, %v3346_v58, %v3350_v27  ;;  %v3365_v46 = vshrl.u32 %v6886_v28, 16  ;;  %v3940_v55 = vld [vmem:[%s7322_s5] sm:$0xf]  ;;  %v3514_v11 = vrot.slane %v6879_v5, 1 }
 0x208   : > { %v2552_v16 = vsel %vm1911_vm12, %v6323_v59, %v2392_v35  ;;  %v4790_v26 = vcombine.low %v3067_v40, %v6847_v22  ;;  %v3509_v59 = vsel %vm1830_vm10, %v3507_v30, %v3508_v19  ;;  %v3372_v22 = vshll.u32 %v5529_v3, 16  ;;  %5330 = vmatprep.subr.msk.bf16.mxu0 %vm2633_vm13, %v3940_v55 }
 0x209   : > { %v2522_v61 = vpop.permute.xlu1 %2521  ;;  %3536 = vrot.lane.b32.xlu0 %v3500_v10, %s5622_s24  ;;  %v3387_v9 = vsel %vm1557_vm11, %v3382_v56, %v3386_v39  ;;  %v3997_v10 = vsel %vm2633_vm13, %v3940_v55, 0  ;;  %v3370_v42 = vor.u32 %v3369_v1, %v3365_v46  ;;  %v4789_v40 = vcombine.low %v3066_v7, %v6869_v12  ;;  %v5533_v56 = vld [vmem:[%s7320_s3 + $0x20] ss:$0 sps:$4 sm:$0xff]  }
 0x20a   : > { %v2586_v2 = vsel %vm481_vm0, %v2554_v21, %v2522_v61  ;;  %v3513_v0 = vrot.slane %v4790_v26, 1  ;;  %v3506_v61 = vsel %vm1830_vm10, %v3504_v38, %v3505_v62  ;;  %5132 = vmatpush3.bf16.msra.mxu0 %v3997_v10  ;;  %v3511_v27 = vrot.slane %v5529_v3, 1 }
 0x20b   : > { %3414 = vrot.lane.b32.xlu1 %v3363_v50, %s5623_s26  ;;  %v2520_v13 = vpop.permute.xlu0 %2519  ;;  %v3374_v50 = vrot.slane %v3372_v22, 1  ;;  %v3658_v26 = vsel %vm2633_vm13, %v5533_v56, 0 }
 0x20c   : > { %v2584_v23 = vsel %vm481_vm0, %v2552_v16, %v2520_v13  ;;  %v3515_v19 = vsel %vm1830_vm10, %v3513_v0, %v3514_v11  ;;  %v3510_v13 = vrot.slane %v4789_v40, 1 }
 0x20d   : > { %v1753_v43 = vpop.permute.xlu1 %1752  ;;  %3412 = vrot.lane.b32.xlu0 %v3351_v53, %s5623_s26  ;;  %5055 = vmatprep.mubr.msk.bf16.mxu1 %vm2600_vm14, %v2584_v23  ;;  %v3375_v12 = vsel %vm1557_vm11, %v3370_v42, %v3374_v50 }
 0x20e   : > { %5056 = vmatmul.mubr.msk.bf16.gmra.mrb[28].mxu1 %vm2600_vm14, %v2586_v2  ;;  %v1915_v38 = vsel %vm1911_vm12, %v6342_v47, %v1753_v43 }
 0x20f   : > { %3542 = vrot.lane.b32.xlu1 %v3509_v59, %s5622_s24  ;;  %v1751_v35 = vpop.permute.xlu0 %1750 }
 0x210   : > { %v1913_v5 = vsel %vm1911_vm12, %v6345_v36, %v1751_v35  ;;  %v3512_v36 = vsel %vm1830_vm10, %v3510_v13, %v3511_v27 }
 0x211   : > { %v1882_v58 = vpop.permute.xlu1 %1881  ;;  %3540 = vrot.lane.b32.xlu0 %v3506_v61, %s5622_s24 }
 0x212   : > { %v1947_v39 = vsel %vm481_vm0, %v1915_v38, %v1882_v58 }
 0x213   : > { %3418 = vrot.lane.b32.xlu1 %v3387_v9, %s5623_s26  ;;  %v1880_v30 = vpop.permute.xlu0 %1879 }
 0x214   : > { %v1945_v62 = vsel %vm481_vm0, %v1913_v5, %v1880_v30 }
 0x215   : > { %v1757_v16 = vpop.permute.xlu1 %1756  ;;  %3416 = vrot.lane.b32.xlu0 %v3375_v12, %s5623_s26  ;;  %5063 = vmatprep.mubr.msk.bf16.mxu1 %vm2600_vm14, %v1945_v62 }
 0x216   : > { %5064 = vmatmul.mubr.msk.bf16.vlgmr.msra.gmra.mrb[0].mxu1 %vm2600_vm14, %v1947_v39  ;;  %v1919_v53 = vsel %vm1911_vm12, %v6366_v29, %v1757_v16 }
 0x217   : > { %3546 = vrot.lane.b32.xlu1 %v3515_v19, %s5622_s24  ;;  %5096 = vmatpush3.bf16.msra.mxu1 %v6648_v60  ;;  %v1755_v47 = vpop.permute.xlu0 %1754 }
 0x218   : > { %5329 = vmatprep.subr.msk.bf16.mxu1 %vm2633_vm13, %v5533_v56  ;;  %v1917_v21 = vsel %vm1911_vm12, %v6377_v25, %v1755_v47 }
 0x219   : > { %v1886_v3 = vpop.permute.xlu1 %1885  ;;  %3544 = vrot.lane.b32.xlu0 %v3512_v36, %s5622_s24 }
 0x21a   : > { %v1951_v1 = vsel %vm481_vm0, %v1919_v53, %v1886_v3 }
 0x21b   : > { %v1884_v23 = vpop.permute.xlu0 %1883  ;;  %5098 = vmatpush3.bf16.msra.mxu1 %v3658_v26 }
 0x21c   : > { %v1949_v60 = vsel %vm481_vm0, %v1917_v21, %v1884_v23 }
 0x21d   : > { %v1761_v43 = vpop.permute.xlu1 %1760  ;;  %5067 = vmatprep.mubr.msk.bf16.mxu1 %vm2600_vm14, %v1949_v60 }
 0x21e   : > { %5068 = vmatmul.mubr.msk.bf16.gmra.mrb[4].mxu1 %vm2600_vm14, %v1951_v1  ;;  %v1923_v22 = vsel %vm1911_vm12, %v6392_v14, %v1761_v43 }
 0x21f   : > { %v1759_v2 = vpop.permute.xlu0 %1758 }
 0x220   : > { %v1921_v46 = vsel %vm1911_vm12, %v6401_v17, %v1759_v2 }
 0x221   : > { %v1890_v59 = vpop.permute.xlu1 %1889 }
 0x222   : > { %v1955_v35 = vsel %vm481_vm0, %v1923_v22, %v1890_v59 }
 0x223   : > { %v1888_v25 = vpop.permute.xlu0 %1887 }
 0x224   : > { %v1953_v29 = vsel %vm481_vm0, %v1921_v46, %v1888_v25 }
 0x225   : > { %v1765_v55 = vpop.permute.xlu1 %1764  ;;  %5071 = vmatprep.mubr.msk.bf16.mxu1 %vm2600_vm14, %v1953_v29 }
 0x226   : > { %5072 = vmatmul.mubr.msk.bf16.gmra.mrb[8].mxu1 %vm2600_vm14, %v1955_v35  ;;  %v1927_v17 = vsel %vm1911_vm12, %v6419_v34, %v1765_v55 }
 0x227   : > { %v1763_v9 = vpop.permute.xlu0 %1762 }
 0x228   : > { %v1925_v11 = vsel %vm1911_vm12, %v6430_v31, %v1763_v9 }
 0x229   : > { %v1894_v0 = vpop.permute.xlu1 %1893 }
 0x22a   : > { %v1959_v61 = vsel %vm481_vm0, %v1927_v17, %v1894_v0 }
 0x22b   : > { %v1892_v7 = vpop.permute.xlu0 %1891 }
 0x22c   : > { %v1957_v14 = vsel %vm481_vm0, %v1925_v11, %v1892_v7 }
 0x22d   : > { %v1769_v10 = vpop.permute.xlu1 %1768  ;;  %5075 = vmatprep.mubr.msk.bf16.mxu1 %vm2600_vm14, %v1957_v14  ;;  %v7344_v14 = vld [vmem:[#allocation7_spill] sm:$0xff] }
 0x22e   : > { %5076 = vmatmul.mubr.msk.bf16.gmra.mrb[12].mxu1 %vm2600_vm14, %v1959_v61  ;;  %v1931_v31 = vsel %vm1911_vm12, %v6448_v4, %v1769_v10 }
 0x22f   : > { %v1767_v58 = vpop.permute.xlu0 %1766 }
 0x230   : > { %v1929_v40 = vsel %vm1911_vm12, %v6460_v33, %v1767_v58 }
 0x231   : > { %v1898_v42 = vpop.permute.xlu1 %1897 }
 0x232   : > { %v1963_v30 = vsel %vm481_vm0, %v1931_v31, %v1898_v42 }
 0x233   : > { %v1896_v50 = vpop.permute.xlu0 %1895 }
 0x234   : > { %v1961_v34 = vsel %vm481_vm0, %v1929_v40, %v1896_v50 }
 0x235   : > { %v1773_v5 = vpop.permute.xlu1 %1772  ;;  %5079 = vmatprep.mubr.msk.bf16.mxu1 %vm2600_vm14, %v1961_v34 }
 0x236   : > { %5080 = vmatmul.mubr.msk.bf16.gmra.mrb[16].mxu1 %vm2600_vm14, %v1963_v30  ;;  %v1935_v33 = vsel %vm1911_vm12, %v6483_v15, %v1773_v5 }
 0x237   : > { %v1771_v19 = vpop.permute.xlu0 %1770 }
 0x238   : > { %v1933_v38 = vsel %vm1911_vm12, %v6498_v24, %v1771_v19 }
 0x239   : > { %v1902_v27 = vpop.permute.xlu1 %1901 }
 0x23a   : > { %v1967_v16 = vsel %vm481_vm0, %v1935_v33, %v1902_v27 }
 0x23b   : > { %v1900_v62 = vpop.permute.xlu0 %1899 }
 0x23c   : > { %v1965_v4 = vsel %vm481_vm0, %v1933_v38, %v1900_v62 }
 0x23d   : > { %v1777_v12 = vpop.permute.xlu1 %1776  ;;  %5083 = vmatprep.mubr.msk.bf16.mxu1 %vm2600_vm14, %v1965_v4 }
 0x23e   : > { %5084 = vmatmul.mubr.msk.bf16.gmra.mrb[20].mxu1 %vm2600_vm14, %v1967_v16  ;;  %v1939_v24 = vsel %vm1911_vm12, %v6524_v52, %v1777_v12 }
 0x23f   : > { %v1775_v13 = vpop.permute.xlu0 %1774 }
 0x240   : > { %v1937_v39 = vsel %vm1911_vm12, %v6542_v63, %v1775_v13 }
 0x241   : > { %v1906_v56 = vpop.permute.xlu1 %1905 }
 0x242   : > { %v1971_v3 = vsel %vm481_vm0, %v1939_v24, %v1906_v56 }
 0x243   : > { %v1904_v47 = vpop.permute.xlu0 %1903 }
 0x244   : > { %v1969_v15 = vsel %vm481_vm0, %v1937_v39, %v1904_v47 }
 0x245   : > { %v1781_v36 = vpop.permute.xlu1 %1780  ;;  %5087 = vmatprep.mubr.msk.bf16.mxu1 %vm2600_vm14, %v1969_v15 }
 0x246   : > { %5088 = vmatmul.mubr.msk.bf16.gmra.mrb[24].mxu1 %vm2600_vm14, %v1971_v3  ;;  %v1943_v63 = vsel %vm1911_vm12, %v6565_v18, %v1781_v36 }
 0x247   : > { %v1779_v26 = vpop.permute.xlu0 %1778 }
 0x248   : > { %v1941_v23 = vsel %vm1911_vm12, %v6578_v37, %v1779_v26 }
 0x249   : > { %v1910_v21 = vpop.permute.xlu1 %1909 }
 0x24a   : > { %v1975_v43 = vsel %vm481_vm0, %v1943_v63, %v1910_v21 }
 0x24b   : > { %v1908_v53 = vpop.permute.xlu0 %1907 }
 0x24c   : > { %v1973_v52 = vsel %vm481_vm0, %v1941_v23, %v1908_v53 }
 0x24d   : > { %v3391_v60 = vpop.permute.xlu1 %3390  ;;  %5091 = vmatprep.mubr.msk.bf16.mxu1 %vm2600_vm14, %v1973_v52 }
 0x24e   : > { %5092 = vmatmul.mubr.msk.bf16.gmra.mrb[28].mxu1 %vm2600_vm14, %v1975_v43  ;;  %v3551_v37 = vsel %vm1911_vm12, %v6603_v54, %v3391_v60 }
 0x24f   : > { %v3389_v1 = vpop.permute.xlu0 %3388 }
 0x250   : > { %v3549_v59 = vsel %vm1911_vm12, %v6614_v44, %v3389_v1 }
 0x251   : > { %v3519_v2 = vpop.permute.xlu1 %3518 }
 0x252   : > { %v3583_v22 = vsel %vm481_vm0, %v3551_v37, %v3519_v2  ;;  %v5534_v37 = vld [vmem:[%s7324_s7] sm:$0xff]  }
 0x253   : > { %v3517_v46 = vpop.permute.xlu0 %3516  ;;  %5165 = vmatprep.subr.bf16.mxu0 %v5534_v37 }
 0x254   : > { %v3581_v18 = vsel %vm481_vm0, %v3549_v59, %v3517_v46 }
 0x255   : > { %v3395_v25 = vpop.permute.xlu1 %3394  ;;  %5099 = vmatprep.mubr.msk.bf16.mxu1 %vm2600_vm14, %v3581_v18 }
 0x256   : > { %5100 = vmatmul.mubr.msk.bf16.vlgmr.msra.gmra.mrb[0].mxu1 %vm2600_vm14, %v3583_v22  ;;  %v3555_v44 = vsel %vm1911_vm12, %v6637_v41, %v3395_v25 }
 0x257   : > { %v3393_v29 = vpop.permute.xlu0 %3392 }
 0x258   : > { %v3553_v35 = vsel %vm1911_vm12, %v6655_v32, %v3393_v29  ;;  %v7345_v32 = vld [vmem:[#allocation6_spill] sm:$0xff] }
 0x259   : > { %v3523_v55 = vpop.permute.xlu1 %3522 }
 0x25a   : > { %v3587_v11 = vsel %vm481_vm0, %v3555_v44, %v3523_v55 }
 0x25b   : > { %v3521_v9 = vpop.permute.xlu0 %3520 }
 0x25c   : > { %v3585_v54 = vsel %vm481_vm0, %v3553_v35, %v3521_v9 }
 0x25d   : > { %v3399_v0 = vpop.permute.xlu1 %3398  ;;  %5103 = vmatprep.mubr.msk.bf16.mxu1 %vm2600_vm14, %v3585_v54 }
 0x25e   : > { %5104 = vmatmul.mubr.msk.bf16.gmra.mrb[4].mxu1 %vm2600_vm14, %v3587_v11  ;;  %v3559_v58 = vsel %vm1911_vm12, %v7345_v32, %v3399_v0 }
 0x25f   : > { %v3397_v7 = vpop.permute.xlu0 %3396 }
 0x260   : > { %v3557_v10 = vsel %vm1911_vm12, %v7344_v14, %v3397_v7 }
 0x261   : > { %v3527_v17 = vpop.permute.xlu1 %3526 }
 0x262   : > { %v3591_v40 = vsel %vm481_vm0, %v3559_v58, %v3527_v17 }
 0x263   : > { %v3525_v61 = vpop.permute.xlu0 %3524 }
 0x264   : > { %v3589_v41 = vsel %vm481_vm0, %v3557_v10, %v3525_v61 }
 0x265   : > { %v3403_v42 = vpop.permute.xlu1 %3402  ;;  %5107 = vmatprep.mubr.msk.bf16.mxu1 %vm2600_vm14, %v3589_v41 }
 0x266   : > { %5108 = vmatmul.mubr.msk.bf16.gmra.mrb[8].mxu1 %vm2600_vm14, %v3591_v40  ;;  %v3563_v30 = vsel %vm1911_vm12, %v6717_v20, %v3403_v42 }
 0x267   : > { %v3401_v50 = vpop.permute.xlu0 %3400 }
 0x268   : > { %v3561_v34 = vsel %vm1911_vm12, %v6730_v6, %v3401_v50  ;;  %v7346_v6 = vld [vmem:[#allocation8_spill] sm:$0xff] }
 0x269   : > { %v3531_v31 = vpop.permute.xlu1 %3530 }
 0x26a   : > { %v3595_v38 = vsel %vm481_vm0, %v3563_v30, %v3531_v31 }
 0x26b   : > { %v3529_v5 = vpop.permute.xlu0 %3528 }
 0x26c   : > { %v3593_v19 = vsel %vm481_vm0, %v3561_v34, %v3529_v5 }
 0x26d   : > { %v3407_v27 = vpop.permute.xlu1 %3406  ;;  %5111 = vmatprep.mubr.msk.bf16.mxu1 %vm2600_vm14, %v3593_v19 }
 0x26e   : > { %5112 = vmatmul.mubr.msk.bf16.gmra.mrb[12].mxu1 %vm2600_vm14, %v3595_v38  ;;  %v3567_v16 = vsel %vm1911_vm12, %v7346_v6, %v3407_v27 }
 0x26f   : > { %v3405_v62 = vpop.permute.xlu0 %3404 }
 0x270   : > { %v3565_v4 = vsel %vm1911_vm12, %v6767_v8, %v3405_v62 }
 0x271   : > { %v3535_v33 = vpop.permute.xlu1 %3534 }
 0x272   : > { %v3599_v56 = vsel %vm481_vm0, %v3567_v16, %v3535_v33 }
 0x273   : > { %v3533_v12 = vpop.permute.xlu0 %3532 }
 0x274   : > { %v3597_v20 = vsel %vm481_vm0, %v3565_v4, %v3533_v12 }
 0x275   : > { %v3411_v13 = vpop.permute.xlu1 %3410  ;;  %5115 = vmatprep.mubr.msk.bf16.mxu1 %vm2600_vm14, %v3597_v20 }
 0x276   : > { %5116 = vmatmul.mubr.msk.bf16.gmra.mrb[16].mxu1 %vm2600_vm14, %v3599_v56  ;;  %v3571_v8 = vsel %vm1911_vm12, %v6789_v49, %v3411_v13 }
 0x277   : > { %v3409_v39 = vpop.permute.xlu0 %3408 }
 0x278   : > { %v3569_v24 = vsel %vm1911_vm12, %v6800_v48, %v3409_v39 }
 0x279   : > { %v3539_v47 = vpop.permute.xlu1 %3538 }
 0x27a   : > { %v3603_v26 = vsel %vm481_vm0, %v3571_v8, %v3539_v47 }
 0x27b   : > { %v3537_v15 = vpop.permute.xlu0 %3536 }
 0x27c   : > { %v3601_v36 = vsel %vm481_vm0, %v3569_v24, %v3537_v15 }
 0x27d   : > { %v3415_v3 = vpop.permute.xlu1 %3414  ;;  %5119 = vmatprep.mubr.msk.bf16.mxu1 %vm2600_vm14, %v3601_v36 }
 0x27e   : > { %5120 = vmatmul.mubr.msk.bf16.gmra.mrb[20].mxu1 %vm2600_vm14, %v3603_v26  ;;  %v3575_v48 = vsel %vm1911_vm12, %v6828_v51, %v3415_v3 }
 0x27f   : > { %v3413_v21 = vpop.permute.xlu0 %3412 }
 0x280   : > { %v3573_v53 = vsel %vm1911_vm12, %v6845_v45, %v3413_v21 }
 0x281   : > { %v3543_v23 = vpop.permute.xlu1 %3542 }
 0x282   : > { %v3607_v60 = vsel %vm481_vm0, %v3575_v48, %v3543_v23 }
 0x283   : > { %v3541_v63 = vpop.permute.xlu0 %3540 }
 0x284   : > { %v3605_v49 = vsel %vm481_vm0, %v3573_v53, %v3541_v63 }
 0x285   : > { %v3419_v52 = vpop.permute.xlu1 %3418  ;;  %5123 = vmatprep.mubr.msk.bf16.mxu1 %vm2600_vm14, %v3605_v49 }
 0x286   : > { %5124 = vmatmul.mubr.msk.bf16.gmra.mrb[24].mxu1 %vm2600_vm14, %v3607_v60  ;;  %v3579_v1 = vsel %vm1911_vm12, %v6861_v57, %v3419_v52  ;;  %v7077_v57 = vld [vmem:[%s7321_s4] ss:$0 sm:$0xff] }
 0x287   : > { %v3417_v43 = vpop.permute.xlu0 %3416 }
 0x288   : > { %v3577_v45 = vsel %vm1911_vm12, %v6886_v28, %v3417_v43 }
 0x289   : > { %v3547_v2 = vpop.permute.xlu1 %3546 }
 0x28a   : > { %v3611_v46 = vsel %vm481_vm0, %v3579_v1, %v3547_v2 }
 0x28b   : > { %v3545_v59 = vpop.permute.xlu0 %3544 }
 0x28c   : > { %v3609_v51 = vsel %vm481_vm0, %v3577_v45, %v3545_v59 }
 0x28d   : > { %5127 = vmatprep.mubr.msk.bf16.mxu1 %vm2600_vm14, %v3609_v51 }
 0x28e   : > { %5128 = vmatmul.mubr.msk.bf16.gmra.mrb[28].mxu1 %vm2600_vm14, %v3611_v46 }
 0x329   : > { %v5101_v28 = vpop.f32.mrb[0].mxu1 }
 0x32a   : > { %v3862_v18 = vadd.f32 %v5101_v28, %v7077_v57  ;;  %v3694_v25 = vpop.f32.mrb[1].mxu1 }
 0x32b   : > { %v3860_v22 = vadd.f32 %v7077_v57, %v3694_v25  ;;  %v5102_v29 = vpop.f32.mrb[2].mxu1 }
 0x32c   : > { %v3863_v55 = vadd.f32 %v5102_v29, %v7077_v57  ;;  %v3697_v35 = vpop.f32.mrb[3].mxu1  ;;  %v3894_v44 = vmax.f32 %v3862_v18, 0.0 }
 0x32d   : > { %v3861_v9 = vadd.f32 %v7077_v57, %v3697_v35  ;;  %v3892_v0 = vmax.f32 %v3860_v22, 0.0 }
 0x32e   : > { %v3895_v54 = vmax.f32 %v3863_v55, 0.0 }
 0x32f   : > { %v3893_v11 = vmax.f32 %v3861_v9, 0.0 }
 0x330   : > { %v3925_v7 = vpack.c.bf16 %v3895_v54, %v3894_v44 }
 0x331   : > { %v3924_v17 = vpack.c.bf16 %v3893_v11, %v3892_v0  ;;  %v5105_v14 = vpop.f32.mrb[4].mxu1 }
 0x332   : > { %v3866_v10 = vadd.f32 %v5105_v14, %v7077_v57  ;;  %v3710_v61 = vpop.f32.mrb[5].mxu1 }
 0x333   : > { %v3864_v32 = vadd.f32 %v7077_v57, %v3710_v61  ;;  %v5106_v58 = vpop.f32.mrb[6].mxu1  ;;  %5133 = vmatprep.mubr.msk.bf16.mxu0 %vm1911_vm12, %v3924_v17 }
 0x334   : > { %v3867_v41 = vadd.f32 %v5106_v58, %v7077_v57  ;;  %v3713_v42 = vpop.f32.mrb[7].mxu1  ;;  %5134 = vmatmul.mubr.msk.bf16.vlgmr.msra.gmra.mrb[32].mxu0 %vm1911_vm12, %v3925_v7  ;;  %v3898_v50 = vmax.f32 %v3866_v10, 0.0 }
 0x335   : > { %v3865_v40 = vadd.f32 %v7077_v57, %v3713_v42  ;;  %5166 = vmatpush3.bf16.msra.mxu0 %v5534_v37  ;;  %v3896_v34 = vmax.f32 %v3864_v32, 0.0 }
 0x336   : > { %v3899_v31 = vmax.f32 %v3867_v41, 0.0 }
 0x337   : > { %v3897_v5 = vmax.f32 %v3865_v40, 0.0 }
 0x338   : > { %v3927_v30 = vpack.c.bf16 %v3899_v31, %v3898_v50 }
 0x339   : > { %v3926_v19 = vpack.c.bf16 %v3897_v5, %v3896_v34  ;;  %v5109_v27 = vpop.f32.mrb[8].mxu1 }
 0x33a   : > { %v3870_v38 = vadd.f32 %v5109_v27, %v7077_v57  ;;  %v3726_v62 = vpop.f32.mrb[9].mxu1 }
 0x33b   : > { %v3868_v33 = vadd.f32 %v7077_v57, %v3726_v62  ;;  %v5110_v4 = vpop.f32.mrb[10].mxu1  ;;  %5137 = vmatprep.mubr.msk.bf16.mxu0 %vm1911_vm12, %v3926_v19 }
 0x33c   : > { %v3871_v12 = vadd.f32 %v5110_v4, %v7077_v57  ;;  %v3729_v6 = vpop.f32.mrb[11].mxu1  ;;  %5138 = vmatmul.mubr.msk.bf16.gmra.mrb[36].mxu0 %vm1911_vm12, %v3927_v30  ;;  %v3902_v20 = vmax.f32 %v3870_v38, 0.0 }
 0x33d   : > { %v3869_v16 = vadd.f32 %v7077_v57, %v3729_v6  ;;  %v3900_v56 = vmax.f32 %v3868_v33, 0.0 }
 0x33e   : > { %v3903_v13 = vmax.f32 %v3871_v12, 0.0 }
 0x33f   : > { %v3901_v39 = vmax.f32 %v3869_v16, 0.0 }
 0x340   : > { %v3929_v47 = vpack.c.bf16 %v3903_v13, %v3902_v20 }
 0x341   : > { %v3928_v24 = vpack.c.bf16 %v3901_v39, %v3900_v56  ;;  %v5113_v15 = vpop.f32.mrb[12].mxu1 }
 0x342   : > { %v3874_v8 = vadd.f32 %v5113_v15, %v7077_v57  ;;  %v3742_v36 = vpop.f32.mrb[13].mxu1 }
 0x343   : > { %v3872_v3 = vadd.f32 %v7077_v57, %v3742_v36  ;;  %v5114_v26 = vpop.f32.mrb[14].mxu1  ;;  %5141 = vmatprep.mubr.msk.bf16.mxu0 %vm1911_vm12, %v3928_v24 }
 0x344   : > { %v3875_v21 = vadd.f32 %v5114_v26, %v7077_v57  ;;  %v3745_v23 = vpop.f32.mrb[15].mxu1  ;;  %5142 = vmatmul.mubr.msk.bf16.gmra.mrb[40].mxu0 %vm1911_vm12, %v3929_v47  ;;  %v3906_v63 = vmax.f32 %v3874_v8, 0.0 }
 0x345   : > { %v3873_v53 = vadd.f32 %v7077_v57, %v3745_v23  ;;  %v3904_v49 = vmax.f32 %v3872_v3, 0.0 }
 0x346   : > { %v3907_v48 = vmax.f32 %v3875_v21, 0.0 }
 0x347   : > { %v3905_v52 = vmax.f32 %v3873_v53, 0.0  ;;  %v5536_v53 = vld [vmem:[%s5760_s21] sm:$0xff]  }
 0x348   : > { %v3931_v60 = vpack.c.bf16 %v3907_v48, %v3906_v63  ;;  %v5537_v63 = vld [vmem:[%s5760_s21 + $0x8] sm:$0xff]   ;;  %v5539_v48 = vld [vmem:[%s5760_s21 + $0x18] sm:$0xff]  }
 0x349   : > { %v3930_v43 = vpack.c.bf16 %v3905_v52, %v3904_v49  ;;  %v5117_v1 = vpop.f32.mrb[16].mxu1  ;;  %v5540_v49 = vld [vmem:[%s5760_s21 + $0x20] sm:$0xff]   ;;  %v5541_v52 = vld [vmem:[%s5760_s21 + $0x28] sm:$0xff]  }
 0x34a   : > { %v3878_v2 = vadd.f32 %v5117_v1, %v7077_v57  ;;  %v3758_v45 = vpop.f32.mrb[17].mxu1  ;;  %v5544_v1 = vld [vmem:[%s5760_s21 + $0x40] sm:$0xff]  }
 0x34b   : > { %v3876_v59 = vadd.f32 %v7077_v57, %v3758_v45  ;;  %v5118_v51 = vpop.f32.mrb[18].mxu1  ;;  %5145 = vmatprep.mubr.msk.bf16.mxu0 %vm1911_vm12, %v3930_v43  ;;  %v5543_v43 = vld [vmem:[%s5760_s21 + $0x38] sm:$0xff]   ;;  %v5546_v45 = vld [vmem:[%s5760_s21 + $0x50] sm:$0xff]  }
 0x34c   : > { %v3879_v46 = vadd.f32 %v5118_v51, %v7077_v57  ;;  %v3761_v37 = vpop.f32.mrb[19].mxu1  ;;  %5146 = vmatmul.mubr.msk.bf16.gmra.mrb[44].mxu0 %vm1911_vm12, %v3931_v60  ;;  %v3910_v18 = vmax.f32 %v3878_v2, 0.0  ;;  %v5542_v60 = vld [vmem:[%s5760_s21 + $0x30] sm:$0xff]   ;;  %v5545_v2 = vld [vmem:[%s5760_s21 + $0x48] sm:$0xff]   ;;  %v5548_v51 = vld [vmem:[%s5760_s21 + $0x60] sm:$0xff]  }
 0x34d   : > { %v3877_v28 = vadd.f32 %v7077_v57, %v3761_v37  ;;  %v3908_v22 = vmax.f32 %v3876_v59, 0.0  ;;  %v5547_v59 = vld [vmem:[%s5760_s21 + $0x58] sm:$0xff]   ;;  %v5550_v37 = vld [vmem:[%s5760_s21 + $0x70] sm:$0xff]  }
 0x34e   : > { %v3911_v25 = vmax.f32 %v3879_v46, 0.0  ;;  %v5549_v46 = vld [vmem:[%s5760_s21 + $0x68] sm:$0xff]  }
 0x34f   : > { %v3909_v29 = vmax.f32 %v3877_v28, 0.0  ;;  %v5551_v28 = vld [vmem:[%s5760_s21 + $0x78] sm:$0xff]  }
 0x350   : > { %v3933_v55 = vpack.c.bf16 %v3911_v25, %v3910_v18  ;;  %v7164_v18 = vld [vmem:[%s7323_s6] ss:$0 sm:$0xff] }
 0x351   : > { %v3932_v35 = vpack.c.bf16 %v3909_v29, %v3908_v22  ;;  %v5121_v9 = vpop.f32.mrb[20].mxu1  ;;  %v7169_v22 = vld [vmem:[%s7325_s8] ss:$0 sm:$0xff] }
 0x352   : > { %v3882_v44 = vadd.f32 %v5121_v9, %v7077_v57  ;;  %v3774_v54 = vpop.f32.mrb[21].mxu1 }
 0x353   : > { %v3880_v0 = vadd.f32 %v7077_v57, %v3774_v54  ;;  %v5122_v11 = vpop.f32.mrb[22].mxu1  ;;  %5149 = vmatprep.mubr.msk.bf16.mxu0 %vm1911_vm12, %v3932_v35 }
 0x354   : > { %v3883_v7 = vadd.f32 %v5122_v11, %v7077_v57  ;;  %v3777_v17 = vpop.f32.mrb[23].mxu1  ;;  %5150 = vmatmul.mubr.msk.bf16.gmra.mrb[48].mxu0 %vm1911_vm12, %v3933_v55  ;;  %v3914_v10 = vmax.f32 %v3882_v44, 0.0 }
 0x355   : > { %v3881_v14 = vadd.f32 %v7077_v57, %v3777_v17  ;;  %v3912_v32 = vmax.f32 %v3880_v0, 0.0 }
 0x356   : > { %v3915_v61 = vmax.f32 %v3883_v7, 0.0 }
 0x357   : > { %v3913_v58 = vmax.f32 %v3881_v14, 0.0 }
 0x358   : > { %v3935_v41 = vpack.c.bf16 %v3915_v61, %v3914_v10 }
 0x359   : > { %v3934_v42 = vpack.c.bf16 %v3913_v58, %v3912_v32  ;;  %v5125_v40 = vpop.f32.mrb[24].mxu1 }
 0x35a   : > { %v3886_v50 = vadd.f32 %v5125_v40, %v7077_v57  ;;  %v3790_v31 = vpop.f32.mrb[25].mxu1 }
 0x35b   : > { %v3884_v34 = vadd.f32 %v7077_v57, %v3790_v31  ;;  %v5126_v5 = vpop.f32.mrb[26].mxu1  ;;  %5153 = vmatprep.mubr.msk.bf16.mxu0 %vm1911_vm12, %v3934_v42 }
 0x35c   : > { %v3887_v30 = vadd.f32 %v5126_v5, %v7077_v57  ;;  %v3793_v19 = vpop.f32.mrb[27].mxu1  ;;  %5154 = vmatmul.mubr.msk.bf16.gmra.mrb[52].mxu0 %vm1911_vm12, %v3935_v41  ;;  %v3918_v38 = vmax.f32 %v3886_v50, 0.0 }
 0x35d   : > { %v3885_v27 = vadd.f32 %v7077_v57, %v3793_v19  ;;  %v3916_v33 = vmax.f32 %v3884_v34, 0.0 }
 0x35e   : > { %v3919_v62 = vmax.f32 %v3887_v30, 0.0 }
 0x35f   : > { %v3917_v4 = vmax.f32 %v3885_v27, 0.0 }
 0x360   : > { %v3937_v12 = vpack.c.bf16 %v3919_v62, %v3918_v38 }
 0x361   : > { %v3936_v6 = vpack.c.bf16 %v3917_v4, %v3916_v33  ;;  %v5129_v16 = vpop.f32.mrb[28].mxu1 }
 0x362   : > { %v3890_v20 = vadd.f32 %v5129_v16, %v7077_v57  ;;  %v3806_v13 = vpop.f32.mrb[29].mxu1 }
 0x363   : > { %v3888_v56 = vadd.f32 %v7077_v57, %v3806_v13  ;;  %v5130_v39 = vpop.f32.mrb[30].mxu1  ;;  %5157 = vmatprep.mubr.msk.bf16.mxu0 %vm1911_vm12, %v3936_v6 }
 0x364   : > { %v3891_v47 = vadd.f32 %v5130_v39, %v7077_v57  ;;  %v3809_v24 = vpop.f32.mrb[31].mxu1  ;;  %5158 = vmatmul.mubr.msk.bf16.gmra.mrb[56].mxu0 %vm1911_vm12, %v3937_v12  ;;  %v3922_v8 = vmax.f32 %v3890_v20, 0.0 }
 0x365   : > { %v3889_v15 = vadd.f32 %v7077_v57, %v3809_v24  ;;  %v3920_v3 = vmax.f32 %v3888_v56, 0.0  ;;  %v5538_v57 = vld [vmem:[%s5760_s21 + $0x10] sm:$0xff]  }
 0x366   : > { %v3923_v36 = vmax.f32 %v3891_v47, 0.0 }
 0x367   : > { %v3921_v26 = vmax.f32 %v3889_v15, 0.0 }
 0x368   : > { %v3939_v21 = vpack.c.bf16 %v3923_v36, %v3922_v8 }
 0x369   : > { %v3938_v23 = vpack.c.bf16 %v3921_v26, %v3920_v3 }
 0x36b   : > { %5161 = vmatprep.mubr.msk.bf16.mxu0 %vm1911_vm12, %v3938_v23 }
 0x36c   : > { %5162 = vmatmul.mubr.msk.bf16.gmra.mrb[60].mxu0 %vm1911_vm12, %v3939_v21 }
 0x36d   : > { %5167 = vmatprep.mubr.msk.bf16.mxu0 %vm481_vm0, %v5536_v53 }
 0x374   : > { %5168 = vmatmul.mubr.msk.bf16.vlgmr.msra.gmra.mrb[32].mxu0 %vm481_vm0, %v5537_v63 }
 0x375   : > { %5171 = vmatprep.mubr.msk.bf16.mxu0 %vm481_vm0, %v5538_v57 }
 0x37c   : > { %5172 = vmatmul.mubr.msk.bf16.gmra.mrb[36].mxu0 %vm481_vm0, %v5539_v48 }
 0x37d   : > { %5175 = vmatprep.mubr.msk.bf16.mxu0 %vm481_vm0, %v5540_v49 }
 0x384   : > { %5176 = vmatmul.mubr.msk.bf16.gmra.mrb[40].mxu0 %vm481_vm0, %v5541_v52 }
 0x385   : > { %5179 = vmatprep.mubr.msk.bf16.mxu0 %vm481_vm0, %v5542_v60 }
 0x38c   : > { %5180 = vmatmul.mubr.msk.bf16.gmra.mrb[44].mxu0 %vm481_vm0, %v5543_v43 }
 0x38d   : > { %5183 = vmatprep.mubr.msk.bf16.mxu0 %vm481_vm0, %v5544_v1 }
 0x394   : > { %5184 = vmatmul.mubr.msk.bf16.gmra.mrb[48].mxu0 %vm481_vm0, %v5545_v2 }
 0x395   : > { %5187 = vmatprep.mubr.msk.bf16.mxu0 %vm481_vm0, %v5546_v45 }
 0x39c   : > { %5188 = vmatmul.mubr.msk.bf16.gmra.mrb[52].mxu0 %vm481_vm0, %v5547_v59 }
 0x39d   : > { %5191 = vmatprep.mubr.msk.bf16.mxu0 %vm481_vm0, %v5548_v51 }
 0x3a4   : > { %5192 = vmatmul.mubr.msk.bf16.gmra.mrb[56].mxu0 %vm481_vm0, %v5549_v46 }
 0x3a5   : > { %5195 = vmatprep.mubr.msk.bf16.mxu0 %vm481_vm0, %v5550_v37 }
 0x3ac   : > { %5196 = vmatmul.mubr.msk.bf16.gmra.mrb[60].mxu0 %vm481_vm0, %v5551_v28 }
 0x447   : > { %v5169_v25 = vpop.f32.mrb[32].mxu0 }
 0x448   : > { %v5199_v29 = vadd.f32 %v5169_v25, %v7164_v18  ;;  %v4202_v55 = vpop.f32.mrb[33].mxu0 }
 0x449   : > { %v5200_v35 = vadd.f32 %v7164_v18, %v4202_v55  ;;  %v5170_v9 = vpop.f32.mrb[34].mxu0 }
 0x44a   : > { %v4370_v44 = vadd.f32 %v5199_v29, %v7169_v22  ;;  %v5201_v54 = vadd.f32 %v5170_v9, %v7164_v18  ;;  %v4205_v0 = vpop.f32.mrb[35].mxu0 }
 0x44b   : > { %v4368_v11 = vadd.f32 %v5200_v35, %v7169_v22  ;;  %v5202_v7 = vadd.f32 %v7164_v18, %v4205_v0 }
 0x44c   : > { %v4402_v17 = vmax.f32 %v4370_v44, 0.0  ;;  %v4371_v14 = vadd.f32 %v5201_v54, %v7169_v22 }
 0x44d   : > { %v4400_v10 = vmax.f32 %v4368_v11, 0.0  ;;  %v4369_v61 = vadd.f32 %v5202_v7, %v7169_v22 }
 0x44e   : > { %4435 = vst.msk [vmem:[%s7178_s12 + $0x10] sm:$0xff] %vm4432_vm15, %v4402_v17  ;;  %v4403_v32 = vmax.f32 %v4371_v14, 0.0 }
 0x44f   : > { %4433 = vst.msk [vmem:[%s7178_s12] sm:$0xff] %vm4432_vm15, %v4400_v10  ;;  %v4401_v58 = vmax.f32 %v4369_v61, 0.0  ;;  %v5173_v41 = vpop.f32.mrb[36].mxu0 }
 0x450   : > { %4436 = vst.msk [vmem:[%s7178_s12 + $0x18] sm:$0xff] %vm4432_vm15, %v4403_v32  ;;  %v5203_v42 = vadd.f32 %v5173_v41, %v7164_v18  ;;  %v4218_v40 = vpop.f32.mrb[37].mxu0 }
 0x451   : > { %4434 = vst.msk [vmem:[%s7178_s12 + $0x8] sm:$0xff] %vm4432_vm15, %v4401_v58  ;;  %v5204_v50 = vadd.f32 %v7164_v18, %v4218_v40  ;;  %v5174_v31 = vpop.f32.mrb[38].mxu0 }
 0x452   : > { %v4374_v34 = vadd.f32 %v5203_v42, %v7169_v22  ;;  %v5205_v5 = vadd.f32 %v5174_v31, %v7164_v18  ;;  %v4221_v30 = vpop.f32.mrb[39].mxu0 }
 0x453   : > { %v4372_v19 = vadd.f32 %v5204_v50, %v7169_v22  ;;  %v5206_v27 = vadd.f32 %v7164_v18, %v4221_v30 }
 0x454   : > { %v4406_v38 = vmax.f32 %v4374_v34, 0.0  ;;  %v4375_v62 = vadd.f32 %v5205_v5, %v7169_v22 }
 0x455   : > { %v4404_v33 = vmax.f32 %v4372_v19, 0.0  ;;  %v4373_v4 = vadd.f32 %v5206_v27, %v7169_v22 }
 0x456   : > { %4439 = vst.msk [vmem:[%s7178_s12 + $0x30] sm:$0xff] %vm4432_vm15, %v4406_v38  ;;  %v4407_v12 = vmax.f32 %v4375_v62, 0.0 }
 0x457   : > { %4437 = vst.msk [vmem:[%s7178_s12 + $0x20] sm:$0xff] %vm4432_vm15, %v4404_v33  ;;  %v4405_v6 = vmax.f32 %v4373_v4, 0.0  ;;  %v5177_v16 = vpop.f32.mrb[40].mxu0 }
 0x458   : > { %4440 = vst.msk [vmem:[%s7178_s12 + $0x38] sm:$0xff] %vm4432_vm15, %v4407_v12  ;;  %v5207_v20 = vadd.f32 %v5177_v16, %v7164_v18  ;;  %v4234_v13 = vpop.f32.mrb[41].mxu0 }
 0x459   : > { %4438 = vst.msk [vmem:[%s7178_s12 + $0x28] sm:$0xff] %vm4432_vm15, %v4405_v6  ;;  %v5208_v56 = vadd.f32 %v7164_v18, %v4234_v13  ;;  %v5178_v39 = vpop.f32.mrb[42].mxu0 }
 0x45a   : > { %v4378_v47 = vadd.f32 %v5207_v20, %v7169_v22  ;;  %v5209_v24 = vadd.f32 %v5178_v39, %v7164_v18  ;;  %v4237_v15 = vpop.f32.mrb[43].mxu0 }
 0x45b   : > { %v4376_v8 = vadd.f32 %v5208_v56, %v7169_v22  ;;  %v5210_v36 = vadd.f32 %v7164_v18, %v4237_v15 }
 0x45c   : > { %v4410_v3 = vmax.f32 %v4378_v47, 0.0  ;;  %v4379_v26 = vadd.f32 %v5209_v24, %v7169_v22 }
 0x45d   : > { %v4408_v21 = vmax.f32 %v4376_v8, 0.0  ;;  %v4377_v23 = vadd.f32 %v5210_v36, %v7169_v22 }
 0x45e   : > { %4443 = vst.msk [vmem:[%s7178_s12 + $0x50] sm:$0xff] %vm4432_vm15, %v4410_v3  ;;  %v4411_v53 = vmax.f32 %v4379_v26, 0.0 }
 0x45f   : > { %4441 = vst.msk [vmem:[%s7178_s12 + $0x40] sm:$0xff] %vm4432_vm15, %v4408_v21  ;;  %v4409_v63 = vmax.f32 %v4377_v23, 0.0  ;;  %v5181_v57 = vpop.f32.mrb[44].mxu0 }
 0x460   : > { %4444 = vst.msk [vmem:[%s7178_s12 + $0x58] sm:$0xff] %vm4432_vm15, %v4411_v53  ;;  %v5211_v48 = vadd.f32 %v5181_v57, %v7164_v18  ;;  %v4250_v49 = vpop.f32.mrb[45].mxu0 }
 0x461   : > { %4442 = vst.msk [vmem:[%s7178_s12 + $0x48] sm:$0xff] %vm4432_vm15, %v4409_v63  ;;  %v5212_v52 = vadd.f32 %v7164_v18, %v4250_v49  ;;  %v5182_v60 = vpop.f32.mrb[46].mxu0 }
 0x462   : > { %v4382_v43 = vadd.f32 %v5211_v48, %v7169_v22  ;;  %v5213_v1 = vadd.f32 %v5182_v60, %v7164_v18  ;;  %v4253_v2 = vpop.f32.mrb[47].mxu0 }
 0x463   : > { %v4380_v45 = vadd.f32 %v5212_v52, %v7169_v22  ;;  %v5214_v59 = vadd.f32 %v7164_v18, %v4253_v2 }
 0x464   : > { %v4414_v51 = vmax.f32 %v4382_v43, 0.0  ;;  %v4383_v46 = vadd.f32 %v5213_v1, %v7169_v22 }
 0x465   : > { %v4412_v37 = vmax.f32 %v4380_v45, 0.0  ;;  %v4381_v28 = vadd.f32 %v5214_v59, %v7169_v22 }
 0x466   : > { %4447 = vst.msk [vmem:[%s7178_s12 + $0x70] sm:$0xff] %vm4432_vm15, %v4414_v51  ;;  %v4415_v25 = vmax.f32 %v4383_v46, 0.0 }
 0x467   : > { %4445 = vst.msk [vmem:[%s7178_s12 + $0x60] sm:$0xff] %vm4432_vm15, %v4412_v37  ;;  %v4413_v29 = vmax.f32 %v4381_v28, 0.0  ;;  %v5185_v55 = vpop.f32.mrb[48].mxu0 }
 0x468   : > { %4448 = vst.msk [vmem:[%s7178_s12 + $0x78] sm:$0xff] %vm4432_vm15, %v4415_v25  ;;  %v5215_v35 = vadd.f32 %v5185_v55, %v7164_v18  ;;  %v4266_v9 = vpop.f32.mrb[49].mxu0 }
 0x469   : > { %4446 = vst.msk [vmem:[%s7178_s12 + $0x68] sm:$0xff] %vm4432_vm15, %v4413_v29  ;;  %v5216_v44 = vadd.f32 %v7164_v18, %v4266_v9  ;;  %v5186_v54 = vpop.f32.mrb[50].mxu0 }
 0x46a   : > { %v4386_v0 = vadd.f32 %v5215_v35, %v7169_v22  ;;  %v5217_v11 = vadd.f32 %v5186_v54, %v7164_v18  ;;  %v4269_v7 = vpop.f32.mrb[51].mxu0 }
 0x46b   : > { %v4384_v17 = vadd.f32 %v5216_v44, %v7169_v22  ;;  %v5218_v14 = vadd.f32 %v7164_v18, %v4269_v7 }
 0x46c   : > { %v4418_v10 = vmax.f32 %v4386_v0, 0.0  ;;  %v4387_v61 = vadd.f32 %v5217_v11, %v7169_v22 }
 0x46d   : > { %v4416_v32 = vmax.f32 %v4384_v17, 0.0  ;;  %v4385_v58 = vadd.f32 %v5218_v14, %v7169_v22 }
 0x46e   : > { %4451 = vst.msk [vmem:[%s7178_s12 + $0x90] sm:$0xff] %vm4432_vm15, %v4418_v10  ;;  %v4419_v41 = vmax.f32 %v4387_v61, 0.0 }
 0x46f   : > { %4449 = vst.msk [vmem:[%s7178_s12 + $0x80] sm:$0xff] %vm4432_vm15, %v4416_v32  ;;  %v4417_v42 = vmax.f32 %v4385_v58, 0.0  ;;  %v5189_v40 = vpop.f32.mrb[52].mxu0 }
 0x470   : > { %4452 = vst.msk [vmem:[%s7178_s12 + $0x98] sm:$0xff] %vm4432_vm15, %v4419_v41  ;;  %v5219_v50 = vadd.f32 %v5189_v40, %v7164_v18  ;;  %v4282_v31 = vpop.f32.mrb[53].mxu0 }
 0x471   : > { %4450 = vst.msk [vmem:[%s7178_s12 + $0x88] sm:$0xff] %vm4432_vm15, %v4417_v42  ;;  %v5220_v34 = vadd.f32 %v7164_v18, %v4282_v31  ;;  %v5190_v5 = vpop.f32.mrb[54].mxu0 }
 0x472   : > { %v4390_v30 = vadd.f32 %v5219_v50, %v7169_v22  ;;  %v5221_v19 = vadd.f32 %v5190_v5, %v7164_v18  ;;  %v4285_v27 = vpop.f32.mrb[55].mxu0 }
 0x473   : > { %v4388_v38 = vadd.f32 %v5220_v34, %v7169_v22  ;;  %v5222_v62 = vadd.f32 %v7164_v18, %v4285_v27 }
 0x474   : > { %v4422_v33 = vmax.f32 %v4390_v30, 0.0  ;;  %v4391_v4 = vadd.f32 %v5221_v19, %v7169_v22 }
 0x475   : > { %v4420_v12 = vmax.f32 %v4388_v38, 0.0  ;;  %v4389_v6 = vadd.f32 %v5222_v62, %v7169_v22 }
 0x476   : > { %4455 = vst.msk [vmem:[%s7178_s12 + $0xb0] sm:$0xff] %vm4432_vm15, %v4422_v33  ;;  %v4423_v16 = vmax.f32 %v4391_v4, 0.0 }
 0x477   : > { %4453 = vst.msk [vmem:[%s7178_s12 + $0xa0] sm:$0xff] %vm4432_vm15, %v4420_v12  ;;  %v4421_v20 = vmax.f32 %v4389_v6, 0.0  ;;  %v5193_v13 = vpop.f32.mrb[56].mxu0 }
 0x478   : > { %4456 = vst.msk [vmem:[%s7178_s12 + $0xb8] sm:$0xff] %vm4432_vm15, %v4423_v16  ;;  %v5223_v56 = vadd.f32 %v5193_v13, %v7164_v18  ;;  %v4298_v39 = vpop.f32.mrb[57].mxu0 }
 0x479   : > { %4454 = vst.msk [vmem:[%s7178_s12 + $0xa8] sm:$0xff] %vm4432_vm15, %v4421_v20  ;;  %v5224_v47 = vadd.f32 %v7164_v18, %v4298_v39  ;;  %v5194_v24 = vpop.f32.mrb[58].mxu0 }
 0x47a   : > { %v4394_v15 = vadd.f32 %v5223_v56, %v7169_v22  ;;  %v5225_v8 = vadd.f32 %v5194_v24, %v7164_v18  ;;  %v4301_v36 = vpop.f32.mrb[59].mxu0 }
 0x47b   : > { %v4392_v3 = vadd.f32 %v5224_v47, %v7169_v22  ;;  %v5226_v26 = vadd.f32 %v7164_v18, %v4301_v36 }
 0x47c   : > { %v4426_v21 = vmax.f32 %v4394_v15, 0.0  ;;  %v4395_v23 = vadd.f32 %v5225_v8, %v7169_v22 }
 0x47d   : > { %v4424_v53 = vmax.f32 %v4392_v3, 0.0  ;;  %v4393_v63 = vadd.f32 %v5226_v26, %v7169_v22 }
 0x47e   : > { %4459 = vst.msk [vmem:[%s7178_s12 + $0xd0] sm:$0xff] %vm4432_vm15, %v4426_v21  ;;  %v4427_v57 = vmax.f32 %v4395_v23, 0.0 }
 0x47f   : > { %4457 = vst.msk [vmem:[%s7178_s12 + $0xc0] sm:$0xff] %vm4432_vm15, %v4424_v53  ;;  %v4425_v48 = vmax.f32 %v4393_v63, 0.0  ;;  %v5197_v49 = vpop.f32.mrb[60].mxu0 }
 0x480   : > { %4460 = vst.msk [vmem:[%s7178_s12 + $0xd8] sm:$0xff] %vm4432_vm15, %v4427_v57  ;;  %v5227_v52 = vadd.f32 %v5197_v49, %v7164_v18  ;;  %v4314_v60 = vpop.f32.mrb[61].mxu0 }
 0x481   : > { %4458 = vst.msk [vmem:[%s7178_s12 + $0xc8] sm:$0xff] %vm4432_vm15, %v4425_v48  ;;  %v5228_v43 = vadd.f32 %v7164_v18, %v4314_v60  ;;  %v5198_v1 = vpop.f32.mrb[62].mxu0 }
 0x482   : > { %v4398_v2 = vadd.f32 %v5227_v52, %v7169_v22  ;;  %v5229_v45 = vadd.f32 %v5198_v1, %v7164_v18  ;;  %v4317_v59 = vpop.f32.mrb[63].mxu0 }
 0x483   : > { %v4396_v51 = vadd.f32 %v5228_v43, %v7169_v22  ;;  %v5230_v46 = vadd.f32 %v7164_v18, %v4317_v59 }
 0x484   : > { %v4430_v37 = vmax.f32 %v4398_v2, 0.0  ;;  %v4399_v28 = vadd.f32 %v5229_v45, %v7169_v22 }
 0x485   : > { %v4428_v25 = vmax.f32 %v4396_v51, 0.0  ;;  %v4397_v29 = vadd.f32 %v5230_v46, %v7169_v22 }
 0x486   : > { %4463 = vst.msk [vmem:[%s7178_s12 + $0xf0] sm:$0xff] %vm4432_vm15, %v4430_v37  ;;  %v4431_v55 = vmax.f32 %v4399_v28, 0.0 }
 0x487   : > { %4461 = vst.msk [vmem:[%s7178_s12 + $0xe0] sm:$0xff] %vm4432_vm15, %v4428_v25  ;;  %v4429_v35 = vmax.f32 %v4397_v29, 0.0 }
 0x488   : > { %4464 = vst.msk [vmem:[%s7178_s12 + $0xf8] sm:$0xff] %vm4432_vm15, %v4431_v55 }
 0x489   : > { %4462 = vst.msk [vmem:[%s7178_s12 + $0xe8] sm:$0xff] %vm4432_vm15, %v4429_v35 }
 0x48a PF: > { %p19_p8 = scmp.ge.s32.totalorder %s5696_s14, 4   ;;  %s7347_s30 = smov %s5608_s10 }
 0x48b   : > { %s7348_s10 = smov %s5612_s11  ;;  %s7349_s11 = smov %s5706_s17 }
 0x48c   : > { %s7350_s12 = smov %s5696_s14  ;;  %21 = sbr.rel (!%p19_p8) target bundleno = 3 (0x3), region = 101 }
 0x493   :  { %4486 = vsyncpa [#allocation4], 1 }
 0x494   :  { %4488 = vsyncpa [#allocation4 + $0x1], 1 }

</bundles_post_ra>
